<compile_context>
chip_gen: v5e
topology: v5e:2x2
jax: 0.10.0
libtpu: 0.0.40
codegen_flags: <defaults>
</compile_context>

<pallas_src>
import numpy as np
import jax
import jax.numpy as jnp
from jax.experimental import pallas as pl
from jax.experimental.pallas import tpu as pltpu

LEAKY_SLOPE = 0.01                       # torch.nn.LeakyReLU default slope

# Layer configs: (cin, cout, output_padding); kernel=4, stride=2, padding=1.
_ARCH = ((32, 32, 1), (32, 32, 0), (32, 2, 0))
_KSIZE = 4

# Lane-padded packed row widths (W * C rounded up to a lane-friendly size).
KP1 = 128    # layer-1 input   3*32  = 96   -> 128
KP2 = 256    # layer-2 input   7*32  = 224  -> 256   (== layer-1 output width)
KP3 = 512    # layer-3 input   14*32 = 448  -> 512   (== layer-2 output width)
NP3 = 64     # layer-3 output  28*2  = 56   -> 64    (pair-packed slab = 128 lanes)


# --------------------- precomputed banded pair-form weights ------------------ #
def _banded_phase_mats(w, w_in, w_out, kp, npad):
    """M[pr, dr]: (kp, npad) matrices s.t. out_row(2j+pr) = sum_dr P[j+pr+dr] @ M[pr,dr].

    PyTorch ConvTranspose2d (k=4, s=2, p=1): output (oh, ow) accumulates
    x[ih, iw] * w[ci, co, kh, kw] with oh = 2*ih - 1 + kh, ow = 2*iw - 1 + kw.
    Rows: oh = 2j+pr reads padded input row j+pr+dr with kh = 3 - 2*dr - pr.
    Columns are folded into the band structure; padded rows/cols stay zero.
    """
    cin, cout = w.shape[0], w.shape[1]
    assert w_in * cin <= kp and w_out * cout <= npad
    m = np.zeros((2, 2, kp, npad), np.float32)
    for pr in range(2):
        for dr in range(2):
            kh = 3 - 2 * dr - pr
            for wo in range(w_out):
                k, pc = wo // 2, wo % 2
                pairs = ((k - 1, 3), (k, 1)) if pc == 0 else ((k, 2), (k + 1, 0))
                for wi, kw in pairs:
                    if 0 <= wi < w_in:
                        m[pr, dr,
                          wi * cin:(wi + 1) * cin,
                          wo * cout:(wo + 1) * cout] = w[:, :, kh, kw]
    return m


def _pair_form_weights(w, b, w_in, w_out, kp, npad):
    """Pair-form RHS (3*kp, 2*npad) and bias row (1, 2*npad).

    With LHS row j = [P[j] || P[j+1] || P[j+2]] the matmul result row j is
    [out_row 2j || out_row 2j+1].
    """
    cout = w.shape[1]
    m = _banded_phase_mats(w, w_in, w_out, kp, npad)
    rhs = np.zeros((3 * kp, 2 * npad), np.float32)
    rhs[0 * kp:1 * kp, :npad] = m[0, 0]
    rhs[1 * kp:2 * kp, :npad] = m[0, 1]
    rhs[1 * kp:2 * kp, npad:] = m[1, 0]
    rhs[2 * kp:3 * kp, npad:] = m[1, 1]
    bvec = np.zeros((npad,), np.float32)
    bvec[:w_out * cout] = np.tile(np.asarray(b, np.float32), w_out)
    bias = np.concatenate([bvec, bvec])[None, :]
    return rhs, bias


# --------------------------------- kernel ----------------------------------- #
def _dcnn_kernel(x_ref, w1_ref, w2_ref, w3_ref, b1_ref, b2_ref, b3_ref,
                 out_ref, e1_ref, o1_ref, c0_ref, c1_ref, c2_ref, c3_ref):
    """Fused 3-layer transposed-conv decoder, one sample per grid step.

    x_ref  : (1, 6, KP1) bf16   padded input rows [0, x0, x1, x2, 0, 0]
    wK_ref : pair-form banded weights (3*K, 2*N) bf16
    bK_ref : pair-form tiled bias     (1, 2*N)   f32
    out_ref: (1, 16, 2*NP3) f32  -- row q*4+m holds [y[8m+2q] || y[8m+2q+1]]
    e1/o1  : act-1 padded rows grouped by row parity (even / odd)
    c0..c3 : act-2 padded rows grouped by row index mod 4
    """
    def pair_matmul(parts, w_ref, b_ref, relu):
        lhs = jnp.concatenate(parts, axis=-1)                 # lane concat, 128-aligned
        acc = jnp.dot(lhs, w_ref[...], preferred_element_type=jnp.float32)
        acc = acc + b_ref[...]                                # f32 epilogue (v5e-safe)
        if relu:
            acc = jnp.where(acc >= 0.0, acc, LEAKY_SLOPE * acc)
        return acc

    zrow2 = jnp.zeros((1, KP2), jnp.bfloat16)
    zrow3 = jnp.zeros((1, KP3), jnp.bfloat16)

    # ------------- layer 1: (3, 96) -> act1 (7, 224), LeakyReLU -------------
    r1 = pair_matmul([x_ref[0, 0:4, :], x_ref[0, 1:5, :], x_ref[0, 2:6, :]],
                     w1_ref, b1_ref, relu=True).astype(jnp.bfloat16)   # (4, 2*KP2)
    # padded act1 rows P[0..8]; e1[m] = P[2m] (5 rows), o1[m] = P[2m+1] (4 rows)
    e1_ref[0:1, :] = zrow2                    # P[0]  top pad
    e1_ref[4:5, :] = zrow2                    # P[8]  bottom pad
    o1_ref[0:4, :] = r1[:, :KP2]              # act1 rows 0,2,4,6
    e1_ref[1:4, :] = r1[0:3, KP2:]            # act1 rows 1,3,5   (row 7 is the
                                              #  discarded output_padding ghost)

    # ------------- layer 2: act1 -> act2 (14, 448), LeakyReLU ---------------
    # pair index j (output rows 2j, 2j+1), split by parity of j
    r2e = pair_matmul([e1_ref[0:4, :], o1_ref[0:4, :], e1_ref[1:5, :]],
                      w2_ref, b2_ref, relu=True).astype(jnp.bfloat16)  # j = 0,2,4,6
    r2o = pair_matmul([o1_ref[0:3, :], e1_ref[1:4, :], o1_ref[1:4, :]],
                      w2_ref, b2_ref, relu=True).astype(jnp.bfloat16)  # j = 1,3,5
    # padded act2 rows Q[0..15]; cq[m] = Q[4m+q]
    c0_ref[0:1, :] = zrow3                    # Q[0]  top pad
    c3_ref[3:4, :] = zrow3                    # Q[15] bottom pad
    c1_ref[0:4, :] = r2e[:, :KP3]             # act2 rows 0,4,8,12
    c2_ref[0:4, :] = r2e[:, KP3:]             # act2 rows 1,5,9,13
    c3_ref[0:3, :] = r2o[:, :KP3]             # act2 rows 2,6,10
    c0_ref[1:4, :] = r2o[:, KP3:]             # act2 rows 3,7,11

    # ------------- layer 3: act2 -> out (28, 56), no activation -------------
    # pair index jj = 4m+q; result row m of group q = [y[8m+2q] || y[8m+2q+1]]
    r30 = pair_matmul([c0_ref[0:4, :], c1_ref[0:4, :], c2_ref[0:4, :]],
                      w3_ref, b3_ref, relu=False)             # (4, 128)
    r31 = pair_matmul([c1_ref[0:4, :], c2_ref[0:4, :], c3_ref[0:4, :]],
                      w3_ref, b3_ref, relu=False)             # (4, 128)
    r32 = pair_matmul([c2_ref[0:3, :], c3_ref[0:3, :], c0_ref[1:4, :]],
                      w3_ref, b3_ref, relu=False)             # (3, 128)
    r33 = pair_matmul([c3_ref[0:3, :], c0_ref[1:4, :], c1_ref[1:4, :]],
                      w3_ref, b3_ref, relu=False)             # (3, 128)

    zout = jnp.zeros((1, 2 * NP3), jnp.float32)
    out_ref[0, 0:4, :] = r30
    out_ref[0, 4:8, :] = r31
    out_ref[0, 8:11, :] = r32
    out_ref[0, 11:12, :] = zout               # rows 28/29 don't exist
    out_ref[0, 12:15, :] = r33
    out_ref[0, 15:16, :] = zout               # rows 30/31 don't exist


# ------------------------------- parameters ---------------------------------- #
def init_params(key):
    """Deterministic init. Returns (raw_params, kernel_params) for (N,32,3,3) input."""
    def init_layer(k, cin, cout, ksz):
        kw_, kb_ = jax.random.split(k)
        fan = cout * ksz * ksz
        wgt = jax.random.normal(kw_, (cin, cout, ksz, ksz), jnp.float32) / np.sqrt(fan)
        b = 0.01 * jax.random.normal(kb_, (cout,), jnp.float32)
        return wgt, b

    keys = jax.random.split(key, len(_ARCH))
    raw = [init_layer(keys[i], cin, cout, _KSIZE)
           for i, (cin, cout, _) in enumerate(_ARCH)]

    # (w_in, w_out, kp, npad) per layer for the 3 -> 7 -> 14 -> 28 decoder.
    dims = ((3, 7, KP1, KP2), (7, 14, KP2, KP3), (14, 28, KP3, NP3))
    rhss, biases = [], []
    for (wgt, b), (w_in, w_out, kp, npad) in zip(raw, dims):
        rhs, bias = _pair_form_weights(np.asarray(wgt), np.asarray(b),
                                       w_in, w_out, kp, npad)
        rhss.append(jnp.asarray(rhs, jnp.bfloat16))
        biases.append(jnp.asarray(bias, jnp.float32))
    kern = {"rhs": tuple(rhss), "bias": tuple(biases)}
    return raw, kern


# --------------------------------- forward ----------------------------------- #
def dcnn_forward(kern, x_nchw):
    n, c, h, w = x_nchw.shape
    assert (c, h, w) == (32, 3, 3), "fused kernel is specialized to the (32,3,3) decoder input"

    # NCHW -> (N, H, W*C) packed rows; one zero row on top, two below; lane-pad
    # the packed width 96 -> 128; bf16 for the MXU.
    x = jnp.transpose(x_nchw, (0, 2, 3, 1)).reshape(n, h, w * c)
    x = jnp.pad(x, ((0, 0), (1, 2), (0, KP1 - w * c))).astype(jnp.bfloat16)

    rhs1, rhs2, rhs3 = kern["rhs"]
    bias1, bias2, bias3 = kern["bias"]

    out = pl.pallas_call(
        _dcnn_kernel,
        out_shape=jax.ShapeDtypeStruct((n, 16, 2 * NP3), jnp.float32),
        grid=(n,),
        in_specs=[
            pl.BlockSpec((1, 6, KP1), lambda b: (b, 0, 0)),
            pl.BlockSpec((3 * KP1, 2 * KP2), lambda b: (0, 0)),   # weights: same block
            pl.BlockSpec((3 * KP2, 2 * KP3), lambda b: (0, 0)),   # every step -> fetched once
            pl.BlockSpec((3 * KP3, 2 * NP3), lambda b: (0, 0)),
            pl.BlockSpec((1, 2 * KP2), lambda b: (0, 0)),
            pl.BlockSpec((1, 2 * KP3), lambda b: (0, 0)),
            pl.BlockSpec((1, 2 * NP3), lambda b: (0, 0)),
        ],
        out_specs=pl.BlockSpec((1, 16, 2 * NP3), lambda b: (b, 0, 0)),
        scratch_shapes=[
            pltpu.VMEM((5, KP2), jnp.bfloat16),   # e1: padded act1 rows 0,2,4,6,8
            pltpu.VMEM((4, KP2), jnp.bfloat16),   # o1: padded act1 rows 1,3,5,7
            pltpu.VMEM((4, KP3), jnp.bfloat16),   # c0: padded act2 rows 0,4,8,12
            pltpu.VMEM((4, KP3), jnp.bfloat16),   # c1: rows 1,5,9,13
            pltpu.VMEM((4, KP3), jnp.bfloat16),   # c2: rows 2,6,10,14
            pltpu.VMEM((4, KP3), jnp.bfloat16),   # c3: rows 3,7,11,15
        ],
        compiler_params=pltpu.CompilerParams(
            dimension_semantics=("parallel",)),   # v7x: both TensorCores; no-op on v5e/v6e
    )(x, rhs1, rhs2, rhs3, bias1, bias2, bias3)

    # (N, 16, 128) pair-packed slab -> NCHW.
    # out[n, q*4+m, p*64+u] holds output row 8m+2q+p, packed column u = 2*wo+co
    # (u >= 56 is lane padding).  Cheap XLA reassembly; negligible at small N.
    o = out.reshape(n, 4, 4, 2, NP3)[..., :28 * 2]              # (n, q, m, p, wo*co)
    o = o.reshape(n, 4, 4, 2, 28, 2)                            # (n, q, m, p, wo, co)
    o = jnp.transpose(o, (0, 2, 1, 3, 4, 5)).reshape(n, 32, 28, 2)[:, :28]
    return jnp.transpose(o, (0, 3, 1, 2))                       # (n, 2, 28, 28)


# ----------------------------- pure-JAX reference ----------------------------- #
def _ref_conv_transpose(x_nhwc, w, b, *, stride, padding, output_padding):
    kh = w.shape[2]
    lo = kh - 1 - padding
    hi = lo + output_padding
    wf = jnp.transpose(jnp.flip(w, axis=(2, 3)), (2, 3, 0, 1))  # HWIO, flipped
    y = jax.lax.conv_general_dilated(
        x_nhwc, wf, window_strides=(1, 1),
        padding=((lo, hi), (lo, hi)), lhs_dilation=(stride, stride),
        dimension_numbers=("NHWC", "HWIO", "NHWC"),
        precision=jax.lax.Precision.HIGHEST)
    return y + b


def dcnn_forward_ref(raw_params, x_nchw):
    x = jnp.transpose(x_nchw, (0, 2, 3, 1)).astype(jnp.float32)
    for i, ((wgt, b), (_, _, op)) in enumerate(zip(raw_params, _ARCH)):
        x = _ref_conv_transpose(x, wgt, b, stride=2, padding=1, output_padding=op)
        if i < len(_ARCH) - 1:
            x = jnp.where(x >= 0, x, LEAKY_SLOPE * x)
    return jnp.transpose(x, (0, 3, 1, 2))


if __name__ == "__main__":
    key = jax.random.PRNGKey(0)
    pkey, xkey = jax.random.split(key)
    raw_params, kern_params = init_params(pkey)

    # (N=2, C=32, 3, 3) -> (2, 2, 28, 28), as the original MNIST decoder implies.
    x = jax.random.normal(xkey, (2, 32, 3, 3), jnp.float32)

    out = jax.block_until_ready(jax.jit(dcnn_forward)(kern_params, x))
    assert out.shape == (2, 2, 28, 28), out.shape

    ref = jax.block_until_ready(jax.jit(dcnn_forward_ref)(raw_params, x))
    assert bool(jnp.allclose(out, ref, atol=5e-2, rtol=5e-2)), \
        float(jnp.max(jnp.abs(out - ref)))

    print("KERNEL_OK")
</pallas_src>

<mosaic_0001>
module attributes {stable_mosaic.version = 11 : i64} {
  func.func @_dcnn_kernel(%arg0: i32, %arg1: memref<1x6x128xbf16, #tpu.memory_space<vmem>>, %arg2: memref<384x512xbf16, #tpu.memory_space<vmem>>, %arg3: memref<768x1024xbf16, #tpu.memory_space<vmem>>, %arg4: memref<1536x128xbf16, #tpu.memory_space<vmem>>, %arg5: memref<1x512xf32, #tpu.memory_space<vmem>>, %arg6: memref<1x1024xf32, #tpu.memory_space<vmem>>, %arg7: memref<1x128xf32, #tpu.memory_space<vmem>>, %arg8: memref<1x16x128xf32, #tpu.memory_space<vmem>>, %arg9: memref<5x256xbf16, #tpu.memory_space<vmem>>, %arg10: memref<4x256xbf16, #tpu.memory_space<vmem>>, %arg11: memref<4x512xbf16, #tpu.memory_space<vmem>>, %arg12: memref<4x512xbf16, #tpu.memory_space<vmem>>, %arg13: memref<4x512xbf16, #tpu.memory_space<vmem>>, %arg14: memref<4x512xbf16, #tpu.memory_space<vmem>>) attributes {dimension_semantics = [#tpu.dimension_semantics<parallel>], iteration_bounds = array<i64: 2>, scalar_prefetch = 0 : i64, scratch_operands = 6 : i64, tpu.core_type = #tpu.core_type<tc>, window_params = [{transform_indices = @transform_0, window_bounds = array<i64: 1, 6, 128>}, {pipeline_mode = #tpu.pipeline_mode<synchronous>, transform_indices = @transform_1, window_bounds = array<i64: 384, 512>}, {pipeline_mode = #tpu.pipeline_mode<synchronous>, transform_indices = @transform_2, window_bounds = array<i64: 768, 1024>}, {pipeline_mode = #tpu.pipeline_mode<synchronous>, transform_indices = @transform_3, window_bounds = array<i64: 1536, 128>}, {pipeline_mode = #tpu.pipeline_mode<synchronous>, transform_indices = @transform_4, window_bounds = array<i64: 1, 512>}, {pipeline_mode = #tpu.pipeline_mode<synchronous>, transform_indices = @transform_5, window_bounds = array<i64: 1, 1024>}, {pipeline_mode = #tpu.pipeline_mode<synchronous>, transform_indices = @transform_6, window_bounds = array<i64: 1, 128>}, {transform_indices = @transform_7, window_bounds = array<i64: 1, 16, 128>}]} {
    %cst = arith.constant 0.000000e+00 : bf16
    %0 = vector.broadcast %cst : bf16 to vector<1x256xbf16>
    %cst_0 = arith.constant 0.000000e+00 : bf16
    %1 = vector.broadcast %cst_0 : bf16 to vector<1x512xbf16>
    %c0 = arith.constant 0 : index
    %c0_1 = arith.constant 0 : index
    %c0_2 = arith.constant 0 : index
    %2 = vector.load %arg1[%c0, %c0_1, %c0_2] : memref<1x6x128xbf16, #tpu.memory_space<vmem>>, vector<1x4x128xbf16>
    %3 = vector.shape_cast %2 : vector<1x4x128xbf16> to vector<4x128xbf16>
    %c0_3 = arith.constant 0 : index
    %c1 = arith.constant 1 : index
    %c0_4 = arith.constant 0 : index
    %4 = vector.load %arg1[%c0_3, %c1, %c0_4] : memref<1x6x128xbf16, #tpu.memory_space<vmem>>, vector<1x4x128xbf16>
    %5 = vector.shape_cast %4 : vector<1x4x128xbf16> to vector<4x128xbf16>
    %c0_5 = arith.constant 0 : index
    %c2 = arith.constant 2 : index
    %c0_6 = arith.constant 0 : index
    %6 = vector.load %arg1[%c0_5, %c2, %c0_6] : memref<1x6x128xbf16, #tpu.memory_space<vmem>>, vector<1x4x128xbf16>
    %7 = vector.shape_cast %6 : vector<1x4x128xbf16> to vector<4x128xbf16>
    %8 = tpu.concatenate %3, %5, %7 in 1 : vector<4x128xbf16>, vector<4x128xbf16>, vector<4x128xbf16> -> vector<4x384xbf16>
    %c0_7 = arith.constant 0 : index
    %c0_8 = arith.constant 0 : index
    %9 = vector.load %arg2[%c0_7, %c0_8] : memref<384x512xbf16, #tpu.memory_space<vmem>>, vector<384x512xbf16>
    %cst_9 = arith.constant dense<0.000000e+00> : vector<4x512xf32>
    %10 = tpu.matmul %8, %9, %cst_9 {dimension_numbers = #tpu.dot_dimension_numbers<[1], [0], [0], [1], [0, 0, 1, 1], [], []>} : vector<4x384xbf16>, vector<384x512xbf16>, vector<4x512xf32> -> vector<4x512xf32>
    %c0_10 = arith.constant 0 : index
    %c0_11 = arith.constant 0 : index
    %11 = vector.load %arg5[%c0_10, %c0_11] : memref<1x512xf32, #tpu.memory_space<vmem>>, vector<1x512xf32>
    %12 = vector.broadcast %11 : vector<1x512xf32> to vector<4x512xf32>
    %13 = arith.addf %10, %12 : vector<4x512xf32>
    %cst_12 = arith.constant 0.000000e+00 : f32
    %14 = vector.broadcast %cst_12 : f32 to vector<4x512xf32>
    %15 = arith.cmpf oge, %13, %14 : vector<4x512xf32>
    %cst_13 = arith.constant 0.00999999977 : f32
    %16 = vector.broadcast %cst_13 : f32 to vector<4x512xf32>
    %17 = arith.mulf %16, %13 : vector<4x512xf32>
    %18 = arith.select %15, %13, %17 : vector<4x512xi1>, vector<4x512xf32>
    %19 = arith.truncf %18 : vector<4x512xf32> to vector<4x512xbf16>
    %c0_14 = arith.constant 0 : index
    %c0_15 = arith.constant 0 : index
    %20 = vector.load %arg9[%c0_14, %c0_15] : memref<5x256xbf16, #tpu.memory_space<vmem>>, vector<1x256xbf16>
    tpu.vector_store %arg9[%c0_14, %c0_15], %0 {strides = array<i32>} : memref<5x256xbf16, #tpu.memory_space<vmem>>, vector<1x256xbf16>,
    %c4 = arith.constant 4 : index
    %c0_16 = arith.constant 0 : index
    %21 = vector.load %arg9[%c4, %c0_16] : memref<5x256xbf16, #tpu.memory_space<vmem>>, vector<1x256xbf16>
    tpu.vector_store %arg9[%c4, %c0_16], %0 {strides = array<i32>} : memref<5x256xbf16, #tpu.memory_space<vmem>>, vector<1x256xbf16>,
    %22 = vector.extract_strided_slice %19 {offsets = [0, 0], sizes = [4, 256], strides = [1, 1]} : vector<4x512xbf16> to vector<4x256xbf16>
    %c0_17 = arith.constant 0 : index
    %c0_18 = arith.constant 0 : index
    %23 = vector.load %arg10[%c0_17, %c0_18] : memref<4x256xbf16, #tpu.memory_space<vmem>>, vector<4x256xbf16>
    tpu.vector_store %arg10[%c0_17, %c0_18], %22 {strides = array<i32>} : memref<4x256xbf16, #tpu.memory_space<vmem>>, vector<4x256xbf16>,
    %24 = vector.extract_strided_slice %19 {offsets = [0, 256], sizes = [3, 256], strides = [1, 1]} : vector<4x512xbf16> to vector<3x256xbf16>
    %c1_19 = arith.constant 1 : index
    %c0_20 = arith.constant 0 : index
    %25 = vector.load %arg9[%c1_19, %c0_20] : memref<5x256xbf16, #tpu.memory_space<vmem>>, vector<3x256xbf16>
    tpu.vector_store %arg9[%c1_19, %c0_20], %24 {strides = array<i32>} : memref<5x256xbf16, #tpu.memory_space<vmem>>, vector<3x256xbf16>,
    %c0_21 = arith.constant 0 : index
    %c0_22 = arith.constant 0 : index
    %26 = vector.load %arg9[%c0_21, %c0_22] : memref<5x256xbf16, #tpu.memory_space<vmem>>, vector<4x256xbf16>
    %c0_23 = arith.constant 0 : index
    %c0_24 = arith.constant 0 : index
    %27 = vector.load %arg10[%c0_23, %c0_24] : memref<4x256xbf16, #tpu.memory_space<vmem>>, vector<4x256xbf16>
    %c1_25 = arith.constant 1 : index
    %c0_26 = arith.constant 0 : index
    %28 = vector.load %arg9[%c1_25, %c0_26] : memref<5x256xbf16, #tpu.memory_space<vmem>>, vector<4x256xbf16>
    %29 = tpu.concatenate %26, %27, %28 in 1 : vector<4x256xbf16>, vector<4x256xbf16>, vector<4x256xbf16> -> vector<4x768xbf16>
    %c0_27 = arith.constant 0 : index
    %c0_28 = arith.constant 0 : index
    %30 = vector.load %arg3[%c0_27, %c0_28] : memref<768x1024xbf16, #tpu.memory_space<vmem>>, vector<768x1024xbf16>
    %cst_29 = arith.constant dense<0.000000e+00> : vector<4x1024xf32>
    %31 = tpu.matmul %29, %30, %cst_29 {dimension_numbers = #tpu.dot_dimension_numbers<[1], [0], [0], [1], [0, 0, 1, 1], [], []>} : vector<4x768xbf16>, vector<768x1024xbf16>, vector<4x1024xf32> -> vector<4x1024xf32>
    %c0_30 = arith.constant 0 : index
    %c0_31 = arith.constant 0 : index
    %32 = vector.load %arg6[%c0_30, %c0_31] : memref<1x1024xf32, #tpu.memory_space<vmem>>, vector<1x1024xf32>
    %33 = vector.broadcast %32 : vector<1x1024xf32> to vector<4x1024xf32>
    %34 = arith.addf %31, %33 : vector<4x1024xf32>
    %cst_32 = arith.constant 0.000000e+00 : f32
    %35 = vector.broadcast %cst_32 : f32 to vector<4x1024xf32>
    %36 = arith.cmpf oge, %34, %35 : vector<4x1024xf32>
    %cst_33 = arith.constant 0.00999999977 : f32
    %37 = vector.broadcast %cst_33 : f32 to vector<4x1024xf32>
    %38 = arith.mulf %37, %34 : vector<4x1024xf32>
    %39 = arith.select %36, %34, %38 : vector<4x1024xi1>, vector<4x1024xf32>
    %40 = arith.truncf %39 : vector<4x1024xf32> to vector<4x1024xbf16>
    %c0_34 = arith.constant 0 : index
    %c0_35 = arith.constant 0 : index
    %41 = vector.load %arg10[%c0_34, %c0_35] : memref<4x256xbf16, #tpu.memory_space<vmem>>, vector<3x256xbf16>
    %c1_36 = arith.constant 1 : index
    %c0_37 = arith.constant 0 : index
    %42 = vector.load %arg9[%c1_36, %c0_37] : memref<5x256xbf16, #tpu.memory_space<vmem>>, vector<3x256xbf16>
    %c1_38 = arith.constant 1 : index
    %c0_39 = arith.constant 0 : index
    %43 = vector.load %arg10[%c1_38, %c0_39] : memref<4x256xbf16, #tpu.memory_space<vmem>>, vector<3x256xbf16>
    %44 = tpu.concatenate %41, %42, %43 in 1 : vector<3x256xbf16>, vector<3x256xbf16>, vector<3x256xbf16> -> vector<3x768xbf16>
    %c0_40 = arith.constant 0 : index
    %c0_41 = arith.constant 0 : index
    %45 = vector.load %arg3[%c0_40, %c0_41] : memref<768x1024xbf16, #tpu.memory_space<vmem>>, vector<768x1024xbf16>
    %cst_42 = arith.constant dense<0.000000e+00> : vector<3x1024xf32>
    %46 = tpu.matmul %44, %45, %cst_42 {dimension_numbers = #tpu.dot_dimension_numbers<[1], [0], [0], [1], [0, 0, 1, 1], [], []>} : vector<3x768xbf16>, vector<768x1024xbf16>, vector<3x1024xf32> -> vector<3x1024xf32>
    %c0_43 = arith.constant 0 : index
    %c0_44 = arith.constant 0 : index
    %47 = vector.load %arg6[%c0_43, %c0_44] : memref<1x1024xf32, #tpu.memory_space<vmem>>, vector<1x1024xf32>
    %48 = vector.broadcast %47 : vector<1x1024xf32> to vector<3x1024xf32>
    %49 = arith.addf %46, %48 : vector<3x1024xf32>
    %cst_45 = arith.constant 0.000000e+00 : f32
    %50 = vector.broadcast %cst_45 : f32 to vector<3x1024xf32>
    %51 = arith.cmpf oge, %49, %50 : vector<3x1024xf32>
    %cst_46 = arith.constant 0.00999999977 : f32
    %52 = vector.broadcast %cst_46 : f32 to vector<3x1024xf32>
    %53 = arith.mulf %52, %49 : vector<3x1024xf32>
    %54 = arith.select %51, %49, %53 : vector<3x1024xi1>, vector<3x1024xf32>
    %55 = arith.truncf %54 : vector<3x1024xf32> to vector<3x1024xbf16>
    %c0_47 = arith.constant 0 : index
    %c0_48 = arith.constant 0 : index
    %56 = vector.load %arg11[%c0_47, %c0_48] : memref<4x512xbf16, #tpu.memory_space<vmem>>, vector<1x512xbf16>
    tpu.vector_store %arg11[%c0_47, %c0_48], %1 {strides = array<i32>} : memref<4x512xbf16, #tpu.memory_space<vmem>>, vector<1x512xbf16>,
    %c3 = arith.constant 3 : index
    %c0_49 = arith.constant 0 : index
    %57 = vector.load %arg14[%c3, %c0_49] : memref<4x512xbf16, #tpu.memory_space<vmem>>, vector<1x512xbf16>
    tpu.vector_store %arg14[%c3, %c0_49], %1 {strides = array<i32>} : memref<4x512xbf16, #tpu.memory_space<vmem>>, vector<1x512xbf16>,
    %58 = vector.extract_strided_slice %40 {offsets = [0, 0], sizes = [4, 512], strides = [1, 1]} : vector<4x1024xbf16> to vector<4x512xbf16>
    %c0_50 = arith.constant 0 : index
    %c0_51 = arith.constant 0 : index
    %59 = vector.load %arg12[%c0_50, %c0_51] : memref<4x512xbf16, #tpu.memory_space<vmem>>, vector<4x512xbf16>
    tpu.vector_store %arg12[%c0_50, %c0_51], %58 {strides = array<i32>} : memref<4x512xbf16, #tpu.memory_space<vmem>>, vector<4x512xbf16>,
    %60 = vector.extract_strided_slice %40 {offsets = [0, 512], sizes = [4, 512], strides = [1, 1]} : vector<4x1024xbf16> to vector<4x512xbf16>
    %c0_52 = arith.constant 0 : index
    %c0_53 = arith.constant 0 : index
    %61 = vector.load %arg13[%c0_52, %c0_53] : memref<4x512xbf16, #tpu.memory_space<vmem>>, vector<4x512xbf16>
    tpu.vector_store %arg13[%c0_52, %c0_53], %60 {strides = array<i32>} : memref<4x512xbf16, #tpu.memory_space<vmem>>, vector<4x512xbf16>,
    %62 = vector.extract_strided_slice %55 {offsets = [0, 0], sizes = [3, 512], strides = [1, 1]} : vector<3x1024xbf16> to vector<3x512xbf16>
    %c0_54 = arith.constant 0 : index
    %c0_55 = arith.constant 0 : index
    %63 = vector.load %arg14[%c0_54, %c0_55] : memref<4x512xbf16, #tpu.memory_space<vmem>>, vector<3x512xbf16>
    tpu.vector_store %arg14[%c0_54, %c0_55], %62 {strides = array<i32>} : memref<4x512xbf16, #tpu.memory_space<vmem>>, vector<3x512xbf16>,
    %64 = vector.extract_strided_slice %55 {offsets = [0, 512], sizes = [3, 512], strides = [1, 1]} : vector<3x1024xbf16> to vector<3x512xbf16>
    %c1_56 = arith.constant 1 : index
    %c0_57 = arith.constant 0 : index
    %65 = vector.load %arg11[%c1_56, %c0_57] : memref<4x512xbf16, #tpu.memory_space<vmem>>, vector<3x512xbf16>
    tpu.vector_store %arg11[%c1_56, %c0_57], %64 {strides = array<i32>} : memref<4x512xbf16, #tpu.memory_space<vmem>>, vector<3x512xbf16>,
    %c0_58 = arith.constant 0 : index
    %c0_59 = arith.constant 0 : index
    %66 = vector.load %arg11[%c0_58, %c0_59] : memref<4x512xbf16, #tpu.memory_space<vmem>>, vector<4x512xbf16>
    %c0_60 = arith.constant 0 : index
    %c0_61 = arith.constant 0 : index
    %67 = vector.load %arg12[%c0_60, %c0_61] : memref<4x512xbf16, #tpu.memory_space<vmem>>, vector<4x512xbf16>
    %c0_62 = arith.constant 0 : index
    %c0_63 = arith.constant 0 : index
    %68 = vector.load %arg13[%c0_62, %c0_63] : memref<4x512xbf16, #tpu.memory_space<vmem>>, vector<4x512xbf16>
    %69 = tpu.concatenate %66, %67, %68 in 1 : vector<4x512xbf16>, vector<4x512xbf16>, vector<4x512xbf16> -> vector<4x1536xbf16>
    %c0_64 = arith.constant 0 : index
    %c0_65 = arith.constant 0 : index
    %70 = vector.load %arg4[%c0_64, %c0_65] : memref<1536x128xbf16, #tpu.memory_space<vmem>>, vector<1536x128xbf16>
    %cst_66 = arith.constant dense<0.000000e+00> : vector<4x128xf32>
    %71 = tpu.matmul %69, %70, %cst_66 {dimension_numbers = #tpu.dot_dimension_numbers<[1], [0], [0], [1], [0, 0, 1, 1], [], []>} : vector<4x1536xbf16>, vector<1536x128xbf16>, vector<4x128xf32> -> vector<4x128xf32>
    %c0_67 = arith.constant 0 : index
    %c0_68 = arith.constant 0 : index
    %72 = vector.load %arg7[%c0_67, %c0_68] : memref<1x128xf32, #tpu.memory_space<vmem>>, vector<1x128xf32>
    %73 = vector.broadcast %72 : vector<1x128xf32> to vector<4x128xf32>
    %74 = arith.addf %71, %73 : vector<4x128xf32>
    %c0_69 = arith.constant 0 : index
    %c0_70 = arith.constant 0 : index
    %75 = vector.load %arg12[%c0_69, %c0_70] : memref<4x512xbf16, #tpu.memory_space<vmem>>, vector<4x512xbf16>
    %c0_71 = arith.constant 0 : index
    %c0_72 = arith.constant 0 : index
    %76 = vector.load %arg13[%c0_71, %c0_72] : memref<4x512xbf16, #tpu.memory_space<vmem>>, vector<4x512xbf16>
    %c0_73 = arith.constant 0 : index
    %c0_74 = arith.constant 0 : index
    %77 = vector.load %arg14[%c0_73, %c0_74] : memref<4x512xbf16, #tpu.memory_space<vmem>>, vector<4x512xbf16>
    %78 = tpu.concatenate %75, %76, %77 in 1 : vector<4x512xbf16>, vector<4x512xbf16>, vector<4x512xbf16> -> vector<4x1536xbf16>
    %c0_75 = arith.constant 0 : index
    %c0_76 = arith.constant 0 : index
    %79 = vector.load %arg4[%c0_75, %c0_76] : memref<1536x128xbf16, #tpu.memory_space<vmem>>, vector<1536x128xbf16>
    %cst_77 = arith.constant dense<0.000000e+00> : vector<4x128xf32>
    %80 = tpu.matmul %78, %79, %cst_77 {dimension_numbers = #tpu.dot_dimension_numbers<[1], [0], [0], [1], [0, 0, 1, 1], [], []>} : vector<4x1536xbf16>, vector<1536x128xbf16>, vector<4x128xf32> -> vector<4x128xf32>
    %c0_78 = arith.constant 0 : index
    %c0_79 = arith.constant 0 : index
    %81 = vector.load %arg7[%c0_78, %c0_79] : memref<1x128xf32, #tpu.memory_space<vmem>>, vector<1x128xf32>
    %82 = vector.broadcast %81 : vector<1x128xf32> to vector<4x128xf32>
    %83 = arith.addf %80, %82 : vector<4x128xf32>
    %c0_80 = arith.constant 0 : index
    %c0_81 = arith.constant 0 : index
    %84 = vector.load %arg13[%c0_80, %c0_81] : memref<4x512xbf16, #tpu.memory_space<vmem>>, vector<3x512xbf16>
    %c0_82 = arith.constant 0 : index
    %c0_83 = arith.constant 0 : index
    %85 = vector.load %arg14[%c0_82, %c0_83] : memref<4x512xbf16, #tpu.memory_space<vmem>>, vector<3x512xbf16>
    %c1_84 = arith.constant 1 : index
    %c0_85 = arith.constant 0 : index
    %86 = vector.load %arg11[%c1_84, %c0_85] : memref<4x512xbf16, #tpu.memory_space<vmem>>, vector<3x512xbf16>
    %87 = tpu.concatenate %84, %85, %86 in 1 : vector<3x512xbf16>, vector<3x512xbf16>, vector<3x512xbf16> -> vector<3x1536xbf16>
    %c0_86 = arith.constant 0 : index
    %c0_87 = arith.constant 0 : index
    %88 = vector.load %arg4[%c0_86, %c0_87] : memref<1536x128xbf16, #tpu.memory_space<vmem>>, vector<1536x128xbf16>
    %cst_88 = arith.constant dense<0.000000e+00> : vector<3x128xf32>
    %89 = tpu.matmul %87, %88, %cst_88 {dimension_numbers = #tpu.dot_dimension_numbers<[1], [0], [0], [1], [0, 0, 1, 1], [], []>} : vector<3x1536xbf16>, vector<1536x128xbf16>, vector<3x128xf32> -> vector<3x128xf32>
    %c0_89 = arith.constant 0 : index
    %c0_90 = arith.constant 0 : index
    %90 = vector.load %arg7[%c0_89, %c0_90] : memref<1x128xf32, #tpu.memory_space<vmem>>, vector<1x128xf32>
    %91 = vector.broadcast %90 : vector<1x128xf32> to vector<3x128xf32>
    %92 = arith.addf %89, %91 : vector<3x128xf32>
    %c0_91 = arith.constant 0 : index
    %c0_92 = arith.constant 0 : index
    %93 = vector.load %arg14[%c0_91, %c0_92] : memref<4x512xbf16, #tpu.memory_space<vmem>>, vector<3x512xbf16>
    %c1_93 = arith.constant 1 : index
    %c0_94 = arith.constant 0 : index
    %94 = vector.load %arg11[%c1_93, %c0_94] : memref<4x512xbf16, #tpu.memory_space<vmem>>, vector<3x512xbf16>
    %c1_95 = arith.constant 1 : index
    %c0_96 = arith.constant 0 : index
    %95 = vector.load %arg12[%c1_95, %c0_96] : memref<4x512xbf16, #tpu.memory_space<vmem>>, vector<3x512xbf16>
    %96 = tpu.concatenate %93, %94, %95 in 1 : vector<3x512xbf16>, vector<3x512xbf16>, vector<3x512xbf16> -> vector<3x1536xbf16>
    %c0_97 = arith.constant 0 : index
    %c0_98 = arith.constant 0 : index
    %97 = vector.load %arg4[%c0_97, %c0_98] : memref<1536x128xbf16, #tpu.memory_space<vmem>>, vector<1536x128xbf16>
    %cst_99 = arith.constant dense<0.000000e+00> : vector<3x128xf32>
    %98 = tpu.matmul %96, %97, %cst_99 {dimension_numbers = #tpu.dot_dimension_numbers<[1], [0], [0], [1], [0, 0, 1, 1], [], []>} : vector<3x1536xbf16>, vector<1536x128xbf16>, vector<3x128xf32> -> vector<3x128xf32>
    %c0_100 = arith.constant 0 : index
    %c0_101 = arith.constant 0 : index
    %99 = vector.load %arg7[%c0_100, %c0_101] : memref<1x128xf32, #tpu.memory_space<vmem>>, vector<1x128xf32>
    %100 = vector.broadcast %99 : vector<1x128xf32> to vector<3x128xf32>
    %101 = arith.addf %98, %100 : vector<3x128xf32>
    %cst_102 = arith.constant 0.000000e+00 : f32
    %102 = vector.broadcast %cst_102 : f32 to vector<1x128xf32>
    %c0_103 = arith.constant 0 : index
    %c0_104 = arith.constant 0 : index
    %c0_105 = arith.constant 0 : index
    %103 = vector.load %arg8[%c0_103, %c0_104, %c0_105] : memref<1x16x128xf32, #tpu.memory_space<vmem>>, vector<1x4x128xf32>
    %104 = vector.shape_cast %103 : vector<1x4x128xf32> to vector<4x128xf32>
    %105 = vector.shape_cast %74 : vector<4x128xf32> to vector<1x4x128xf32>
    tpu.vector_store %arg8[%c0_103, %c0_104, %c0_105], %105 {strides = array<i32>} : memref<1x16x128xf32, #tpu.memory_space<vmem>>, vector<1x4x128xf32>,
    %c0_106 = arith.constant 0 : index
    %c4_107 = arith.constant 4 : index
    %c0_108 = arith.constant 0 : index
    %106 = vector.load %arg8[%c0_106, %c4_107, %c0_108] : memref<1x16x128xf32, #tpu.memory_space<vmem>>, vector<1x4x128xf32>
    %107 = vector.shape_cast %106 : vector<1x4x128xf32> to vector<4x128xf32>
    %108 = vector.shape_cast %83 : vector<4x128xf32> to vector<1x4x128xf32>
    tpu.vector_store %arg8[%c0_106, %c4_107, %c0_108], %108 {strides = array<i32>} : memref<1x16x128xf32, #tpu.memory_space<vmem>>, vector<1x4x128xf32>,
    %c0_109 = arith.constant 0 : index
    %c8 = arith.constant 8 : index
    %c0_110 = arith.constant 0 : index
    %109 = vector.load %arg8[%c0_109, %c8, %c0_110] : memref<1x16x128xf32, #tpu.memory_space<vmem>>, vector<1x3x128xf32>
    %110 = vector.shape_cast %109 : vector<1x3x128xf32> to vector<3x128xf32>
    %111 = vector.shape_cast %92 : vector<3x128xf32> to vector<1x3x128xf32>
    tpu.vector_store %arg8[%c0_109, %c8, %c0_110], %111 {strides = array<i32>} : memref<1x16x128xf32, #tpu.memory_space<vmem>>, vector<1x3x128xf32>,
    %c0_111 = arith.constant 0 : index
    %c11 = arith.constant 11 : index
    %c0_112 = arith.constant 0 : index
    %112 = vector.load %arg8[%c0_111, %c11, %c0_112] : memref<1x16x128xf32, #tpu.memory_space<vmem>>, vector<1x1x128xf32>
    %113 = vector.shape_cast %112 : vector<1x1x128xf32> to vector<1x128xf32>
    %114 = vector.shape_cast %102 : vector<1x128xf32> to vector<1x1x128xf32>
    tpu.vector_store %arg8[%c0_111, %c11, %c0_112], %114 {strides = array<i32>} : memref<1x16x128xf32, #tpu.memory_space<vmem>>, vector<1x1x128xf32>,
    %c0_113 = arith.constant 0 : index
    %c12 = arith.constant 12 : index
    %c0_114 = arith.constant 0 : index
    %115 = vector.load %arg8[%c0_113, %c12, %c0_114] : memref<1x16x128xf32, #tpu.memory_space<vmem>>, vector<1x3x128xf32>
    %116 = vector.shape_cast %115 : vector<1x3x128xf32> to vector<3x128xf32>
    %117 = vector.shape_cast %101 : vector<3x128xf32> to vector<1x3x128xf32>
    tpu.vector_store %arg8[%c0_113, %c12, %c0_114], %117 {strides = array<i32>} : memref<1x16x128xf32, #tpu.memory_space<vmem>>, vector<1x3x128xf32>,
    %c0_115 = arith.constant 0 : index
    %c15 = arith.constant 15 : index
    %c0_116 = arith.constant 0 : index
    %118 = vector.load %arg8[%c0_115, %c15, %c0_116] : memref<1x16x128xf32, #tpu.memory_space<vmem>>, vector<1x1x128xf32>
    %119 = vector.shape_cast %118 : vector<1x1x128xf32> to vector<1x128xf32>
    %120 = vector.shape_cast %102 : vector<1x128xf32> to vector<1x1x128xf32>
    tpu.vector_store %arg8[%c0_115, %c15, %c0_116], %120 {strides = array<i32>} : memref<1x16x128xf32, #tpu.memory_space<vmem>>, vector<1x1x128xf32>,
    return
  }
  func.func @transform_0(%arg0: i32) -> (i32, i32, i32) {
    %c0_i32 = arith.constant 0 : i32
    %c0_i32_0 = arith.constant 0 : i32
    %c0_i32_1 = arith.constant 0 : i32
    return %arg0, %c0_i32, %c0_i32_0 : i32, i32, i32
  }
  func.func @transform_1(%arg0: i32) -> (i32, i32) {
    %c0_i32 = arith.constant 0 : i32
    %c0_i32_0 = arith.constant 0 : i32
    %c0_i32_1 = arith.constant 0 : i32
    return %c0_i32, %c0_i32_0 : i32, i32
  }
  func.func @transform_2(%arg0: i32) -> (i32, i32) {
    %c0_i32 = arith.constant 0 : i32
    %c0_i32_0 = arith.constant 0 : i32
    %c0_i32_1 = arith.constant 0 : i32
    return %c0_i32, %c0_i32_0 : i32, i32
  }
  func.func @transform_3(%arg0: i32) -> (i32, i32) {
    %c0_i32 = arith.constant 0 : i32
    %c0_i32_0 = arith.constant 0 : i32
    %c0_i32_1 = arith.constant 0 : i32
    return %c0_i32, %c0_i32_0 : i32, i32
  }
  func.func @transform_4(%arg0: i32) -> (i32, i32) {
    %c0_i32 = arith.constant 0 : i32
    %c0_i32_0 = arith.constant 0 : i32
    %c0_i32_1 = arith.constant 0 : i32
    return %c0_i32, %c0_i32_0 : i32, i32
  }
  func.func @transform_5(%arg0: i32) -> (i32, i32) {
    %c0_i32 = arith.constant 0 : i32
    %c0_i32_0 = arith.constant 0 : i32
    %c0_i32_1 = arith.constant 0 : i32
    return %c0_i32, %c0_i32_0 : i32, i32
  }
  func.func @transform_6(%arg0: i32) -> (i32, i32) {
    %c0_i32 = arith.constant 0 : i32
    %c0_i32_0 = arith.constant 0 : i32
    %c0_i32_1 = arith.constant 0 : i32
    return %c0_i32, %c0_i32_0 : i32, i32
  }
  func.func @transform_7(%arg0: i32) -> (i32, i32, i32) {
    %c0_i32 = arith.constant 0 : i32
    %c0_i32_0 = arith.constant 0 : i32
    %c0_i32_1 = arith.constant 0 : i32
    return %arg0, %c0_i32, %c0_i32_0 : i32, i32, i32
  }
}

</mosaic_0001>

<bundles_post_ra>
// kernel: dcnn_forward.1
= control target key start
LH: loop header
LB: loop body
LE: loop exit
PB: predicated region body
PF: predicated region fallthrough
CT: control target
= control target key end

     0   :  { %12 = vsyncpa [#allocation9], 0  ;;  %s12787_s0 = inlined_call_operand.vmem [shape: bf16[2,6,128], index: 0, kind: input, shape index: {}]   ;;  %s12788_s1 = inlined_call_operand.hbm [shape: bf16[384,512], index: 1, kind: input, shape index: {}]   ;;  %s12789_s2 = inlined_call_operand.hbm [shape: bf16[768,1024], index: 2, kind: input, shape index: {}]   ;;  %s12790_s3 = inlined_call_operand.hbm [shape: bf16[1536,128], index: 3, kind: input, shape index: {}]   ;;  %s12791_s4 = inlined_call_operand.hbm [shape: f32[1,512], index: 4, kind: input, shape index: {}]   ;;  %s12792_s5 = inlined_call_operand.hbm [shape: f32[1,1024], index: 5, kind: input, shape index: {}]   ;;  %s12793_s6 = inlined_call_operand.hbm [shape: f32[1,128], index: 6, kind: input, shape index: {}]   ;;  %s12794_s7 = inlined_call_operand.vmem [shape: f32[2,16,128], index: 7, kind: output, shape index: {}]  }
   0x1   :  { %13 = vsyncpa [#allocation11], 0 }
   0x2   :  { %14 = vsyncpa [#allocation14], 0 }
   0x3   :  { %15 = vsyncpa [#allocation17], 0  ;;  %s10038_s24 = smov 0  }
   0x4 LB: > { %s229_s27 = sshll.u32 %s12789_s2, 4  ;;  %s10047_s28 = sadd.s32 4294967295, %s9983_s24   ;;  %s9983_s24 = sphi %s10038_s24, %s21_s24   ;;  %s230_s27 = int_to_ptr.hbm [resolvable:$true] %s229_s27 }
   0x5   : > { %p6728_p0 = scmp.ge.s32.totalorder %s9983_s24, 1  ;;  %p204_p1 = scmp.lt.s32.totalorder %s9983_s24, 3 }
   0x6   : > { %p9672_p2 = scmp.eq.s32.totalorder %s10047_s28, 0  ;;  %s9985_s30 = smov [#allocation10]  }
   0x7   : > { %p10052_p3 = pnand %p6728_p0, %p204_p1  ;;  %s231_s8 = sshll.u32 %s9985_s30, 4  ;;  %s232_s8 = int_to_ptr.vmem [resolvable:$true] %s231_s8 }
   0x8   : > { %s258_s11 = sshll.u32 %s12791_s4, 4  ;;  %s9986_s13 = smov [#allocation13]   ;;  %s259_s11 = int_to_ptr.hbm [resolvable:$true] %s258_s11 }
   0x9   : > { %p9653_p4 = pneg %p10052_p3  ;;  %s260_s14 = sshll.u32 %s9986_s13, 4  ;;  %s261_s14 = int_to_ptr.vmem [resolvable:$true] %s260_s14 }
   0xa   : > { %s215_s17 = sshll.u32 %s12788_s1, 4  ;;  %s9987_s18 = smov 512   ;;  %s216_s17 = int_to_ptr.hbm [resolvable:$true] %s215_s17 }
   0xb   : > { %p10063_p5 = pnand %p9672_p2, %p9653_p4  ;;  %s9988_s19 = smov 32  }
   0xc   : > { %s9989_s20 = smov [#allocation8]   ;;  %s9990_s22 = smov 256  }
   0xd   : > { %9659 = dma.hbm_to_vmem [thread:$0]  (!%p10063_p5), %s230_s27, 49152, %s232_s8, [#allocation11], %s9987_s18, %s9987_s18, %s9988_s19  }
   0xe   : > { %9665 = dma.hbm_to_vmem [thread:$0]  (!%p10063_p5), %s259_s11, 64, %s261_s14, [#allocation14]  }
   0xf   : > { %s217_s21 = sshll.u32 %s9989_s20, 4  ;;  %s9991_s23 = smov 16   ;;  %s218_s21 = int_to_ptr.vmem [resolvable:$true] %s217_s21 }
  0x10   : > { %9656 = dma.hbm_to_vmem [thread:$0]  (!%p10063_p5), %s216_s17, 12288, %s218_s21, [#allocation9], %s9990_s22, %s9990_s22, %s9991_s23  }
  0x11   : > { %s243_s30 = sshll.u32 %s12790_s3, 4  ;;  %s9992_s9 = smov [#allocation12]   ;;  %s244_s30 = int_to_ptr.hbm [resolvable:$true] %s243_s30 }
  0x12   : > { %s245_s10 = sshll.u32 %s9992_s9, 4  ;;  %s270_s11 = sshll.u32 %s12792_s5, 4  ;;  %s246_s10 = int_to_ptr.vmem [resolvable:$true] %s245_s10  ;;  %s271_s11 = int_to_ptr.hbm [resolvable:$true] %s270_s11 }
  0x13   : > { %s9993_s13 = smov 64   ;;  %s9994_s14 = smov 4  }
  0x14   : > { %9662 = dma.hbm_to_vmem [thread:$0]  (!%p10063_p5), %s244_s30, 12288, %s246_s10, [#allocation11], %s9993_s13, %s9993_s13, %s9994_s14  }
  0x15   : > { %s9995_s15 = smov [#allocation15]   ;;  %s282_s19 = sshll.u32 %s12793_s6, 4  ;;  %s283_s19 = int_to_ptr.hbm [resolvable:$true] %s282_s19 }
  0x16   : > { %s272_s16 = sshll.u32 %s9995_s15, 4  ;;  %s9996_s20 = smov [#allocation16]   ;;  %s273_s16 = int_to_ptr.vmem [resolvable:$true] %s272_s16 }
  0x17   : > { %9668 = dma.hbm_to_vmem [thread:$0]  (!%p10063_p5), %s271_s11, 128, %s273_s16, [#allocation14]  }
  0x18   : > { %s284_s21 = sshll.u32 %s9996_s20, 4  ;;  %304 = sbr.rel (%p10052_p3) target bundleno = 1629 (0x65d), region = 48  ;;  %s285_s21 = int_to_ptr.vmem [resolvable:$true] %s284_s21 }
  0x19   : > { %9671 = dma.hbm_to_vmem [thread:$0]  (!%p10063_p5), %s283_s19, 16, %s285_s21, [#allocation17]  }
  0x1d   : > { %9966 = dma.done.wait (%p9672_p2), [#allocation9], 12288  }
  0x1e   : > { %9968 = vsyncadd (%p9672_p2), [#allocation9], 4294955008 }
  0x1f   : > { %9970 = dma.done.wait (%p9672_p2), [#allocation11], 61440  }
  0x20   : > { %9972 = vsyncadd (%p9672_p2), [#allocation11], 4294905856 }
  0x21   : > { %9974 = dma.done.wait (%p9672_p2), [#allocation14], 192  }
  0x22   : > { %9976 = vsyncadd (%p9672_p2), [#allocation14], 4294967104 }
  0x23   : > { %9978 = dma.done.wait (%p9672_p2), [#allocation17], 16  }
  0x24   : > { %9980 = vsyncadd (%p9672_p2), [#allocation17], 4294967280  ;;  %v6860_v0 = vld [vmem:[#allocation8 + $0xe0] sm:$0xf]  ;;  %v9083_v1 = vld [vmem:[#allocation8 + $0xec] sm:$0xf0] }
  0x25   : > { %v6988_v2 = vld [vmem:[#allocation8 + $0x1e0] sm:$0xf]  ;;  %v6861_v3 = vor.u32 %v9083_v1, %v6860_v0  ;;  %v9115_v4 = vld [vmem:[#allocation8 + $0x1ec] sm:$0xf0]  ;;  %v9081_v9 = vld [vmem:[#allocation8 + $0xe4] sm:$0xf] }
  0x26   : > { %v7116_v5 = vld [vmem:[#allocation8 + $0x2e0] sm:$0xf]  ;;  %v9147_v6 = vld [vmem:[#allocation8 + $0x2ec] sm:$0xf0]  ;;  %v6989_v7 = vor.u32 %v9115_v4, %v6988_v2  ;;  %v6862_v10 = vld [vmem:[#allocation8 + $0xf0] sm:$0xf0] }
  0x27   : > { %v7117_v8 = vor.u32 %v9147_v6, %v7116_v5  ;;  %v6844_v11 = vld [vmem:[#allocation8 + $0xc0] sm:$0xf]  ;;  %976 = vmatpush.bf16.msra.mxu0 %v6861_v3  ;;  %v6865_v12 = vor.u32 %v9081_v9, %v6862_v10  ;;  %v9079_v13 = vld [vmem:[#allocation8 + $0xcc] sm:$0xf0]  ;;  %v9077_v20 = vld [vmem:[#allocation8 + $0xc4] sm:$0xf] }
  0x28   : > { %v6972_v14 = vld [vmem:[#allocation8 + $0x1c0] sm:$0xf]  ;;  %v9111_v15 = vld [vmem:[#allocation8 + $0x1cc] sm:$0xf0]  ;;  %989 = vmatpush.bf16.msra.mxu1 %v6989_v7  ;;  %v6845_v16 = vor.u32 %v9079_v13, %v6844_v11  ;;  %v6846_v22 = vld [vmem:[#allocation8 + $0xd0] sm:$0xf0] }
  0x29   : > { %1002 = vmatpush.bf16.msra.mxu2 %v7117_v8  ;;  %v6973_v17 = vor.u32 %v9111_v15, %v6972_v14  ;;  %v7100_v18 = vld [vmem:[#allocation8 + $0x2c0] sm:$0xf]  ;;  %v9143_v19 = vld [vmem:[#allocation8 + $0x2cc] sm:$0xf0]  ;;  %1015 = vmatpush.bf16.msra.mxu3 %v6865_v12  ;;  %v6849_v25 = vor.u32 %v9077_v20, %v6846_v22  ;;  %v9073_v31 = vld [vmem:[#allocation8 + $0xa4] sm:$0xf] }
  0x2a   : > { %v7101_v21 = vor.u32 %v9143_v19, %v7100_v18  ;;  %v6828_v23 = vld [vmem:[#allocation8 + $0xa0] sm:$0xf]  ;;  %v9075_v24 = vld [vmem:[#allocation8 + $0xac] sm:$0xf0]  ;;  %v6830_v32 = vld [vmem:[#allocation8 + $0xb0] sm:$0xf0] }
  0x2b   : > { %v6956_v26 = vld [vmem:[#allocation8 + $0x1a0] sm:$0xf]  ;;  %v9107_v27 = vld [vmem:[#allocation8 + $0x1ac] sm:$0xf0]  ;;  %977 = vmatpush.bf16.msra.mxu0 %v6845_v16  ;;  %v6829_v29 = vor.u32 %v9075_v24, %v6828_v23  ;;  %v6833_v38 = vor.u32 %v9073_v31, %v6830_v32  ;;  %v9069_v42 = vld [vmem:[#allocation8 + $0x84] sm:$0xf] }
  0x2c   : > { %v7084_v28 = vld [vmem:[#allocation8 + $0x2a0] sm:$0xf]  ;;  %v9139_v30 = vld [vmem:[#allocation8 + $0x2ac] sm:$0xf0]  ;;  %990 = vmatpush.bf16.msra.mxu1 %v6973_v17  ;;  %v6957_v33 = vor.u32 %v9107_v27, %v6956_v26  ;;  %v6814_v43 = vld [vmem:[#allocation8 + $0x90] sm:$0xf0] }
  0x2d   : > { %1003 = vmatpush.bf16.msra.mxu2 %v7101_v21  ;;  %v7085_v34 = vor.u32 %v9139_v30, %v7084_v28  ;;  %v6812_v35 = vld [vmem:[#allocation8 + $0x80] sm:$0xf]  ;;  %v9071_v36 = vld [vmem:[#allocation8 + $0x8c] sm:$0xf0]  ;;  %1016 = vmatpush.bf16.msra.mxu3 %v6849_v25  ;;  %v6817_v50 = vor.u32 %v9069_v42, %v6814_v43  ;;  %v9065_v54 = vld [vmem:[#allocation8 + $0x64] sm:$0xf] }
  0x2e   : > { %v6940_v37 = vld [vmem:[#allocation8 + $0x180] sm:$0xf]  ;;  %v9103_v39 = vld [vmem:[#allocation8 + $0x18c] sm:$0xf0]  ;;  %v6813_v44 = vor.u32 %v9071_v36, %v6812_v35  ;;  %v6798_v55 = vld [vmem:[#allocation8 + $0x70] sm:$0xf0] }
  0x2f   : > { %v7068_v40 = vld [vmem:[#allocation8 + $0x280] sm:$0xf]  ;;  %v9135_v41 = vld [vmem:[#allocation8 + $0x28c] sm:$0xf0]  ;;  %978 = vmatpush.bf16.msra.mxu0 %v6829_v29  ;;  %v6941_v45 = vor.u32 %v9103_v39, %v6940_v37  ;;  %p361_p6 = scmp.lt.s32.totalorder %s10047_s28, 1  ;;  %v6801_v62 = vor.u32 %v9065_v54, %v6798_v55  ;;  %vm1168_vm2 = vcmask 1041408  }
  0x30   : > { %991 = vmatpush.bf16.msra.mxu1 %v6957_v33  ;;  %v7069_v46 = vor.u32 %v9135_v41, %v7068_v40  ;;  %v6796_v47 = vld [vmem:[#allocation8 + $0x60] sm:$0xf]  ;;  %v9067_v48 = vld [vmem:[#allocation8 + $0x6c] sm:$0xf0]  ;;  %v9061_v2 = vld [vmem:[#allocation8 + $0x44] sm:$0xf] }
  0x31   : > { %1004 = vmatpush.bf16.msra.mxu2 %v7085_v34  ;;  %v6924_v49 = vld [vmem:[#allocation8 + $0x160] sm:$0xf]  ;;  %1017 = vmatpush.bf16.msra.mxu3 %v6833_v38  ;;  %v9099_v51 = vld [vmem:[#allocation8 + $0x16c] sm:$0xf0]  ;;  %v6797_v56 = vor.u32 %v9067_v48, %v6796_v47  ;;  %v6782_v3 = vld [vmem:[#allocation8 + $0x50] sm:$0xf0] }
  0x32   : > { %v7052_v52 = vld [vmem:[#allocation8 + $0x260] sm:$0xf]  ;;  %v9131_v53 = vld [vmem:[#allocation8 + $0x26c] sm:$0xf0]  ;;  %v6925_v57 = vor.u32 %v9099_v51, %v6924_v49  ;;  %s14140_s28 = smov (!%p361_p6, %s10047_s28), 1  ;;  %v6785_v10 = vor.u32 %v9061_v2, %v6782_v3  ;;  %vm1146_vm3 = vcmask 1040384  }
  0x33   : > { %979 = vmatpush.bf16.msra.mxu0 %v6813_v44  ;;  %v7053_v58 = vor.u32 %v9131_v53, %v7052_v52  ;;  %v6780_v59 = vld [vmem:[#allocation8 + $0x40] sm:$0xf]  ;;  %v9063_v60 = vld [vmem:[#allocation8 + $0x4c] sm:$0xf0]  ;;  %v9057_v14 = vld [vmem:[#allocation8 + $0x24] sm:$0xf] }
  0x34   : > { %992 = vmatpush.bf16.msra.mxu1 %v6941_v45  ;;  %v6908_v61 = vld [vmem:[#allocation8 + $0x140] sm:$0xf]  ;;  %v9095_v63 = vld [vmem:[#allocation8 + $0x14c] sm:$0xf0]  ;;  %v6781_v4 = vor.u32 %v9063_v60, %v6780_v59  ;;  %v6766_v15 = vld [vmem:[#allocation8 + $0x30] sm:$0xf0] }
  0x35   : > { %1005 = vmatpush.bf16.msra.mxu2 %v7069_v46  ;;  %1018 = vmatpush.bf16.msra.mxu3 %v6817_v50  ;;  %v7036_v0 = vld [vmem:[#allocation8 + $0x240] sm:$0xf]  ;;  %v9127_v1 = vld [vmem:[#allocation8 + $0x24c] sm:$0xf0]  ;;  %v6909_v5 = vor.u32 %v9095_v63, %v6908_v61  ;;  %s6743_s29 = sshll.u32 %s14140_s28, 2  ;;  %v6769_v24 = vor.u32 %v9057_v14, %v6766_v15  ;;  %s9052_s25 = sshll.u32 %s14140_s28, 4 }
  0x36   : > { %v7037_v6 = vor.u32 %v9127_v1, %v7036_v0  ;;  %v6764_v7 = vld [vmem:[#allocation8 + $0x20] sm:$0xf]  ;;  %v9059_v8 = vld [vmem:[#allocation8 + $0x2c] sm:$0xf0]  ;;  %v9053_v26 = vld [vmem:[#allocation8 + $0x4] sm:$0xf]  ;;  %s364_s23 = scalar_lea.vmem %s12787_s0, %s6743_s29  ;;  %s10127_s30 = scalar_lea.vmem %s12794_s7, %s9052_s25 }
  0x37   : > { %980 = vmatpush.bf16.msra.mxu0 %v6797_v56  ;;  %v6892_v9 = vld [vmem:[#allocation8 + $0x120] sm:$0xf]  ;;  %v9091_v11 = vld [vmem:[#allocation8 + $0x12c] sm:$0xf0]  ;;  %v6765_v16 = vor.u32 %v9059_v8, %v6764_v7  ;;  %v6750_v27 = vld [vmem:[#allocation8 + $0x10] sm:$0xf0] }
  0x38   : > { %993 = vmatpush.bf16.msra.mxu1 %v6925_v57  ;;  %v7020_v12 = vld [vmem:[#allocation8 + $0x220] sm:$0xf]  ;;  %v9123_v13 = vld [vmem:[#allocation8 + $0x22c] sm:$0xf0]  ;;  %v6893_v19 = vor.u32 %v9091_v11, %v6892_v9  ;;  %v9113_v28 = vld [vmem:[#allocation8 + $0x1e4] sm:$0xf]  ;;  %v6753_v39 = vor.u32 %v9053_v26, %v6750_v27 }
  0x39   : > { %1006 = vmatpush.bf16.msra.mxu2 %v7053_v58  ;;  %1019 = vmatpush.bf16.msra.mxu3 %v6801_v62  ;;  %v6748_v17 = vld [vmem:[#allocation8] sm:$0xf]  ;;  %v9055_v18 = vld [vmem:[#allocation8 + $0xc] sm:$0xf0]  ;;  %v7021_v20 = vor.u32 %v9123_v13, %v7020_v12  ;;  %v6990_v29 = vld [vmem:[#allocation8 + $0x1f0] sm:$0xf0] }
  0x3a   : > { %v6876_v21 = vld [vmem:[#allocation8 + $0x100] sm:$0xf]  ;;  %v9087_v22 = vld [vmem:[#allocation8 + $0x10c] sm:$0xf0]  ;;  %v9145_v30 = vld [vmem:[#allocation8 + $0x2e4] sm:$0xf]  ;;  %v6749_v31 = vor.u32 %v9055_v18, %v6748_v17  ;;  %v6993_v40 = vor.u32 %v9113_v28, %v6990_v29 }
  0x3b   : > { %981 = vmatpush.bf16.msra.mxu0 %v6781_v4  ;;  %v7004_v23 = vld [vmem:[#allocation8 + $0x200] sm:$0xf]  ;;  %v9119_v25 = vld [vmem:[#allocation8 + $0x20c] sm:$0xf0]  ;;  %v7118_v32 = vld [vmem:[#allocation8 + $0x2f0] sm:$0xf0]  ;;  %v6877_v35 = vor.u32 %v9087_v22, %v6876_v21 }
  0x3c   : > { %994 = vmatpush.bf16.msra.mxu1 %v6909_v5  ;;  %v6868_v33 = vld [vmem:[#allocation8 + $0xe8] sm:$0xf]  ;;  %v9084_v34 = vld [vmem:[#allocation8 + $0xf4] sm:$0xf0]  ;;  %v7005_v36 = vor.u32 %v9119_v25, %v7004_v23  ;;  %v9109_v41 = vld [vmem:[#allocation8 + $0x1c4] sm:$0xf]  ;;  %v7121_v43 = vor.u32 %v9145_v30, %v7118_v32 }
  0x3d   : > { %1007 = vmatpush.bf16.msra.mxu2 %v7037_v6  ;;  %1020 = vmatpush.bf16.msra.mxu3 %v6785_v10  ;;  %v6996_v37 = vld [vmem:[#allocation8 + $0x1e8] sm:$0xf]  ;;  %v9116_v38 = vld [vmem:[#allocation8 + $0x1f4] sm:$0xf0]  ;;  %v6974_v42 = vld [vmem:[#allocation8 + $0x1d0] sm:$0xf0]  ;;  %v6869_v44 = vor.u32 %v9084_v34, %v6868_v33 }
  0x3e   : > { %v9141_v45 = vld [vmem:[#allocation8 + $0x2c4] sm:$0xf]  ;;  %v7102_v46 = vld [vmem:[#allocation8 + $0x2d0] sm:$0xf0]  ;;  %v6852_v47 = vld [vmem:[#allocation8 + $0xc8] sm:$0xf]  ;;  %v6997_v48 = vor.u32 %v9116_v38, %v6996_v37  ;;  %v6977_v55 = vor.u32 %v9109_v41, %v6974_v42 }
  0x3f   : > { %982 = vmatpush.bf16.msra.mxu0 %v6765_v16  ;;  %v9080_v49 = vld [vmem:[#allocation8 + $0xd4] sm:$0xf0]  ;;  %v6980_v50 = vld [vmem:[#allocation8 + $0x1c8] sm:$0xf]  ;;  %v10122_v52 = vld [vmem:[%s364_s23] sm:$0x3]  ;;  %v7105_v60 = vor.u32 %v9141_v45, %v7102_v46 }
  0x40   : > { %995 = vmatpush.bf16.msra.mxu1 %v6893_v19  ;;  %v9112_v51 = vld [vmem:[#allocation8 + $0x1d4] sm:$0xf0]  ;;  %v372_v53 = vld [vmem:[%s364_s23] sm:$0x7]  ;;  %v9105_v56 = vld [vmem:[#allocation8 + $0x1a4] sm:$0xf]  ;;  %v6853_v61 = vor.u32 %v9080_v49, %v6852_v47 }
  0x41   : > { %1008 = vmatpush.bf16.msra.mxu2 %v7021_v20  ;;  %1021 = vmatpush.bf16.msra.mxu3 %v6769_v24  ;;  %v373_v54 = vld [vmem:[%s364_s23] sm:$0x6]  ;;  %v6958_v57 = vld [vmem:[#allocation8 + $0x1b0] sm:$0xf0]  ;;  %v375_v58 = vunpack.c.l.b16 %v372_v53  ;;  %v9137_v62 = vld [vmem:[#allocation8 + $0x2a4] sm:$0xf]  ;;  %v6981_v1 = vor.u32 %v9112_v51, %v6980_v50 }
  0x42   : > { %v386_v59 = vunpack.c.l.b16 %v373_v54  ;;  %v7086_v63 = vld [vmem:[#allocation8 + $0x2b0] sm:$0xf0]  ;;  %v9997_v0 = vmov 0.0   ;;  %v6836_v2 = vld [vmem:[#allocation8 + $0xa8] sm:$0xf]  ;;  %v6961_v8 = vor.u32 %v9105_v56, %v6958_v57  ;;  %vm1149_vm5 = vcmask 1044484  }
  0x43   : > { %983 = vmatpush.bf16.msra.mxu0 %v6749_v31  ;;  %6608 = vst [vmem:[%s10127_s30 + $0xb] sm:$0x1] %v9997_v0  ;;  %v9076_v3 = vld [vmem:[#allocation8 + $0xb4] sm:$0xf0]  ;;  %v376_v4 = vpack.c.b16 %v375_v58, %v375_v58  ;;  %v6964_v6 = vld [vmem:[#allocation8 + $0x1a8] sm:$0xf]  ;;  %v7089_v13 = vor.u32 %v9137_v62, %v7086_v63 }
  0x44   : > { %996 = vmatpush.bf16.msra.mxu1 %v6877_v35  ;;  %6610 = vst [vmem:[%s10127_s30 + $0xf] sm:$0x1] %v9997_v0  ;;  %v387_v5 = vpack.c.b16 %v386_v59, %v386_v59  ;;  %v9108_v7 = vld [vmem:[#allocation8 + $0x1b4] sm:$0xf0]  ;;  %v9101_v9 = vld [vmem:[#allocation8 + $0x184] sm:$0xf]  ;;  %v6837_v14 = vor.u32 %v9076_v3, %v6836_v2 }
  0x45   : > { %1009 = vmatpush.bf16.msra.mxu2 %v7005_v36  ;;  %1022 = vmatpush.bf16.msra.mxu3 %v6753_v39  ;;  %v378_v10 = vshrl.u32 %v376_v4, 16  ;;  %v380_v11 = vshll.u32 %v376_v4, 16  ;;  %v6942_v15 = vld [vmem:[#allocation8 + $0x190] sm:$0xf0]  ;;  %v9133_v16 = vld [vmem:[#allocation8 + $0x284] sm:$0xf]  ;;  %v6965_v18 = vor.u32 %v9108_v7, %v6964_v6 }
  0x46   : > { %984 = vmatmul.bf16.vlgmr.msra.gmra.mxu0 %v10122_v52  ;;  %v10133_v12 = vrot.slane %v387_v5, 1  ;;  %v7070_v17 = vld [vmem:[#allocation8 + $0x290] sm:$0xf0]  ;;  %v6820_v19 = vld [vmem:[#allocation8 + $0x88] sm:$0xf]  ;;  %v6945_v24 = vor.u32 %v9101_v9, %v6942_v15  ;;  %vm1156_vm10 = vcmask 1042434  }
  0x47   : > { %1028 = vmatpush.bf16.msrb.mxu0 %v6993_v40  ;;  %v9072_v20 = vld [vmem:[#allocation8 + $0x94] sm:$0xf0]  ;;  %v382_v21 = vrot.slane %v380_v11, 1  ;;  %v6948_v22 = vld [vmem:[#allocation8 + $0x188] sm:$0xf]  ;;  %v7073_v26 = vor.u32 %v9133_v16, %v7070_v17  ;;  %vm1159_vm12 = vcmask 1046534  }
  0x48   : > { %1041 = vmatpush.bf16.msrb.mxu1 %v7121_v43  ;;  %1023 = vmatmul.bf16.vlgmr.msra.gmra.mxu3 %v10122_v52  ;;  %v9104_v23 = vld [vmem:[#allocation8 + $0x194] sm:$0xf0]  ;;  %v6821_v27 = vor.u32 %v9072_v20, %v6820_v19  ;;  %v9097_v28 = vld [vmem:[#allocation8 + $0x164] sm:$0xf]  ;;  %v6926_v29 = vld [vmem:[#allocation8 + $0x170] sm:$0xf0] }
  0x49   : > { %1054 = vmatpush.bf16.msrb.mxu2 %v6869_v44  ;;  %1067 = vmatpush.bf16.msrb.mxu3 %v6997_v48  ;;  %v10136_v25 = vor.u32 %v382_v21, %v378_v10  ;;  %v9129_v30 = vld [vmem:[#allocation8 + $0x264] sm:$0xf]  ;;  %v6949_v31 = vor.u32 %v9104_v23, %v6948_v22  ;;  %v7054_v32 = vld [vmem:[#allocation8 + $0x270] sm:$0xf0]  ;;  %v6804_v33 = vld [vmem:[#allocation8 + $0x68] sm:$0xf]  ;;  %v6929_v37 = vor.u32 %v9097_v28, %v6926_v29 }
  0x4a   : > { %1010 = vmatmul.bf16.vlgmr.msra.gmra.mxu2 %v10133_v12  ;;  %v9068_v34 = vld [vmem:[#allocation8 + $0x74] sm:$0xf0]  ;;  %v6932_v35 = vld [vmem:[#allocation8 + $0x168] sm:$0xf]  ;;  %v7057_v38 = vor.u32 %v9129_v30, %v7054_v32  ;;  %v9093_v40 = vld [vmem:[#allocation8 + $0x144] sm:$0xf] }
  0x4b   : > { %1029 = vmatpush.bf16.msrb.mxu0 %v6977_v55  ;;  %997 = vmatmul.bf16.vlgmr.msra.gmra.mxu1 %v10136_v25  ;;  %v9100_v36 = vld [vmem:[#allocation8 + $0x174] sm:$0xf0]  ;;  %v6805_v39 = vor.u32 %v9068_v34, %v6804_v33  ;;  %v6910_v41 = vld [vmem:[#allocation8 + $0x150] sm:$0xf0]  ;;  %v9125_v42 = vld [vmem:[#allocation8 + $0x244] sm:$0xf] }
  0x4c   : > { %1042 = vmatpush.bf16.msrb.mxu1 %v7105_v60  ;;  %v6933_v43 = vor.u32 %v9100_v36, %v6932_v35  ;;  %v7038_v44 = vld [vmem:[#allocation8 + $0x250] sm:$0xf0]  ;;  %v6788_v45 = vld [vmem:[#allocation8 + $0x48] sm:$0xf]  ;;  %v9064_v46 = vld [vmem:[#allocation8 + $0x54] sm:$0xf0]  ;;  %v6913_v49 = vor.u32 %v9093_v40, %v6910_v41 }
  0x4d   : > { %1055 = vmatpush.bf16.msrb.mxu2 %v6853_v61  ;;  %1068 = vmatpush.bf16.msrb.mxu3 %v6981_v1  ;;  %v6916_v47 = vld [vmem:[#allocation8 + $0x148] sm:$0xf]  ;;  %v9096_v48 = vld [vmem:[#allocation8 + $0x154] sm:$0xf0]  ;;  %v7041_v50 = vor.u32 %v9125_v42, %v7038_v44  ;;  %v6789_v51 = vor.u32 %v9064_v46, %v6788_v45  ;;  %v9089_v53 = vld [vmem:[#allocation8 + $0x124] sm:$0xf] }
  0x4e   : > { %v6894_v54 = vld [vmem:[#allocation8 + $0x130] sm:$0xf0]  ;;  %v9121_v55 = vld [vmem:[#allocation8 + $0x224] sm:$0xf]  ;;  %v6917_v56 = vor.u32 %v9096_v48, %v6916_v47  ;;  %v6772_v58 = vld [vmem:[#allocation8 + $0x28] sm:$0xf] }
  0x4f   : > { %1030 = vmatpush.bf16.msrb.mxu0 %v6961_v8  ;;  %v7022_v57 = vld [vmem:[#allocation8 + $0x230] sm:$0xf0]  ;;  %v9060_v59 = vld [vmem:[#allocation8 + $0x34] sm:$0xf0]  ;;  %v6900_v60 = vld [vmem:[#allocation8 + $0x128] sm:$0xf]  ;;  %v6897_v62 = vor.u32 %v9089_v53, %v6894_v54 }
  0x50   : > { %1043 = vmatpush.bf16.msrb.mxu1 %v7089_v13  ;;  %v9092_v61 = vld [vmem:[#allocation8 + $0x134] sm:$0xf0]  ;;  %v9085_v63 = vld [vmem:[#allocation8 + $0x104] sm:$0xf]  ;;  %v6878_v0 = vld [vmem:[#allocation8 + $0x110] sm:$0xf0]  ;;  %v7025_v1 = vor.u32 %v9121_v55, %v7022_v57  ;;  %v6773_v2 = vor.u32 %v9060_v59, %v6772_v58 }
  0x51   : > { %1056 = vmatpush.bf16.msrb.mxu2 %v6837_v14  ;;  %1069 = vmatpush.bf16.msrb.mxu3 %v6965_v18  ;;  %v9117_v3 = vld [vmem:[#allocation8 + $0x204] sm:$0xf]  ;;  %v7006_v4 = vld [vmem:[#allocation8 + $0x210] sm:$0xf0]  ;;  %v6756_v5 = vld [vmem:[#allocation8 + $0x8] sm:$0xf]  ;;  %v6901_v6 = vor.u32 %v9092_v61, %v6900_v60  ;;  %v6881_v14 = vor.u32 %v9085_v63, %v6878_v0 }
  0x52   : > { %v9056_v7 = vld [vmem:[#allocation8 + $0x14] sm:$0xf0]  ;;  %v6884_v8 = vld [vmem:[#allocation8 + $0x108] sm:$0xf]  ;;  %v9082_v13 = vld [vmem:[#allocation8 + $0xec] sm:$0xf]  ;;  %v7009_v18 = vor.u32 %v9117_v3, %v7006_v4 }
  0x53   : > { %1031 = vmatpush.bf16.msrb.mxu0 %v6945_v24  ;;  %v9088_v9 = vld [vmem:[#allocation8 + $0x114] sm:$0xf0]  ;;  %v7124_v10 = vld [vmem:[#allocation8 + $0x2e8] sm:$0xf]  ;;  %v6870_v15 = vld [vmem:[#allocation8 + $0xf8] sm:$0xf0]  ;;  %v6757_v19 = vor.u32 %v9056_v7, %v6756_v5 }
  0x54   : > { %1044 = vmatpush.bf16.msrb.mxu1 %v7073_v26  ;;  %v9148_v11 = vld [vmem:[#allocation8 + $0x2f4] sm:$0xf0]  ;;  %v9114_v16 = vld [vmem:[#allocation8 + $0x1ec] sm:$0xf]  ;;  %v6998_v17 = vld [vmem:[#allocation8 + $0x1f8] sm:$0xf0]  ;;  %v6885_v22 = vor.u32 %v9088_v9, %v6884_v8  ;;  %v6873_v24 = vor.u32 %v9082_v13, %v6870_v15 }
  0x55   : > { %1057 = vmatpush.bf16.msrb.mxu2 %v6821_v27  ;;  %1070 = vmatpush.bf16.msrb.mxu3 %v6949_v31  ;;  %v9146_v20 = vld [vmem:[#allocation8 + $0x2ec] sm:$0xf]  ;;  %v7126_v21 = vld [vmem:[#allocation8 + $0x2f8] sm:$0xf0]  ;;  %v7125_v23 = vor.u32 %v9148_v11, %v7124_v10  ;;  %v7001_v26 = vor.u32 %v9114_v16, %v6998_v17  ;;  %v7108_v27 = vld [vmem:[#allocation8 + $0x2c8] sm:$0xf] }
  0x56   : > { %v9144_v28 = vld [vmem:[#allocation8 + $0x2d4] sm:$0xf0]  ;;  %v9078_v29 = vld [vmem:[#allocation8 + $0xcc] sm:$0xf]  ;;  %v7129_v30 = vor.u32 %v9146_v20, %v7126_v21  ;;  %v6854_v31 = vld [vmem:[#allocation8 + $0xd8] sm:$0xf0] }
  0x57   : > { %1032 = vmatpush.bf16.msrb.mxu0 %v6929_v37  ;;  %v9110_v32 = vld [vmem:[#allocation8 + $0x1cc] sm:$0xf]  ;;  %v6982_v33 = vld [vmem:[#allocation8 + $0x1d8] sm:$0xf0]  ;;  %v7109_v36 = vor.u32 %v9144_v28, %v7108_v27  ;;  %v6857_v37 = vor.u32 %v9078_v29, %v6854_v31  ;;  %v9140_v40 = vld [vmem:[#allocation8 + $0x2b4] sm:$0xf0] }
  0x58   : > { %1045 = vmatpush.bf16.msrb.mxu1 %v7057_v38  ;;  %v9142_v34 = vld [vmem:[#allocation8 + $0x2cc] sm:$0xf]  ;;  %v7110_v35 = vld [vmem:[#allocation8 + $0x2d8] sm:$0xf0]  ;;  %v6985_v38 = vor.u32 %v9110_v32, %v6982_v33  ;;  %v9136_v53 = vld [vmem:[#allocation8 + $0x294] sm:$0xf0] }
  0x59   : > { %1058 = vmatpush.bf16.msrb.mxu2 %v6805_v39  ;;  %1071 = vmatpush.bf16.msrb.mxu3 %v6933_v43  ;;  %v7092_v39 = vld [vmem:[#allocation8 + $0x2a8] sm:$0xf]  ;;  %v9074_v41 = vld [vmem:[#allocation8 + $0xac] sm:$0xf]  ;;  %v7113_v42 = vor.u32 %v9142_v34, %v7110_v35  ;;  %v6838_v43 = vld [vmem:[#allocation8 + $0xb8] sm:$0xf0] }
  0x5a   : > { %v9106_v44 = vld [vmem:[#allocation8 + $0x1ac] sm:$0xf]  ;;  %v6966_v45 = vld [vmem:[#allocation8 + $0x1b8] sm:$0xf0]  ;;  %v7093_v48 = vor.u32 %v9140_v40, %v7092_v39  ;;  %v7060_v0 = vld [vmem:[#allocation8 + $0x268] sm:$0xf] }
  0x5b   : > { %1033 = vmatpush.bf16.msrb.mxu0 %v6913_v49  ;;  %v9138_v46 = vld [vmem:[#allocation8 + $0x2ac] sm:$0xf]  ;;  %v7094_v47 = vld [vmem:[#allocation8 + $0x2b8] sm:$0xf0]  ;;  %v6841_v49 = vor.u32 %v9074_v41, %v6838_v43  ;;  %v7044_v13 = vld [vmem:[#allocation8 + $0x248] sm:$0xf] }
  0x5c   : > { %1046 = vmatpush.bf16.msrb.mxu1 %v7041_v50  ;;  %v6969_v50 = vor.u32 %v9106_v44, %v6966_v45  ;;  %v9070_v54 = vld [vmem:[#allocation8 + $0x8c] sm:$0xf]  ;;  %v7097_v55 = vor.u32 %v9138_v46, %v7094_v47  ;;  %v6950_v58 = vld [vmem:[#allocation8 + $0x198] sm:$0xf0]  ;;  %v9124_v27 = vld [vmem:[#allocation8 + $0x234] sm:$0xf0] }
  0x5d   : > { %1059 = vmatpush.bf16.msrb.mxu2 %v6789_v51  ;;  %1072 = vmatpush.bf16.msrb.mxu3 %v6917_v56  ;;  %v7076_v51 = vld [vmem:[#allocation8 + $0x288] sm:$0xf]  ;;  %v6822_v56 = vld [vmem:[#allocation8 + $0x98] sm:$0xf0]  ;;  %v9102_v57 = vld [vmem:[#allocation8 + $0x18c] sm:$0xf] }
  0x5e   : > { %v9134_v59 = vld [vmem:[#allocation8 + $0x28c] sm:$0xf]  ;;  %v7078_v60 = vld [vmem:[#allocation8 + $0x298] sm:$0xf0]  ;;  %v7077_v61 = vor.u32 %v9136_v53, %v7076_v51  ;;  %v6953_v63 = vor.u32 %v9102_v57, %v6950_v58  ;;  %v9120_v39 = vld [vmem:[#allocation8 + $0x214] sm:$0xf0] }
  0x5f   : > { %1034 = vmatpush.bf16.msrb.mxu0 %v6897_v62  ;;  %v6825_v62 = vor.u32 %v9070_v54, %v6822_v56  ;;  %v7081_v3 = vor.u32 %v9134_v59, %v7078_v60  ;;  %v6806_v4 = vld [vmem:[#allocation8 + $0x78] sm:$0xf0]  ;;  %v9098_v5 = vld [vmem:[#allocation8 + $0x16c] sm:$0xf]  ;;  %v7868_v47 = vld [vmem:[#allocation10 + $0x5c0] sm:$0xf] }
  0x60   : > { %1047 = vmatpush.bf16.msrb.mxu1 %v7025_v1  ;;  %v9132_v1 = vld [vmem:[#allocation8 + $0x274] sm:$0xf0]  ;;  %v9130_v7 = vld [vmem:[#allocation8 + $0x26c] sm:$0xf]  ;;  %v7062_v8 = vld [vmem:[#allocation8 + $0x278] sm:$0xf0] }
  0x61   : > { %1060 = vmatpush.bf16.msrb.mxu2 %v6773_v2  ;;  %1073 = vmatpush.bf16.msrb.mxu3 %v6901_v6  ;;  %v9066_v2 = vld [vmem:[#allocation8 + $0x6c] sm:$0xf]  ;;  %v6934_v6 = vld [vmem:[#allocation8 + $0x178] sm:$0xf0]  ;;  %v7061_v9 = vor.u32 %v9132_v1, %v7060_v0  ;;  %v7065_v16 = vor.u32 %v9130_v7, %v7062_v8  ;;  %v9401_v51 = vld [vmem:[#allocation10 + $0x7dc] sm:$0xf0] }
  0x62   : > { %v6809_v10 = vor.u32 %v9066_v2, %v6806_v4  ;;  %v6937_v11 = vor.u32 %v9098_v5, %v6934_v6  ;;  %v9062_v15 = vld [vmem:[#allocation8 + $0x4c] sm:$0xf]  ;;  %v6790_v17 = vld [vmem:[#allocation8 + $0x58] sm:$0xf0]  ;;  %v7836_v58 = vld [vmem:[#allocation10 + $0x580] sm:$0xf] }
  0x63   : > { %1035 = vmatpush.bf16.msrb.mxu0 %v6881_v14  ;;  %v9128_v14 = vld [vmem:[#allocation8 + $0x254] sm:$0xf0]  ;;  %v9126_v20 = vld [vmem:[#allocation8 + $0x24c] sm:$0xf]  ;;  %v7046_v21 = vld [vmem:[#allocation8 + $0x258] sm:$0xf0] }
  0x64   : > { %1048 = vmatpush.bf16.msrb.mxu1 %v7009_v18  ;;  %v9094_v18 = vld [vmem:[#allocation8 + $0x14c] sm:$0xf]  ;;  %v7049_v29 = vor.u32 %v9126_v20, %v7046_v21  ;;  %v6902_v32 = vld [vmem:[#allocation8 + $0x138] sm:$0xf0]  ;;  %v9329_v59 = vld [vmem:[#allocation10 + $0x59c] sm:$0xf0] }
  0x65   : > { %1061 = vmatpush.bf16.msrb.mxu2 %v6757_v19  ;;  %1074 = vmatpush.bf16.msrb.mxu3 %v6885_v22  ;;  %v6918_v19 = vld [vmem:[#allocation8 + $0x158] sm:$0xf0]  ;;  %v7045_v22 = vor.u32 %v9128_v14, %v7044_v13  ;;  %v9058_v28 = vld [vmem:[#allocation8 + $0x2c] sm:$0xf]  ;;  %v8092_v60 = vld [vmem:[#allocation10 + $0x780] sm:$0xf] }
  0x66   : > { %1036 = vmatmul.bf16.vlgmr.msrb.gmra.mxu0 %v10136_v25  ;;  %v9090_v31 = vld [vmem:[#allocation8 + $0x12c] sm:$0xf]  ;;  %v7030_v34 = vld [vmem:[#allocation8 + $0x238] sm:$0xf0]  ;;  %v7804_v0 = vld [vmem:[#allocation10 + $0x540] sm:$0xf] }
  0x67   : > { %1080 = vmatpush.bf16.msra.mxu0 %v7125_v23  ;;  %1049 = vmatmul.bf16.vlgmr.msrb.gmra.mxu1 %v10133_v12  ;;  %v6793_v23 = vor.u32 %v9062_v15, %v6790_v17  ;;  %v9122_v33 = vld [vmem:[#allocation8 + $0x22c] sm:$0xf]  ;;  %v6758_v41 = vld [vmem:[#allocation8 + $0x18] sm:$0xf0]  ;;  %v9321_v1 = vld [vmem:[#allocation10 + $0x55c] sm:$0xf0] }
  0x68   : > { %1093 = vmatpush.bf16.msra.mxu1 %v6873_v24  ;;  %1062 = vmatmul.bf16.vlgmr.msrb.gmra.mxu2 %v10122_v52  ;;  %v6921_v24 = vor.u32 %v9094_v18, %v6918_v19  ;;  %v9054_v40 = vld [vmem:[#allocation8 + $0xc] sm:$0xf]  ;;  %v6886_v44 = vld [vmem:[#allocation8 + $0x118] sm:$0xf0]  ;;  %v8060_v2 = vld [vmem:[#allocation10 + $0x740] sm:$0xf] }
  0x69   : > { %1106 = vmatpush.bf16.msra.mxu2 %v7001_v26  ;;  %1119 = vmatpush.bf16.msra.mxu3 %v7129_v30  ;;  %v7028_v26 = vld [vmem:[#allocation8 + $0x228] sm:$0xf]  ;;  %v6774_v30 = vld [vmem:[#allocation8 + $0x38] sm:$0xf0]  ;;  %v9086_v43 = vld [vmem:[#allocation8 + $0x10c] sm:$0xf]  ;;  %v6761_v53 = vor.u32 %v9054_v40, %v6758_v41 }
  0x6a   : > { %1075 = vmatmul.bf16.vlgmr.msrb.gmra.mxu3 %v10136_v25  ;;  %v7029_v35 = vor.u32 %v9124_v27, %v7028_v26  ;;  %v9118_v45 = vld [vmem:[#allocation8 + $0x20c] sm:$0xf]  ;;  %v7014_v46 = vld [vmem:[#allocation8 + $0x218] sm:$0xf0]  ;;  %v6889_v54 = vor.u32 %v9086_v43, %v6886_v44  ;;  %v9385_v4 = vld [vmem:[#allocation10 + $0x75c] sm:$0xf0] }
  0x6b   : > { %1081 = vmatpush.bf16.msra.mxu0 %v7109_v36  ;;  %v7012_v36 = vld [vmem:[#allocation8 + $0x208] sm:$0xf]  ;;  %v10161_v5 = vor.u32 %v9385_v4, %v8060_v2  ;;  %v8028_v6 = vld [vmem:[#allocation10 + $0x700] sm:$0xf]  ;;  %v9205_v41 = vld [vmem:[#allocation10 + $0x1c4] sm:$0xf] }
  0x6c   : > { %1094 = vmatpush.bf16.msra.mxu1 %v6857_v37  ;;  %v6777_v37 = vor.u32 %v9058_v28, %v6774_v30  ;;  %v9377_v7 = vld [vmem:[#allocation10 + $0x71c] sm:$0xf0]  ;;  %v7358_v43 = vld [vmem:[#allocation10 + $0x1e0] sm:$0xf0]  ;;  %vm1147_vm4 = vsmask.f32 256 }
  0x6d   : > { %1107 = vmatpush.bf16.msra.mxu2 %v6985_v38  ;;  %1120 = vmatpush.bf16.msra.mxu3 %v7113_v42  ;;  %v6905_v38 = vor.u32 %v9090_v31, %v6902_v32  ;;  %v7033_v42 = vor.u32 %v9122_v33, %v7030_v34  ;;  %v7740_v8 = vld [vmem:[#allocation10 + $0x4c0] sm:$0xf]  ;;  %v9269_v44 = vld [vmem:[#allocation10 + $0x3c4] sm:$0xf]  ;;  %vm1150_vm6 = vsmask.f32 4352  ;;  %vm10320_vm7 = vmand %vm1146_vm3, %vm1147_vm4 }
  0x6e   : > { %v9369_v13 = vld [vmem:[#allocation10 + $0x6dc] sm:$0xf0]  ;;  %vm10326_vm8 = vmand %vm1149_vm5, %vm1150_vm6  ;;  %vm1157_vm11 = vsmask.f32 2304  ;;  %vm1160_vm14 = vsmask.f32 6400 }
  0x6f   : > { %1082 = vmatpush.bf16.msra.mxu0 %v7093_v48  ;;  %v9337_v48 = vld [vmem:[#allocation10 + $0x5dc] sm:$0xf0]  ;;  %vm1152_vm9 = vmor %vm10326_vm8, %vm10320_vm7  ;;  %vm1183_vm5 = vsmask.f32 7938  ;;  %vm13134_vm6 = vcmask 1045508  }
  0x70   : > { %1095 = vmatpush.bf16.msra.mxu1 %v6841_v49  ;;  %v7013_v49 = vor.u32 %v9120_v39, %v7012_v36  ;;  %v10143_v56 = vor.u32 %v9337_v48, %v7868_v47  ;;  %v9297_v17 = vld [vmem:[#allocation10 + $0x49c] sm:$0xf0]  ;;  %vm10337_vm13 = vmand %vm1156_vm10, %vm1157_vm11  ;;  %vm4970_vm11 = vcmask 1043458  }
  0x71   : > { %1108 = vmatpush.bf16.msra.mxu2 %v6969_v50  ;;  %1121 = vmatpush.bf16.msra.mxu3 %v7097_v55  ;;  %v8124_v50 = vld [vmem:[#allocation10 + $0x7c0] sm:$0xf]  ;;  %v7017_v55 = vor.u32 %v9118_v45, %v7014_v46  ;;  %v7614_v45 = vld [vmem:[#allocation10 + $0x3e0] sm:$0xf0]  ;;  %v10202_v46 = vor.u32 %v9205_v41, %v7358_v43  ;;  %vm10341_vm15 = vmand %vm1159_vm12, %vm1160_vm14 }
  0x72   : > { %v10145_v57 = vor.u32 %v9401_v51, %v8124_v50  ;;  %v7964_v19 = vld [vmem:[#allocation10 + $0x680] sm:$0xf]  ;;  %v10204_v47 = vor.u32 %v9269_v44, %v7614_v45  ;;  %v9245_v44 = vld [vmem:[#allocation10 + $0x304] sm:$0xf] }
  0x73   : > { %1083 = vmatpush.bf16.msra.mxu0 %v7077_v61  ;;  %v9393_v61 = vld [vmem:[#allocation10 + $0x79c] sm:$0xf0]  ;;  %v7518_v45 = vld [vmem:[#allocation10 + $0x320] sm:$0xf0] }
  0x74   : > { %1096 = vmatpush.bf16.msra.mxu1 %v6825_v62  ;;  %v10148_v62 = vor.u32 %v9329_v59, %v7836_v58  ;;  %v9361_v20 = vld [vmem:[#allocation10 + $0x69c] sm:$0xf0]  ;;  %v9197_v59 = vld [vmem:[#allocation10 + $0x184] sm:$0xf] }
  0x75   : > { %1109 = vmatpush.bf16.msra.mxu2 %v6953_v63  ;;  %1122 = vmatpush.bf16.msra.mxu3 %v7081_v3  ;;  %v10152_v63 = vor.u32 %v9393_v61, %v8092_v60  ;;  %v10159_v3 = vor.u32 %v9321_v1, %v7804_v0  ;;  %v10179_v21 = vor.u32 %v9361_v20, %v7964_v19  ;;  %v9353_v27 = vld [vmem:[#allocation10 + $0x65c] sm:$0xf0]  ;;  %v7326_v61 = vld [vmem:[#allocation10 + $0x1a0] sm:$0xf0] }
  0x76   : > { %v7644_v30 = vld [vmem:[#allocation10 + $0x400] sm:$0xf]  ;;  %v9261_v0 = vld [vmem:[#allocation10 + $0x384] sm:$0xf] }
  0x77   : > { %1084 = vmatpush.bf16.msra.mxu0 %v7061_v9  ;;  %v9305_v9 = vld [vmem:[#allocation10 + $0x4dc] sm:$0xf0]  ;;  %v7582_v1 = vld [vmem:[#allocation10 + $0x3a0] sm:$0xf0] }
  0x78   : > { %1097 = vmatpush.bf16.msra.mxu1 %v6809_v10  ;;  %v10167_v10 = vor.u32 %v9377_v7, %v8028_v6  ;;  %v10170_v14 = vor.u32 %v9305_v9, %v7740_v8  ;;  %v9281_v31 = vld [vmem:[#allocation10 + $0x41c] sm:$0xf0]  ;;  %v9253_v20 = vld [vmem:[#allocation10 + $0x344] sm:$0xf] }
  0x79   : > { %1110 = vmatpush.bf16.msra.mxu2 %v6937_v11  ;;  %1123 = vmatpush.bf16.msra.mxu3 %v7065_v16  ;;  %v7996_v11 = vld [vmem:[#allocation10 + $0x6c0] sm:$0xf]  ;;  %v10191_v33 = vor.u32 %v9281_v31, %v7644_v30 }
  0x7a   : > { %v10173_v15 = vor.u32 %v9369_v13, %v7996_v11  ;;  %v7708_v16 = vld [vmem:[#allocation10 + $0x480] sm:$0xf]  ;;  %v9189_v13 = vld [vmem:[#allocation10 + $0x144] sm:$0xf] }
  0x7b   : > { %1085 = vmatpush.bf16.msra.mxu0 %v7045_v22  ;;  %v10177_v18 = vor.u32 %v9297_v17, %v7708_v16  ;;  %v7676_v22 = vld [vmem:[#allocation10 + $0x440] sm:$0xf]  ;;  %v7294_v16 = vld [vmem:[#allocation10 + $0x160] sm:$0xf0] }
  0x7c   : > { %1098 = vmatpush.bf16.msra.mxu1 %v6793_v23  ;;  %v9289_v23 = vld [vmem:[#allocation10 + $0x45c] sm:$0xf0]  ;;  %v10233_v19 = vor.u32 %v9189_v13, %v7294_v16 }
  0x7d   : > { %1111 = vmatpush.bf16.msra.mxu2 %v6921_v24  ;;  %1124 = vmatpush.bf16.msra.mxu3 %v7049_v29  ;;  %v7932_v24 = vld [vmem:[#allocation10 + $0x640] sm:$0xf]  ;;  %v10183_v26 = vor.u32 %v9289_v23, %v7676_v22  ;;  %v7550_v23 = vld [vmem:[#allocation10 + $0x360] sm:$0xf0] }
  0x7e   : > { %v10187_v29 = vor.u32 %v9353_v27, %v7932_v24  ;;  %v7900_v32 = vld [vmem:[#allocation10 + $0x600] sm:$0xf]  ;;  %13248 = vst [vmem:[#allocation22_spill] sm:$0xff] %v10233_v19  ;;  %v10238_v27 = vor.u32 %v9253_v20, %v7550_v23 }
  0x7f   : > { %1086 = vmatpush.bf16.msra.mxu0 %v7029_v35  ;;  %v9345_v34 = vld [vmem:[#allocation10 + $0x61c] sm:$0xf0] }
  0x80   : > { %1099 = vmatpush.bf16.msra.mxu1 %v6777_v37  ;;  %v7356_v35 = vld [vmem:[#allocation10 + $0x1c0] sm:$0xf]  ;;  %v10193_v37 = vor.u32 %v9345_v34, %v7900_v32  ;;  %13249 = vst [vmem:[#allocation23_spill] sm:$0xff] %v10238_v27 }
  0x81   : > { %1112 = vmatpush.bf16.msra.mxu2 %v6905_v38  ;;  %1125 = vmatpush.bf16.msra.mxu3 %v7033_v42  ;;  %v9209_v36 = vld [vmem:[#allocation10 + $0x1dc] sm:$0xf0] }
  0x82   : > { %v10195_v38 = vor.u32 %v9209_v36, %v7356_v35  ;;  %v7612_v39 = vld [vmem:[#allocation10 + $0x3c0] sm:$0xf] }
  0x83   : > { %1087 = vmatpush.bf16.msra.mxu0 %v7013_v49  ;;  %v9273_v40 = vld [vmem:[#allocation10 + $0x3dc] sm:$0xf0] }
  0x84   : > { %1100 = vmatpush.bf16.msra.mxu1 %v6761_v53  ;;  %v10198_v42 = vor.u32 %v9273_v40, %v7612_v39  ;;  %v7324_v49 = vld [vmem:[#allocation10 + $0x180] sm:$0xf]  ;;  %v9181_v39 = vld [vmem:[#allocation10 + $0x104] sm:$0xf] }
  0x85   : > { %1113 = vmatpush.bf16.msra.mxu2 %v6889_v54  ;;  %1126 = vmatpush.bf16.msra.mxu3 %v7017_v55  ;;  %v9201_v50 = vld [vmem:[#allocation10 + $0x19c] sm:$0xf0]  ;;  %v7262_v40 = vld [vmem:[#allocation10 + $0x120] sm:$0xf0] }
  0x86   : > { %1088 = vmatmul.bf16.vlgmr.msra.gmra.mxu0 %v10133_v12  ;;  %v7580_v51 = vld [vmem:[#allocation10 + $0x380] sm:$0xf]  ;;  %v10213_v55 = vor.u32 %v9201_v50, %v7324_v49  ;;  %v10246_v43 = vor.u32 %v9181_v39, %v7262_v40  ;;  %v9229_v39 = vld [vmem:[#allocation10 + $0x284] sm:$0xf] }
  0x87   : > { %1101 = vmatmul.bf16.vlgmr.msra.gmra.mxu1 %v10122_v52  ;;  %v7772_v52 = vld [vmem:[#allocation10 + $0x500] sm:$0xf]  ;;  %3551 = vmatpush.bf16.msrb.mxu0 %v10195_v38  ;;  %v7454_v40 = vld [vmem:[#allocation10 + $0x2a0] sm:$0xf0] }
  0x88   : > { %1114 = vmatmul.bf16.vlgmr.msra.gmra.mxu2 %v10136_v25  ;;  %1127 = vmatmul.bf16.vlgmr.msra.gmra.mxu3 %v10133_v12  ;;  %v9313_v25 = vld [vmem:[#allocation10 + $0x51c] sm:$0xf0]  ;;  %13252 = vst [vmem:[#allocation26_spill] sm:$0xff] %v10246_v43 }
  0x89   : > { %3577 = vmatpush.bf16.msrb.mxu2 %v10143_v56  ;;  %3590 = vmatpush.bf16.msrb.mxu3 %v10145_v57  ;;  %v10165_v12 = vor.u32 %v9313_v25, %v7772_v52  ;;  %v9265_v58 = vld [vmem:[#allocation10 + $0x39c] sm:$0xf0]  ;;  %v10222_v52 = vor.u32 %v9197_v59, %v7326_v61  ;;  %v10224_v25 = vor.u32 %v9261_v0, %v7582_v1  ;;  %v9173_v1 = vld [vmem:[#allocation10 + $0xc4] sm:$0xf] }
  0x8a   : > { %3564 = vmatpush.bf16.msrb.mxu1 %v10198_v42  ;;  %v10215_v60 = vor.u32 %v9265_v58, %v7580_v51  ;;  %v10217_v2 = vld [vmem:[#allocation13] sm:$0xf]  ;;  %v10250_v51 = vor.u32 %v9245_v44, %v7518_v45  ;;  %v10277_v45 = vor.u32 %v9229_v39, %v7454_v40 }
  0x8b   : > { %3552 = vmatpush.bf16.msrb.mxu0 %v10213_v55  ;;  %v7292_v6 = vld [vmem:[#allocation10 + $0x140] sm:$0xf]  ;;  %v488_v22 = vperm.slane %v10217_v2, 0  ;;  %v489_v16 = vperm.slane %v10217_v2, 1 }
  0x8c   : > { %v9193_v7 = vld [vmem:[#allocation10 + $0x15c] sm:$0xf0]  ;;  %13253 = vst [vmem:[#allocation27_spill] sm:$0xff] %v10250_v51 }
  0x8d   : > { %3578 = vmatpush.bf16.msrb.mxu2 %v10148_v62  ;;  %3591 = vmatpush.bf16.msrb.mxu3 %v10152_v63  ;;  %v7548_v8 = vld [vmem:[#allocation10 + $0x340] sm:$0xf]  ;;  %v10229_v9 = vor.u32 %v9193_v7, %v7292_v6  ;;  %v7230_v6 = vld [vmem:[#allocation10 + $0xe0] sm:$0xf0]  ;;  %13261 = vst [vmem:[#allocation35_spill] sm:$0xff] %v10277_v45 }
  0x8e   : > { %3565 = vmatpush.bf16.msrb.mxu1 %v10215_v60  ;;  %v9257_v11 = vld [vmem:[#allocation10 + $0x35c] sm:$0xf0]  ;;  %v10259_v7 = vor.u32 %v9173_v1, %v7230_v6  ;;  %v9157_v1 = vld [vmem:[#allocation10 + $0x44] sm:$0xf] }
  0x8f   : > { %v10231_v17 = vor.u32 %v9257_v11, %v7548_v8  ;;  %3553 = vmatpush.bf16.msrb.mxu0 %v10229_v9  ;;  %v7260_v30 = vld [vmem:[#allocation10 + $0x100] sm:$0xf]  ;;  %v9237_v8 = vld [vmem:[#allocation10 + $0x2c4] sm:$0xf] }
  0x90   : > { %v9185_v31 = vld [vmem:[#allocation10 + $0x11c] sm:$0xf0]  ;;  %13256 = vst [vmem:[#allocation30_spill] sm:$0xff] %v10259_v7  ;;  %v7486_v11 = vld [vmem:[#allocation10 + $0x2e0] sm:$0xf0] }
  0x91   : > { %3579 = vmatpush.bf16.msrb.mxu2 %v10159_v3  ;;  %3592 = vmatpush.bf16.msrb.mxu3 %v10161_v5  ;;  %v7516_v32 = vld [vmem:[#allocation10 + $0x300] sm:$0xf]  ;;  %v10241_v35 = vor.u32 %v9185_v31, %v7260_v30  ;;  %v10264_v20 = vor.u32 %v9237_v8, %v7486_v11  ;;  %v7166_v6 = vld [vmem:[#allocation10 + $0x60] sm:$0xf0] }
  0x92   : > { %3566 = vmatpush.bf16.msrb.mxu1 %v10231_v17  ;;  %v9249_v36 = vld [vmem:[#allocation10 + $0x31c] sm:$0xf0]  ;;  %v10287_v8 = vor.u32 %v9157_v1, %v7166_v6  ;;  %v9221_v11 = vld [vmem:[#allocation10 + $0x244] sm:$0xf] }
  0x93   : > { %13250 = vst [vmem:[#allocation24_spill] sm:$0xff] %v10241_v35  ;;  %v10244_v41 = vor.u32 %v9249_v36, %v7516_v32  ;;  %3554 = vmatpush.bf16.msrb.mxu0 %v10241_v35  ;;  %v9177_v58 = vld [vmem:[#allocation10 + $0xdc] sm:$0xf0]  ;;  %v9165_v32 = vld [vmem:[#allocation10 + $0x84] sm:$0xf] }
  0x94   : > { %v7484_v59 = vld [vmem:[#allocation10 + $0x2c0] sm:$0xf]  ;;  %13257 = vst [vmem:[#allocation31_spill] sm:$0xff] %v10264_v20  ;;  %v7390_v1 = vld [vmem:[#allocation10 + $0x220] sm:$0xf0] }
  0x95   : > { %3580 = vmatpush.bf16.msrb.mxu2 %v10165_v12  ;;  %3593 = vmatpush.bf16.msrb.mxu3 %v10167_v10  ;;  %13251 = vst [vmem:[#allocation25_spill] sm:$0xff] %v10244_v41  ;;  %v9241_v0 = vld [vmem:[#allocation10 + $0x2dc] sm:$0xf0]  ;;  %v8110_v35 = vld [vmem:[#allocation10 + $0x7b0] sm:$0xf0] }
  0x96   : > { %3567 = vmatpush.bf16.msrb.mxu1 %v10244_v41  ;;  %v9169_v23 = vld [vmem:[#allocation10 + $0x9c] sm:$0xf0]  ;;  %13264 = vst [vmem:[#allocation38_spill] sm:$0xff] %v10287_v8  ;;  %v9199_v41 = vld [vmem:[#allocation10 + $0x194] sm:$0xf] }
  0x97   : > { %v9233_v31 = vld [vmem:[#allocation10 + $0x29c] sm:$0xf0] }
  0x98   : > { %v9217_v40 = vld [vmem:[#allocation10 + $0x21c] sm:$0xf0] }
  0x99   : > { %3581 = vmatpush.bf16.msrb.mxu2 %v10170_v14  ;;  %3594 = vmatpush.bf16.msrb.mxu3 %v10173_v15 }
  0x9d   : > { %3582 = vmatpush.bf16.msrb.mxu2 %v10177_v18  ;;  %3595 = vmatpush.bf16.msrb.mxu3 %v10179_v21 }
  0xa1   : > { %3583 = vmatpush.bf16.msrb.mxu2 %v10183_v26  ;;  %3596 = vmatpush.bf16.msrb.mxu3 %v10187_v29 }
  0xa5   : > { %3584 = vmatpush.bf16.msrb.mxu2 %v10191_v33  ;;  %3597 = vmatpush.bf16.msrb.mxu3 %v10193_v37 }
  0xa9   : > { %3629 = vmatpush.bf16.msra.mxu2 %v10202_v46  ;;  %3642 = vmatpush.bf16.msra.mxu3 %v10204_v47 }
  0xad   : > { %3630 = vmatpush.bf16.msra.mxu2 %v10222_v52  ;;  %3643 = vmatpush.bf16.msra.mxu3 %v10224_v25 }
  0xb1   : > { %3631 = vmatpush.bf16.msra.mxu2 %v10233_v19  ;;  %3644 = vmatpush.bf16.msra.mxu3 %v10238_v27  ;;  %v7860_v27 = vld [vmem:[#allocation10 + $0x598] sm:$0xf]  ;;  %v9456_v19 = vld [vmem:[#allocation10 + $0x99c] sm:$0xf] }
  0xb5   : > { %3632 = vmatpush.bf16.msra.mxu2 %v10246_v43  ;;  %3645 = vmatpush.bf16.msra.mxu3 %v10250_v51  ;;  %v9198_v51 = vld [vmem:[#allocation10 + $0x18c] sm:$0xf]  ;;  %v9267_v43 = vld [vmem:[#allocation10 + $0x3ac] sm:$0xf0] }
  0xb9   : > { %3633 = vmatpush.bf16.msra.mxu2 %v10259_v7  ;;  %3646 = vmatpush.bf16.msra.mxu3 %v10264_v20  ;;  %v7998_v7 = vld [vmem:[#allocation10 + $0x6e0] sm:$0xf0] }
  0xbd   : > { %3647 = vmatpush.bf16.msra.mxu3 %v10277_v45  ;;  %v9509_v45 = vld [vmem:[#allocation10 + $0xb44] sm:$0xf] }
  0xc3   : > { %v10185_v28 = vpop.f32.mrf.mxu0 }
  0xc4   : > { %v986_v49 = vadd.f32 %v10185_v28, %v488_v22  ;;  %v10257_v28 = vor.u32 %v9241_v0, %v7484_v59  ;;  %v7196_v22 = vld [vmem:[#allocation10 + $0x80] sm:$0xf] }
  0xc5   : > { %v10268_v30 = vor.u32 %v9169_v23, %v7196_v22  ;;  %v9225_v0 = vld [vmem:[#allocation10 + $0x25c] sm:$0xf0] }
  0xc6   : > { %13255 = vst [vmem:[#allocation29_spill] sm:$0xff] %v10257_v28  ;;  %3568 = vmatpush.bf16.msrb.mxu1 %v10257_v28  ;;  %v9306_v28 = vld [vmem:[#allocation10 + $0x4e4] sm:$0xf0] }
  0xc7   : > { %13258 = vst [vmem:[#allocation32_spill] sm:$0xff] %v10268_v30 }
  0xc8   : > { %v10209_v53 = vpop.f32.mrf.mxu1 }
  0xc9   : > { %v999_v13 = vadd.f32 %v10209_v53, %v986_v49 }
  0xcb   : > { %v10206_v48 = vpop.f32.mrf.mxu3  ;;  %v987_v54 = vpop.f32.mrf.mxu0 }
  0xcc   : > { %v7228_v54 = vld [vmem:[#allocation10 + $0xc0] sm:$0xf]  ;;  %v1025_v49 = vadd.f32 %v10206_v48, %v489_v16  ;;  %v7422_v48 = vld [vmem:[#allocation10 + $0x260] sm:$0xf0] }
  0xcd   : > { %v10219_v4 = vpop.f32.mrf.mxu2  ;;  %v10254_v61 = vor.u32 %v9177_v58, %v7228_v54  ;;  %v9161_v54 = vld [vmem:[#allocation10 + $0x5c] sm:$0xf0]  ;;  %v10290_v22 = vor.u32 %v9221_v11, %v7422_v48 }
  0xce   : > { %v1012_v44 = vadd.f32 %v10219_v4, %v999_v13  ;;  %v7420_v58 = vld [vmem:[#allocation10 + $0x240] sm:$0xf] }
  0xcf   : > { %13254 = vst [vmem:[#allocation28_spill] sm:$0xff] %v10254_v61  ;;  %3555 = vmatpush.bf16.msrb.mxu0 %v10254_v61  ;;  %v10285_v4 = vor.u32 %v9225_v0, %v7420_v58  ;;  %3648 = vmatpush.bf16.msra.mxu3 %v10290_v22  ;;  %v7134_v0 = vld [vmem:[#allocation10 + $0x20] sm:$0xf0]  ;;  %v8380_v48 = vld [vmem:[#allocation10 + $0x9c0] sm:$0xf] }
  0xd0   : > { %v1000_v34 = vpop.f32.mrf.mxu1  ;;  %v1136_v13 = vmul.f32 0.01, %v1012_v44  ;;  %13265 = vst [vmem:[#allocation39_spill] sm:$0xff] %v10290_v22  ;;  %vm1132_vm0 = vcmp.ge.f32.partialorder %v1012_v44, 0.0  ;;  %v9461_v22 = vld [vmem:[#allocation10 + $0x9c4] sm:$0xf] }
  0xd1   : > { %v7198_v34 = vld [vmem:[#allocation10 + $0xa0] sm:$0xf0]  ;;  %13263 = vst [vmem:[#allocation37_spill] sm:$0xff] %v10285_v4  ;;  %v9266_v61 = vld [vmem:[#allocation10 + $0x3a4] sm:$0xf0] }
  0xd2   : > { %v10273_v36 = vor.u32 %v9165_v32, %v7198_v34  ;;  %v9153_v32 = vld [vmem:[#allocation10 + $0x1c] sm:$0xf0] }
  0xd3   : > { %v1026_v24 = vpop.f32.mrf.mxu3  ;;  %3556 = vmatpush.bf16.msrb.mxu0 %v10268_v30  ;;  %v7388_v34 = vld [vmem:[#allocation10 + $0x200] sm:$0xf]  ;;  %v8542_v30 = vld [vmem:[#allocation10 + $0xb20] sm:$0xf0] }
  0xd4   : > { %v7452_v24 = vld [vmem:[#allocation10 + $0x280] sm:$0xf]  ;;  %13260 = vst [vmem:[#allocation34_spill] sm:$0xff] %v10273_v36  ;;  %3634 = vmatpush.bf16.msra.mxu2 %v10273_v36  ;;  %v10297_v58 = vor.u32 %v9217_v40, %v7388_v34  ;;  %v8574_v36 = vld [vmem:[#allocation10 + $0xb60] sm:$0xf0] }
  0xd5   : > { %v1013_v50 = vpop.f32.mrf.mxu2  ;;  %v10271_v53 = vor.u32 %v9233_v31, %v7452_v24  ;;  %v7132_v31 = vld [vmem:[#allocation10] sm:$0xf] }
  0xd6   : > { %v7164_v50 = vld [vmem:[#allocation10 + $0x40] sm:$0xf]  ;;  %v10294_v39 = vor.u32 %v9153_v32, %v7132_v31  ;;  %13267 = vst [vmem:[#allocation41_spill] sm:$0xff] %v10297_v58  ;;  %v1140_v32 = vsel %vm1132_vm0, %v1012_v44, %v1136_v13  ;;  %vm1162_vm0 = vmor %vm10341_vm15, %vm10337_vm13 }
  0xd7   : > { %13259 = vst [vmem:[#allocation33_spill] sm:$0xff] %v10271_v53  ;;  %3569 = vmatpush.bf16.msrb.mxu1 %v10271_v53  ;;  %v10282_v59 = vor.u32 %v9161_v54, %v7164_v50  ;;  %v9149_v50 = vld [vmem:[#allocation10 + $0x4] sm:$0xf]  ;;  %v8636_v31 = vld [vmem:[#allocation10 + $0xbc0] sm:$0xf] }
  0xd8   : > { %3635 = vmatpush.bf16.msra.mxu2 %v10287_v8  ;;  %13266 = vst [vmem:[#allocation40_spill] sm:$0xff] %v10294_v39  ;;  %v10300_v6 = vor.u32 %v9149_v50, %v7134_v0  ;;  %v9529_v34 = vld [vmem:[#allocation10 + $0xbdc] sm:$0xf0]  ;;  %v9501_v53 = vld [vmem:[#allocation10 + $0xb04] sm:$0xf] }
  0xd9   : > { %13262 = vst [vmem:[#allocation36_spill] sm:$0xff] %v10282_v59  ;;  %3557 = vmatpush.bf16.msrb.mxu0 %v10282_v59  ;;  %v10309_v40 = vor.u32 %v9529_v34, %v8636_v31  ;;  %v9457_v44 = vld [vmem:[#allocation10 + $0x99c] sm:$0xf0] }
  0xda   : > { %13268 = vst [vmem:[#allocation42_spill] sm:$0xff] %v10300_v6  ;;  %v8604_v31 = vld [vmem:[#allocation10 + $0xb80] sm:$0xf] }
  0xdb   : > { %3570 = vmatpush.bf16.msrb.mxu1 %v10285_v4  ;;  %13271 = vst [vmem:[#allocation45_spill] sm:$0xff] %v10309_v40  ;;  %v9521_v34 = vld [vmem:[#allocation10 + $0xb9c] sm:$0xf0] }
  0xdc   : > { %3636 = vmatpush.bf16.msra.mxu2 %v10300_v6  ;;  %v9433_v8 = vld [vmem:[#allocation10 + $0x8dc] sm:$0xf0] }
  0xdd   : > { %3558 = vmatpush.bf16.msrb.mxu0 %v10294_v39 }
  0xdf   : > { %3571 = vmatpush.bf16.msrb.mxu1 %v10297_v58 }
  0xe3   : > { %v1037_v16 = vpop.f32.mrf.mxu0  ;;  %3616 = vmatpush.bf16.msra.mxu1 %v10309_v40 }
  0xe4   : > { %v1038_v23 = vadd.f32 %v1037_v16, %v1025_v49  ;;  %v1050_v24 = vpop.f32.mrf.mxu1  ;;  %v9213_v49 = vld [vmem:[#allocation10 + $0x204] sm:$0xf]  ;;  %v9465_v16 = vld [vmem:[#allocation10 + $0x9dc] sm:$0xf0] }
  0xe5   : > { %v10302_v11 = vor.u32 %v9213_v49, %v7390_v1  ;;  %v8348_v49 = vld [vmem:[#allocation10 + $0x980] sm:$0xf] }
  0xe6   : > { %v1051_v54 = vadd.f32 %v1050_v24, %v1038_v23  ;;  %v10306_v24 = vor.u32 %v9465_v16, %v8380_v48  ;;  %v10318_v16 = vor.u32 %v9457_v44, %v8348_v49  ;;  %v1153_v49 = vld [vmem:[#allocation2] sm:$0x11] }
  0xe7   : > { %13269 = vst [vmem:[#allocation43_spill] sm:$0xff] %v10302_v11  ;;  %3649 = vmatpush.bf16.msra.mxu3 %v10302_v11 }
  0xe8   : > { %vm1133_vm1 = vcmp.ge.f32.partialorder %v1051_v54, 0.0  ;;  %v1137_v23 = vmul.f32 0.01, %v1051_v54  ;;  %13270 = vst [vmem:[#allocation44_spill] sm:$0xff] %v10306_v24  ;;  %3603 = vmatpush.bf16.msra.mxu0 %v10306_v24  ;;  %v9505_v24 = vld [vmem:[#allocation10 + $0xb1c] sm:$0xf0] }
  0xe9   : > { %13272 = vst [vmem:[#allocation46_spill] sm:$0xff] %v10318_v16 }
  0xea   : > { %v1141_v50 = vsel %vm1133_vm1, %v1051_v54, %v1137_v23  ;;  %vm4901_vm1 = vmor %vm10337_vm13, %vm10320_vm7  ;;  %vm1186_vm7 = vsmask.f32 7954  ;;  %vm5007_vm13 = vsmask.f32 7962 }
  0xeb   : > { %v10311_v0 = vpop.f32.mrf.mxu2  ;;  %v1144_v13 = vpack.c.bf16 %v1141_v50, %v1140_v32  ;;  %v1039_v48 = vpop.f32.mrf.mxu0  ;;  %v10324_v32 = vor.u32 %v9521_v34, %v8604_v31  ;;  %v1154_v31 = vsel %vm1152_vm9, 0, %v1153_v49  ;;  %v8572_v49 = vld [vmem:[#allocation10 + $0xb40] sm:$0xf]  ;;  %vm4902_vm3 = vmor %vm10326_vm8, %vm4901_vm1  ;;  %vm5003_vm8 = vsmask.f32 7946 }
  0xec   : > { %v1052_v54 = vpop.f32.mrf.mxu1  ;;  %3604 = vmatpush.bf16.msra.mxu0 %v10318_v16  ;;  %v1163_v48 = vld [vmem:[#allocation2] sm:$0x44]  ;;  %1155 = vst [vmem:[#allocation2] sm:$0x11] %v1154_v31  ;;  %v8284_v31 = vld [vmem:[#allocation10 + $0x900] sm:$0xf]  ;;  %vm4903_vm4 = vmor %vm10341_vm15, %vm4902_vm3 }
  0xed   : > { %v10315_v1 = vpop.f32.mrf.mxu3  ;;  %v1167_v23 = vrot.slane %v1144_v13, 2  ;;  %13275 = vst [vmem:[#allocation47_spill] sm:$0xff] %v10324_v32  ;;  %3617 = vmatpush.bf16.msra.mxu1 %v10324_v32  ;;  %v8316_v54 = vld [vmem:[#allocation10 + $0x940] sm:$0xf]  ;;  %v1164_v11 = vsel %vm1162_vm0, 0, %v1163_v48  ;;  %vm10386_vm9 = vmand %vm1168_vm2, %vm1183_vm5  ;;  %vm13133_vm15 = vcmask 1047558  }
  0xee   : > { %v9513_v32 = vld [vmem:[#allocation10 + $0xb5c] sm:$0xf0]  ;;  %1165 = vst [vmem:[#allocation2] sm:$0x44] %v1164_v11  ;;  %v9525_v11 = vld [vmem:[#allocation10 + $0xbc4] sm:$0xf]  ;;  %vm10392_vm10 = vmand %vm13134_vm6, %vm1186_vm7 }
  0xef   : > { %v1171_v44 = vsel %vm1168_vm2, %v1144_v13, %v1167_v23  ;;  %v9449_v23 = vld [vmem:[#allocation10 + $0x95c] sm:$0xf0]  ;;  %v10351_v6 = vor.u32 %v9513_v32, %v8572_v49  ;;  %v8382_v32 = vld [vmem:[#allocation10 + $0x9e0] sm:$0xf0]  ;;  %vm5004_vm12 = vmand %vm4970_vm11, %vm5003_vm8 }
  0xf0   : > { %1173 = vst [vmem:[#allocation3] sm:$0xf] %v1171_v44  ;;  %v10349_v44 = vor.u32 %v9449_v23, %v8316_v54  ;;  %v8638_v48 = vld [vmem:[#allocation10 + $0xbe0] sm:$0xf0]  ;;  %v490_v54 = vperm.slane %v10217_v2, 2  ;;  %v491_v23 = vperm.slane %v10217_v2, 3  ;;  %vm5005_vm14 = vmor %vm5004_vm12, %vm10386_vm9 }
  0xf1   : > { %13283 = vst [vmem:[#allocation49_spill] sm:$0xff] %v10351_v6  ;;  %3618 = vmatpush.bf16.msra.mxu1 %v10351_v6  ;;  %v9453_v49 = vld [vmem:[#allocation10 + $0x984] sm:$0xf]  ;;  %v10372_v2 = vor.u32 %v9525_v11, %v8638_v48  ;;  %v8252_v13 = vld [vmem:[#allocation10 + $0x8c0] sm:$0xf]  ;;  %vm10413_vm0 = vmor %vm10392_vm10, %vm5005_vm14 }
  0xf2   : > { %13282 = vst [vmem:[#allocation48_spill] sm:$0xff] %v10349_v44  ;;  %3605 = vmatpush.bf16.msra.mxu0 %v10349_v44  ;;  %v10370_v44 = vor.u32 %v9461_v22, %v8382_v32  ;;  %v10379_v59 = vor.u32 %v9433_v8, %v8252_v13  ;;  %v8508_v32 = vld [vmem:[#allocation10 + $0xac0] sm:$0xf]  ;;  %v8318_v13 = vld [vmem:[#allocation10 + $0x960] sm:$0xf0]  ;;  %vm10418_vm1 = vmand %vm13133_vm15, %vm5007_vm13  ;;  %vm13132_vm13 = vcmask 1043456  }
  0xf3   : > { %v1065_v16 = vpop.f32.mrf.mxu2  ;;  %13287 = vst [vmem:[#allocation53_spill] sm:$0xff] %v10372_v2  ;;  %v9497_v11 = vld [vmem:[#allocation10 + $0xadc] sm:$0xf0]  ;;  %vm1188_vm7 = vmor %vm10392_vm10, %vm10386_vm9  ;;  %vm4919_vm15 = vsmask.f32 7966 }
  0xf4   : > { %v9441_v16 = vld [vmem:[#allocation10 + $0x91c] sm:$0xf0]  ;;  %13286 = vst [vmem:[#allocation52_spill] sm:$0xff] %v10370_v44 }
  0xf5   : > { %v1078_v40 = vpop.f32.mrf.mxu3  ;;  %v10355_v39 = vor.u32 %v9441_v16, %v8284_v31  ;;  %v8350_v31 = vld [vmem:[#allocation10 + $0x9a0] sm:$0xf0]  ;;  %13288 = vst [vmem:[#allocation54_spill] sm:$0xff] %v10379_v59 }
  0xf6   : > { %v4904_v40 = vld [vmem:[#allocation4] sm:$0x55]  ;;  %v9517_v16 = vld [vmem:[#allocation10 + $0xb84] sm:$0xf] }
  0xf7   : > { %v1193_v58 = vld [vmem:[#allocation3] sm:$0xf]  ;;  %13284 = vst [vmem:[#allocation50_spill] sm:$0xff] %v10355_v39  ;;  %3606 = vmatpush.bf16.msra.mxu0 %v10355_v39  ;;  %v4905_v34 = vsel %vm4903_vm4, 0, %v4904_v40  ;;  %v8606_v39 = vld [vmem:[#allocation10 + $0xba0] sm:$0xf0] }
  0xf8   : > { %1203 = vst [vmem:[#allocation1] ss:$4 sm:$0xff] %v1193_v58  ;;  %v8540_v58 = vld [vmem:[#allocation10 + $0xb00] sm:$0xf]  ;;  %v4203_v6 = vld [vmem:[#allocation3] sm:$0xf] }
  0xf9   : > { %v10368_v50 = vor.u32 %v9505_v24, %v8540_v58  ;;  %4906 = vst [vmem:[#allocation4] sm:$0x55] %v4905_v34  ;;  %v1064_v58 = vadd.f32 %v10311_v0, %v490_v54  ;;  %v10398_v0 = vor.u32 %v9453_v49, %v8350_v31  ;;  %v10400_v54 = vor.u32 %v9517_v16, %v8606_v39  ;;  %v9445_v34 = vld [vmem:[#allocation10 + $0x944] sm:$0xf]  ;;  %v8220_v49 = vld [vmem:[#allocation10 + $0x880] sm:$0xf] }
  0xfa   : > { %v13296_v16 = vmov 0 }
  0xfb   : > { %13285 = vst [vmem:[#allocation51_spill] sm:$0xff] %v10368_v50  ;;  %3619 = vmatpush.bf16.msra.mxu1 %v10368_v50  ;;  %v10402_v50 = vor.u32 %v9497_v11, %v8508_v32  ;;  %3607 = vmatpush.bf16.msra.mxu0 %v10379_v59  ;;  %v1077_v39 = vadd.f32 %v10315_v1, %v1064_v58  ;;  %v13297_v16 = vsel %vm10413_vm0, 4294967295, %v13296_v16  ;;  %v9437_v32 = vld [vmem:[#allocation10 + $0x904] sm:$0xf]  ;;  %v9425_v11 = vld [vmem:[#allocation10 + $0x89c] sm:$0xf0] }
  0xfc   : > { %13293 = vst [vmem:[#allocation55_spill] sm:$0xff] %v10398_v0  ;;  %v13299_v59 = vmov 0  ;;  %v10424_v1 = vor.u32 %v9445_v34, %v8318_v13  ;;  %v8286_v58 = vld [vmem:[#allocation10 + $0x920] sm:$0xf0] }
  0xfd   : > { %13294 = vst [vmem:[#allocation56_spill] sm:$0xff] %v10400_v54  ;;  %v13300_v59 = vsel %vm10418_vm1, 4294967295, %v13299_v59 }
  0xfe   : > { %13295 = vst [vmem:[#allocation57_spill] sm:$0xff] %v10402_v50 }
  0xff   : > { %v10375_v4 = vld.sshfl [vmem:[#allocation1] sm:$0xff pattern:$0x73625140]  ;;  %v10377_v40 = vld.sshfl [vmem:[#allocation1 + $0x8] sm:$0xff pattern:$0x73625140]  ;;  %3620 = vmatpush.bf16.msra.mxu1 %v10402_v50 }
 0x100   : > { %4206 = vst [vmem:[#allocation1] ss:$4 sm:$0xff] %v4203_v6  ;;  %3585 = vmatmul.bf16.vlgmr.msrb.gmra.mxu2 %v10375_v4  ;;  %3598 = vmatmul.bf16.vlgmr.msrb.gmra.mxu3 %v10377_v40  ;;  %v9489_v50 = vld [vmem:[#allocation10 + $0xa9c] sm:$0xf0] }
 0x101   : > { %3681 = vmatpush.bf16.msrb.mxu2 %v10370_v44  ;;  %3694 = vmatpush.bf16.msrb.mxu3 %v10372_v2  ;;  %13298 = vst [vmem:[#allocation58_spill] sm:$0xff] %v13297_v16  ;;  %v8476_v2 = vld [vmem:[#allocation10 + $0xa80] sm:$0xf] }
 0x102   : > { %13301 = vst [vmem:[#allocation59_spill] sm:$0xff] %v13300_v59  ;;  %v10434_v20 = vor.u32 %v9489_v50, %v8476_v2  ;;  %v10444_v50 = vor.u32 %v9437_v32, %v8286_v58  ;;  %v10446_v2 = vor.u32 %v9501_v53, %v8542_v30  ;;  %v9417_v59 = vld [vmem:[#allocation10 + $0x85c] sm:$0xf0]  ;;  %v9421_v58 = vld [vmem:[#allocation10 + $0x884] sm:$0xf] }
 0x103   : > { %v1089_v24 = vpop.f32.mrf.mxu0  ;;  %13302 = vst [vmem:[#allocation60_spill] sm:$0xff] %v10424_v1  ;;  %v8412_v53 = vld [vmem:[#allocation10 + $0xa00] sm:$0xf] }
 0x104   : > { %v1102_v48 = vpop.f32.mrf.mxu1  ;;  %v1090_v44 = vadd.f32 %v1089_v24, %v1077_v39  ;;  %13305 = vst [vmem:[#allocation63_spill] sm:$0xff] %v10434_v20  ;;  %v8254_v39 = vld [vmem:[#allocation10 + $0x8e0] sm:$0xf0]  ;;  %3621 = vmatpush.bf16.msra.mxu1 %v10434_v20 }
 0x105   : > { %v1103_v31 = vadd.f32 %v1102_v48, %v491_v23  ;;  %3682 = vmatpush.bf16.msrb.mxu2 %v10398_v0  ;;  %3695 = vmatpush.bf16.msrb.mxu3 %v10400_v54  ;;  %v10426_v23 = vor.u32 %v9509_v45, %v8574_v36  ;;  %v10428_v48 = vor.u32 %v9425_v11, %v8220_v49  ;;  %v9429_v49 = vld [vmem:[#allocation10 + $0x8c4] sm:$0xf]  ;;  %v8188_v11 = vld [vmem:[#allocation10 + $0x840] sm:$0xf] }
 0x106   : > { %13308 = vst [vmem:[#allocation66_spill] sm:$0xff] %v10444_v50  ;;  %v8510_v54 = vld [vmem:[#allocation10 + $0xae0] sm:$0xf0]  ;;  %vm1134_vm4 = vcmp.ge.f32.partialorder %v1090_v44, 0.0 }
 0x107   : > { %13303 = vst [vmem:[#allocation61_spill] sm:$0xff] %v10426_v23  ;;  %v10436_v0 = vld.sshfl [vmem:[#allocation1] sm:$0xff pattern:$0x73625140]  ;;  %3608 = vmatpush.bf16.msra.mxu0 %v10428_v48 }
 0x108   : > { %13304 = vst [vmem:[#allocation62_spill] sm:$0xff] %v10428_v48  ;;  %v10438_v34 = vld.sshfl [vmem:[#allocation1 + $0x8] sm:$0xff pattern:$0x73625140]  ;;  %v8444_v48 = vld [vmem:[#allocation10 + $0xa40] sm:$0xf] }
 0x109   : > { %13306 = vst [vmem:[#allocation64_spill] sm:$0xff] %v10436_v0  ;;  %3683 = vmatpush.bf16.msrb.mxu2 %v10424_v1  ;;  %3696 = vmatpush.bf16.msrb.mxu3 %v10426_v23  ;;  %v9409_v1 = vld [vmem:[#allocation10 + $0x81c] sm:$0xf0] }
 0x10a   : > { %13307 = vst [vmem:[#allocation65_spill] sm:$0xff] %v10438_v34  ;;  %v10448_v34 = vor.u32 %v9417_v59, %v8188_v11  ;;  %v10458_v59 = vor.u32 %v9429_v49, %v8254_v39  ;;  %v8222_v11 = vld [vmem:[#allocation10 + $0x8a0] sm:$0xf0] }
 0x10b   : > { %v1115_v36 = vpop.f32.mrf.mxu2  ;;  %4232 = vst [vmem:[#allocation1] ss:$4 sm:$0xff] %v4203_v6  ;;  %v1128_v13 = vpop.f32.mrf.mxu3  ;;  %v9481_v6 = vld [vmem:[#allocation10 + $0xa5c] sm:$0xf0]  ;;  %v8190_v39 = vld [vmem:[#allocation10 + $0x860] sm:$0xf0] }
 0x10c   : > { %v1116_v45 = vadd.f32 %v1115_v36, %v1103_v31  ;;  %v1091_v24 = vpop.f32.mrf.mxu0  ;;  %v1104_v16 = vpop.f32.mrf.mxu1  ;;  %13309 = vst [vmem:[#allocation67_spill] sm:$0xff] %v10446_v2  ;;  %v1138_v31 = vmul.f32 0.01, %v1090_v44  ;;  %v10450_v20 = vor.u32 %v9481_v6, %v8444_v48  ;;  %3609 = vmatpush.bf16.msra.mxu0 %v10448_v34  ;;  %v9473_v48 = vld [vmem:[#allocation10 + $0xa1c] sm:$0xf0] }
 0x10d   : > { %v9493_v24 = vld [vmem:[#allocation10 + $0xac4] sm:$0xf]  ;;  %13310 = vst [vmem:[#allocation68_spill] sm:$0xff] %v10448_v34  ;;  %v8156_v16 = vld [vmem:[#allocation10 + $0x800] sm:$0xf]  ;;  %3684 = vmatpush.bf16.msrb.mxu2 %v10444_v50  ;;  %3697 = vmatpush.bf16.msrb.mxu3 %v10446_v2  ;;  %v10462_v0 = vor.u32 %v9473_v48, %v8412_v53 }
 0x10e   : > { %v1129_v36 = vadd.f32 %v1128_v13, %v1116_v45  ;;  %13311 = vst [vmem:[#allocation69_spill] sm:$0xff] %v10450_v20  ;;  %3622 = vmatpush.bf16.msra.mxu1 %v10450_v20  ;;  %v10454_v30 = vor.u32 %v9409_v1, %v8156_v16  ;;  %v10460_v32 = vor.u32 %v9493_v24, %v8510_v54  ;;  %v9485_v6 = vld [vmem:[#allocation10 + $0xa84] sm:$0xf]  ;;  %v8068_v2 = vld [vmem:[#allocation10 + $0x748] sm:$0xf] }
 0x10f   : > { %13313 = vst [vmem:[#allocation71_spill] sm:$0xff] %v10458_v59  ;;  %v1142_v45 = vsel %vm1134_vm4, %v1090_v44, %v1138_v31  ;;  %v8478_v34 = vld [vmem:[#allocation10 + $0xaa0] sm:$0xf0]  ;;  %v10468_v54 = vor.u32 %v9421_v58, %v8222_v11 }
 0x110   : > { %vm1135_vm5 = vcmp.ge.f32.partialorder %v1129_v36, 0.0  ;;  %v1139_v23 = vmul.f32 0.01, %v1129_v36  ;;  %13312 = vst [vmem:[#allocation70_spill] sm:$0xff] %v10454_v30  ;;  %3610 = vmatpush.bf16.msra.mxu0 %v10454_v30  ;;  %v10470_v44 = vor.u32 %v9485_v6, %v8478_v34  ;;  %v9477_v31 = vld [vmem:[#allocation10 + $0xa44] sm:$0xf] }
 0x111   : > { %13314 = vst [vmem:[#allocation72_spill] sm:$0xff] %v10460_v32  ;;  %3685 = vmatpush.bf16.msrb.mxu2 %v10458_v59  ;;  %3698 = vmatpush.bf16.msrb.mxu3 %v10460_v32  ;;  %v9469_v11 = vld [vmem:[#allocation10 + $0xa04] sm:$0xf]  ;;  %v7844_v32 = vld [vmem:[#allocation10 + $0x588] sm:$0xf] }
 0x112   : > { %v1143_v13 = vsel %vm1135_vm5, %v1129_v36, %v1139_v23  ;;  %13315 = vst [vmem:[#allocation73_spill] sm:$0xff] %v10462_v0  ;;  %3623 = vmatpush.bf16.msra.mxu1 %v10462_v0  ;;  %v9413_v23 = vld [vmem:[#allocation10 + $0x844] sm:$0xf]  ;;  %v9402_v0 = vld [vmem:[#allocation10 + $0x7e4] sm:$0xf0] }
 0x113   : > { %v1145_v1 = vpack.c.bf16 %v1143_v13, %v1142_v45  ;;  %v1117_v16 = vpop.f32.mrf.mxu2  ;;  %v1130_v20 = vpop.f32.mrf.mxu3  ;;  %13316 = vst [vmem:[#allocation74_spill] sm:$0xff] %v10468_v54  ;;  %v8446_v36 = vld [vmem:[#allocation10 + $0xa60] sm:$0xf0]  ;;  %v10478_v58 = vor.u32 %v9413_v23, %v8190_v39  ;;  %v7812_v59 = vld [vmem:[#allocation10 + $0x548] sm:$0xf] }
 0x114   : > { %13317 = vst [vmem:[#allocation75_spill] sm:$0xff] %v10470_v44  ;;  %v1189_v20 = vld [vmem:[#allocation2] sm:$0x33]  ;;  %v10480_v34 = vor.u32 %v9477_v31, %v8446_v36 }
 0x115   : > { %v1175_v49 = vshrl.u32 %v1145_v1, 16  ;;  %v1178_v53 = vshll.u32 %v1145_v1, 16  ;;  %3686 = vmatpush.bf16.msrb.mxu2 %v10468_v54  ;;  %3699 = vmatpush.bf16.msrb.mxu3 %v10470_v44  ;;  %13318 = vst [vmem:[#allocation76_spill] sm:$0xff] %v10478_v58  ;;  %v9405_v45 = vld [vmem:[#allocation10 + $0x804] sm:$0xf] }
 0x116   : > { %13319 = vst [vmem:[#allocation77_spill] sm:$0xff] %v10480_v34  ;;  %v8158_v13 = vld [vmem:[#allocation10 + $0x820] sm:$0xf0]  ;;  %v7876_v36 = vld [vmem:[#allocation10 + $0x5c8] sm:$0xf] }
 0x117   : > { %v1177_v24 = vrot.slane %v1175_v49, 7  ;;  %v8414_v6 = vld [vmem:[#allocation10 + $0xa20] sm:$0xf0]  ;;  %v10484_v22 = vor.u32 %v9405_v45, %v8158_v13 }
 0x118   : > { %v10486_v8 = vor.u32 %v9469_v11, %v8414_v6  ;;  %v9333_v16 = vld [vmem:[#allocation10 + $0x5c4] sm:$0xf] }
 0x119   : > { %v1180_v48 = vor.u32 %v1178_v53, %v1177_v24  ;;  %3687 = vmatpush.bf16.msrb.mxu2 %v10478_v58  ;;  %3700 = vmatpush.bf16.msrb.mxu3 %v10480_v34  ;;  %13320 = vst [vmem:[#allocation78_spill] sm:$0xff] %v10484_v22  ;;  %v7870_v49 = vld [vmem:[#allocation10 + $0x5e0] sm:$0xf0] }
 0x11a   : > { %13321 = vst [vmem:[#allocation79_spill] sm:$0xff] %v10486_v8  ;;  %v9397_v23 = vld [vmem:[#allocation10 + $0x7c4] sm:$0xf]  ;;  %v10490_v45 = vor.u32 %v9333_v16, %v7870_v49  ;;  %v9330_v16 = vld [vmem:[#allocation10 + $0x5a4] sm:$0xf0] }
 0x11b   : > { %v1190_v1 = vsel %vm1188_vm7, %v1180_v48, %v1189_v20  ;;  %v8126_v39 = vld [vmem:[#allocation10 + $0x7e0] sm:$0xf0]  ;;  %v9338_v48 = vld [vmem:[#allocation10 + $0x5e4] sm:$0xf0] }
 0x11c   : > { %1191 = vst [vmem:[#allocation2] sm:$0x33] %v1190_v1  ;;  %v8132_v1 = vld [vmem:[#allocation10 + $0x7c8] sm:$0xf]  ;;  %v10492_v13 = vor.u32 %v9397_v23, %v8126_v39  ;;  %v10498_v58 = vor.u32 %v9338_v48, %v7876_v36  ;;  %v8094_v54 = vld [vmem:[#allocation10 + $0x7a0] sm:$0xf0]  ;;  %v10514_v48 = vor.u32 %v9330_v16, %v7844_v32 }
 0x11d   : > { %3688 = vmatpush.bf16.msrb.mxu2 %v10484_v22  ;;  %3701 = vmatpush.bf16.msrb.mxu3 %v10486_v8  ;;  %13322 = vst [vmem:[#allocation80_spill] sm:$0xff] %v10490_v45  ;;  %v9325_v8 = vld [vmem:[#allocation10 + $0x584] sm:$0xf]  ;;  %v10500_v44 = vor.u32 %v9402_v0, %v8132_v1  ;;  %v8100_v49 = vld [vmem:[#allocation10 + $0x788] sm:$0xf] }
 0x11e   : > { %13323 = vst [vmem:[#allocation81_spill] sm:$0xff] %v10492_v13  ;;  %v7838_v22 = vld [vmem:[#allocation10 + $0x5a0] sm:$0xf0]  ;;  %v9394_v23 = vld [vmem:[#allocation10 + $0x7a4] sm:$0xf0] }
 0x11f   : > { %13324 = vst [vmem:[#allocation82_spill] sm:$0xff] %v10498_v58  ;;  %v10506_v39 = vor.u32 %v9325_v8, %v7838_v22  ;;  %v9317_v36 = vld [vmem:[#allocation10 + $0x544] sm:$0xf]  ;;  %v10516_v1 = vor.u32 %v9394_v23, %v8100_v49 }
 0x120   : > { %13325 = vst [vmem:[#allocation83_spill] sm:$0xff] %v10500_v44  ;;  %v9381_v22 = vld [vmem:[#allocation10 + $0x744] sm:$0xf] }
 0x121   : > { %13326 = vst [vmem:[#allocation84_spill] sm:$0xff] %v10506_v39  ;;  %v8062_v8 = vld [vmem:[#allocation10 + $0x760] sm:$0xf0] }
 0x122   : > { %13328 = vst [vmem:[#allocation86_spill] sm:$0xff] %v10514_v48 }
 0x123   : > { %v1192_v31 = vld [vmem:[#allocation2] sm:$0x33]  ;;  %13329 = vst [vmem:[#allocation87_spill] sm:$0xff] %v10516_v1 }
 0x124   : > { %v1194_v24 = vld [vmem:[#allocation2] sm:$0x77]  ;;  %v1196_v53 = vunpack.c.l.b16 %v1192_v31  ;;  %v1197_v20 = vunpack.c.h.b16 %v1192_v31 }
 0x125   : > { %v1209_v30 = vunpack.c.l.b16 %v1194_v24  ;;  %v1210_v34 = vunpack.c.h.b16 %v1194_v24  ;;  %v9389_v31 = vld [vmem:[#allocation10 + $0x784] sm:$0xf] }
 0x126   : > { %v10494_v11 = vpack.c.b16 %v1196_v53, %v1196_v53  ;;  %v10496_v6 = vpack.c.b16 %v1197_v20, %v1197_v20  ;;  %v10510_v0 = vor.u32 %v9389_v31, %v8094_v54  ;;  %v7806_v24 = vld [vmem:[#allocation10 + $0x560] sm:$0xf0]  ;;  %v10522_v54 = vor.u32 %v9381_v22, %v8062_v8 }
 0x127   : > { %v1211_v53 = vpack.c.b16 %v1209_v30, %v1209_v30  ;;  %v1212_v20 = vpack.c.b16 %v1210_v34, %v1210_v34  ;;  %v10520_v30 = vor.u32 %v9317_v36, %v7806_v24  ;;  %v9309_v34 = vld [vmem:[#allocation10 + $0x504] sm:$0xf]  ;;  %v8036_v36 = vld [vmem:[#allocation10 + $0x708] sm:$0xf] }
 0x128   : > { %3559 = vmatmul.bf16.vlgmr.msrb.gmra.mxu0 %v10494_v11  ;;  %3572 = vmatmul.bf16.vlgmr.msrb.gmra.mxu1 %v10496_v6  ;;  %13327 = vst [vmem:[#allocation85_spill] sm:$0xff] %v10510_v0  ;;  %v7774_v31 = vld [vmem:[#allocation10 + $0x520] sm:$0xf0]  ;;  %v9378_v24 = vld [vmem:[#allocation10 + $0x724] sm:$0xf0] }
 0x129   : > { %3637 = vmatmul.bf16.vlgmr.msra.gmra.mxu2 %v10494_v11  ;;  %3650 = vmatmul.bf16.vlgmr.msra.gmra.mxu3 %v10496_v6  ;;  %13330 = vst [vmem:[#allocation88_spill] sm:$0xff] %v10520_v30  ;;  %v1216_v32 = vshll.u32 %v1211_v53, 16  ;;  %v1223_v16 = vshll.u32 %v1212_v20, 16  ;;  %v9301_v22 = vld [vmem:[#allocation10 + $0x4c4] sm:$0xf]  ;;  %v10532_v8 = vor.u32 %v9309_v34, %v7774_v31  ;;  %v10540_v50 = vor.u32 %v9378_v24, %v8036_v36 }
 0x12a   : > { %3655 = vmatpush.bf16.msrb.mxu0 %v10490_v45  ;;  %3668 = vmatpush.bf16.msrb.mxu1 %v10492_v13  ;;  %v9322_v45 = vld [vmem:[#allocation10 + $0x564] sm:$0xf0]  ;;  %13331 = vst [vmem:[#allocation89_spill] sm:$0xff] %v10522_v54  ;;  %v1221_v34 = vshrl.u32 %v1212_v20, 16  ;;  %v7710_v36 = vld [vmem:[#allocation10 + $0x4a0] sm:$0xf0] }
 0x12b   : > { %3733 = vmatpush.bf16.msra.mxu2 %v10498_v58  ;;  %3746 = vmatpush.bf16.msra.mxu3 %v10500_v44  ;;  %v9386_v13 = vld [vmem:[#allocation10 + $0x764] sm:$0xf0]  ;;  %v10526_v49 = vor.u32 %v9322_v45, %v7812_v59  ;;  %v9373_v44 = vld [vmem:[#allocation10 + $0x704] sm:$0xf]  ;;  %13334 = vst [vmem:[#allocation92_spill] sm:$0xff] %v10532_v8  ;;  %v1225_v59 = vrot.slane %v1223_v16, 1 }
 0x12c   : > { %v10528_v23 = vor.u32 %v9386_v13, %v8068_v2  ;;  %v7780_v58 = vld [vmem:[#allocation10 + $0x508] sm:$0xf]  ;;  %v7742_v45 = vld [vmem:[#allocation10 + $0x4e0] sm:$0xf0]  ;;  %13337 = vst [vmem:[#allocation95_spill] sm:$0xff] %v10540_v50 }
 0x12d   : > { %13332 = vst [vmem:[#allocation90_spill] sm:$0xff] %v10526_v49  ;;  %v9365_v2 = vld [vmem:[#allocation10 + $0x6c4] sm:$0xf]  ;;  %v8004_v31 = vld [vmem:[#allocation10 + $0x6c8] sm:$0xf]  ;;  %v10548_v16 = vor.u32 %v1225_v59, %v1221_v34 }
 0x12e   : > { %3656 = vmatpush.bf16.msrb.mxu0 %v10506_v39  ;;  %3669 = vmatpush.bf16.msrb.mxu1 %v10510_v0  ;;  %13333 = vst [vmem:[#allocation91_spill] sm:$0xff] %v10528_v23  ;;  %v8030_v39 = vld [vmem:[#allocation10 + $0x720] sm:$0xf0]  ;;  %v9314_v0 = vld [vmem:[#allocation10 + $0x524] sm:$0xf0] }
 0x12f   : > { %3734 = vmatpush.bf16.msra.mxu2 %v10514_v48  ;;  %3747 = vmatpush.bf16.msra.mxu3 %v10516_v1  ;;  %v10534_v48 = vor.u32 %v9373_v44, %v8030_v39  ;;  %v1218_v1 = vrot.slane %v1216_v32, 1  ;;  %v10538_v13 = vor.u32 %v9314_v0, %v7780_v58  ;;  %v9370_v44 = vld [vmem:[#allocation10 + $0x6e4] sm:$0xf0]  ;;  %v10542_v39 = vor.u32 %v9301_v22, %v7742_v45  ;;  %v9293_v0 = vld [vmem:[#allocation10 + $0x484] sm:$0xf] }
 0x130   : > { %v10550_v58 = vor.u32 %v9365_v2, %v7998_v7  ;;  %v10556_v20 = vor.u32 %v9370_v44, %v8004_v31  ;;  %v9357_v24 = vld [vmem:[#allocation10 + $0x684] sm:$0xf]  ;;  %v7716_v45 = vld [vmem:[#allocation10 + $0x488] sm:$0xf] }
 0x131   : > { %13335 = vst [vmem:[#allocation93_spill] sm:$0xff] %v10534_v48  ;;  %v7966_v22 = vld [vmem:[#allocation10 + $0x6a0] sm:$0xf0]  ;;  %v7972_v7 = vld [vmem:[#allocation10 + $0x688] sm:$0xf] }
 0x132   : > { %3657 = vmatpush.bf16.msrb.mxu0 %v10520_v30  ;;  %3670 = vmatpush.bf16.msrb.mxu1 %v10522_v54  ;;  %13336 = vst [vmem:[#allocation94_spill] sm:$0xff] %v10538_v13  ;;  %v7748_v30 = vld [vmem:[#allocation10 + $0x4c8] sm:$0xf]  ;;  %v1214_v54 = vshrl.u32 %v1211_v53, 16  ;;  %v9285_v59 = vld [vmem:[#allocation10 + $0x444] sm:$0xf] }
 0x133   : > { %3735 = vmatpush.bf16.msra.mxu2 %v10526_v49  ;;  %3748 = vmatpush.bf16.msra.mxu3 %v10528_v23  ;;  %13338 = vst [vmem:[#allocation96_spill] sm:$0xff] %v10542_v39  ;;  %v10554_v53 = vor.u32 %v9306_v28, %v7748_v30  ;;  %v10564_v28 = vor.u32 %v9293_v0, %v7710_v36  ;;  %v7678_v2 = vld [vmem:[#allocation10 + $0x460] sm:$0xf0] }
 0x134   : > { %v10546_v32 = vor.u32 %v1218_v1, %v1214_v54  ;;  %13339 = vst [vmem:[#allocation97_spill] sm:$0xff] %v10550_v58  ;;  %v9298_v1 = vld [vmem:[#allocation10 + $0x4a4] sm:$0xf0]  ;;  %v10566_v30 = vor.u32 %v9357_v24, %v7966_v22  ;;  %v9349_v44 = vld [vmem:[#allocation10 + $0x644] sm:$0xf]  ;;  %v10576_v36 = vor.u32 %v9285_v59, %v7678_v2 }
 0x135   : > { %13340 = vst [vmem:[#allocation98_spill] sm:$0xff] %v10554_v53  ;;  %v9362_v54 = vld [vmem:[#allocation10 + $0x6a4] sm:$0xf0]  ;;  %v10570_v34 = vor.u32 %v9298_v1, %v7716_v45  ;;  %v9277_v0 = vld [vmem:[#allocation10 + $0x404] sm:$0xf] }
 0x136   : > { %3658 = vmatpush.bf16.msrb.mxu0 %v10532_v8  ;;  %3671 = vmatpush.bf16.msrb.mxu1 %v10534_v48  ;;  %13341 = vst [vmem:[#allocation99_spill] sm:$0xff] %v10556_v20  ;;  %v10572_v31 = vor.u32 %v9362_v54, %v7972_v7  ;;  %v7940_v48 = vld [vmem:[#allocation10 + $0x648] sm:$0xf]  ;;  %v7646_v22 = vld [vmem:[#allocation10 + $0x420] sm:$0xf0] }
 0x137   : > { %3736 = vmatpush.bf16.msra.mxu2 %v10538_v13  ;;  %3749 = vmatpush.bf16.msra.mxu3 %v10540_v50  ;;  %13342 = vst [vmem:[#allocation100_spill] sm:$0xff] %v10564_v28  ;;  %v7934_v50 = vld [vmem:[#allocation10 + $0x660] sm:$0xf0]  ;;  %v7684_v13 = vld [vmem:[#allocation10 + $0x448] sm:$0xf] }
 0x138   : > { %3611 = vmatmul.bf16.vlgmr.msra.gmra.mxu0 %v10546_v32  ;;  %3624 = vmatmul.bf16.vlgmr.msra.gmra.mxu1 %v10548_v16  ;;  %13343 = vst [vmem:[#allocation101_spill] sm:$0xff] %v10566_v30  ;;  %v10578_v24 = vor.u32 %v9349_v44, %v7934_v50  ;;  %v9341_v45 = vld [vmem:[#allocation10 + $0x604] sm:$0xf]  ;;  %v9346_v8 = vld [vmem:[#allocation10 + $0x624] sm:$0xf0] }
 0x139   : > { %3689 = vmatmul.bf16.vlgmr.msrb.gmra.mxu2 %v10546_v32  ;;  %3702 = vmatmul.bf16.vlgmr.msrb.gmra.mxu3 %v10548_v16  ;;  %13344 = vst [vmem:[#allocation102_spill] sm:$0xff] %v10570_v34  ;;  %v7902_v1 = vld [vmem:[#allocation10 + $0x620] sm:$0xf0]  ;;  %v9210_v59 = vld [vmem:[#allocation10 + $0x1e4] sm:$0xf0] }
 0x13a   : > { %3659 = vmatpush.bf16.msrb.mxu0 %v10542_v39  ;;  %3672 = vmatpush.bf16.msrb.mxu1 %v10550_v58  ;;  %13345 = vst [vmem:[#allocation103_spill] sm:$0xff] %v10572_v31  ;;  %v9290_v39 = vld [vmem:[#allocation10 + $0x464] sm:$0xf0]  ;;  %v9206_v44 = vld [vmem:[#allocation10 + $0x1cc] sm:$0xf] }
 0x13b   : > { %3737 = vmatpush.bf16.msra.mxu2 %v10554_v53  ;;  %3750 = vmatpush.bf16.msra.mxu3 %v10556_v20  ;;  %v9354_v58 = vld [vmem:[#allocation10 + $0x664] sm:$0xf0]  ;;  %13346 = vst [vmem:[#allocation104_spill] sm:$0xff] %v10576_v36  ;;  %v10582_v7 = vor.u32 %v9290_v39, %v7684_v13  ;;  %v7366_v13 = vld [vmem:[#allocation10 + $0x1e8] sm:$0xf0] }
 0x13c   : > { %13347 = vst [vmem:[#allocation105_spill] sm:$0xff] %v10578_v24  ;;  %v10584_v54 = vor.u32 %v9354_v58, %v7940_v48  ;;  %v7652_v20 = vld [vmem:[#allocation10 + $0x408] sm:$0xf]  ;;  %v9270_v48 = vld [vmem:[#allocation10 + $0x3cc] sm:$0xf] }
 0x13d   : > { %13348 = vst [vmem:[#allocation106_spill] sm:$0xff] %v10582_v7  ;;  %v9282_v53 = vld [vmem:[#allocation10 + $0x424] sm:$0xf0]  ;;  %v7622_v39 = vld [vmem:[#allocation10 + $0x3e8] sm:$0xf0] }
 0x13e   : > { %3660 = vmatpush.bf16.msrb.mxu0 %v10564_v28  ;;  %3673 = vmatpush.bf16.msrb.mxu1 %v10566_v30  ;;  %13349 = vst [vmem:[#allocation107_spill] sm:$0xff] %v10584_v54  ;;  %v7908_v28 = vld [vmem:[#allocation10 + $0x608] sm:$0xf]  ;;  %v10594_v58 = vor.u32 %v9282_v53, %v7652_v20  ;;  %v7334_v53 = vld [vmem:[#allocation10 + $0x1a8] sm:$0xf0] }
 0x13f   : > { %3738 = vmatpush.bf16.msra.mxu2 %v10570_v34  ;;  %3751 = vmatpush.bf16.msra.mxu3 %v10572_v31  ;;  %v7364_v30 = vld [vmem:[#allocation10 + $0x1c8] sm:$0xf]  ;;  %v10588_v34 = vor.u32 %v9277_v0, %v7646_v22  ;;  %v10590_v31 = vor.u32 %v9341_v45, %v7902_v1  ;;  %v10596_v23 = vor.u32 %v9346_v8, %v7908_v28  ;;  %v9262_v8 = vld [vmem:[#allocation10 + $0x38c] sm:$0xf] }
 0x140   : > { %v7620_v2 = vld [vmem:[#allocation10 + $0x3c8] sm:$0xf]  ;;  %13352 = vst [vmem:[#allocation110_spill] sm:$0xff] %v10594_v58  ;;  %v10598_v49 = vor.u32 %v9210_v59, %v7364_v30  ;;  %v10602_v22 = vor.u32 %v9206_v44, %v7366_v13  ;;  %v10604_v45 = vor.u32 %v9270_v48, %v7622_v39  ;;  %v7590_v20 = vld [vmem:[#allocation10 + $0x3a8] sm:$0xf0] }
 0x141   : > { %v9274_v50 = vld [vmem:[#allocation10 + $0x3e4] sm:$0xf0]  ;;  %13350 = vst [vmem:[#allocation108_spill] sm:$0xff] %v10588_v34  ;;  %v10620_v44 = vor.u32 %v9262_v8, %v7590_v20  ;;  %v9190_v39 = vld [vmem:[#allocation10 + $0x14c] sm:$0xf] }
 0x142   : > { %3661 = vmatpush.bf16.msrb.mxu0 %v10576_v36  ;;  %3674 = vmatpush.bf16.msrb.mxu1 %v10578_v24  ;;  %13351 = vst [vmem:[#allocation109_spill] sm:$0xff] %v10590_v31  ;;  %v10600_v36 = vor.u32 %v9274_v50, %v7620_v2  ;;  %v7332_v24 = vld [vmem:[#allocation10 + $0x188] sm:$0xf]  ;;  %v10618_v50 = vor.u32 %v9198_v51, %v7334_v53 }
 0x143   : > { %3739 = vmatpush.bf16.msra.mxu2 %v10582_v7  ;;  %3752 = vmatpush.bf16.msra.mxu3 %v10584_v54  ;;  %13353 = vst [vmem:[#allocation111_spill] sm:$0xff] %v10596_v23  ;;  %v9202_v0 = vld [vmem:[#allocation10 + $0x1a4] sm:$0xf0]  ;;  %v9454_v7 = vld [vmem:[#allocation10 + $0x98c] sm:$0xf] }
 0x144   : > { %13354 = vst [vmem:[#allocation112_spill] sm:$0xff] %v10598_v49  ;;  %v7588_v1 = vld [vmem:[#allocation10 + $0x388] sm:$0xf]  ;;  %v10612_v28 = vor.u32 %v9202_v0, %v7332_v24  ;;  %v7302_v24 = vld [vmem:[#allocation10 + $0x168] sm:$0xf0] }
 0x145   : > { %13355 = vst [vmem:[#allocation113_spill] sm:$0xff] %v10600_v36  ;;  %v10614_v30 = vor.u32 %v9266_v61, %v7588_v1  ;;  %v7300_v59 = vld [vmem:[#allocation10 + $0x148] sm:$0xf]  ;;  %v9254_v61 = vld [vmem:[#allocation10 + $0x34c] sm:$0xf]  ;;  %v10634_v20 = vor.u32 %v9190_v39, %v7302_v24 }
 0x146   : > { %13356 = vst [vmem:[#allocation114_spill] sm:$0xff] %v10602_v22  ;;  %3662 = vmatpush.bf16.msrb.mxu0 %v10588_v34  ;;  %3675 = vmatpush.bf16.msrb.mxu1 %v10590_v31  ;;  %v9194_v2 = vld [vmem:[#allocation10 + $0x164] sm:$0xf0]  ;;  %v7558_v0 = vld [vmem:[#allocation10 + $0x368] sm:$0xf0] }
 0x147   : > { %13357 = vst [vmem:[#allocation115_spill] sm:$0xff] %v10604_v45  ;;  %3740 = vmatpush.bf16.msra.mxu2 %v10594_v58  ;;  %3753 = vmatpush.bf16.msra.mxu3 %v10596_v23  ;;  %v7556_v13 = vld [vmem:[#allocation10 + $0x348] sm:$0xf]  ;;  %v10628_v51 = vor.u32 %v9194_v2, %v7300_v59  ;;  %v9246_v23 = vld [vmem:[#allocation10 + $0x30c] sm:$0xf] }
 0x148   : > { %13358 = vst [vmem:[#allocation116_spill] sm:$0xff] %v10612_v28  ;;  %v9258_v48 = vld [vmem:[#allocation10 + $0x364] sm:$0xf0]  ;;  %v7398_v58 = vld [vmem:[#allocation10 + $0x228] sm:$0xf0] }
 0x149   : > { %13359 = vst [vmem:[#allocation117_spill] sm:$0xff] %v10614_v30  ;;  %3663 = vmatmul.bf16.vlgmr.msrb.gmra.mxu0 %v10375_v4  ;;  %3676 = vmatmul.bf16.vlgmr.msrb.gmra.mxu1 %v10377_v40  ;;  %v10630_v1 = vor.u32 %v9258_v48, %v7556_v13  ;;  %v7268_v53 = vld [vmem:[#allocation10 + $0x108] sm:$0xf] }
 0x14a   : > { %3707 = vmatpush.bf16.msra.mxu0 %v10598_v49  ;;  %3720 = vmatpush.bf16.msra.mxu1 %v10600_v36  ;;  %13360 = vst [vmem:[#allocation118_spill] sm:$0xff] %v10618_v50  ;;  %v9186_v8 = vld [vmem:[#allocation10 + $0x124] sm:$0xf0]  ;;  %v9182_v49 = vld [vmem:[#allocation10 + $0x10c] sm:$0xf] }
 0x14b   : > { %3785 = vmatpush.bf16.msrb.mxu2 %v10602_v22  ;;  %3798 = vmatpush.bf16.msrb.mxu3 %v10604_v45  ;;  %13361 = vst [vmem:[#allocation119_spill] sm:$0xff] %v10620_v44  ;;  %v10636_v45 = vor.u32 %v9254_v61, %v7558_v0  ;;  %v7524_v22 = vld [vmem:[#allocation10 + $0x308] sm:$0xf]  ;;  %v10640_v59 = vor.u32 %v9186_v8, %v7268_v53 }
 0x14c   : > { %3741 = vmatmul.bf16.vlgmr.msra.gmra.mxu2 %v10375_v4  ;;  %3754 = vmatmul.bf16.vlgmr.msra.gmra.mxu3 %v10377_v40  ;;  %13362 = vst [vmem:[#allocation120_spill] sm:$0xff] %v10628_v51  ;;  %v9250_v36 = vld [vmem:[#allocation10 + $0x324] sm:$0xf0] }
 0x14d   : > { %13363 = vst [vmem:[#allocation121_spill] sm:$0xff] %v10630_v1  ;;  %v10642_v2 = vor.u32 %v9250_v36, %v7524_v22  ;;  %v7236_v13 = vld [vmem:[#allocation10 + $0xc8] sm:$0xf] }
 0x14e   : > { %3708 = vmatpush.bf16.msra.mxu0 %v10612_v28  ;;  %3721 = vmatpush.bf16.msra.mxu1 %v10614_v30  ;;  %13364 = vst [vmem:[#allocation122_spill] sm:$0xff] %v10634_v20  ;;  %v7270_v28 = vld [vmem:[#allocation10 + $0x128] sm:$0xf0]  ;;  %v9178_v48 = vld [vmem:[#allocation10 + $0xe4] sm:$0xf0] }
 0x14f   : > { %3786 = vmatpush.bf16.msrb.mxu2 %v10618_v50  ;;  %3799 = vmatpush.bf16.msrb.mxu3 %v10620_v44  ;;  %13365 = vst [vmem:[#allocation123_spill] sm:$0xff] %v10636_v45  ;;  %v7526_v30 = vld [vmem:[#allocation10 + $0x328] sm:$0xf0]  ;;  %v10646_v39 = vor.u32 %v9182_v49, %v7270_v28  ;;  %v7492_v61 = vld [vmem:[#allocation10 + $0x2c8] sm:$0xf]  ;;  %v10652_v36 = vor.u32 %v9178_v48, %v7236_v13 }
 0x150   : > { %13366 = vst [vmem:[#allocation124_spill] sm:$0xff] %v10640_v59  ;;  %v10648_v24 = vor.u32 %v9246_v23, %v7526_v30  ;;  %v9242_v0 = vld [vmem:[#allocation10 + $0x2e4] sm:$0xf0]  ;;  %v9174_v44 = vld [vmem:[#allocation10 + $0xcc] sm:$0xf] }
 0x151   : > { %13367 = vst [vmem:[#allocation125_spill] sm:$0xff] %v10642_v2  ;;  %v9238_v50 = vld [vmem:[#allocation10 + $0x2cc] sm:$0xf]  ;;  %v10654_v22 = vor.u32 %v9242_v0, %v7492_v61  ;;  %v7204_v53 = vld [vmem:[#allocation10 + $0x88] sm:$0xf] }
 0x152   : > { %3709 = vmatpush.bf16.msra.mxu0 %v10628_v51  ;;  %3722 = vmatpush.bf16.msra.mxu1 %v10630_v1  ;;  %13368 = vst [vmem:[#allocation126_spill] sm:$0xff] %v10646_v39  ;;  %v7238_v51 = vld [vmem:[#allocation10 + $0xe8] sm:$0xf0]  ;;  %v9170_v8 = vld [vmem:[#allocation10 + $0xa4] sm:$0xf0] }
 0x153   : > { %3787 = vmatpush.bf16.msrb.mxu2 %v10634_v20  ;;  %3800 = vmatpush.bf16.msrb.mxu3 %v10636_v45  ;;  %13369 = vst [vmem:[#allocation127_spill] sm:$0xff] %v10648_v24  ;;  %v7494_v1 = vld [vmem:[#allocation10 + $0x2e8] sm:$0xf0]  ;;  %v10658_v49 = vor.u32 %v9174_v44, %v7238_v51  ;;  %v7460_v28 = vld [vmem:[#allocation10 + $0x288] sm:$0xf]  ;;  %v10664_v13 = vor.u32 %v9170_v8, %v7204_v53 }
 0x154   : > { %13370 = vst [vmem:[#allocation128_spill] sm:$0xff] %v10652_v36  ;;  %v10660_v23 = vor.u32 %v9238_v50, %v7494_v1  ;;  %v9234_v30 = vld [vmem:[#allocation10 + $0x2a4] sm:$0xf0]  ;;  %v9166_v45 = vld [vmem:[#allocation10 + $0x8c] sm:$0xf] }
 0x155   : > { %13371 = vst [vmem:[#allocation129_spill] sm:$0xff] %v10654_v22  ;;  %v9230_v20 = vld [vmem:[#allocation10 + $0x28c] sm:$0xf]  ;;  %v10666_v48 = vor.u32 %v9234_v30, %v7460_v28  ;;  %v7172_v61 = vld [vmem:[#allocation10 + $0x48] sm:$0xf] }
 0x156   : > { %3710 = vmatpush.bf16.msra.mxu0 %v10640_v59  ;;  %3723 = vmatpush.bf16.msra.mxu1 %v10642_v2  ;;  %13372 = vst [vmem:[#allocation130_spill] sm:$0xff] %v10658_v49  ;;  %v7206_v59 = vld [vmem:[#allocation10 + $0xa8] sm:$0xf0]  ;;  %v9162_v0 = vld [vmem:[#allocation10 + $0x64] sm:$0xf0] }
 0x157   : > { %3788 = vmatpush.bf16.msrb.mxu2 %v10646_v39  ;;  %3801 = vmatpush.bf16.msrb.mxu3 %v10648_v24  ;;  %13373 = vst [vmem:[#allocation131_spill] sm:$0xff] %v10660_v23  ;;  %v7462_v2 = vld [vmem:[#allocation10 + $0x2a8] sm:$0xf0]  ;;  %v10670_v50 = vor.u32 %v9166_v45, %v7206_v59  ;;  %v7428_v51 = vld [vmem:[#allocation10 + $0x248] sm:$0xf]  ;;  %v10676_v8 = vor.u32 %v9162_v0, %v7172_v61 }
 0x158   : > { %13374 = vst [vmem:[#allocation132_spill] sm:$0xff] %v10664_v13  ;;  %v10672_v44 = vor.u32 %v9230_v20, %v7462_v2  ;;  %v9226_v1 = vld [vmem:[#allocation10 + $0x264] sm:$0xf0]  ;;  %v9158_v24 = vld [vmem:[#allocation10 + $0x4c] sm:$0xf] }
 0x159   : > { %13375 = vst [vmem:[#allocation133_spill] sm:$0xff] %v10666_v48  ;;  %v9222_v39 = vld [vmem:[#allocation10 + $0x24c] sm:$0xf]  ;;  %v7140_v53 = vld [vmem:[#allocation10 + $0x8] sm:$0xf]  ;;  %v10678_v28 = vor.u32 %v9226_v1, %v7428_v51 }
 0x15a   : > { %3711 = vmatpush.bf16.msra.mxu0 %v10652_v36  ;;  %3724 = vmatpush.bf16.msra.mxu1 %v10654_v22  ;;  %13376 = vst [vmem:[#allocation134_spill] sm:$0xff] %v10670_v50  ;;  %v7174_v36 = vld [vmem:[#allocation10 + $0x68] sm:$0xf0]  ;;  %v9154_v30 = vld [vmem:[#allocation10 + $0x24] sm:$0xf0] }
 0x15b   : > { %3789 = vmatpush.bf16.msrb.mxu2 %v10658_v49  ;;  %3802 = vmatpush.bf16.msrb.mxu3 %v10660_v23  ;;  %13377 = vst [vmem:[#allocation135_spill] sm:$0xff] %v10672_v44  ;;  %v7430_v22 = vld [vmem:[#allocation10 + $0x268] sm:$0xf0]  ;;  %v7396_v45 = vld [vmem:[#allocation10 + $0x208] sm:$0xf]  ;;  %v10682_v20 = vor.u32 %v9158_v24, %v7174_v36 }
 0x15c   : > { %13378 = vst [vmem:[#allocation136_spill] sm:$0xff] %v10676_v8  ;;  %v9218_v59 = vld [vmem:[#allocation10 + $0x224] sm:$0xf0]  ;;  %v10684_v2 = vor.u32 %v9222_v39, %v7430_v22  ;;  %v9150_v23 = vld [vmem:[#allocation10 + $0xc] sm:$0xf] }
 0x15d   : > { %13379 = vst [vmem:[#allocation137_spill] sm:$0xff] %v10678_v28  ;;  %v7142_v49 = vld [vmem:[#allocation10 + $0x28] sm:$0xf0]  ;;  %v9466_v61 = vld [vmem:[#allocation10 + $0x9e4] sm:$0xf0] }
 0x15e   : > { %3712 = vmatpush.bf16.msra.mxu0 %v10664_v13  ;;  %3725 = vmatpush.bf16.msra.mxu1 %v10666_v48  ;;  %13380 = vst [vmem:[#allocation138_spill] sm:$0xff] %v10682_v20  ;;  %v9214_v13 = vld [vmem:[#allocation10 + $0x20c] sm:$0xf]  ;;  %v8388_v48 = vld [vmem:[#allocation10 + $0x9c8] sm:$0xf]  ;;  %v10694_v22 = vor.u32 %v9150_v23, %v7142_v49 }
 0x15f   : > { %3790 = vmatpush.bf16.msrb.mxu2 %v10670_v50  ;;  %3803 = vmatpush.bf16.msrb.mxu3 %v10672_v44  ;;  %13381 = vst [vmem:[#allocation139_spill] sm:$0xff] %v10684_v2  ;;  %v8644_v0 = vld [vmem:[#allocation10 + $0xbc8] sm:$0xf]  ;;  %v9462_v1 = vld [vmem:[#allocation10 + $0x9cc] sm:$0xf]  ;;  %v10688_v50 = vor.u32 %v9154_v30, %v7140_v53  ;;  %v10690_v44 = vor.u32 %v9218_v59, %v7396_v45 }
 0x160   : > { %v9530_v51 = vld [vmem:[#allocation10 + $0xbe4] sm:$0xf0]  ;;  %v8390_v24 = vld [vmem:[#allocation10 + $0x9e8] sm:$0xf0]  ;;  %13384 = vst [vmem:[#allocation142_spill] sm:$0xff] %v10694_v22  ;;  %v10696_v31 = vor.u32 %v9214_v13, %v7398_v58  ;;  %v10698_v34 = vor.u32 %v9466_v61, %v8388_v48 }
 0x161   : > { %13382 = vst [vmem:[#allocation140_spill] sm:$0xff] %v10688_v50  ;;  %v9526_v39 = vld [vmem:[#allocation10 + $0xbcc] sm:$0xf]  ;;  %v9458_v53 = vld [vmem:[#allocation10 + $0x9a4] sm:$0xf0]  ;;  %v10702_v30 = vor.u32 %v9462_v1, %v8390_v24 }
 0x162   : > { %3713 = vmatpush.bf16.msra.mxu0 %v10676_v8  ;;  %3726 = vmatpush.bf16.msra.mxu1 %v10678_v28  ;;  %13383 = vst [vmem:[#allocation141_spill] sm:$0xff] %v10690_v44  ;;  %v8646_v36 = vld [vmem:[#allocation10 + $0xbe8] sm:$0xf0]  ;;  %v10700_v8 = vor.u32 %v9530_v51, %v8644_v0  ;;  %v8356_v28 = vld [vmem:[#allocation10 + $0x988] sm:$0xf] }
 0x163   : > { %3791 = vmatpush.bf16.msrb.mxu2 %v10682_v20  ;;  %3804 = vmatpush.bf16.msrb.mxu3 %v10684_v2  ;;  %13385 = vst [vmem:[#allocation143_spill] sm:$0xff] %v10696_v31  ;;  %v10704_v45 = vor.u32 %v9526_v39, %v8646_v36  ;;  %v8612_v59 = vld [vmem:[#allocation10 + $0xb88] sm:$0xf]  ;;  %v8358_v49 = vld [vmem:[#allocation10 + $0x9a8] sm:$0xf0]  ;;  %v10712_v13 = vor.u32 %v9458_v53, %v8356_v28 }
 0x164   : > { %13386 = vst [vmem:[#allocation144_spill] sm:$0xff] %v10698_v34  ;;  %v9522_v54 = vld [vmem:[#allocation10 + $0xba4] sm:$0xf0]  ;;  %v9518_v58 = vld [vmem:[#allocation10 + $0xb8c] sm:$0xf]  ;;  %v10718_v51 = vor.u32 %v9454_v7, %v8358_v49 }
 0x165   : > { %13387 = vst [vmem:[#allocation145_spill] sm:$0xff] %v10700_v8  ;;  %v8614_v23 = vld [vmem:[#allocation10 + $0xba8] sm:$0xf0]  ;;  %v10714_v48 = vor.u32 %v9522_v54, %v8612_v59  ;;  %v8324_v61 = vld [vmem:[#allocation10 + $0x948] sm:$0xf] }
 0x166   : > { %13388 = vst [vmem:[#allocation146_spill] sm:$0xff] %v10702_v30  ;;  %3714 = vmatpush.bf16.msra.mxu0 %v10688_v50  ;;  %3727 = vmatpush.bf16.msra.mxu1 %v10690_v44  ;;  %v9450_v0 = vld [vmem:[#allocation10 + $0x964] sm:$0xf0]  ;;  %v10720_v1 = vor.u32 %v9518_v58, %v8614_v23  ;;  %v9446_v36 = vld [vmem:[#allocation10 + $0x94c] sm:$0xf] }
 0x167   : > { %13389 = vst [vmem:[#allocation147_spill] sm:$0xff] %v10704_v45  ;;  %3792 = vmatpush.bf16.msrb.mxu2 %v10694_v22  ;;  %3805 = vmatpush.bf16.msrb.mxu3 %v10696_v31  ;;  %v8580_v24 = vld [vmem:[#allocation10 + $0xb48] sm:$0xf]  ;;  %v8326_v28 = vld [vmem:[#allocation10 + $0x968] sm:$0xf0]  ;;  %v10728_v7 = vor.u32 %v9450_v0, %v8324_v61 }
 0x168   : > { %13390 = vst [vmem:[#allocation148_spill] sm:$0xff] %v10712_v13  ;;  %v9514_v39 = vld [vmem:[#allocation10 + $0xb64] sm:$0xf0]  ;;  %v9510_v54 = vld [vmem:[#allocation10 + $0xb4c] sm:$0xf]  ;;  %v10734_v23 = vor.u32 %v9446_v36, %v8326_v28 }
 0x169   : > { %13391 = vst [vmem:[#allocation149_spill] sm:$0xff] %v10714_v48  ;;  %3715 = vmatmul.bf16.vlgmr.msra.gmra.mxu0 %v10494_v11  ;;  %3728 = vmatmul.bf16.vlgmr.msra.gmra.mxu1 %v10496_v6  ;;  %v8582_v53 = vld [vmem:[#allocation10 + $0xb68] sm:$0xf0]  ;;  %v10730_v59 = vor.u32 %v9514_v39, %v8580_v24  ;;  %v8292_v49 = vld [vmem:[#allocation10 + $0x908] sm:$0xf] }
 0x16a   : > { %3759 = vmatpush.bf16.msrb.mxu0 %v10698_v34  ;;  %3772 = vmatpush.bf16.msrb.mxu1 %v10700_v8  ;;  %13392 = vst [vmem:[#allocation150_spill] sm:$0xff] %v10718_v51  ;;  %v9442_v58 = vld [vmem:[#allocation10 + $0x924] sm:$0xf0]  ;;  %v9438_v34 = vld [vmem:[#allocation10 + $0x90c] sm:$0xf] }
 0x16b   : > { %3837 = vmatpush.bf16.msra.mxu2 %v10702_v30  ;;  %3850 = vmatpush.bf16.msra.mxu3 %v10704_v45  ;;  %13393 = vst [vmem:[#allocation151_spill] sm:$0xff] %v10720_v1  ;;  %v10736_v45 = vor.u32 %v9510_v54, %v8582_v53  ;;  %v8548_v30 = vld [vmem:[#allocation10 + $0xb08] sm:$0xf]  ;;  %v9502_v31 = vld [vmem:[#allocation10 + $0xb0c] sm:$0xf]  ;;  %v10740_v61 = vor.u32 %v9442_v58, %v8292_v49 }
 0x16c   : > { %3793 = vmatmul.bf16.vlgmr.msrb.gmra.mxu2 %v10494_v11  ;;  %3806 = vmatmul.bf16.vlgmr.msrb.gmra.mxu3 %v10496_v6  ;;  %13394 = vst [vmem:[#allocation152_spill] sm:$0xff] %v10728_v7  ;;  %v9506_v8 = vld [vmem:[#allocation10 + $0xb24] sm:$0xf0]  ;;  %v8422_v22 = vld [vmem:[#allocation10 + $0xa28] sm:$0xf0] }
 0x16d   : > { %13395 = vst [vmem:[#allocation153_spill] sm:$0xff] %v10730_v59  ;;  %v10742_v0 = vor.u32 %v9506_v8, %v8548_v30  ;;  %v8260_v24 = vld [vmem:[#allocation10 + $0x8c8] sm:$0xf]  ;;  %v8102_v2 = vld [vmem:[#allocation10 + $0x7a8] sm:$0xf0] }
 0x16e   : > { %3760 = vmatpush.bf16.msrb.mxu0 %v10712_v13  ;;  %3773 = vmatpush.bf16.msrb.mxu1 %v10714_v48  ;;  %13396 = vst [vmem:[#allocation154_spill] sm:$0xff] %v10734_v23  ;;  %v8294_v13 = vld [vmem:[#allocation10 + $0x928] sm:$0xf0]  ;;  %v9434_v39 = vld [vmem:[#allocation10 + $0x8e4] sm:$0xf0] }
 0x16f   : > { %3838 = vmatpush.bf16.msra.mxu2 %v10718_v51  ;;  %3851 = vmatpush.bf16.msra.mxu3 %v10720_v1  ;;  %13397 = vst [vmem:[#allocation155_spill] sm:$0xff] %v10736_v45  ;;  %v8550_v48 = vld [vmem:[#allocation10 + $0xb28] sm:$0xf0]  ;;  %v10746_v36 = vor.u32 %v9438_v34, %v8294_v13  ;;  %v8516_v54 = vld [vmem:[#allocation10 + $0xac8] sm:$0xf]  ;;  %v10752_v8 = vor.u32 %v9434_v39, %v8260_v24 }
 0x170   : > { %13398 = vst [vmem:[#allocation156_spill] sm:$0xff] %v10740_v61  ;;  %v10748_v28 = vor.u32 %v9502_v31, %v8550_v48  ;;  %v9498_v53 = vld [vmem:[#allocation10 + $0xae4] sm:$0xf0]  ;;  %v9430_v1 = vld [vmem:[#allocation10 + $0x8cc] sm:$0xf] }
 0x171   : > { %13399 = vst [vmem:[#allocation157_spill] sm:$0xff] %v10742_v0  ;;  %v9494_v51 = vld [vmem:[#allocation10 + $0xacc] sm:$0xf]  ;;  %v10754_v30 = vor.u32 %v9498_v53, %v8516_v54  ;;  %v8228_v49 = vld [vmem:[#allocation10 + $0x888] sm:$0xf] }
 0x172   : > { %3761 = vmatpush.bf16.msrb.mxu0 %v10728_v7  ;;  %3774 = vmatpush.bf16.msrb.mxu1 %v10730_v59  ;;  %13400 = vst [vmem:[#allocation158_spill] sm:$0xff] %v10746_v36  ;;  %v8262_v7 = vld [vmem:[#allocation10 + $0x8e8] sm:$0xf0]  ;;  %v9426_v58 = vld [vmem:[#allocation10 + $0x8a4] sm:$0xf0] }
 0x173   : > { %3839 = vmatpush.bf16.msra.mxu2 %v10734_v23  ;;  %3852 = vmatpush.bf16.msra.mxu3 %v10736_v45  ;;  %13401 = vst [vmem:[#allocation159_spill] sm:$0xff] %v10748_v28  ;;  %v8518_v59 = vld [vmem:[#allocation10 + $0xae8] sm:$0xf0]  ;;  %v10758_v34 = vor.u32 %v9430_v1, %v8262_v7  ;;  %v8484_v13 = vld [vmem:[#allocation10 + $0xa88] sm:$0xf]  ;;  %v10764_v24 = vor.u32 %v9426_v58, %v8228_v49 }
 0x174   : > { %13402 = vst [vmem:[#allocation160_spill] sm:$0xff] %v10752_v8  ;;  %v10760_v31 = vor.u32 %v9494_v51, %v8518_v59  ;;  %v9490_v48 = vld [vmem:[#allocation10 + $0xaa4] sm:$0xf0]  ;;  %v9422_v45 = vld [vmem:[#allocation10 + $0x88c] sm:$0xf] }
 0x175   : > { %13403 = vst [vmem:[#allocation161_spill] sm:$0xff] %v10754_v30  ;;  %v9486_v23 = vld [vmem:[#allocation10 + $0xa8c] sm:$0xf]  ;;  %v10766_v39 = vor.u32 %v9490_v48, %v8484_v13  ;;  %v8196_v54 = vld [vmem:[#allocation10 + $0x848] sm:$0xf] }
 0x176   : > { %3762 = vmatpush.bf16.msrb.mxu0 %v10740_v61  ;;  %3775 = vmatpush.bf16.msrb.mxu1 %v10742_v0  ;;  %13404 = vst [vmem:[#allocation162_spill] sm:$0xff] %v10758_v34  ;;  %v8230_v61 = vld [vmem:[#allocation10 + $0x8a8] sm:$0xf0]  ;;  %v9418_v53 = vld [vmem:[#allocation10 + $0x864] sm:$0xf0] }
 0x177   : > { %3840 = vmatpush.bf16.msra.mxu2 %v10746_v36  ;;  %3853 = vmatpush.bf16.msra.mxu3 %v10748_v28  ;;  %13405 = vst [vmem:[#allocation163_spill] sm:$0xff] %v10760_v31  ;;  %v8486_v0 = vld [vmem:[#allocation10 + $0xaa8] sm:$0xf0]  ;;  %v10770_v51 = vor.u32 %v9422_v45, %v8230_v61  ;;  %v8452_v7 = vld [vmem:[#allocation10 + $0xa48] sm:$0xf]  ;;  %v10776_v58 = vor.u32 %v9418_v53, %v8196_v54 }
 0x178   : > { %13406 = vst [vmem:[#allocation164_spill] sm:$0xff] %v10764_v24  ;;  %v10772_v1 = vor.u32 %v9486_v23, %v8486_v0  ;;  %v9482_v59 = vld [vmem:[#allocation10 + $0xa64] sm:$0xf0]  ;;  %v9414_v28 = vld [vmem:[#allocation10 + $0x84c] sm:$0xf] }
 0x179   : > { %13407 = vst [vmem:[#allocation165_spill] sm:$0xff] %v10766_v39  ;;  %v9478_v36 = vld [vmem:[#allocation10 + $0xa4c] sm:$0xf]  ;;  %v8164_v49 = vld [vmem:[#allocation10 + $0x808] sm:$0xf]  ;;  %v10778_v13 = vor.u32 %v9482_v59, %v8452_v7 }
 0x17a   : > { %3763 = vmatpush.bf16.msrb.mxu0 %v10752_v8  ;;  %3776 = vmatpush.bf16.msrb.mxu1 %v10754_v30  ;;  %13408 = vst [vmem:[#allocation166_spill] sm:$0xff] %v10770_v51  ;;  %v8198_v8 = vld [vmem:[#allocation10 + $0x868] sm:$0xf0]  ;;  %v9410_v48 = vld [vmem:[#allocation10 + $0x824] sm:$0xf0] }
 0x17b   : > { %3841 = vmatpush.bf16.msra.mxu2 %v10758_v34  ;;  %3854 = vmatpush.bf16.msra.mxu3 %v10760_v31  ;;  %13409 = vst [vmem:[#allocation167_spill] sm:$0xff] %v10772_v1  ;;  %v8454_v30 = vld [vmem:[#allocation10 + $0xa68] sm:$0xf0]  ;;  %v8420_v45 = vld [vmem:[#allocation10 + $0xa08] sm:$0xf]  ;;  %v10782_v23 = vor.u32 %v9414_v28, %v8198_v8 }
 0x17c   : > { %13410 = vst [vmem:[#allocation168_spill] sm:$0xff] %v10776_v58  ;;  %v9474_v61 = vld [vmem:[#allocation10 + $0xa24] sm:$0xf0]  ;;  %v10784_v0 = vor.u32 %v9478_v36, %v8454_v30  ;;  %v9406_v31 = vld [vmem:[#allocation10 + $0x80c] sm:$0xf] }
 0x17d   : > { %13411 = vst [vmem:[#allocation169_spill] sm:$0xff] %v10778_v13  ;;  %v8166_v34 = vld [vmem:[#allocation10 + $0x828] sm:$0xf0]  ;;  %v7884_v59 = vld [vmem:[#allocation10 + $0x5d0] sm:$0xf] }
 0x17e   : > { %3764 = vmatpush.bf16.msrb.mxu0 %v10764_v24  ;;  %3777 = vmatpush.bf16.msrb.mxu1 %v10766_v39  ;;  %13412 = vst [vmem:[#allocation170_spill] sm:$0xff] %v10782_v23  ;;  %v9470_v24 = vld [vmem:[#allocation10 + $0xa0c] sm:$0xf]  ;;  %v9339_v28 = vld [vmem:[#allocation10 + $0x5ec] sm:$0xf0]  ;;  %v10794_v30 = vor.u32 %v9406_v31, %v8166_v34 }
 0x17f   : > { %3842 = vmatpush.bf16.msra.mxu2 %v10770_v51  ;;  %3855 = vmatpush.bf16.msra.mxu3 %v10772_v1  ;;  %13413 = vst [vmem:[#allocation171_spill] sm:$0xff] %v10784_v0  ;;  %v9334_v39 = vld [vmem:[#allocation10 + $0x5cc] sm:$0xf]  ;;  %v10788_v51 = vor.u32 %v9410_v48, %v8164_v49  ;;  %v10790_v1 = vor.u32 %v9474_v61, %v8420_v45  ;;  %v8140_v36 = vld [vmem:[#allocation10 + $0x7d0] sm:$0xf] }
 0x180   : > { %v7878_v54 = vld [vmem:[#allocation10 + $0x5e8] sm:$0xf0]  ;;  %v9403_v8 = vld [vmem:[#allocation10 + $0x7ec] sm:$0xf0]  ;;  %13416 = vst [vmem:[#allocation174_spill] sm:$0xff] %v10794_v30  ;;  %v10796_v44 = vor.u32 %v9470_v24, %v8422_v22  ;;  %v10802_v48 = vor.u32 %v9339_v28, %v7884_v59 }
 0x181   : > { %v9398_v53 = vld [vmem:[#allocation10 + $0x7cc] sm:$0xf]  ;;  %13414 = vst [vmem:[#allocation172_spill] sm:$0xff] %v10788_v51  ;;  %v10798_v50 = vor.u32 %v9334_v39, %v7878_v54  ;;  %v10804_v45 = vor.u32 %v9403_v8, %v8140_v36  ;;  %v7852_v20 = vld [vmem:[#allocation10 + $0x590] sm:$0xf] }
 0x182   : > { %v8134_v7 = vld [vmem:[#allocation10 + $0x7e8] sm:$0xf0]  ;;  %3765 = vmatpush.bf16.msrb.mxu0 %v10776_v58  ;;  %3778 = vmatpush.bf16.msrb.mxu1 %v10778_v13  ;;  %13415 = vst [vmem:[#allocation173_spill] sm:$0xff] %v10790_v1  ;;  %v9331_v34 = vld [vmem:[#allocation10 + $0x5ac] sm:$0xf0] }
 0x183   : > { %3843 = vmatpush.bf16.msra.mxu2 %v10782_v23  ;;  %3856 = vmatpush.bf16.msra.mxu3 %v10784_v0  ;;  %13417 = vst [vmem:[#allocation175_spill] sm:$0xff] %v10796_v44  ;;  %v10800_v58 = vor.u32 %v9398_v53, %v8134_v7  ;;  %v9326_v13 = vld [vmem:[#allocation10 + $0x58c] sm:$0xf]  ;;  %v8108_v22 = vld [vmem:[#allocation10 + $0x790] sm:$0xf]  ;;  %v10818_v7 = vor.u32 %v9331_v34, %v7852_v20  ;;  %v10828_v20 = vpop.f32.mrf.mxu3 }
 0x184   : > { %13418 = vst [vmem:[#allocation176_spill] sm:$0xff] %v10798_v50  ;;  %v7846_v49 = vld [vmem:[#allocation10 + $0x5a8] sm:$0xf0]  ;;  %v9395_v31 = vld [vmem:[#allocation10 + $0x7ac] sm:$0xf0] }
 0x185   : > { %13419 = vst [vmem:[#allocation177_spill] sm:$0xff] %v10800_v58  ;;  %v9390_v61 = vld [vmem:[#allocation10 + $0x78c] sm:$0xf]  ;;  %v10812_v24 = vor.u32 %v9326_v13, %v7846_v49  ;;  %v10820_v59 = vor.u32 %v9395_v31, %v8108_v22  ;;  %v7820_v8 = vld [vmem:[#allocation10 + $0x550] sm:$0xf] }
 0x186   : > { %13420 = vst [vmem:[#allocation178_spill] sm:$0xff] %v10802_v48  ;;  %3766 = vmatpush.bf16.msrb.mxu0 %v10788_v51  ;;  %3779 = vmatpush.bf16.msrb.mxu1 %v10790_v1  ;;  %v10814_v39 = vor.u32 %v9390_v61, %v8102_v2  ;;  %v9318_v54 = vld [vmem:[#allocation10 + $0x54c] sm:$0xf]  ;;  %v9323_v13 = vld [vmem:[#allocation10 + $0x56c] sm:$0xf0]  ;;  %v10826_v61 = vpop.f32.mrf.mxu2 }
 0x187   : > { %13421 = vst [vmem:[#allocation179_spill] sm:$0xff] %v10804_v45  ;;  %3844 = vmatpush.bf16.msra.mxu2 %v10794_v30  ;;  %3857 = vmatpush.bf16.msra.mxu3 %v10796_v44  ;;  %v7814_v53 = vld [vmem:[#allocation10 + $0x568] sm:$0xf0]  ;;  %v8076_v2 = vld [vmem:[#allocation10 + $0x750] sm:$0xf] }
 0x188   : > { %13422 = vst [vmem:[#allocation180_spill] sm:$0xff] %v10812_v24  ;;  %v9382_v28 = vld [vmem:[#allocation10 + $0x74c] sm:$0xf]  ;;  %v9387_v49 = vld [vmem:[#allocation10 + $0x76c] sm:$0xf0]  ;;  %v10832_v34 = vor.u32 %v9318_v54, %v7814_v53 }
 0x189   : > { %13423 = vst [vmem:[#allocation181_spill] sm:$0xff] %v10814_v39  ;;  %v8070_v36 = vld [vmem:[#allocation10 + $0x768] sm:$0xf0]  ;;  %3767 = vmatmul.bf16.vlgmr.msrb.gmra.mxu0 %v10546_v32  ;;  %3780 = vmatmul.bf16.vlgmr.msrb.gmra.mxu1 %v10548_v16  ;;  %v7788_v30 = vld [vmem:[#allocation10 + $0x510] sm:$0xf] }
 0x18a   : > { %3811 = vmatpush.bf16.msra.mxu0 %v10798_v50  ;;  %3824 = vmatpush.bf16.msra.mxu1 %v10800_v58  ;;  %13424 = vst [vmem:[#allocation182_spill] sm:$0xff] %v10818_v7  ;;  %v10834_v22 = vor.u32 %v9382_v28, %v8070_v36  ;;  %v9310_v31 = vld [vmem:[#allocation10 + $0x50c] sm:$0xf]  ;;  %v10840_v58 = vor.u32 %v9387_v49, %v8076_v2  ;;  %v8044_v1 = vld [vmem:[#allocation10 + $0x710] sm:$0xf] }
 0x18b   : > { %3889 = vmatpush.bf16.msrb.mxu2 %v10802_v48  ;;  %3902 = vmatpush.bf16.msrb.mxu3 %v10804_v45  ;;  %13425 = vst [vmem:[#allocation183_spill] sm:$0xff] %v10820_v59  ;;  %v7782_v45 = vld [vmem:[#allocation10 + $0x528] sm:$0xf0]  ;;  %v10838_v48 = vor.u32 %v9323_v13, %v7820_v8  ;;  %v9347_v51 = vld [vmem:[#allocation10 + $0x62c] sm:$0xf0] }
 0x18c   : > { %3845 = vmatmul.bf16.vlgmr.msra.gmra.mxu2 %v10546_v32  ;;  %3858 = vmatmul.bf16.vlgmr.msra.gmra.mxu3 %v10548_v16  ;;  %13426 = vst [vmem:[#allocation184_spill] sm:$0xff] %v10832_v34  ;;  %v9374_v50 = vld [vmem:[#allocation10 + $0x70c] sm:$0xf]  ;;  %v10844_v54 = vor.u32 %v9310_v31, %v7782_v45  ;;  %v3601_v31 = vpop.f32.mrf.mxu3 }
 0x18d   : > { %13427 = vst [vmem:[#allocation185_spill] sm:$0xff] %v10834_v22  ;;  %v8038_v44 = vld [vmem:[#allocation10 + $0x728] sm:$0xf0] }
 0x18e   : > { %3812 = vmatpush.bf16.msra.mxu0 %v10812_v24  ;;  %3825 = vmatpush.bf16.msra.mxu1 %v10814_v39  ;;  %13428 = vst [vmem:[#allocation186_spill] sm:$0xff] %v10838_v48  ;;  %v9315_v24 = vld [vmem:[#allocation10 + $0x52c] sm:$0xf0]  ;;  %v10846_v53 = vor.u32 %v9374_v50, %v8038_v44  ;;  %v9302_v28 = vld [vmem:[#allocation10 + $0x4cc] sm:$0xf]  ;;  %v3588_v45 = vpop.f32.mrf.mxu2 }
 0x18f   : > { %3890 = vmatpush.bf16.msrb.mxu2 %v10818_v7  ;;  %3903 = vmatpush.bf16.msrb.mxu3 %v10820_v59  ;;  %13429 = vst [vmem:[#allocation187_spill] sm:$0xff] %v10840_v58  ;;  %v9379_v39 = vld [vmem:[#allocation10 + $0x72c] sm:$0xf0]  ;;  %v7750_v36 = vld [vmem:[#allocation10 + $0x4e8] sm:$0xf0]  ;;  %v10850_v8 = vor.u32 %v9315_v24, %v7788_v30 }
 0x190   : > { %13430 = vst [vmem:[#allocation188_spill] sm:$0xff] %v10844_v54  ;;  %v10852_v13 = vor.u32 %v9379_v39, %v8044_v1  ;;  %v9366_v2 = vld [vmem:[#allocation10 + $0x6cc] sm:$0xf]  ;;  %v7756_v59 = vld [vmem:[#allocation10 + $0x4d0] sm:$0xf]  ;;  %v10856_v50 = vor.u32 %v9302_v28, %v7750_v36 }
 0x191   : > { %13431 = vst [vmem:[#allocation189_spill] sm:$0xff] %v10846_v53  ;;  %v8006_v49 = vld [vmem:[#allocation10 + $0x6e8] sm:$0xf0]  ;;  %v8012_v7 = vld [vmem:[#allocation10 + $0x6d0] sm:$0xf] }
 0x192   : > { %3813 = vmatpush.bf16.msra.mxu0 %v10832_v34  ;;  %3826 = vmatpush.bf16.msra.mxu1 %v10834_v22  ;;  %13432 = vst [vmem:[#allocation190_spill] sm:$0xff] %v10850_v8  ;;  %v9307_v34 = vld [vmem:[#allocation10 + $0x4ec] sm:$0xf0]  ;;  %v10858_v44 = vor.u32 %v9366_v2, %v8006_v49  ;;  %v9294_v30 = vld [vmem:[#allocation10 + $0x48c] sm:$0xf] }
 0x193   : > { %3891 = vmatpush.bf16.msrb.mxu2 %v10838_v48  ;;  %3904 = vmatpush.bf16.msrb.mxu3 %v10840_v58  ;;  %13433 = vst [vmem:[#allocation191_spill] sm:$0xff] %v10852_v13  ;;  %v9371_v22 = vld [vmem:[#allocation10 + $0x6ec] sm:$0xf0]  ;;  %v7718_v24 = vld [vmem:[#allocation10 + $0x4a8] sm:$0xf0]  ;;  %v10862_v1 = vor.u32 %v9307_v34, %v7756_v59 }
 0x194   : > { %13434 = vst [vmem:[#allocation192_spill] sm:$0xff] %v10856_v50  ;;  %v10864_v39 = vor.u32 %v9371_v22, %v8012_v7  ;;  %v9358_v45 = vld [vmem:[#allocation10 + $0x68c] sm:$0xf]  ;;  %v7724_v58 = vld [vmem:[#allocation10 + $0x490] sm:$0xf]  ;;  %v10868_v28 = vor.u32 %v9294_v30, %v7718_v24 }
 0x195   : > { %13435 = vst [vmem:[#allocation193_spill] sm:$0xff] %v10858_v44  ;;  %v7974_v31 = vld [vmem:[#allocation10 + $0x6a8] sm:$0xf0]  ;;  %v7980_v48 = vld [vmem:[#allocation10 + $0x690] sm:$0xf] }
 0x196   : > { %3814 = vmatpush.bf16.msra.mxu0 %v10844_v54  ;;  %3827 = vmatpush.bf16.msra.mxu1 %v10846_v53  ;;  %13436 = vst [vmem:[#allocation194_spill] sm:$0xff] %v10862_v1  ;;  %v9299_v54 = vld [vmem:[#allocation10 + $0x4ac] sm:$0xf0]  ;;  %v10870_v36 = vor.u32 %v9358_v45, %v7974_v31  ;;  %v9286_v2 = vld [vmem:[#allocation10 + $0x44c] sm:$0xf] }
 0x197   : > { %3892 = vmatpush.bf16.msrb.mxu2 %v10850_v8  ;;  %3905 = vmatpush.bf16.msrb.mxu3 %v10852_v13  ;;  %13437 = vst [vmem:[#allocation195_spill] sm:$0xff] %v10864_v39  ;;  %v9363_v53 = vld [vmem:[#allocation10 + $0x6ac] sm:$0xf0]  ;;  %v7686_v49 = vld [vmem:[#allocation10 + $0x468] sm:$0xf0]  ;;  %v10874_v7 = vor.u32 %v9299_v54, %v7724_v58 }
 0x198   : > { %13438 = vst [vmem:[#allocation196_spill] sm:$0xff] %v10868_v28  ;;  %v10876_v59 = vor.u32 %v9363_v53, %v7980_v48  ;;  %v9350_v34 = vld [vmem:[#allocation10 + $0x64c] sm:$0xf]  ;;  %v7692_v13 = vld [vmem:[#allocation10 + $0x450] sm:$0xf]  ;;  %v10880_v24 = vor.u32 %v9286_v2, %v7686_v49 }
 0x199   : > { %13439 = vst [vmem:[#allocation197_spill] sm:$0xff] %v10870_v36  ;;  %v7942_v22 = vld [vmem:[#allocation10 + $0x668] sm:$0xf0]  ;;  %v7948_v8 = vld [vmem:[#allocation10 + $0x650] sm:$0xf] }
 0x19a   : > { %3815 = vmatpush.bf16.msra.mxu0 %v10856_v50  ;;  %3828 = vmatpush.bf16.msra.mxu1 %v10858_v44  ;;  %13440 = vst [vmem:[#allocation198_spill] sm:$0xff] %v10874_v7  ;;  %v9291_v50 = vld [vmem:[#allocation10 + $0x46c] sm:$0xf0]  ;;  %v9278_v30 = vld [vmem:[#allocation10 + $0x40c] sm:$0xf]  ;;  %v10882_v45 = vor.u32 %v9350_v34, %v7942_v22 }
 0x19b   : > { %3893 = vmatpush.bf16.msrb.mxu2 %v10862_v1  ;;  %3906 = vmatpush.bf16.msrb.mxu3 %v10864_v39  ;;  %13441 = vst [vmem:[#allocation199_spill] sm:$0xff] %v10876_v59  ;;  %v9355_v44 = vld [vmem:[#allocation10 + $0x66c] sm:$0xf0]  ;;  %v7654_v31 = vld [vmem:[#allocation10 + $0x428] sm:$0xf0]  ;;  %v10886_v48 = vor.u32 %v9291_v50, %v7692_v13 }
 0x19c   : > { %13442 = vst [vmem:[#allocation200_spill] sm:$0xff] %v10880_v24  ;;  %v9342_v58 = vld [vmem:[#allocation10 + $0x60c] sm:$0xf]  ;;  %v10888_v53 = vor.u32 %v9355_v44, %v7948_v8  ;;  %v7660_v39 = vld [vmem:[#allocation10 + $0x410] sm:$0xf] }
 0x19d   : > { %13443 = vst [vmem:[#allocation201_spill] sm:$0xff] %v10882_v45  ;;  %v7910_v54 = vld [vmem:[#allocation10 + $0x628] sm:$0xf0]  ;;  %v9283_v1 = vld [vmem:[#allocation10 + $0x42c] sm:$0xf0] }
 0x19e   : > { %3816 = vmatpush.bf16.msra.mxu0 %v10868_v28  ;;  %3829 = vmatpush.bf16.msra.mxu1 %v10870_v36  ;;  %13444 = vst [vmem:[#allocation202_spill] sm:$0xff] %v10886_v48  ;;  %v7916_v28 = vld [vmem:[#allocation10 + $0x610] sm:$0xf]  ;;  %v9207_v22 = vld [vmem:[#allocation10 + $0x1d4] sm:$0xf]  ;;  %v10898_v44 = vor.u32 %v9283_v1, %v7660_v39 }
 0x19f   : > { %3894 = vmatpush.bf16.msrb.mxu2 %v10874_v7  ;;  %3907 = vmatpush.bf16.msrb.mxu3 %v10876_v59  ;;  %13445 = vst [vmem:[#allocation203_spill] sm:$0xff] %v10888_v53  ;;  %v7372_v36 = vld [vmem:[#allocation10 + $0x1d0] sm:$0xf]  ;;  %v10892_v7 = vor.u32 %v9278_v30, %v7654_v31  ;;  %v10894_v59 = vor.u32 %v9342_v58, %v7910_v54  ;;  %v7374_v13 = vld [vmem:[#allocation10 + $0x1f0] sm:$0xf0] }
 0x1a0   : > { %v9211_v2 = vld [vmem:[#allocation10 + $0x1ec] sm:$0xf0]  ;;  %v9271_v8 = vld [vmem:[#allocation10 + $0x3d4] sm:$0xf]  ;;  %13448 = vst [vmem:[#allocation206_spill] sm:$0xff] %v10898_v44  ;;  %v10900_v0 = vor.u32 %v9347_v51, %v7916_v28  ;;  %v10906_v58 = vor.u32 %v9207_v22, %v7374_v13 }
 0x1a1   : > { %v7628_v49 = vld [vmem:[#allocation10 + $0x3d0] sm:$0xf]  ;;  %13446 = vst [vmem:[#allocation204_spill] sm:$0xff] %v10892_v7  ;;  %v7630_v50 = vld [vmem:[#allocation10 + $0x3f0] sm:$0xf0]  ;;  %v10902_v23 = vor.u32 %v9211_v2, %v7372_v36 }
 0x1a2   : > { %v9275_v34 = vld [vmem:[#allocation10 + $0x3ec] sm:$0xf0]  ;;  %3817 = vmatpush.bf16.msra.mxu0 %v10880_v24  ;;  %3830 = vmatpush.bf16.msra.mxu1 %v10882_v45  ;;  %13447 = vst [vmem:[#allocation205_spill] sm:$0xff] %v10894_v59  ;;  %v10908_v54 = vor.u32 %v9271_v8, %v7630_v50  ;;  %v7342_v51 = vld [vmem:[#allocation10 + $0x1b0] sm:$0xf0] }
 0x1a3   : > { %3895 = vmatpush.bf16.msrb.mxu2 %v10886_v48  ;;  %3908 = vmatpush.bf16.msrb.mxu3 %v10888_v53  ;;  %13449 = vst [vmem:[#allocation207_spill] sm:$0xff] %v10900_v0  ;;  %v10904_v24 = vor.u32 %v9275_v34, %v7628_v49  ;;  %v7340_v45 = vld [vmem:[#allocation10 + $0x190] sm:$0xf]  ;;  %v10910_v48 = vld [vmem:[#allocation15] sm:$0xff]  ;;  %v9263_v1 = vld [vmem:[#allocation10 + $0x394] sm:$0xf]  ;;  %v10925_v22 = vor.u32 %v9199_v41, %v7342_v51 }
 0x1a4   : > { %13450 = vst [vmem:[#allocation208_spill] sm:$0xff] %v10902_v23  ;;  %v9203_v30 = vld [vmem:[#allocation10 + $0x1ac] sm:$0xf0]  ;;  %v7598_v39 = vld [vmem:[#allocation10 + $0x3b0] sm:$0xf0] }
 0x1a5   : > { %13451 = vst [vmem:[#allocation209_spill] sm:$0xff] %v10904_v24  ;;  %v7596_v31 = vld [vmem:[#allocation10 + $0x390] sm:$0xf]  ;;  %v10918_v28 = vor.u32 %v9203_v30, %v7340_v45  ;;  %v10927_v13 = vor.u32 %v9263_v1, %v7598_v39  ;;  %v9255_v45 = vld [vmem:[#allocation10 + $0x354] sm:$0xf]  ;;  %v3573_v34 = vpop.f32.mrf.mxu1  ;;  %v13461_v1 = vperm.slane %v10910_v48, 0 }
 0x1a6   : > { %13452 = vst [vmem:[#allocation210_spill] sm:$0xff] %v10906_v58  ;;  %3818 = vmatpush.bf16.msra.mxu0 %v10892_v7  ;;  %3831 = vmatpush.bf16.msra.mxu1 %v10894_v59  ;;  %v10920_v36 = vor.u32 %v9267_v43, %v7596_v31  ;;  %v7308_v2 = vld [vmem:[#allocation10 + $0x150] sm:$0xf]  ;;  %v7310_v43 = vld [vmem:[#allocation10 + $0x170] sm:$0xf0]  ;;  %v3560_v31 = vpop.f32.mrf.mxu0 }
 0x1a7   : > { %13453 = vst [vmem:[#allocation211_spill] sm:$0xff] %v10908_v54  ;;  %3896 = vmatpush.bf16.msrb.mxu2 %v10898_v44  ;;  %3909 = vmatpush.bf16.msrb.mxu3 %v10900_v0  ;;  %v9195_v49 = vld [vmem:[#allocation10 + $0x16c] sm:$0xf0]  ;;  %v7566_v30 = vld [vmem:[#allocation10 + $0x370] sm:$0xf0]  ;;  %v3561_v39 = vadd.f32 %v3560_v31, %v13461_v1 }
 0x1a8   : > { %13454 = vst [vmem:[#allocation212_spill] sm:$0xff] %v10910_v48  ;;  %v7564_v8 = vld [vmem:[#allocation10 + $0x350] sm:$0xf]  ;;  %v10935_v41 = vor.u32 %v9195_v49, %v7308_v2  ;;  %v10945_v0 = vor.u32 %v9255_v45, %v7566_v30  ;;  %v7278_v49 = vld [vmem:[#allocation10 + $0x130] sm:$0xf0] }
 0x1a9   : > { %13455 = vst [vmem:[#allocation213_spill] sm:$0xff] %v10918_v28  ;;  %v9259_v50 = vld [vmem:[#allocation10 + $0x36c] sm:$0xf0]  ;;  %3819 = vmatmul.bf16.vlgmr.msra.gmra.mxu0 %v10375_v4  ;;  %3832 = vmatmul.bf16.vlgmr.msra.gmra.mxu1 %v10377_v40  ;;  %v3574_v2 = vadd.f32 %v3573_v34, %v3561_v39  ;;  %v9215_v7 = vld [vmem:[#allocation10 + $0x214] sm:$0xf] }
 0x1aa   : > { %3863 = vmatpush.bf16.msrb.mxu0 %v10902_v23  ;;  %3876 = vmatpush.bf16.msrb.mxu1 %v10904_v24  ;;  %13456 = vst [vmem:[#allocation214_spill] sm:$0xff] %v10920_v36  ;;  %v9191_v23 = vld [vmem:[#allocation10 + $0x154] sm:$0xf]  ;;  %v10937_v51 = vor.u32 %v9259_v50, %v7564_v8  ;;  %v9251_v44 = vld [vmem:[#allocation10 + $0x32c] sm:$0xf0] }
 0x1ab   : > { %3941 = vmatpush.bf16.msra.mxu2 %v10906_v58  ;;  %3954 = vmatpush.bf16.msra.mxu3 %v10908_v54  ;;  %13457 = vst [vmem:[#allocation215_spill] sm:$0xff] %v10925_v22  ;;  %v7276_v54 = vld [vmem:[#allocation10 + $0x110] sm:$0xf]  ;;  %v10943_v24 = vor.u32 %v9191_v23, %v7310_v43  ;;  %v9247_v8 = vld [vmem:[#allocation10 + $0x314] sm:$0xf]  ;;  %v3587_v31 = vadd.f32 %v10826_v61, %v3574_v2 }
 0x1ac   : > { %13458 = vst [vmem:[#allocation216_spill] sm:$0xff] %v10927_v13  ;;  %3897 = vmatmul.bf16.vlgmr.msrb.gmra.mxu2 %v10375_v4  ;;  %3910 = vmatmul.bf16.vlgmr.msrb.gmra.mxu3 %v10377_v40  ;;  %v9187_v58 = vld [vmem:[#allocation10 + $0x12c] sm:$0xf0]  ;;  %v7534_v50 = vld [vmem:[#allocation10 + $0x330] sm:$0xf0] }
 0x1ad   : > { %13459 = vst [vmem:[#allocation217_spill] sm:$0xff] %v10935_v41  ;;  %v10951_v1 = vor.u32 %v9187_v58, %v7276_v54  ;;  %v7244_v43 = vld [vmem:[#allocation10 + $0xd0] sm:$0xf]  ;;  %v10959_v30 = vor.u32 %v9247_v8, %v7534_v50  ;;  %v7246_v61 = vld [vmem:[#allocation10 + $0xf0] sm:$0xf0] }
 0x1ae   : > { %3864 = vmatpush.bf16.msrb.mxu0 %v10918_v28  ;;  %3877 = vmatpush.bf16.msrb.mxu1 %v10920_v36  ;;  %13460 = vst [vmem:[#allocation218_spill] sm:$0xff] %v10937_v51  ;;  %v7532_v28 = vld [vmem:[#allocation10 + $0x310] sm:$0xf]  ;;  %v9183_v36 = vld [vmem:[#allocation10 + $0x114] sm:$0xf] }
 0x1af   : > { %3942 = vmatpush.bf16.msra.mxu2 %v10925_v22  ;;  %3955 = vmatpush.bf16.msra.mxu3 %v10927_v13  ;;  %13462 = vst [vmem:[#allocation219_spill] sm:$0xff] %v10943_v24  ;;  %v10953_v23 = vor.u32 %v9251_v44, %v7532_v28  ;;  %v9179_v45 = vld [vmem:[#allocation10 + $0xec] sm:$0xf0]  ;;  %v10957_v34 = vor.u32 %v9183_v36, %v7278_v49  ;;  %v3651_v13 = vpop.f32.mrf.mxu3  ;;  %v9239_v58 = vld [vmem:[#allocation10 + $0x2d4] sm:$0xf]  ;;  %v13468_v28 = vperm.slane %v10910_v48, 1  ;;  %v3575_v22 = vpop.f32.mrf.mxu1 }
 0x1b0   : > { %13463 = vst [vmem:[#allocation220_spill] sm:$0xff] %v10945_v0  ;;  %v7500_v39 = vld [vmem:[#allocation10 + $0x2d0] sm:$0xf]  ;;  %v7502_v54 = vld [vmem:[#allocation10 + $0x2f0] sm:$0xf0]  ;;  %v3600_v44 = vadd.f32 %v10828_v20, %v3587_v31  ;;  %v10966_v36 = vor.u32 %v9179_v45, %v7244_v43 }
 0x1b1   : > { %13464 = vst [vmem:[#allocation221_spill] sm:$0xff] %v10951_v1  ;;  %v9243_v59 = vld [vmem:[#allocation10 + $0x2ec] sm:$0xf0]  ;;  %v9231_v43 = vld [vmem:[#allocation10 + $0x294] sm:$0xf] }
 0x1b2   : > { %3865 = vmatpush.bf16.msrb.mxu0 %v10935_v41  ;;  %3878 = vmatpush.bf16.msrb.mxu1 %v10937_v51  ;;  %13465 = vst [vmem:[#allocation222_spill] sm:$0xff] %v10953_v23  ;;  %v9175_v41 = vld [vmem:[#allocation10 + $0xd4] sm:$0xf]  ;;  %v3638_v51 = vpop.f32.mrf.mxu2  ;;  %v10968_v49 = vor.u32 %v9243_v59, %v7500_v39  ;;  %v7212_v8 = vld [vmem:[#allocation10 + $0x90] sm:$0xf] }
 0x1b3   : > { %3943 = vmatpush.bf16.msra.mxu2 %v10943_v24  ;;  %3956 = vmatpush.bf16.msra.mxu3 %v10945_v0  ;;  %13466 = vst [vmem:[#allocation223_spill] sm:$0xff] %v10957_v34  ;;  %v3639_v2 = vadd.f32 %v3638_v51, %v13468_v28  ;;  %v3562_v24 = vpop.f32.mrf.mxu0  ;;  %v9171_v50 = vld [vmem:[#allocation10 + $0xac] sm:$0xf0]  ;;  %v10974_v31 = vor.u32 %v9175_v41, %v7246_v61  ;;  %v9167_v28 = vld [vmem:[#allocation10 + $0x94] sm:$0xf] }
 0x1b4   : > { %13467 = vst [vmem:[#allocation224_spill] sm:$0xff] %v10959_v30  ;;  %v10976_v24 = vor.u32 %v9239_v58, %v7502_v54  ;;  %v7468_v22 = vld [vmem:[#allocation10 + $0x290] sm:$0xf]  ;;  %v7470_v45 = vld [vmem:[#allocation10 + $0x2b0] sm:$0xf0]  ;;  %v10980_v59 = vor.u32 %v9171_v50, %v7212_v8 }
 0x1b5   : > { %13469 = vst [vmem:[#allocation225_spill] sm:$0xff] %v10966_v36  ;;  %v10972_v20 = vadd.f32 %v3651_v13, %v3639_v2  ;;  %v9235_v51 = vld [vmem:[#allocation10 + $0x2ac] sm:$0xf0]  ;;  %v10988_v61 = vor.u32 %v9231_v43, %v7470_v45  ;;  %v9223_v8 = vld [vmem:[#allocation10 + $0x254] sm:$0xf] }
 0x1b6   : > { %3866 = vmatpush.bf16.msrb.mxu0 %v10951_v1  ;;  %3879 = vmatpush.bf16.msrb.mxu1 %v10953_v23  ;;  %13470 = vst [vmem:[#allocation226_spill] sm:$0xff] %v10968_v49  ;;  %v7214_v23 = vld [vmem:[#allocation10 + $0xb0] sm:$0xf0]  ;;  %v10982_v39 = vor.u32 %v9235_v51, %v7468_v22  ;;  %v7180_v13 = vld [vmem:[#allocation10 + $0x50] sm:$0xf] }
 0x1b7   : > { %3944 = vmatpush.bf16.msra.mxu2 %v10957_v34  ;;  %3957 = vmatpush.bf16.msra.mxu3 %v10959_v30  ;;  %13471 = vst [vmem:[#allocation227_spill] sm:$0xff] %v10974_v31  ;;  %v9163_v2 = vld [vmem:[#allocation10 + $0x6c] sm:$0xf0]  ;;  %v10986_v41 = vor.u32 %v9167_v28, %v7214_v23  ;;  %v9159_v30 = vld [vmem:[#allocation10 + $0x54] sm:$0xf]  ;;  %v3653_v34 = vpop.f32.mrf.mxu3  ;;  %v3625_v51 = vpop.f32.mrf.mxu1 }
 0x1b8   : > { %13472 = vst [vmem:[#allocation228_spill] sm:$0xff] %v10976_v24  ;;  %v7436_v58 = vld [vmem:[#allocation10 + $0x250] sm:$0xf]  ;;  %v7438_v50 = vld [vmem:[#allocation10 + $0x270] sm:$0xf0] }
 0x1b9   : > { %13473 = vst [vmem:[#allocation229_spill] sm:$0xff] %v10980_v59  ;;  %v9227_v54 = vld [vmem:[#allocation10 + $0x26c] sm:$0xf0]  ;;  %v9151_v0 = vld [vmem:[#allocation10 + $0x14] sm:$0xf] }
 0x1ba   : > { %3867 = vmatpush.bf16.msrb.mxu0 %v10966_v36  ;;  %3880 = vmatpush.bf16.msrb.mxu1 %v10968_v49  ;;  %13474 = vst [vmem:[#allocation230_spill] sm:$0xff] %v10982_v39  ;;  %v3640_v36 = vpop.f32.mrf.mxu2  ;;  %v7182_v49 = vld [vmem:[#allocation10 + $0x70] sm:$0xf0]  ;;  %v7148_v1 = vld [vmem:[#allocation10 + $0x10] sm:$0xf]  ;;  %v10994_v23 = vor.u32 %v9227_v54, %v7436_v58 }
 0x1bb   : > { %3945 = vmatpush.bf16.msra.mxu2 %v10974_v31  ;;  %3958 = vmatpush.bf16.msra.mxu3 %v10976_v24  ;;  %13475 = vst [vmem:[#allocation231_spill] sm:$0xff] %v10986_v41  ;;  %v3612_v22 = vpop.f32.mrf.mxu0  ;;  %v10992_v24 = vor.u32 %v9163_v2, %v7180_v13  ;;  %v9155_v43 = vld [vmem:[#allocation10 + $0x2c] sm:$0xf0]  ;;  %v10998_v34 = vor.u32 %v9159_v30, %v7182_v49  ;;  %v7406_v13 = vld [vmem:[#allocation10 + $0x230] sm:$0xf0] }
 0x1bc   : > { %13476 = vst [vmem:[#allocation232_spill] sm:$0xff] %v10988_v61  ;;  %v3613_v28 = vadd.f32 %v3612_v22, %v3600_v44  ;;  %v7404_v45 = vld [vmem:[#allocation10 + $0x210] sm:$0xf]  ;;  %v11000_v36 = vor.u32 %v9223_v8, %v7438_v50  ;;  %v9463_v22 = vld [vmem:[#allocation10 + $0x9d4] sm:$0xf] }
 0x1bd   : > { %13477 = vst [vmem:[#allocation233_spill] sm:$0xff] %v10992_v24  ;;  %v9219_v31 = vld [vmem:[#allocation10 + $0x22c] sm:$0xf0]  ;;  %v8398_v49 = vld [vmem:[#allocation10 + $0x9f0] sm:$0xf0] }
 0x1be   : > { %3868 = vmatpush.bf16.msrb.mxu0 %v10980_v59  ;;  %3881 = vmatpush.bf16.msrb.mxu1 %v10982_v39  ;;  %13478 = vst [vmem:[#allocation234_spill] sm:$0xff] %v10994_v23  ;;  %v7150_v59 = vld [vmem:[#allocation10 + $0x30] sm:$0xf0]  ;;  %v11002_v39 = vadd.f32 %v3625_v51, %v3613_v28  ;;  %v8396_v2 = vld [vmem:[#allocation10 + $0x9d0] sm:$0xf]  ;;  %v11008_v30 = vor.u32 %v9219_v31, %v7404_v45 }
 0x1bf   : > { %3946 = vmatpush.bf16.msra.mxu2 %v10986_v41  ;;  %3959 = vmatpush.bf16.msra.mxu3 %v10988_v61  ;;  %13479 = vst [vmem:[#allocation235_spill] sm:$0xff] %v10998_v34  ;;  %v9467_v58 = vld [vmem:[#allocation10 + $0x9ec] sm:$0xf0]  ;;  %v11006_v61 = vor.u32 %v9155_v43, %v7148_v1  ;;  %v9527_v8 = vld [vmem:[#allocation10 + $0xbd4] sm:$0xf]  ;;  %v11012_v51 = vor.u32 %v9151_v0, %v7150_v59  ;;  %v11022_v1 = vpop.f32.mrf.mxu3 }
 0x1c0   : > { %13480 = vst [vmem:[#allocation236_spill] sm:$0xff] %v11000_v36  ;;  %v8652_v44 = vld [vmem:[#allocation10 + $0xbd0] sm:$0xf]  ;;  %v8654_v50 = vld [vmem:[#allocation10 + $0xbf0] sm:$0xf0]  ;;  %v11014_v28 = vor.u32 %v9215_v7, %v7406_v13  ;;  %v11016_v41 = vor.u32 %v9467_v58, %v8396_v2  ;;  %v11024_v45 = vor.u32 %v9463_v22, %v8398_v49  ;;  %vm4175_vm8 = vcmp.ge.f32.partialorder %v11002_v39, 0.0 }
 0x1c1   : > { %v9531_v54 = vld [vmem:[#allocation10 + $0xbec] sm:$0xf0]  ;;  %13481 = vst [vmem:[#allocation237_spill] sm:$0xff] %v11006_v61  ;;  %v11026_v53 = vor.u32 %v9527_v8, %v8654_v50  ;;  %v9455_v7 = vld [vmem:[#allocation10 + $0x994] sm:$0xf] }
 0x1c2   : > { %3869 = vmatpush.bf16.msrb.mxu0 %v10992_v24  ;;  %3882 = vmatpush.bf16.msrb.mxu1 %v10994_v23  ;;  %13482 = vst [vmem:[#allocation238_spill] sm:$0xff] %v11008_v30  ;;  %v11018_v24 = vor.u32 %v9531_v54, %v8652_v44  ;;  %v11020_v23 = vpop.f32.mrf.mxu2  ;;  %v8364_v31 = vld [vmem:[#allocation10 + $0x990] sm:$0xf]  ;;  %v8366_v13 = vld [vmem:[#allocation10 + $0x9b0] sm:$0xf0] }
 0x1c3   : > { %3947 = vmatpush.bf16.msra.mxu2 %v10998_v34  ;;  %3960 = vmatpush.bf16.msra.mxu3 %v11000_v36  ;;  %13483 = vst [vmem:[#allocation239_spill] sm:$0xff] %v11012_v51  ;;  %v9459_v43 = vld [vmem:[#allocation10 + $0x9ac] sm:$0xf0]  ;;  %v3614_v34 = vpop.f32.mrf.mxu0  ;;  %v3627_v36 = vpop.f32.mrf.mxu1  ;;  %v9519_v2 = vld [vmem:[#allocation10 + $0xb94] sm:$0xf]  ;;  %v11040_v22 = vor.u32 %v9455_v7, %v8366_v13 }
 0x1c4   : > { %13484 = vst [vmem:[#allocation240_spill] sm:$0xff] %v11014_v28  ;;  %v8620_v0 = vld [vmem:[#allocation10 + $0xb90] sm:$0xf]  ;;  %v8622_v58 = vld [vmem:[#allocation10 + $0xbb0] sm:$0xf0]  ;;  %v11034_v34 = vor.u32 %v9459_v43, %v8364_v31 }
 0x1c5   : > { %13485 = vst [vmem:[#allocation241_spill] sm:$0xff] %v11016_v41  ;;  %v9523_v59 = vld [vmem:[#allocation10 + $0xbac] sm:$0xf0]  ;;  %v11042_v49 = vor.u32 %v9519_v2, %v8622_v58  ;;  %v8334_v31 = vld [vmem:[#allocation10 + $0x970] sm:$0xf0] }
 0x1c6   : > { %13486 = vst [vmem:[#allocation242_spill] sm:$0xff] %v11018_v24  ;;  %3870 = vmatpush.bf16.msrb.mxu0 %v11006_v61  ;;  %3883 = vmatpush.bf16.msrb.mxu1 %v11008_v30  ;;  %v11036_v36 = vor.u32 %v9523_v59, %v8620_v0  ;;  %v8332_v44 = vld [vmem:[#allocation10 + $0x950] sm:$0xf]  ;;  %v9511_v43 = vld [vmem:[#allocation10 + $0xb54] sm:$0xf] }
 0x1c7   : > { %13487 = vst [vmem:[#allocation243_spill] sm:$0xff] %v11024_v45  ;;  %3948 = vmatpush.bf16.msra.mxu2 %v11012_v51  ;;  %3961 = vmatpush.bf16.msra.mxu3 %v11014_v28  ;;  %v9451_v54 = vld [vmem:[#allocation10 + $0x96c] sm:$0xf0]  ;;  %v9447_v28 = vld [vmem:[#allocation10 + $0x954] sm:$0xf]  ;;  %v3705_v2 = vpop.f32.mrf.mxu3 }
 0x1c8   : > { %13488 = vst [vmem:[#allocation244_spill] sm:$0xff] %v11026_v53  ;;  %v8588_v8 = vld [vmem:[#allocation10 + $0xb50] sm:$0xf]  ;;  %v8590_v0 = vld [vmem:[#allocation10 + $0xb70] sm:$0xf0]  ;;  %v11050_v59 = vor.u32 %v9451_v54, %v8332_v44 }
 0x1c9   : > { %13489 = vst [vmem:[#allocation245_spill] sm:$0xff] %v11034_v34  ;;  %v9515_v50 = vld [vmem:[#allocation10 + $0xb6c] sm:$0xf0]  ;;  %3871 = vmatmul.bf16.vlgmr.msrb.gmra.mxu0 %v10494_v11  ;;  %3884 = vmatmul.bf16.vlgmr.msrb.gmra.mxu1 %v10496_v6  ;;  %v9439_v51 = vld [vmem:[#allocation10 + $0x914] sm:$0xf] }
 0x1ca   : > { %3915 = vmatpush.bf16.msra.mxu0 %v11016_v41  ;;  %3928 = vmatpush.bf16.msra.mxu1 %v11018_v24  ;;  %13490 = vst [vmem:[#allocation246_spill] sm:$0xff] %v11036_v36  ;;  %v11052_v7 = vor.u32 %v9515_v50, %v8588_v8  ;;  %v3692_v13 = vpop.f32.mrf.mxu2  ;;  %v8300_v58 = vld [vmem:[#allocation10 + $0x910] sm:$0xf]  ;;  %v11058_v24 = vor.u32 %v9511_v43, %v8590_v0  ;;  %v9503_v44 = vld [vmem:[#allocation10 + $0xb14] sm:$0xf] }
 0x1cb   : > { %3993 = vmatpush.bf16.msrb.mxu2 %v11024_v45  ;;  %4006 = vmatpush.bf16.msrb.mxu3 %v11026_v53  ;;  %13491 = vst [vmem:[#allocation247_spill] sm:$0xff] %v11040_v22  ;;  %v9443_v53 = vld [vmem:[#allocation10 + $0x92c] sm:$0xf0]  ;;  %v11056_v45 = vor.u32 %v9447_v28, %v8334_v31  ;;  %v8558_v54 = vld [vmem:[#allocation10 + $0xb30] sm:$0xf0]  ;;  %v3664_v8 = vpop.f32.mrf.mxu0  ;;  %v3677_v50 = vpop.f32.mrf.mxu1 }
 0x1cc   : > { %13492 = vst [vmem:[#allocation248_spill] sm:$0xff] %v11042_v49  ;;  %3949 = vmatmul.bf16.vlgmr.msra.gmra.mxu2 %v10494_v11  ;;  %3962 = vmatmul.bf16.vlgmr.msra.gmra.mxu3 %v10496_v6  ;;  %v8556_v41 = vld [vmem:[#allocation10 + $0xb10] sm:$0xf]  ;;  %v3665_v13 = vadd.f32 %v3664_v8, %v10972_v20  ;;  %v11063_v2 = vor.u32 %v9443_v53, %v8300_v58  ;;  %v9431_v30 = vld [vmem:[#allocation10 + $0x8d4] sm:$0xf] }
 0x1cd   : > { %13493 = vst [vmem:[#allocation249_spill] sm:$0xff] %v11050_v59  ;;  %v8268_v31 = vld [vmem:[#allocation10 + $0x8d0] sm:$0xf]  ;;  %v8270_v61 = vld [vmem:[#allocation10 + $0x8f0] sm:$0xf0] }
 0x1ce   : > { %3916 = vmatpush.bf16.msra.mxu0 %v11034_v34  ;;  %3929 = vmatpush.bf16.msra.mxu1 %v11036_v36  ;;  %13494 = vst [vmem:[#allocation250_spill] sm:$0xff] %v11052_v7  ;;  %v9507_v34 = vld [vmem:[#allocation10 + $0xb2c] sm:$0xf0]  ;;  %v8302_v36 = vld [vmem:[#allocation10 + $0x930] sm:$0xf0] }
 0x1cf   : > { %3994 = vmatpush.bf16.msrb.mxu2 %v11040_v22  ;;  %4007 = vmatpush.bf16.msrb.mxu3 %v11042_v49  ;;  %13495 = vst [vmem:[#allocation251_spill] sm:$0xff] %v11056_v45  ;;  %v11065_v28 = vor.u32 %v9507_v34, %v8556_v41  ;;  %v9435_v43 = vld [vmem:[#allocation10 + $0x8ec] sm:$0xf0]  ;;  %v11069_v0 = vor.u32 %v9439_v51, %v8302_v36  ;;  %v9495_v20 = vld [vmem:[#allocation10 + $0xad4] sm:$0xf] }
 0x1d0   : > { %13496 = vst [vmem:[#allocation252_spill] sm:$0xff] %v11058_v24  ;;  %v11071_v49 = vor.u32 %v9503_v44, %v8558_v54  ;;  %v8524_v22 = vld [vmem:[#allocation10 + $0xad0] sm:$0xf]  ;;  %v8526_v53 = vld [vmem:[#allocation10 + $0xaf0] sm:$0xf0]  ;;  %v11076_v34 = vor.u32 %v9435_v43, %v8268_v31  ;;  %v11082_v54 = vor.u32 %v9431_v30, %v8270_v61 }
 0x1d1   : > { %13497 = vst [vmem:[#allocation253_spill] sm:$0xff] %v11063_v2  ;;  %v8236_v51 = vld [vmem:[#allocation10 + $0x890] sm:$0xf]  ;;  %v11084_v8 = vor.u32 %v9495_v20, %v8526_v53  ;;  %v9487_v43 = vld [vmem:[#allocation10 + $0xa94] sm:$0xf] }
 0x1d2   : > { %3917 = vmatpush.bf16.msra.mxu0 %v11050_v59  ;;  %3930 = vmatpush.bf16.msra.mxu1 %v11052_v7  ;;  %13498 = vst [vmem:[#allocation254_spill] sm:$0xff] %v11065_v28  ;;  %v9499_v59 = vld [vmem:[#allocation10 + $0xaec] sm:$0xf0]  ;;  %v3678_v7 = vadd.f32 %v3677_v50, %v3665_v13  ;;  %v8238_v50 = vld [vmem:[#allocation10 + $0x8b0] sm:$0xf0] }
 0x1d3   : > { %3995 = vmatpush.bf16.msrb.mxu2 %v11056_v45  ;;  %4008 = vmatpush.bf16.msrb.mxu3 %v11058_v24  ;;  %13499 = vst [vmem:[#allocation255_spill] sm:$0xff] %v11069_v0  ;;  %v11078_v58 = vor.u32 %v9499_v59, %v8524_v22  ;;  %v9427_v36 = vld [vmem:[#allocation10 + $0x8ac] sm:$0xf0]  ;;  %v4183_v13 = vmul.f32 0.01, %v11002_v39  ;;  %v11088_v22 = vpop.f32.mrf.mxu2  ;;  %v11090_v59 = vpop.f32.mrf.mxu3 }
 0x1d4   : > { %13500 = vst [vmem:[#allocation256_spill] sm:$0xff] %v11071_v49  ;;  %v3691_v41 = vadd.f32 %v11020_v23, %v3678_v7  ;;  %v8492_v44 = vld [vmem:[#allocation10 + $0xa90] sm:$0xf]  ;;  %v9423_v7 = vld [vmem:[#allocation10 + $0x894] sm:$0xf]  ;;  %v3679_v61 = vpop.f32.mrf.mxu1  ;;  %v11095_v53 = vor.u32 %v9427_v36, %v8236_v51 }
 0x1d5   : > { %13501 = vst [vmem:[#allocation257_spill] sm:$0xff] %v11076_v34  ;;  %v9491_v23 = vld [vmem:[#allocation10 + $0xaac] sm:$0xf0]  ;;  %v9415_v24 = vld [vmem:[#allocation10 + $0x854] sm:$0xf] }
 0x1d6   : > { %3918 = vmatpush.bf16.msra.mxu0 %v11063_v2  ;;  %3931 = vmatpush.bf16.msra.mxu1 %v11065_v28  ;;  %13502 = vst [vmem:[#allocation258_spill] sm:$0xff] %v11078_v58  ;;  %v3704_v31 = vadd.f32 %v11022_v1, %v3691_v41  ;;  %v8494_v28 = vld [vmem:[#allocation10 + $0xab0] sm:$0xf0]  ;;  %v8204_v30 = vld [vmem:[#allocation10 + $0x850] sm:$0xf]  ;;  %v11097_v1 = vor.u32 %v9491_v23, %v8492_v44 }
 0x1d7   : > { %3996 = vmatpush.bf16.msrb.mxu2 %v11069_v0  ;;  %4009 = vmatpush.bf16.msrb.mxu3 %v11071_v49  ;;  %13503 = vst [vmem:[#allocation259_spill] sm:$0xff] %v11082_v54  ;;  %v3666_v49 = vpop.f32.mrf.mxu0  ;;  %v9419_v41 = vld [vmem:[#allocation10 + $0x86c] sm:$0xf0]  ;;  %v11101_v0 = vor.u32 %v9423_v7, %v8238_v50  ;;  %v8206_v36 = vld [vmem:[#allocation10 + $0x870] sm:$0xf0] }
 0x1d8   : > { %13504 = vst [vmem:[#allocation260_spill] sm:$0xff] %v11084_v8  ;;  %vm4176_vm9 = vcmp.ge.f32.partialorder %v3704_v31, 0.0  ;;  %v4184_v20 = vmul.f32 0.01, %v3704_v31  ;;  %v11103_v49 = vor.u32 %v9487_v43, %v8494_v28  ;;  %v8460_v61 = vld [vmem:[#allocation10 + $0xa50] sm:$0xf]  ;;  %v11112_v28 = vor.u32 %v9419_v41, %v8204_v30 }
 0x1d9   : > { %13505 = vst [vmem:[#allocation261_spill] sm:$0xff] %v11095_v53  ;;  %v9483_v2 = vld [vmem:[#allocation10 + $0xa6c] sm:$0xf0]  ;;  %v9479_v44 = vld [vmem:[#allocation10 + $0xa54] sm:$0xf] }
 0x1da   : > { %3919 = vmatpush.bf16.msra.mxu0 %v11076_v34  ;;  %3932 = vmatpush.bf16.msra.mxu1 %v11078_v58  ;;  %13506 = vst [vmem:[#allocation262_spill] sm:$0xff] %v11097_v1  ;;  %v4191_v58 = vsel %vm4175_vm8, %v11002_v39, %v4183_v13  ;;  %v4192_v51 = vsel %vm4176_vm9, %v3704_v31, %v4184_v20  ;;  %v8462_v23 = vld [vmem:[#allocation10 + $0xa70] sm:$0xf0]  ;;  %v9411_v50 = vld [vmem:[#allocation10 + $0x82c] sm:$0xf0] }
 0x1db   : > { %3997 = vmatpush.bf16.msrb.mxu2 %v11082_v54  ;;  %4010 = vmatpush.bf16.msrb.mxu3 %v11084_v8  ;;  %13507 = vst [vmem:[#allocation263_spill] sm:$0xff] %v11101_v0  ;;  %v11108_v34 = vpack.c.bf16 %v4192_v51, %v4191_v58  ;;  %v8172_v54 = vld [vmem:[#allocation10 + $0x810] sm:$0xf]  ;;  %v11114_v7 = vor.u32 %v9483_v2, %v8460_v61  ;;  %v9407_v13 = vld [vmem:[#allocation10 + $0x814] sm:$0xf]  ;;  %v3744_v51 = vpop.f32.mrf.mxu2 }
 0x1dc   : > { %13508 = vst [vmem:[#allocation264_spill] sm:$0xff] %v11103_v49  ;;  %v8428_v43 = vld [vmem:[#allocation10 + $0xa10] sm:$0xf]  ;;  %v11118_v39 = vor.u32 %v9415_v24, %v8206_v36  ;;  %v11120_v58 = vor.u32 %v9479_v44, %v8462_v23  ;;  %v8174_v31 = vld [vmem:[#allocation10 + $0x830] sm:$0xf0] }
 0x1dd   : > { %13509 = vst [vmem:[#allocation265_spill] sm:$0xff] %v11112_v28  ;;  %v9475_v8 = vld [vmem:[#allocation10 + $0xa2c] sm:$0xf0]  ;;  %v9471_v20 = vld [vmem:[#allocation10 + $0xa14] sm:$0xf] }
 0x1de   : > { %3920 = vmatpush.bf16.msra.mxu0 %v11095_v53  ;;  %3933 = vmatpush.bf16.msra.mxu1 %v11097_v1  ;;  %13510 = vst [vmem:[#allocation266_spill] sm:$0xff] %v11114_v7  ;;  %v3757_v1 = vpop.f32.mrf.mxu3  ;;  %v8430_v30 = vld [vmem:[#allocation10 + $0xa30] sm:$0xf0]  ;;  %v7892_v45 = vld [vmem:[#allocation10 + $0x5d8] sm:$0xf]  ;;  %v11126_v24 = vor.u32 %v9475_v8, %v8428_v43 }
 0x1df   : > { %3998 = vmatpush.bf16.msrb.mxu2 %v11101_v0  ;;  %4011 = vmatpush.bf16.msrb.mxu3 %v11103_v49  ;;  %13511 = vst [vmem:[#allocation267_spill] sm:$0xff] %v11118_v39  ;;  %v9335_v41 = vld [vmem:[#allocation10 + $0x5d4] sm:$0xf]  ;;  %v11124_v49 = vor.u32 %v9411_v50, %v8172_v54  ;;  %v9340_v36 = vld [vmem:[#allocation10 + $0x5f4] sm:$0xf0]  ;;  %v11130_v1 = vor.u32 %v9407_v13, %v8174_v31 }
 0x1e0   : > { %13512 = vst [vmem:[#allocation268_spill] sm:$0xff] %v11120_v58  ;;  %v7886_v2 = vld [vmem:[#allocation10 + $0x5f0] sm:$0xf0]  ;;  %v8148_v44 = vld [vmem:[#allocation10 + $0x7d8] sm:$0xf]  ;;  %v11132_v51 = vor.u32 %v9471_v20, %v8430_v30  ;;  %v11138_v50 = vor.u32 %v9340_v36, %v7892_v45 }
 0x1e1   : > { %v9399_v61 = vld [vmem:[#allocation10 + $0x7d4] sm:$0xf]  ;;  %13513 = vst [vmem:[#allocation269_spill] sm:$0xff] %v11124_v49  ;;  %v9404_v23 = vld [vmem:[#allocation10 + $0x7f4] sm:$0xf0]  ;;  %v11134_v0 = vor.u32 %v9335_v41, %v7886_v2 }
 0x1e2   : > { %v8142_v53 = vld [vmem:[#allocation10 + $0x7f0] sm:$0xf0]  ;;  %3921 = vmatpush.bf16.msra.mxu0 %v11112_v28  ;;  %3934 = vmatpush.bf16.msra.mxu1 %v11114_v7  ;;  %13514 = vst [vmem:[#allocation270_spill] sm:$0xff] %v11126_v24  ;;  %v11140_v8 = vor.u32 %v9404_v23, %v8148_v44  ;;  %v9332_v13 = vld [vmem:[#allocation10 + $0x5b4] sm:$0xf0] }
 0x1e3   : > { %3999 = vmatpush.bf16.msrb.mxu2 %v11118_v39  ;;  %4012 = vmatpush.bf16.msrb.mxu3 %v11120_v58  ;;  %13515 = vst [vmem:[#allocation271_spill] sm:$0xff] %v11130_v1  ;;  %v11136_v28 = vor.u32 %v9399_v61, %v8142_v53  ;;  %v9327_v7 = vld [vmem:[#allocation10 + $0x594] sm:$0xf]  ;;  %v8116_v31 = vld [vmem:[#allocation10 + $0x798] sm:$0xf]  ;;  %v11154_v2 = vor.u32 %v9332_v13, %v7860_v27  ;;  %v13052_v13 = vperm.slane %v10910_v48, 2 }
 0x1e4   : > { %13516 = vst [vmem:[#allocation272_spill] sm:$0xff] %v11132_v51  ;;  %v7854_v54 = vld [vmem:[#allocation10 + $0x5b0] sm:$0xf0]  ;;  %v9396_v20 = vld [vmem:[#allocation10 + $0x7b4] sm:$0xf0] }
 0x1e5   : > { %13517 = vst [vmem:[#allocation273_spill] sm:$0xff] %v11134_v0  ;;  %v9391_v43 = vld [vmem:[#allocation10 + $0x794] sm:$0xf]  ;;  %v11148_v45 = vor.u32 %v9327_v7, %v7854_v54  ;;  %v11156_v61 = vor.u32 %v9396_v20, %v8116_v31  ;;  %v7828_v23 = vld [vmem:[#allocation10 + $0x558] sm:$0xf] }
 0x1e6   : > { %13518 = vst [vmem:[#allocation274_spill] sm:$0xff] %v11136_v28  ;;  %3922 = vmatpush.bf16.msra.mxu0 %v11124_v49  ;;  %3935 = vmatpush.bf16.msra.mxu1 %v11126_v24  ;;  %v11150_v53 = vor.u32 %v9391_v43, %v8110_v35  ;;  %v9319_v30 = vld [vmem:[#allocation10 + $0x554] sm:$0xf]  ;;  %v9324_v7 = vld [vmem:[#allocation10 + $0x574] sm:$0xf0] }
 0x1e7   : > { %13519 = vst [vmem:[#allocation275_spill] sm:$0xff] %v11138_v50  ;;  %4000 = vmatpush.bf16.msrb.mxu2 %v11130_v1  ;;  %4013 = vmatpush.bf16.msrb.mxu3 %v11132_v51  ;;  %v7822_v41 = vld [vmem:[#allocation10 + $0x570] sm:$0xf0]  ;;  %v8084_v35 = vld [vmem:[#allocation10 + $0x758] sm:$0xf] }
 0x1e8   : > { %13520 = vst [vmem:[#allocation276_spill] sm:$0xff] %v11140_v8  ;;  %v9383_v36 = vld [vmem:[#allocation10 + $0x754] sm:$0xf]  ;;  %v9388_v54 = vld [vmem:[#allocation10 + $0x774] sm:$0xf0]  ;;  %v11164_v27 = vor.u32 %v9319_v30, %v7822_v41 }
 0x1e9   : > { %13521 = vst [vmem:[#allocation277_spill] sm:$0xff] %v11148_v45  ;;  %v8078_v44 = vld [vmem:[#allocation10 + $0x770] sm:$0xf0]  ;;  %3923 = vmatmul.bf16.vlgmr.msra.gmra.mxu0 %v10546_v32  ;;  %3936 = vmatmul.bf16.vlgmr.msra.gmra.mxu1 %v10548_v16  ;;  %v8052_v30 = vld [vmem:[#allocation10 + $0x718] sm:$0xf] }
 0x1ea   : > { %3967 = vmatpush.bf16.msrb.mxu0 %v11134_v0  ;;  %3980 = vmatpush.bf16.msrb.mxu1 %v11136_v28  ;;  %13522 = vst [vmem:[#allocation278_spill] sm:$0xff] %v11150_v53  ;;  %v11166_v43 = vor.u32 %v9383_v36, %v8078_v44  ;;  %v9311_v31 = vld [vmem:[#allocation10 + $0x514] sm:$0xf]  ;;  %v7796_v0 = vld [vmem:[#allocation10 + $0x518] sm:$0xf]  ;;  %v3716_v36 = vpop.f32.mrf.mxu0  ;;  %v3729_v44 = vpop.f32.mrf.mxu1 }
 0x1eb   : > { %4045 = vmatpush.bf16.msra.mxu2 %v11138_v50  ;;  %4058 = vmatpush.bf16.msra.mxu3 %v11140_v8  ;;  %13523 = vst [vmem:[#allocation279_spill] sm:$0xff] %v11154_v2  ;;  %v7790_v20 = vld [vmem:[#allocation10 + $0x530] sm:$0xf0]  ;;  %v11171_v8 = vor.u32 %v9324_v7, %v7828_v23  ;;  %v11173_v50 = vor.u32 %v9388_v54, %v8084_v35  ;;  %v9380_v41 = vld [vmem:[#allocation10 + $0x734] sm:$0xf0] }
 0x1ec   : > { %13524 = vst [vmem:[#allocation280_spill] sm:$0xff] %v11156_v61  ;;  %4001 = vmatmul.bf16.vlgmr.msrb.gmra.mxu2 %v10546_v32  ;;  %4014 = vmatmul.bf16.vlgmr.msrb.gmra.mxu3 %v10548_v16  ;;  %v9375_v28 = vld [vmem:[#allocation10 + $0x714] sm:$0xf]  ;;  %v11187_v51 = vor.u32 %v9380_v41, %v8052_v30  ;;  %v9308_v49 = vld [vmem:[#allocation10 + $0x4f4] sm:$0xf0] }
 0x1ed   : > { %13525 = vst [vmem:[#allocation281_spill] sm:$0xff] %v11164_v27  ;;  %v9303_v7 = vld [vmem:[#allocation10 + $0x4d4] sm:$0xf]  ;;  %v9268_v58 = vld [vmem:[#allocation10 + $0x3b4] sm:$0xf0] }
 0x1ee   : > { %3968 = vmatpush.bf16.msrb.mxu0 %v11148_v45  ;;  %3981 = vmatpush.bf16.msrb.mxu1 %v11150_v53  ;;  %13526 = vst [vmem:[#allocation282_spill] sm:$0xff] %v11166_v43  ;;  %v8046_v45 = vld [vmem:[#allocation10 + $0x730] sm:$0xf0]  ;;  %v9316_v53 = vld [vmem:[#allocation10 + $0x534] sm:$0xf0] }
 0x1ef   : > { %4046 = vmatpush.bf16.msra.mxu2 %v11154_v2  ;;  %4059 = vmatpush.bf16.msra.mxu3 %v11156_v61  ;;  %13527 = vst [vmem:[#allocation283_spill] sm:$0xff] %v11171_v8  ;;  %v3717_v2 = vadd.f32 %v3716_v36, %v13052_v13  ;;  %v11179_v61 = vor.u32 %v9311_v31, %v7790_v20  ;;  %v7758_v35 = vld [vmem:[#allocation10 + $0x4f0] sm:$0xf0]  ;;  %v8020_v36 = vld [vmem:[#allocation10 + $0x6d8] sm:$0xf]  ;;  %v3794_v13 = vpop.f32.mrf.mxu2 }
 0x1f0   : > { %13528 = vst [vmem:[#allocation284_spill] sm:$0xff] %v11173_v50  ;;  %v11181_v23 = vor.u32 %v9375_v28, %v8046_v45  ;;  %v11185_v54 = vor.u32 %v9316_v53, %v7796_v0  ;;  %v8014_v1 = vld [vmem:[#allocation10 + $0x6f0] sm:$0xf0]  ;;  %v9372_v31 = vld [vmem:[#allocation10 + $0x6f4] sm:$0xf0]  ;;  %v11193_v20 = vor.u32 %v9303_v7, %v7758_v35  ;;  %v3807_v28 = vpop.f32.mrf.mxu3 }
 0x1f1   : > { %13529 = vst [vmem:[#allocation285_spill] sm:$0xff] %v11179_v61  ;;  %v3730_v24 = vadd.f32 %v3729_v44, %v3717_v2  ;;  %v9295_v53 = vld [vmem:[#allocation10 + $0x494] sm:$0xf]  ;;  %v11201_v41 = vor.u32 %v9372_v31, %v8020_v36  ;;  %v7988_v7 = vld [vmem:[#allocation10 + $0x698] sm:$0xf] }
 0x1f2   : > { %3969 = vmatpush.bf16.msrb.mxu0 %v11164_v27  ;;  %3982 = vmatpush.bf16.msrb.mxu1 %v11166_v43  ;;  %13530 = vst [vmem:[#allocation286_spill] sm:$0xff] %v11181_v23  ;;  %v9367_v27 = vld [vmem:[#allocation10 + $0x6d4] sm:$0xf]  ;;  %v7764_v43 = vld [vmem:[#allocation10 + $0x4d8] sm:$0xf] }
 0x1f3   : > { %4047 = vmatpush.bf16.msra.mxu2 %v11171_v8  ;;  %4060 = vmatpush.bf16.msra.mxu3 %v11173_v50  ;;  %13531 = vst [vmem:[#allocation287_spill] sm:$0xff] %v11185_v54  ;;  %v3743_v45 = vadd.f32 %v11088_v22, %v3730_v24  ;;  %v11195_v0 = vor.u32 %v9367_v27, %v8014_v1  ;;  %v7726_v30 = vld [vmem:[#allocation10 + $0x4b0] sm:$0xf0]  ;;  %v7732_v24 = vld [vmem:[#allocation10 + $0x498] sm:$0xf]  ;;  %v13537_v27 = vperm.slane %v10910_v48, 3 }
 0x1f4   : > { %13532 = vst [vmem:[#allocation288_spill] sm:$0xff] %v11187_v51  ;;  %v11199_v2 = vor.u32 %v9308_v49, %v7764_v43  ;;  %v9359_v44 = vld [vmem:[#allocation10 + $0x694] sm:$0xf]  ;;  %v9364_v35 = vld [vmem:[#allocation10 + $0x6b4] sm:$0xf0]  ;;  %v11210_v49 = vor.u32 %v9295_v53, %v7726_v30 }
 0x1f5   : > { %13533 = vst [vmem:[#allocation289_spill] sm:$0xff] %v11193_v20  ;;  %v7982_v22 = vld [vmem:[#allocation10 + $0x6b0] sm:$0xf0]  ;;  %v11204_v1 = vadd.f32 %v11090_v59, %v3743_v45  ;;  %v7956_v53 = vld [vmem:[#allocation10 + $0x658] sm:$0xf] }
 0x1f6   : > { %3970 = vmatpush.bf16.msrb.mxu0 %v11179_v61  ;;  %3983 = vmatpush.bf16.msrb.mxu1 %v11181_v23  ;;  %13534 = vst [vmem:[#allocation290_spill] sm:$0xff] %v11195_v0  ;;  %v9300_v23 = vld [vmem:[#allocation10 + $0x4b4] sm:$0xf0]  ;;  %v3718_v61 = vpop.f32.mrf.mxu0  ;;  %v11212_v43 = vor.u32 %v9359_v44, %v7982_v22  ;;  %v9287_v36 = vld [vmem:[#allocation10 + $0x454] sm:$0xf] }
 0x1f7   : > { %4048 = vmatpush.bf16.msra.mxu2 %v11185_v54  ;;  %4061 = vmatpush.bf16.msra.mxu3 %v11187_v51  ;;  %13535 = vst [vmem:[#allocation291_spill] sm:$0xff] %v11199_v2  ;;  %v3795_v54 = vadd.f32 %v3794_v13, %v13537_v27  ;;  %v3731_v51 = vpop.f32.mrf.mxu1  ;;  %v7694_v31 = vld [vmem:[#allocation10 + $0x470] sm:$0xf0]  ;;  %v11218_v45 = vor.u32 %v9300_v23, %v7732_v24  ;;  %v7700_v27 = vld [vmem:[#allocation10 + $0x458] sm:$0xf] }
 0x1f8   : > { %13536 = vst [vmem:[#allocation292_spill] sm:$0xff] %v11201_v41  ;;  %v11220_v61 = vor.u32 %v9364_v35, %v7988_v7  ;;  %v9351_v51 = vld [vmem:[#allocation10 + $0x654] sm:$0xf]  ;;  %v9356_v30 = vld [vmem:[#allocation10 + $0x674] sm:$0xf0]  ;;  %v11224_v22 = vor.u32 %v9287_v36, %v7694_v31 }
 0x1f9   : > { %13538 = vst [vmem:[#allocation293_spill] sm:$0xff] %v11210_v49  ;;  %v11216_v59 = vadd.f32 %v3807_v28, %v3795_v54  ;;  %v7950_v13 = vld [vmem:[#allocation10 + $0x670] sm:$0xf0]  ;;  %v11232_v7 = vor.u32 %v9356_v30, %v7956_v53  ;;  %v7668_v35 = vld [vmem:[#allocation10 + $0x418] sm:$0xf] }
 0x1fa   : > { %3971 = vmatpush.bf16.msrb.mxu0 %v11193_v20  ;;  %3984 = vmatpush.bf16.msrb.mxu1 %v11195_v0  ;;  %13539 = vst [vmem:[#allocation294_spill] sm:$0xff] %v11212_v43  ;;  %v9292_v0 = vld [vmem:[#allocation10 + $0x474] sm:$0xf0]  ;;  %v9279_v44 = vld [vmem:[#allocation10 + $0x414] sm:$0xf]  ;;  %v3796_v20 = vpop.f32.mrf.mxu2 }
 0x1fb   : > { %4049 = vmatpush.bf16.msra.mxu2 %v11199_v2  ;;  %4062 = vmatpush.bf16.msra.mxu3 %v11201_v41  ;;  %13540 = vst [vmem:[#allocation295_spill] sm:$0xff] %v11218_v45  ;;  %v11226_v41 = vor.u32 %v9351_v51, %v7950_v13  ;;  %v7662_v54 = vld [vmem:[#allocation10 + $0x430] sm:$0xf0]  ;;  %v11230_v24 = vor.u32 %v9292_v0, %v7700_v27  ;;  %v9284_v2 = vld [vmem:[#allocation10 + $0x434] sm:$0xf0] }
 0x1fc   : > { %13541 = vst [vmem:[#allocation296_spill] sm:$0xff] %v11220_v61  ;;  %v9343_v23 = vld [vmem:[#allocation10 + $0x614] sm:$0xf]  ;;  %v9348_v36 = vld [vmem:[#allocation10 + $0x634] sm:$0xf0]  ;;  %v11242_v20 = vor.u32 %v9284_v2, %v7668_v35 }
 0x1fd   : > { %13542 = vst [vmem:[#allocation297_spill] sm:$0xff] %v11224_v22  ;;  %v7918_v28 = vld [vmem:[#allocation10 + $0x630] sm:$0xf0]  ;;  %v7380_v31 = vld [vmem:[#allocation10 + $0x1d8] sm:$0xf] }
 0x1fe   : > { %3972 = vmatpush.bf16.msrb.mxu0 %v11210_v49  ;;  %3985 = vmatpush.bf16.msrb.mxu1 %v11212_v43  ;;  %13543 = vst [vmem:[#allocation298_spill] sm:$0xff] %v11226_v41  ;;  %v7924_v49 = vld [vmem:[#allocation10 + $0x618] sm:$0xf]  ;;  %v3809_v43 = vpop.f32.mrf.mxu3  ;;  %v9208_v8 = vld [vmem:[#allocation10 + $0x1dc] sm:$0xf]  ;;  %v11238_v0 = vor.u32 %v9343_v23, %v7918_v28 }
 0x1ff   : > { %4050 = vmatpush.bf16.msra.mxu2 %v11218_v45  ;;  %4063 = vmatpush.bf16.msra.mxu3 %v11220_v61  ;;  %13544 = vst [vmem:[#allocation299_spill] sm:$0xff] %v11230_v24  ;;  %v9212_v51 = vld [vmem:[#allocation10 + $0x1f4] sm:$0xf0]  ;;  %v11236_v61 = vor.u32 %v9279_v44, %v7662_v54  ;;  %v7382_v27 = vld [vmem:[#allocation10 + $0x1f8] sm:$0xf0]  ;;  %v11244_v43 = vor.u32 %v9348_v36, %v7924_v49 }
 0x200   : > { %13545 = vst [vmem:[#allocation300_spill] sm:$0xff] %v11232_v7  ;;  %v7636_v13 = vld [vmem:[#allocation10 + $0x3d8] sm:$0xf]  ;;  %v9272_v53 = vld [vmem:[#allocation10 + $0x3dc] sm:$0xf]  ;;  %v11246_v45 = vor.u32 %v9212_v51, %v7380_v31  ;;  %v11250_v54 = vor.u32 %v9208_v8, %v7382_v27 }
 0x201   : > { %v9276_v50 = vld [vmem:[#allocation10 + $0x3f4] sm:$0xf0]  ;;  %13546 = vst [vmem:[#allocation301_spill] sm:$0xff] %v11236_v61  ;;  %v7638_v30 = vld [vmem:[#allocation10 + $0x3f8] sm:$0xf0] }
 0x202   : > { %3973 = vmatpush.bf16.msrb.mxu0 %v11224_v22  ;;  %3986 = vmatpush.bf16.msrb.mxu1 %v11226_v41  ;;  %13547 = vst [vmem:[#allocation302_spill] sm:$0xff] %v11238_v0  ;;  %v11248_v22 = vor.u32 %v9276_v50, %v7636_v13  ;;  %v7348_v41 = vld [vmem:[#allocation10 + $0x198] sm:$0xf]  ;;  %v11252_v23 = vor.u32 %v9272_v53, %v7638_v30  ;;  %v9200_v39 = vld [vmem:[#allocation10 + $0x19c] sm:$0xf] }
 0x203   : > { %4051 = vmatpush.bf16.msra.mxu2 %v11230_v24  ;;  %4064 = vmatpush.bf16.msra.mxu3 %v11232_v7  ;;  %13548 = vst [vmem:[#allocation303_spill] sm:$0xff] %v11242_v20  ;;  %v9204_v44 = vld [vmem:[#allocation10 + $0x1b4] sm:$0xf0]  ;;  %v7350_v2 = vld [vmem:[#allocation10 + $0x1b8] sm:$0xf0] }
 0x204   : > { %13549 = vst [vmem:[#allocation304_spill] sm:$0xff] %v11244_v43  ;;  %v7604_v28 = vld [vmem:[#allocation10 + $0x398] sm:$0xf]  ;;  %v9264_v49 = vld [vmem:[#allocation10 + $0x39c] sm:$0xf]  ;;  %v11260_v50 = vor.u32 %v9204_v44, %v7348_v41  ;;  %v11266_v51 = vor.u32 %v9200_v39, %v7350_v2 }
 0x205   : > { %13550 = vst [vmem:[#allocation305_spill] sm:$0xff] %v11246_v45  ;;  %v7606_v35 = vld [vmem:[#allocation10 + $0x3b8] sm:$0xf0]  ;;  %v11262_v8 = vor.u32 %v9268_v58, %v7604_v28  ;;  %v7316_v36 = vld [vmem:[#allocation10 + $0x158] sm:$0xf] }
 0x206   : > { %13551 = vst [vmem:[#allocation306_spill] sm:$0xff] %v11248_v22  ;;  %3974 = vmatpush.bf16.msrb.mxu0 %v11236_v61  ;;  %3987 = vmatpush.bf16.msrb.mxu1 %v11238_v0  ;;  %v9196_v31 = vld [vmem:[#allocation10 + $0x174] sm:$0xf0]  ;;  %v11268_v13 = vor.u32 %v9264_v49, %v7606_v35  ;;  %v9192_v30 = vld [vmem:[#allocation10 + $0x15c] sm:$0xf] }
 0x207   : > { %13552 = vst [vmem:[#allocation307_spill] sm:$0xff] %v11250_v54  ;;  %4052 = vmatpush.bf16.msra.mxu2 %v11242_v20  ;;  %4065 = vmatpush.bf16.msra.mxu3 %v11244_v43  ;;  %v7572_v27 = vld [vmem:[#allocation10 + $0x358] sm:$0xf]  ;;  %v7318_v41 = vld [vmem:[#allocation10 + $0x178] sm:$0xf0]  ;;  %v11276_v39 = vor.u32 %v9196_v31, %v7316_v36  ;;  %v3768_v36 = vpop.f32.mrf.mxu0  ;;  %v3781_v31 = vpop.f32.mrf.mxu1 }
 0x208   : > { %13553 = vst [vmem:[#allocation308_spill] sm:$0xff] %v11252_v23  ;;  %v9260_v53 = vld [vmem:[#allocation10 + $0x374] sm:$0xf0]  ;;  %v9256_v58 = vld [vmem:[#allocation10 + $0x35c] sm:$0xf]  ;;  %v11282_v35 = vor.u32 %v9192_v30, %v7318_v41 }
 0x209   : > { %13554 = vst [vmem:[#allocation309_spill] sm:$0xff] %v11260_v50  ;;  %3975 = vmatmul.bf16.vlgmr.msrb.gmra.mxu0 %v10375_v4  ;;  %3988 = vmatmul.bf16.vlgmr.msrb.gmra.mxu1 %v10377_v40  ;;  %v7574_v44 = vld [vmem:[#allocation10 + $0x378] sm:$0xf0]  ;;  %v11278_v28 = vor.u32 %v9260_v53, %v7572_v27  ;;  %v7284_v2 = vld [vmem:[#allocation10 + $0x118] sm:$0xf]  ;;  %v3769_v27 = vadd.f32 %v3768_v36, %v11204_v1 }
 0x20a   : > { %4019 = vmatpush.bf16.msra.mxu0 %v11246_v45  ;;  %4032 = vmatpush.bf16.msra.mxu1 %v11248_v22  ;;  %13555 = vst [vmem:[#allocation310_spill] sm:$0xff] %v11262_v8  ;;  %v9188_v49 = vld [vmem:[#allocation10 + $0x134] sm:$0xf0]  ;;  %v9184_v45 = vld [vmem:[#allocation10 + $0x11c] sm:$0xf] }
 0x20b   : > { %4097 = vmatpush.bf16.msrb.mxu2 %v11250_v54  ;;  %4110 = vmatpush.bf16.msrb.mxu3 %v11252_v23  ;;  %13556 = vst [vmem:[#allocation311_spill] sm:$0xff] %v11266_v51  ;;  %v11284_v23 = vor.u32 %v9256_v58, %v7574_v44  ;;  %v7540_v54 = vld [vmem:[#allocation10 + $0x318] sm:$0xf]  ;;  %v9248_v43 = vld [vmem:[#allocation10 + $0x31c] sm:$0xf]  ;;  %v11289_v53 = vor.u32 %v9188_v49, %v7284_v2 }
 0x20c   : > { %13557 = vst [vmem:[#allocation312_spill] sm:$0xff] %v11268_v13  ;;  %4053 = vmatmul.bf16.vlgmr.msra.gmra.mxu2 %v10375_v4  ;;  %4066 = vmatmul.bf16.vlgmr.msra.gmra.mxu3 %v10377_v40  ;;  %v9252_v22 = vld [vmem:[#allocation10 + $0x334] sm:$0xf0]  ;;  %v9176_v20 = vld [vmem:[#allocation10 + $0xdc] sm:$0xf] }
 0x20d   : > { %13558 = vst [vmem:[#allocation313_spill] sm:$0xff] %v11276_v39  ;;  %v11291_v30 = vor.u32 %v9252_v22, %v7540_v54  ;;  %v7252_v41 = vld [vmem:[#allocation10 + $0xd8] sm:$0xf]  ;;  %v7254_v1 = vld [vmem:[#allocation10 + $0xf8] sm:$0xf0] }
 0x20e   : > { %4020 = vmatpush.bf16.msra.mxu0 %v11260_v50  ;;  %4033 = vmatpush.bf16.msra.mxu1 %v11262_v8  ;;  %13559 = vst [vmem:[#allocation314_spill] sm:$0xff] %v11278_v28  ;;  %v7286_v50 = vld [vmem:[#allocation10 + $0x138] sm:$0xf0]  ;;  %v9180_v58 = vld [vmem:[#allocation10 + $0xf4] sm:$0xf0] }
 0x20f   : > { %4098 = vmatpush.bf16.msrb.mxu2 %v11266_v51  ;;  %4111 = vmatpush.bf16.msrb.mxu3 %v11268_v13  ;;  %13560 = vst [vmem:[#allocation315_spill] sm:$0xff] %v11282_v35  ;;  %v7542_v8 = vld [vmem:[#allocation10 + $0x338] sm:$0xf0]  ;;  %v11295_v44 = vor.u32 %v9184_v45, %v7286_v50  ;;  %v7508_v51 = vld [vmem:[#allocation10 + $0x2d8] sm:$0xf]  ;;  %v11303_v22 = vor.u32 %v9180_v58, %v7252_v41  ;;  %v3770_v58 = vpop.f32.mrf.mxu0 }
 0x210   : > { %13561 = vst [vmem:[#allocation316_spill] sm:$0xff] %v11284_v23  ;;  %v11297_v13 = vor.u32 %v9248_v43, %v7542_v8  ;;  %v9240_v2 = vld [vmem:[#allocation10 + $0x2dc] sm:$0xf]  ;;  %v7220_v45 = vld [vmem:[#allocation10 + $0x98] sm:$0xf]  ;;  %v11309_v43 = vor.u32 %v9176_v20, %v7254_v1 }
 0x211   : > { %13562 = vst [vmem:[#allocation317_spill] sm:$0xff] %v11289_v53  ;;  %v7510_v49 = vld [vmem:[#allocation10 + $0x2f8] sm:$0xf0]  ;;  %v9172_v50 = vld [vmem:[#allocation10 + $0xb4] sm:$0xf0] }
 0x212   : > { %4021 = vmatpush.bf16.msra.mxu0 %v11276_v39  ;;  %4034 = vmatpush.bf16.msra.mxu1 %v11278_v28  ;;  %13563 = vst [vmem:[#allocation318_spill] sm:$0xff] %v11291_v30  ;;  %v9244_v39 = vld [vmem:[#allocation10 + $0x2f4] sm:$0xf0]  ;;  %v11299_v28 = vadd.f32 %v3781_v31, %v3769_v27  ;;  %v11311_v8 = vor.u32 %v9240_v2, %v7510_v49  ;;  %v9168_v27 = vld [vmem:[#allocation10 + $0x9c] sm:$0xf] }
 0x213   : > { %4099 = vmatpush.bf16.msrb.mxu2 %v11282_v35  ;;  %4112 = vmatpush.bf16.msrb.mxu3 %v11284_v23  ;;  %13564 = vst [vmem:[#allocation319_spill] sm:$0xff] %v11295_v44  ;;  %v11305_v54 = vor.u32 %v9244_v39, %v7508_v51  ;;  %v7476_v36 = vld [vmem:[#allocation10 + $0x298] sm:$0xf]  ;;  %v7222_v41 = vld [vmem:[#allocation10 + $0xb8] sm:$0xf0]  ;;  %v3783_v23 = vpop.f32.mrf.mxu1  ;;  %v11319_v20 = vor.u32 %v9172_v50, %v7220_v45 }
 0x214   : > { %13565 = vst [vmem:[#allocation320_spill] sm:$0xff] %v11297_v13  ;;  %v9236_v31 = vld [vmem:[#allocation10 + $0x2b4] sm:$0xf0]  ;;  %v9232_v51 = vld [vmem:[#allocation10 + $0x29c] sm:$0xf]  ;;  %vm4177_vm10 = vcmp.ge.f32.partialorder %v11299_v28, 0.0 }
 0x215   : > { %13566 = vst [vmem:[#allocation321_spill] sm:$0xff] %v11303_v22  ;;  %v7478_v39 = vld [vmem:[#allocation10 + $0x2b8] sm:$0xf0]  ;;  %v11321_v1 = vor.u32 %v9236_v31, %v7476_v36  ;;  %v7188_v2 = vld [vmem:[#allocation10 + $0x58] sm:$0xf] }
 0x216   : > { %4022 = vmatpush.bf16.msra.mxu0 %v11289_v53  ;;  %4035 = vmatpush.bf16.msra.mxu1 %v11291_v30  ;;  %13567 = vst [vmem:[#allocation322_spill] sm:$0xff] %v11305_v54  ;;  %v11313_v53 = vpop.f32.mrf.mxu2  ;;  %v11315_v30 = vpop.f32.mrf.mxu3  ;;  %v9164_v49 = vld [vmem:[#allocation10 + $0x74] sm:$0xf0]  ;;  %v9160_v35 = vld [vmem:[#allocation10 + $0x5c] sm:$0xf] }
 0x217   : > { %4100 = vmatpush.bf16.msrb.mxu2 %v11295_v44  ;;  %4113 = vmatpush.bf16.msrb.mxu3 %v11297_v13  ;;  %13568 = vst [vmem:[#allocation323_spill] sm:$0xff] %v11309_v43  ;;  %v11325_v13 = vor.u32 %v9168_v27, %v7222_v41  ;;  %v11327_v44 = vor.u32 %v9232_v51, %v7478_v39  ;;  %v7444_v58 = vld [vmem:[#allocation10 + $0x258] sm:$0xf]  ;;  %v9224_v0 = vld [vmem:[#allocation10 + $0x25c] sm:$0xf] }
 0x218   : > { %13569 = vst [vmem:[#allocation324_spill] sm:$0xff] %v11311_v8  ;;  %v9228_v23 = vld [vmem:[#allocation10 + $0x274] sm:$0xf0]  ;;  %v11331_v50 = vor.u32 %v9164_v49, %v7188_v2  ;;  %v7414_v2 = vld [vmem:[#allocation10 + $0x238] sm:$0xf0] }
 0x219   : > { %13570 = vst [vmem:[#allocation325_spill] sm:$0xff] %v11319_v20  ;;  %v7156_v45 = vld [vmem:[#allocation10 + $0x18] sm:$0xf]  ;;  %v11333_v36 = vor.u32 %v9228_v23, %v7444_v58  ;;  %v9464_v24 = vld [vmem:[#allocation10 + $0x9dc] sm:$0xf] }
 0x21a   : > { %4023 = vmatpush.bf16.msra.mxu0 %v11303_v22  ;;  %4036 = vmatpush.bf16.msra.mxu1 %v11305_v54  ;;  %13571 = vst [vmem:[#allocation326_spill] sm:$0xff] %v11321_v1  ;;  %v7190_v22 = vld [vmem:[#allocation10 + $0x78] sm:$0xf0]  ;;  %v9156_v31 = vld [vmem:[#allocation10 + $0x34] sm:$0xf0] }
 0x21b   : > { %4101 = vmatpush.bf16.msrb.mxu2 %v11309_v43  ;;  %4114 = vmatpush.bf16.msrb.mxu3 %v11311_v8  ;;  %13572 = vst [vmem:[#allocation327_spill] sm:$0xff] %v11325_v13  ;;  %v7446_v54 = vld [vmem:[#allocation10 + $0x278] sm:$0xf0]  ;;  %v7412_v27 = vld [vmem:[#allocation10 + $0x218] sm:$0xf]  ;;  %v11337_v51 = vor.u32 %v9160_v35, %v7190_v22 }
 0x21c   : > { %13573 = vst [vmem:[#allocation328_spill] sm:$0xff] %v11327_v44  ;;  %v9220_v41 = vld [vmem:[#allocation10 + $0x234] sm:$0xf0]  ;;  %v11339_v39 = vor.u32 %v9224_v0, %v7446_v54  ;;  %v9152_v8 = vld [vmem:[#allocation10 + $0x1c] sm:$0xf] }
 0x21d   : > { %13574 = vst [vmem:[#allocation329_spill] sm:$0xff] %v11331_v50  ;;  %v7158_v43 = vld [vmem:[#allocation10 + $0x38] sm:$0xf0]  ;;  %v8404_v49 = vld [vmem:[#allocation10 + $0x9d8] sm:$0xf]  ;;  %v11345_v35 = vor.u32 %v9220_v41, %v7412_v27 }
 0x21e   : > { %4024 = vmatpush.bf16.msra.mxu0 %v11319_v20  ;;  %4037 = vmatpush.bf16.msra.mxu1 %v11321_v1  ;;  %13575 = vst [vmem:[#allocation330_spill] sm:$0xff] %v11333_v36  ;;  %v9216_v20 = vld [vmem:[#allocation10 + $0x21c] sm:$0xf]  ;;  %v3848_v61 = vpop.f32.mrf.mxu2  ;;  %v3861_v1 = vpop.f32.mrf.mxu3  ;;  %v9468_v58 = vld [vmem:[#allocation10 + $0x9f4] sm:$0xf0] }
 0x21f   : > { %4102 = vmatpush.bf16.msrb.mxu2 %v11325_v13  ;;  %4115 = vmatpush.bf16.msrb.mxu3 %v11327_v44  ;;  %v8660_v23 = vld [vmem:[#allocation10 + $0xbd8] sm:$0xf]  ;;  %v11343_v44 = vor.u32 %v9156_v31, %v7156_v45  ;;  %13576 = vst [vmem:[#allocation331_spill] sm:$0xff] %v11345_v35  ;;  %v8406_v0 = vld [vmem:[#allocation10 + $0x9f8] sm:$0xf0]  ;;  %v11349_v61 = vor.u32 %v9152_v8, %v7158_v43 }
 0x220   : > { %v9532_v7 = vld [vmem:[#allocation10 + $0xbf4] sm:$0xf0]  ;;  %v9528_v22 = vld [vmem:[#allocation10 + $0xbdc] sm:$0xf]  ;;  %v11351_v1 = vor.u32 %v9216_v20, %v7414_v2  ;;  %v11353_v13 = vor.u32 %v9468_v58, %v8404_v49  ;;  %v11357_v31 = vor.u32 %v9464_v24, %v8406_v0 }
 0x221   : > { %v8662_v54 = vld [vmem:[#allocation10 + $0xbf8] sm:$0xf0]  ;;  %13577 = vst [vmem:[#allocation332_spill] sm:$0xff] %v11349_v61  ;;  %v9460_v45 = vld [vmem:[#allocation10 + $0x9b4] sm:$0xf0] }
 0x222   : > { %4025 = vmatpush.bf16.msra.mxu0 %v11331_v50  ;;  %4038 = vmatpush.bf16.msra.mxu1 %v11333_v36  ;;  %13578 = vst [vmem:[#allocation333_spill] sm:$0xff] %v11351_v1  ;;  %v11355_v50 = vor.u32 %v9532_v7, %v8660_v23  ;;  %v8372_v36 = vld [vmem:[#allocation10 + $0x998] sm:$0xf]  ;;  %v11359_v27 = vor.u32 %v9528_v22, %v8662_v54  ;;  %v8374_v43 = vld [vmem:[#allocation10 + $0x9b8] sm:$0xf0] }
 0x223   : > { %4103 = vmatpush.bf16.msrb.mxu2 %v11337_v51  ;;  %4116 = vmatpush.bf16.msrb.mxu3 %v11339_v39  ;;  %13579 = vst [vmem:[#allocation334_spill] sm:$0xff] %v11353_v13  ;;  %v8628_v41 = vld [vmem:[#allocation10 + $0xb98] sm:$0xf]  ;;  %v9520_v8 = vld [vmem:[#allocation10 + $0xb9c] sm:$0xf]  ;;  %v11367_v24 = vor.u32 %v9460_v45, %v8372_v36  ;;  %v11373_v58 = vor.u32 %v9456_v19, %v8374_v43 }
 0x224   : > { %13580 = vst [vmem:[#allocation335_spill] sm:$0xff] %v11355_v50  ;;  %v9524_v48 = vld [vmem:[#allocation10 + $0xbb4] sm:$0xf0]  ;;  %v8630_v20 = vld [vmem:[#allocation10 + $0xbb8] sm:$0xf0] }
 0x225   : > { %13581 = vst [vmem:[#allocation336_spill] sm:$0xff] %v11357_v31  ;;  %v11369_v7 = vor.u32 %v9524_v48, %v8628_v41  ;;  %v8340_v2 = vld [vmem:[#allocation10 + $0x958] sm:$0xf]  ;;  %v11375_v23 = vor.u32 %v9520_v8, %v8630_v20  ;;  %v9448_v54 = vld [vmem:[#allocation10 + $0x95c] sm:$0xf] }
 0x226   : > { %13582 = vst [vmem:[#allocation337_spill] sm:$0xff] %v11359_v27  ;;  %4026 = vmatpush.bf16.msra.mxu0 %v11343_v44  ;;  %4039 = vmatpush.bf16.msra.mxu1 %v11345_v35  ;;  %v9452_v49 = vld [vmem:[#allocation10 + $0x974] sm:$0xf0]  ;;  %v8342_v36 = vld [vmem:[#allocation10 + $0x978] sm:$0xf0] }
 0x227   : > { %4104 = vmatpush.bf16.msrb.mxu2 %v11349_v61  ;;  %4117 = vmatpush.bf16.msrb.mxu3 %v11351_v1  ;;  %13583 = vst [vmem:[#allocation338_spill] sm:$0xff] %v11367_v24  ;;  %v8596_v0 = vld [vmem:[#allocation10 + $0xb58] sm:$0xf]  ;;  %v9512_v48 = vld [vmem:[#allocation10 + $0xb5c] sm:$0xf]  ;;  %v11383_v19 = vor.u32 %v9452_v49, %v8340_v2  ;;  %v11389_v20 = vor.u32 %v9448_v54, %v8342_v36  ;;  %v3820_v2 = vpop.f32.mrf.mxu0  ;;  %v3833_v49 = vpop.f32.mrf.mxu1 }
 0x228   : > { %13584 = vst [vmem:[#allocation339_spill] sm:$0xff] %v11369_v7  ;;  %v9516_v22 = vld [vmem:[#allocation10 + $0xb74] sm:$0xf0]  ;;  %v8598_v45 = vld [vmem:[#allocation10 + $0xb78] sm:$0xf0] }
 0x229   : > { %13585 = vst [vmem:[#allocation340_spill] sm:$0xff] %v11373_v58  ;;  %4027 = vmatmul.bf16.vlgmr.msra.gmra.mxu0 %v10494_v11  ;;  %4040 = vmatmul.bf16.vlgmr.msra.gmra.mxu1 %v10496_v6  ;;  %v11385_v41 = vor.u32 %v9516_v22, %v8596_v0  ;;  %v8308_v43 = vld [vmem:[#allocation10 + $0x918] sm:$0xf]  ;;  %v3821_v0 = vadd.f32 %v3820_v2, %v11216_v59  ;;  %v8278_v1 = vld [vmem:[#allocation10 + $0x8f8] sm:$0xf0] }
 0x22a   : > { %4071 = vmatpush.bf16.msrb.mxu0 %v11353_v13  ;;  %4084 = vmatpush.bf16.msrb.mxu1 %v11355_v50  ;;  %13586 = vst [vmem:[#allocation341_spill] sm:$0xff] %v11375_v23  ;;  %v9444_v8 = vld [vmem:[#allocation10 + $0x934] sm:$0xf0]  ;;  %v9504_v50 = vld [vmem:[#allocation10 + $0xb1c] sm:$0xf] }
 0x22b   : > { %4149 = vmatpush.bf16.msra.mxu2 %v11357_v31  ;;  %4162 = vmatpush.bf16.msra.mxu3 %v11359_v27  ;;  %13587 = vst [vmem:[#allocation342_spill] sm:$0xff] %v11383_v19  ;;  %v11391_v27 = vor.u32 %v9512_v48, %v8598_v45  ;;  %v9440_v31 = vld [vmem:[#allocation10 + $0x91c] sm:$0xf]  ;;  %v11396_v22 = vor.u32 %v9444_v8, %v8308_v43  ;;  %v8276_v36 = vld [vmem:[#allocation10 + $0x8d8] sm:$0xf] }
 0x22c   : > { %4105 = vmatmul.bf16.vlgmr.msrb.gmra.mxu2 %v10494_v11  ;;  %4118 = vmatmul.bf16.vlgmr.msrb.gmra.mxu3 %v10496_v6  ;;  %13588 = vst [vmem:[#allocation343_spill] sm:$0xff] %v11385_v41  ;;  %v8564_v11 = vld [vmem:[#allocation10 + $0xb18] sm:$0xf]  ;;  %v9432_v13 = vld [vmem:[#allocation10 + $0x8dc] sm:$0xf] }
 0x22d   : > { %13589 = vst [vmem:[#allocation344_spill] sm:$0xff] %v11389_v20  ;;  %v9508_v6 = vld [vmem:[#allocation10 + $0xb34] sm:$0xf0]  ;;  %v9496_v59 = vld [vmem:[#allocation10 + $0xadc] sm:$0xf] }
 0x22e   : > { %4072 = vmatpush.bf16.msrb.mxu0 %v11367_v24  ;;  %4085 = vmatpush.bf16.msrb.mxu1 %v11369_v7  ;;  %13590 = vst [vmem:[#allocation345_spill] sm:$0xff] %v11391_v27  ;;  %v8310_v24 = vld [vmem:[#allocation10 + $0x938] sm:$0xf0]  ;;  %v11398_v54 = vor.u32 %v9508_v6, %v8564_v11  ;;  %v9436_v48 = vld [vmem:[#allocation10 + $0x8f4] sm:$0xf0] }
 0x22f   : > { %4150 = vmatpush.bf16.msra.mxu2 %v11373_v58  ;;  %4163 = vmatpush.bf16.msra.mxu3 %v11375_v23  ;;  %v8566_v7 = vld [vmem:[#allocation10 + $0xb38] sm:$0xf0]  ;;  %13591 = vst [vmem:[#allocation346_spill] sm:$0xff] %v11396_v22  ;;  %v11402_v45 = vor.u32 %v9440_v31, %v8310_v24  ;;  %v8532_v58 = vld [vmem:[#allocation10 + $0xad8] sm:$0xf]  ;;  %v11410_v6 = vor.u32 %v9436_v48, %v8276_v36  ;;  %v11423_v36 = vpop.f32.mrf.mxu3 }
 0x230   : > { %13592 = vst [vmem:[#allocation347_spill] sm:$0xff] %v11398_v54  ;;  %v11404_v23 = vor.u32 %v9504_v50, %v8566_v7  ;;  %v8534_v43 = vld [vmem:[#allocation10 + $0xaf8] sm:$0xf0]  ;;  %v4185_v8 = vmul.f32 0.01, %v11299_v28  ;;  %v11416_v7 = vor.u32 %v9432_v13, %v8278_v1 }
 0x231   : > { %13593 = vst [vmem:[#allocation348_spill] sm:$0xff] %v11402_v45  ;;  %v8244_v50 = vld [vmem:[#allocation10 + $0x898] sm:$0xf]  ;;  %v11418_v2 = vor.u32 %v9496_v59, %v8534_v43  ;;  %v8502_v48 = vld [vmem:[#allocation10 + $0xab8] sm:$0xf0] }
 0x232   : > { %4073 = vmatpush.bf16.msrb.mxu0 %v11383_v19  ;;  %4086 = vmatpush.bf16.msrb.mxu1 %v11385_v41  ;;  %13594 = vst [vmem:[#allocation349_spill] sm:$0xff] %v11404_v23  ;;  %v9500_v19 = vld [vmem:[#allocation10 + $0xaf4] sm:$0xf0]  ;;  %v3834_v41 = vadd.f32 %v3833_v49, %v3821_v0  ;;  %v7894_v61 = vld [vmem:[#allocation10 + $0x5f8] sm:$0xf0] }
 0x233   : > { %4151 = vmatpush.bf16.msra.mxu2 %v11389_v20  ;;  %4164 = vmatpush.bf16.msra.mxu3 %v11391_v27  ;;  %13595 = vst [vmem:[#allocation350_spill] sm:$0xff] %v11410_v6  ;;  %v11412_v31 = vor.u32 %v9500_v19, %v8532_v58  ;;  %v9428_v24 = vld [vmem:[#allocation10 + $0x8b4] sm:$0xf0]  ;;  %v8246_v58 = vld [vmem:[#allocation10 + $0x8b8] sm:$0xf0] }
 0x234   : > { %v3847_v11 = vadd.f32 %v11313_v53, %v3834_v41  ;;  %13597 = vst [vmem:[#allocation352_spill] sm:$0xff] %v11416_v7  ;;  %v8500_v49 = vld [vmem:[#allocation10 + $0xa98] sm:$0xf]  ;;  %v9424_v41 = vld [vmem:[#allocation10 + $0x89c] sm:$0xf]  ;;  %v11428_v59 = vor.u32 %v9428_v24, %v8244_v50 }
 0x235   : > { %13596 = vst [vmem:[#allocation351_spill] sm:$0xff] %v11412_v31  ;;  %v9492_v53 = vld [vmem:[#allocation10 + $0xab4] sm:$0xf0]  ;;  %v9488_v19 = vld [vmem:[#allocation10 + $0xa9c] sm:$0xf] }
 0x236   : > { %4074 = vmatpush.bf16.msrb.mxu0 %v11396_v22  ;;  %4087 = vmatpush.bf16.msrb.mxu1 %v11398_v54  ;;  %13598 = vst [vmem:[#allocation353_spill] sm:$0xff] %v11418_v2  ;;  %v3860_v0 = vadd.f32 %v11315_v30, %v3847_v11  ;;  %v11421_v54 = vpop.f32.mrf.mxu2  ;;  %v8212_v13 = vld [vmem:[#allocation10 + $0x858] sm:$0xf]  ;;  %v11430_v30 = vor.u32 %v9492_v53, %v8500_v49  ;;  %v9416_v27 = vld [vmem:[#allocation10 + $0x85c] sm:$0xf] }
 0x237   : > { %4152 = vmatpush.bf16.msra.mxu2 %v11402_v45  ;;  %4165 = vmatpush.bf16.msra.mxu3 %v11404_v23  ;;  %v3822_v45 = vpop.f32.mrf.mxu0  ;;  %v3835_v23 = vpop.f32.mrf.mxu1  ;;  %13599 = vst [vmem:[#allocation354_spill] sm:$0xff] %v11428_v59  ;;  %v9420_v43 = vld [vmem:[#allocation10 + $0x874] sm:$0xf0]  ;;  %v11434_v11 = vor.u32 %v9424_v41, %v8246_v58  ;;  %v8214_v24 = vld [vmem:[#allocation10 + $0x878] sm:$0xf0] }
 0x238   : > { %vm4178_vm12 = vcmp.ge.f32.partialorder %v3860_v0, 0.0  ;;  %v4186_v1 = vmul.f32 0.01, %v3860_v0  ;;  %13600 = vst [vmem:[#allocation355_spill] sm:$0xff] %v11430_v30  ;;  %v11436_v45 = vor.u32 %v9488_v19, %v8502_v48  ;;  %v8468_v23 = vld [vmem:[#allocation10 + $0xa58] sm:$0xf]  ;;  %v11444_v41 = vor.u32 %v9420_v43, %v8212_v13  ;;  %v3913_v13 = vpop.f32.mrf.mxu3 }
 0x239   : > { %13601 = vst [vmem:[#allocation356_spill] sm:$0xff] %v11434_v11  ;;  %v9484_v22 = vld [vmem:[#allocation10 + $0xa74] sm:$0xf0]  ;;  %v9480_v49 = vld [vmem:[#allocation10 + $0xa5c] sm:$0xf] }
 0x23a   : > { %4075 = vmatpush.bf16.msrb.mxu0 %v11410_v6  ;;  %4088 = vmatpush.bf16.msrb.mxu1 %v11412_v31  ;;  %v4193_v31 = vsel %vm4177_vm10, %v11299_v28, %v4185_v8  ;;  %v4194_v50 = vsel %vm4178_vm12, %v3860_v0, %v4186_v1  ;;  %v8470_v53 = vld [vmem:[#allocation10 + $0xa78] sm:$0xf0]  ;;  %v4927_v6 = vrot.slane %v11108_v34, 2  ;;  %v11446_v58 = vor.u32 %v9484_v22, %v8468_v23  ;;  %v9412_v19 = vld [vmem:[#allocation10 + $0x834] sm:$0xf0] }
 0x23b   : > { %4153 = vmatpush.bf16.msra.mxu2 %v11416_v7  ;;  %4166 = vmatpush.bf16.msra.mxu3 %v11418_v2  ;;  %v4200_v7 = vpack.c.bf16 %v4194_v50, %v4193_v31  ;;  %v8180_v2 = vld [vmem:[#allocation10 + $0x818] sm:$0xf]  ;;  %v11450_v31 = vor.u32 %v9416_v27, %v8214_v24  ;;  %v11452_v1 = vor.u32 %v9480_v49, %v8470_v53  ;;  %v9408_v50 = vld [vmem:[#allocation10 + $0x81c] sm:$0xf]  ;;  %vm4907_vm10 = vcmask 1041409  }
 0x23c   : > { %v8436_v48 = vld [vmem:[#allocation10 + $0xa18] sm:$0xf]  ;;  %v9472_v43 = vld [vmem:[#allocation10 + $0xa1c] sm:$0xf]  ;;  %v4932_v20 = vsel %vm1168_vm2, %v11108_v34, %v4927_v6  ;;  %vm4908_vm12 = vsmask.f32 7942 }
 0x23d   : > { %v9476_v28 = vld [vmem:[#allocation10 + $0xa34] sm:$0xf0]  ;;  %v4928_v8 = vrot.slane %v4200_v7, 4  ;;  %v4929_v0 = vrot.slane %v4200_v7, 6  ;;  %v8438_v22 = vld [vmem:[#allocation10 + $0xa38] sm:$0xf0] }
 0x23e   : > { %4076 = vmatpush.bf16.msrb.mxu0 %v11428_v59  ;;  %4089 = vmatpush.bf16.msrb.mxu1 %v11430_v30  ;;  %v8182_v59 = vld [vmem:[#allocation10 + $0x838] sm:$0xf0]  ;;  %v3900_v30 = vpop.f32.mrf.mxu2  ;;  %v11464_v24 = vor.u32 %v9476_v28, %v8436_v48  ;;  %v11470_v6 = vor.u32 %v9472_v43, %v8438_v22 }
 0x23f   : > { %4154 = vmatpush.bf16.msra.mxu2 %v11434_v11  ;;  %4167 = vmatpush.bf16.msra.mxu3 %v11436_v45  ;;  %v9336_v23 = vld [vmem:[#allocation10 + $0x5dc] sm:$0xf]  ;;  %v4936_v7 = vsel %vm13134_vm6, %v4928_v8, %v4929_v0  ;;  %v11462_v30 = vor.u32 %v9412_v19, %v8180_v2  ;;  %v11468_v34 = vor.u32 %v9408_v50, %v8182_v59 }
 0x240   : > { %v9400_v11 = vld [vmem:[#allocation10 + $0x7dc] sm:$0xf]  ;;  %v11458_v27 = vsel %vm13132_vm13, %v4932_v20, %v4936_v7  ;;  %v11472_v49 = vor.u32 %v9336_v23, %v7894_v61 }
 0x241   : > { %v8150_v35 = vld [vmem:[#allocation10 + $0x7f8] sm:$0xf0]  ;;  %13602 = vst [vmem:[#allocation357_spill] sm:$0xff] %v11458_v27 }
 0x242   : > { %4077 = vmatpush.bf16.msrb.mxu0 %v11444_v41  ;;  %4090 = vmatpush.bf16.msrb.mxu1 %v11446_v58  ;;  %v11474_v20 = vor.u32 %v9400_v11, %v8150_v35  ;;  %v9328_v53 = vld [vmem:[#allocation10 + $0x59c] sm:$0xf] }
 0x243   : > { %4155 = vmatpush.bf16.msra.mxu2 %v11450_v31  ;;  %4168 = vmatpush.bf16.msra.mxu3 %v11452_v1  ;;  %v7862_v8 = vld [vmem:[#allocation10 + $0x5b8] sm:$0xf0] }
 0x244   : > { %v9392_v0 = vld [vmem:[#allocation10 + $0x79c] sm:$0xf]  ;;  %v11482_v61 = vor.u32 %v9328_v53, %v7862_v8 }
 0x245   : > { %v8118_v13 = vld [vmem:[#allocation10 + $0x7b8] sm:$0xf0] }
 0x246   : > { %4078 = vmatpush.bf16.msrb.mxu0 %v11462_v30  ;;  %4091 = vmatpush.bf16.msrb.mxu1 %v11464_v24  ;;  %v11484_v35 = vor.u32 %v9392_v0, %v8118_v13  ;;  %v9320_v2 = vld [vmem:[#allocation10 + $0x55c] sm:$0xf]  ;;  %v3872_v22 = vpop.f32.mrf.mxu0  ;;  %v3885_v23 = vpop.f32.mrf.mxu1 }
 0x247   : > { %4156 = vmatpush.bf16.msra.mxu2 %v11468_v34  ;;  %4169 = vmatpush.bf16.msra.mxu3 %v11470_v6  ;;  %v7830_v59 = vld [vmem:[#allocation10 + $0x578] sm:$0xf0] }
 0x248   : > { %v9384_v11 = vld [vmem:[#allocation10 + $0x75c] sm:$0xf]  ;;  %v11494_v48 = vor.u32 %v9320_v2, %v7830_v59 }
 0x249   : > { %v8086_v19 = vld [vmem:[#allocation10 + $0x778] sm:$0xf0]  ;;  %4079 = vmatmul.bf16.vlgmr.msrb.gmra.mxu0 %v10546_v32  ;;  %4092 = vmatmul.bf16.vlgmr.msrb.gmra.mxu1 %v10548_v16 }
 0x24a   : > { %4123 = vmatpush.bf16.msra.mxu0 %v11472_v49  ;;  %4136 = vmatpush.bf16.msra.mxu1 %v11474_v20  ;;  %v9312_v50 = vld [vmem:[#allocation10 + $0x51c] sm:$0xf] }
 0x24b   : > { %4275 = vmatpush.bf16.msrb.mxu2 %v10143_v56  ;;  %4288 = vmatpush.bf16.msrb.mxu3 %v10145_v57  ;;  %v11496_v56 = vor.u32 %v9384_v11, %v8086_v19  ;;  %v11498_v57 = vld [vmem:[#allocation15] sm:$0xff]  ;;  %v9376_v43 = vld [vmem:[#allocation10 + $0x71c] sm:$0xf] }
 0x24c   : > { %4157 = vmatmul.bf16.vlgmr.msra.gmra.mxu2 %v10546_v32  ;;  %4170 = vmatmul.bf16.vlgmr.msra.gmra.mxu3 %v10548_v16  ;;  %v1619_v28 = vperm.slane %v11498_v57, 4  ;;  %v7798_v32 = vld [vmem:[#allocation10 + $0x538] sm:$0xf0]  ;;  %v1620_v59 = vperm.slane %v11498_v57, 5 }
 0x24d   : > { %v8054_v16 = vld [vmem:[#allocation10 + $0x738] sm:$0xf0]  ;;  %v11507_v53 = vor.u32 %v9312_v50, %v7798_v32 }
 0x24e   : > { %4124 = vmatpush.bf16.msra.mxu0 %v11482_v61  ;;  %4137 = vmatpush.bf16.msra.mxu1 %v11484_v35  ;;  %v3873_v7 = vadd.f32 %v3872_v22, %v1619_v28  ;;  %v11509_v8 = vor.u32 %v9376_v43, %v8054_v16  ;;  %v9304_v0 = vld [vmem:[#allocation10 + $0x4dc] sm:$0xf] }
 0x24f   : > { %4276 = vmatpush.bf16.msrb.mxu2 %v10148_v62  ;;  %4289 = vmatpush.bf16.msrb.mxu3 %v10152_v63  ;;  %v7766_v62 = vld [vmem:[#allocation10 + $0x4f8] sm:$0xf0]  ;;  %v3950_v22 = vpop.f32.mrf.mxu2 }
 0x250   : > { %v9368_v63 = vld [vmem:[#allocation10 + $0x6dc] sm:$0xf]  ;;  %v3886_v2 = vadd.f32 %v3885_v23, %v3873_v7  ;;  %v11517_v19 = vor.u32 %v9304_v0, %v7766_v62  ;;  %v3963_v23 = vpop.f32.mrf.mxu3  ;;  %v3951_v7 = vadd.f32 %v3950_v22, %v1620_v59  ;;  %v3874_v0 = vpop.f32.mrf.mxu0 }
 0x251   : > { %v8022_v13 = vld [vmem:[#allocation10 + $0x6f8] sm:$0xf0]  ;;  %v3887_v62 = vpop.f32.mrf.mxu1 }
 0x252   : > { %4125 = vmatpush.bf16.msra.mxu0 %v11494_v48  ;;  %4138 = vmatpush.bf16.msra.mxu1 %v11496_v56  ;;  %v3899_v11 = vadd.f32 %v11421_v54, %v3886_v2  ;;  %v11519_v50 = vor.u32 %v9368_v63, %v8022_v13  ;;  %v9296_v32 = vld [vmem:[#allocation10 + $0x49c] sm:$0xf] }
 0x253   : > { %4277 = vmatpush.bf16.msrb.mxu2 %v10159_v3  ;;  %4290 = vmatpush.bf16.msrb.mxu3 %v10161_v5  ;;  %v4204_v3 = vld [vmem:[#allocation2] sm:$0x33]  ;;  %v7734_v5 = vld [vmem:[#allocation10 + $0x4b8] sm:$0xf0] }
 0x254   : > { %v9360_v43 = vld [vmem:[#allocation10 + $0x69c] sm:$0xf]  ;;  %v11524_v54 = vadd.f32 %v11423_v36, %v3899_v11  ;;  %v4212_v63 = vunpack.c.l.b16 %v4204_v3  ;;  %v4213_v13 = vunpack.c.h.b16 %v4204_v3  ;;  %v11536_v36 = vadd.f32 %v3963_v23, %v3951_v7 }
 0x255   : > { %v7990_v16 = vld [vmem:[#allocation10 + $0x6b8] sm:$0xf0] }
 0x256   : > { %4126 = vmatpush.bf16.msra.mxu0 %v11507_v53  ;;  %4139 = vmatpush.bf16.msra.mxu1 %v11509_v8  ;;  %v9288_v2 = vld [vmem:[#allocation10 + $0x45c] sm:$0xf]  ;;  %v4214_v62 = vpack.c.b16 %v4212_v63, %v4212_v63  ;;  %v4215_v3 = vpack.c.b16 %v4213_v13, %v4213_v13 }
 0x257   : > { %4278 = vmatpush.bf16.msrb.mxu2 %v10165_v12  ;;  %4291 = vmatpush.bf16.msrb.mxu3 %v10167_v10  ;;  %v11530_v12 = vor.u32 %v9296_v32, %v7734_v5  ;;  %v11532_v10 = vor.u32 %v9360_v43, %v7990_v16  ;;  %v7702_v11 = vld [vmem:[#allocation10 + $0x478] sm:$0xf0]  ;;  %v3952_v23 = vpop.f32.mrf.mxu2 }
 0x258   : > { %v9352_v22 = vld [vmem:[#allocation10 + $0x65c] sm:$0xf]  ;;  %v11540_v32 = vor.u32 %v9288_v2, %v7702_v11  ;;  %v3965_v7 = vpop.f32.mrf.mxu3  ;;  %v4219_v63 = vshll.u32 %v4214_v62, 16  ;;  %v4226_v13 = vshll.u32 %v4215_v3, 16 }
 0x259   : > { %v7958_v0 = vld [vmem:[#allocation10 + $0x678] sm:$0xf0] }
 0x25a   : > { %4127 = vmatpush.bf16.msra.mxu0 %v11517_v19  ;;  %4140 = vmatpush.bf16.msra.mxu1 %v11519_v50  ;;  %v11542_v5 = vor.u32 %v9352_v22, %v7958_v0  ;;  %v9280_v43 = vld [vmem:[#allocation10 + $0x41c] sm:$0xf]  ;;  %v4217_v22 = vshrl.u32 %v4214_v62, 16  ;;  %v4224_v0 = vshrl.u32 %v4215_v3, 16  ;;  %v13611_v3 = vld [vmem:[#allocation30_spill] sm:$0xff] }
 0x25b   : > { %4279 = vmatpush.bf16.msrb.mxu2 %v10170_v14  ;;  %4292 = vmatpush.bf16.msrb.mxu3 %v10173_v15  ;;  %v7670_v14 = vld [vmem:[#allocation10 + $0x438] sm:$0xf0] }
 0x25c   : > { %v9344_v15 = vld [vmem:[#allocation10 + $0x61c] sm:$0xf]  ;;  %v11548_v2 = vor.u32 %v9280_v43, %v7670_v14 }
 0x25d   : > { %v7926_v16 = vld [vmem:[#allocation10 + $0x638] sm:$0xf0] }
 0x25e   : > { %4128 = vmatpush.bf16.msra.mxu0 %v11530_v12  ;;  %4141 = vmatpush.bf16.msra.mxu1 %v11532_v10  ;;  %v11550_v11 = vor.u32 %v9344_v15, %v7926_v16  ;;  %v13609_v62 = vld [vmem:[#allocation28_spill] sm:$0xff]  ;;  %v13612_v43 = vld [vmem:[#allocation31_spill] sm:$0xff]  ;;  %v13614_v15 = vld [vmem:[#allocation33_spill] sm:$0xff] }
 0x25f   : > { %4280 = vmatpush.bf16.msrb.mxu2 %v10177_v18  ;;  %4293 = vmatpush.bf16.msrb.mxu3 %v10179_v21  ;;  %v4221_v18 = vrot.slane %v4219_v63, 1  ;;  %v4228_v21 = vrot.slane %v4226_v13, 1  ;;  %v13613_v14 = vld [vmem:[#allocation32_spill] sm:$0xff]  ;;  %v13615_v16 = vld [vmem:[#allocation34_spill] sm:$0xff]  ;;  %v13616_v23 = vld [vmem:[#allocation35_spill] sm:$0xff] }
 0x260   : > { %v13617_v13 = vld [vmem:[#allocation36_spill] sm:$0xff] }
 0x262   : > { %4129 = vmatpush.bf16.msra.mxu0 %v11540_v32  ;;  %4142 = vmatpush.bf16.msra.mxu1 %v11542_v5 }
 0x263   : > { %4281 = vmatpush.bf16.msrb.mxu2 %v10183_v26  ;;  %4294 = vmatpush.bf16.msrb.mxu3 %v10187_v29  ;;  %v11562_v26 = vor.u32 %v4221_v18, %v4217_v22  ;;  %v11564_v29 = vor.u32 %v4228_v21, %v4224_v0  ;;  %v13618_v18 = vld [vmem:[#allocation37_spill] sm:$0xff]  ;;  %v13619_v21 = vld [vmem:[#allocation38_spill] sm:$0xff]  ;;  %v13620_v22 = vld [vmem:[#allocation39_spill] sm:$0xff] }
 0x264   : > { %v13621_v0 = vld [vmem:[#allocation40_spill] sm:$0xff] }
 0x266   : > { %4130 = vmatpush.bf16.msra.mxu0 %v11548_v2  ;;  %4143 = vmatpush.bf16.msra.mxu1 %v11550_v11 }
 0x267   : > { %4282 = vmatpush.bf16.msrb.mxu2 %v10191_v33  ;;  %4295 = vmatpush.bf16.msrb.mxu3 %v10193_v37  ;;  %v3924_v33 = vpop.f32.mrf.mxu0  ;;  %v3937_v37 = vpop.f32.mrf.mxu1 }
 0x269   : > { %4131 = vmatmul.bf16.vlgmr.msra.gmra.mxu0 %v10375_v4  ;;  %4144 = vmatmul.bf16.vlgmr.msra.gmra.mxu1 %v10377_v40 }
 0x26a   : > { %4249 = vmatpush.bf16.msrb.mxu0 %v10195_v38  ;;  %4262 = vmatpush.bf16.msrb.mxu1 %v10198_v42  ;;  %v3925_v38 = vadd.f32 %v3924_v33, %v11524_v54  ;;  %v13603_v42 = vld [vmem:[#allocation22_spill] sm:$0xff]  ;;  %v13610_v54 = vld [vmem:[#allocation29_spill] sm:$0xff] }
 0x26b   : > { %4327 = vmatpush.bf16.msra.mxu2 %v10202_v46  ;;  %4340 = vmatpush.bf16.msra.mxu3 %v10204_v47  ;;  %v13604_v46 = vld [vmem:[#allocation23_spill] sm:$0xff]  ;;  %v13622_v33 = vld [vmem:[#allocation41_spill] sm:$0xff] }
 0x26c   : > { %4283 = vmatmul.bf16.vlgmr.msrb.gmra.mxu2 %v11562_v26  ;;  %4296 = vmatmul.bf16.vlgmr.msrb.gmra.mxu3 %v11564_v29  ;;  %v11579_v47 = vadd.f32 %v3937_v37, %v3925_v38  ;;  %v13623_v37 = vld [vmem:[#allocation42_spill] sm:$0xff]  ;;  %v13624_v38 = vld [vmem:[#allocation43_spill] sm:$0xff] }
 0x26e   : > { %4250 = vmatpush.bf16.msrb.mxu0 %v10213_v55  ;;  %4263 = vmatpush.bf16.msrb.mxu1 %v10215_v60  ;;  %v13605_v55 = vld [vmem:[#allocation24_spill] sm:$0xff]  ;;  %v13606_v60 = vld [vmem:[#allocation25_spill] sm:$0xff]  ;;  %vm4179_vm14 = vcmp.ge.f32.partialorder %v11579_v47, 0.0 }
 0x26f   : > { %4328 = vmatpush.bf16.msra.mxu2 %v10222_v52  ;;  %4341 = vmatpush.bf16.msra.mxu3 %v10224_v25  ;;  %v13607_v52 = vld [vmem:[#allocation26_spill] sm:$0xff]  ;;  %v13608_v25 = vld [vmem:[#allocation27_spill] sm:$0xff]  ;;  %v4002_v4 = vpop.f32.mrf.mxu2  ;;  %v3926_v40 = vpop.f32.mrf.mxu0 }
 0x270   : > { %v13631_v40 = vld [vmem:[#allocation46_spill] sm:$0xff] }
 0x272   : > { %4251 = vmatpush.bf16.msrb.mxu0 %v10229_v9  ;;  %4264 = vmatpush.bf16.msrb.mxu1 %v10231_v17  ;;  %v4015_v9 = vpop.f32.mrf.mxu3  ;;  %v3939_v17 = vpop.f32.mrf.mxu1 }
 0x273   : > { %4329 = vmatpush.bf16.msra.mxu2 %v13603_v42  ;;  %4342 = vmatpush.bf16.msra.mxu3 %v13604_v46  ;;  %v13625_v42 = vld [vmem:[#allocation44_spill] sm:$0xff]  ;;  %v13626_v46 = vld [vmem:[#allocation45_spill] sm:$0xff]  ;;  %v13632_v17 = vld [vmem:[#allocation47_spill] sm:$0xff] }
 0x276   : > { %4252 = vmatpush.bf16.msrb.mxu0 %v13605_v55  ;;  %4265 = vmatpush.bf16.msrb.mxu1 %v13606_v60  ;;  %v13627_v55 = vld [vmem:[#allocation52_spill] sm:$0xff]  ;;  %v13628_v60 = vld [vmem:[#allocation53_spill] sm:$0xff] }
 0x277   : > { %4330 = vmatpush.bf16.msra.mxu2 %v13607_v52  ;;  %4343 = vmatpush.bf16.msra.mxu3 %v13608_v25  ;;  %v4004_v7 = vpop.f32.mrf.mxu2  ;;  %v13629_v52 = vld [vmem:[#allocation64_spill] sm:$0xff]  ;;  %v13630_v25 = vld [vmem:[#allocation65_spill] sm:$0xff] }
 0x278   : > { %v13638_v7 = vld [vmem:[#allocation61_spill] sm:$0xff] }
 0x27a   : > { %4253 = vmatpush.bf16.msrb.mxu0 %v13609_v62  ;;  %4266 = vmatpush.bf16.msrb.mxu1 %v13610_v54  ;;  %v4017_v63 = vpop.f32.mrf.mxu3  ;;  %v13633_v62 = vld [vmem:[#allocation55_spill] sm:$0xff]  ;;  %v13634_v54 = vld [vmem:[#allocation56_spill] sm:$0xff] }
 0x27b   : > { %4331 = vmatpush.bf16.msra.mxu2 %v13611_v3  ;;  %4344 = vmatpush.bf16.msra.mxu3 %v13612_v43 }
 0x27e   : > { %4254 = vmatpush.bf16.msrb.mxu0 %v13613_v14  ;;  %4267 = vmatpush.bf16.msrb.mxu1 %v13614_v15  ;;  %v13635_v14 = vld [vmem:[#allocation48_spill] sm:$0xff]  ;;  %v13636_v15 = vld [vmem:[#allocation49_spill] sm:$0xff] }
 0x27f   : > { %4332 = vmatpush.bf16.msra.mxu2 %v13615_v16  ;;  %4345 = vmatpush.bf16.msra.mxu3 %v13616_v23  ;;  %v13637_v23 = vld [vmem:[#allocation60_spill] sm:$0xff] }
 0x282   : > { %4255 = vmatpush.bf16.msrb.mxu0 %v13617_v13  ;;  %4268 = vmatpush.bf16.msrb.mxu1 %v13618_v18  ;;  %v13639_v18 = vld [vmem:[#allocation50_spill] sm:$0xff] }
 0x283   : > { %4333 = vmatpush.bf16.msra.mxu2 %v13619_v21  ;;  %4346 = vmatpush.bf16.msra.mxu3 %v13620_v22  ;;  %v13640_v21 = vld [vmem:[#allocation51_spill] sm:$0xff]  ;;  %v13641_v22 = vld [vmem:[#allocation66_spill] sm:$0xff] }
 0x286   : > { %4256 = vmatpush.bf16.msrb.mxu0 %v13621_v0  ;;  %4269 = vmatpush.bf16.msrb.mxu1 %v13622_v33  ;;  %v3976_v3 = vpop.f32.mrf.mxu0  ;;  %v3989_v43 = vpop.f32.mrf.mxu1  ;;  %v13642_v0 = vld [vmem:[#allocation67_spill] sm:$0xff]  ;;  %v4187_v33 = vmul.f32 0.01, %v11579_v47 }
 0x287   : > { %4334 = vmatpush.bf16.msra.mxu2 %v13623_v37  ;;  %4347 = vmatpush.bf16.msra.mxu3 %v13624_v38  ;;  %v3977_v16 = vadd.f32 %v3976_v3, %v11536_v36  ;;  %v4233_v3 = vld.sshfl [vmem:[#allocation1] sm:$0xff pattern:$0x73625140] }
 0x289   : > { %4257 = vmatmul.bf16.vlgmr.msrb.gmra.mxu0 %v13629_v52  ;;  %4270 = vmatmul.bf16.vlgmr.msrb.gmra.mxu1 %v13630_v25  ;;  %v3990_v63 = vadd.f32 %v3989_v43, %v3977_v16  ;;  %v4234_v43 = vld.sshfl [vmem:[#allocation1 + $0x8] sm:$0xff pattern:$0x73625140]  ;;  %v13649_v16 = vld [vmem:[#allocation74_spill] sm:$0xff] }
 0x28a   : > { %4301 = vmatpush.bf16.msra.mxu0 %v13625_v42  ;;  %4314 = vmatpush.bf16.msra.mxu1 %v13626_v46 }
 0x28b   : > { %4379 = vmatpush.bf16.msrb.mxu2 %v13627_v55  ;;  %4392 = vmatpush.bf16.msrb.mxu3 %v13628_v60  ;;  %v4003_v13 = vadd.f32 %v4002_v4, %v3990_v63  ;;  %v13643_v55 = vld [vmem:[#allocation54_spill] sm:$0xff]  ;;  %v13644_v60 = vld [vmem:[#allocation57_spill] sm:$0xff] }
 0x28c   : > { %4335 = vmatmul.bf16.vlgmr.msra.gmra.mxu2 %v13629_v52  ;;  %4348 = vmatmul.bf16.vlgmr.msra.gmra.mxu3 %v13630_v25 }
 0x28d   : > { %v4016_v37 = vadd.f32 %v4015_v9, %v4003_v13  ;;  %v4237_v13 = vshll.u32 %v4233_v3, 16 }
 0x28e   : > { %4302 = vmatpush.bf16.msra.mxu0 %v13631_v40  ;;  %4315 = vmatpush.bf16.msra.mxu1 %v13632_v17  ;;  %v3978_v36 = vpop.f32.mrf.mxu0  ;;  %v3991_v46 = vpop.f32.mrf.mxu1  ;;  %v13645_v40 = vld [vmem:[#allocation71_spill] sm:$0xff]  ;;  %v13646_v17 = vld [vmem:[#allocation72_spill] sm:$0xff] }
 0x28f   : > { %4380 = vmatpush.bf16.msrb.mxu2 %v13633_v62  ;;  %4393 = vmatpush.bf16.msrb.mxu3 %v13634_v54  ;;  %v4054_v38 = vpop.f32.mrf.mxu2  ;;  %v11623_v42 = vpop.f32.mrf.mxu3  ;;  %vm4180_vm4 = vcmp.ge.f32.partialorder %v4016_v37, 0.0  ;;  %v4188_v4 = vmul.f32 0.01, %v4016_v37  ;;  %v4195_v62 = vsel %vm4179_vm14, %v11579_v47, %v4187_v33  ;;  %v13652_v47 = vld [vmem:[#allocation69_spill] sm:$0xff]  ;;  %v4239_v33 = vrot.slane %v4237_v13, 1  ;;  %v13655_v36 = vld [vmem:[#allocation70_spill] sm:$0xff] }
 0x290   : > { %v13656_v46 = vld [vmem:[#allocation73_spill] sm:$0xff]  ;;  %vm4910_vm14 = vcmask 1043459  }
 0x291   : > { %v4196_v9 = vsel %vm4180_vm4, %v4016_v37, %v4188_v4  ;;  %v4235_v4 = vshrl.u32 %v4233_v3, 16  ;;  %v13663_v3 = vld [vmem:[#allocation84_spill] sm:$0xff]  ;;  %vm4911_vm4 = vsmask.f32 7950 }
 0x292   : > { %4303 = vmatpush.bf16.msra.mxu0 %v13635_v14  ;;  %4316 = vmatpush.bf16.msra.mxu1 %v13636_v15  ;;  %v11631_v54 = vpack.c.bf16 %v4196_v9, %v4195_v62  ;;  %v13647_v14 = vld [vmem:[#allocation62_spill] sm:$0xff]  ;;  %v13648_v15 = vld [vmem:[#allocation63_spill] sm:$0xff]  ;;  %v13660_v62 = vld [vmem:[#allocation81_spill] sm:$0xff] }
 0x293   : > { %4381 = vmatpush.bf16.msrb.mxu2 %v13637_v23  ;;  %4394 = vmatpush.bf16.msrb.mxu3 %v13638_v7  ;;  %v13650_v23 = vld [vmem:[#allocation75_spill] sm:$0xff]  ;;  %v11647_v9 = vor.u32 %v4239_v33, %v4235_v4  ;;  %v13671_v4 = vld [vmem:[#allocation92_spill] sm:$0xff] }
 0x294   : > { %v13670_v33 = vld [vmem:[#allocation91_spill] sm:$0xff] }
 0x296   : > { %4304 = vmatpush.bf16.msra.mxu0 %v13639_v18  ;;  %4317 = vmatpush.bf16.msra.mxu1 %v13640_v21  ;;  %v4243_v18 = vshll.u32 %v4234_v43, 16  ;;  %v13651_v21 = vld [vmem:[#allocation68_spill] sm:$0xff] }
 0x297   : > { %4382 = vmatpush.bf16.msrb.mxu2 %v13641_v22  ;;  %4395 = vmatpush.bf16.msrb.mxu3 %v13642_v0  ;;  %v4056_v7 = vpop.f32.mrf.mxu2  ;;  %v4069_v63 = vpop.f32.mrf.mxu3  ;;  %v13653_v22 = vld [vmem:[#allocation76_spill] sm:$0xff]  ;;  %v13654_v0 = vld [vmem:[#allocation77_spill] sm:$0xff] }
 0x298   : > { %v4245_v37 = vrot.slane %v4243_v18, 1  ;;  %v13665_v7 = vld [vmem:[#allocation86_spill] sm:$0xff]  ;;  %v13666_v63 = vld [vmem:[#allocation87_spill] sm:$0xff] }
 0x29a   : > { %4305 = vmatpush.bf16.msra.mxu0 %v13643_v55  ;;  %4318 = vmatpush.bf16.msra.mxu1 %v13644_v60  ;;  %v4241_v55 = vshrl.u32 %v4234_v43, 16  ;;  %v13657_v60 = vld [vmem:[#allocation78_spill] sm:$0xff]  ;;  %v13664_v43 = vld [vmem:[#allocation85_spill] sm:$0xff] }
 0x29b   : > { %4383 = vmatpush.bf16.msrb.mxu2 %v13645_v40  ;;  %4396 = vmatpush.bf16.msrb.mxu3 %v13646_v17  ;;  %v13658_v40 = vld [vmem:[#allocation79_spill] sm:$0xff]  ;;  %v13659_v17 = vld [vmem:[#allocation80_spill] sm:$0xff] }
 0x29e   : > { %4306 = vmatpush.bf16.msra.mxu0 %v13647_v14  ;;  %4319 = vmatpush.bf16.msra.mxu1 %v13648_v15  ;;  %v11649_v14 = vor.u32 %v4245_v37, %v4241_v55  ;;  %v13661_v15 = vld [vmem:[#allocation82_spill] sm:$0xff]  ;;  %v13672_v55 = vld [vmem:[#allocation93_spill] sm:$0xff] }
 0x29f   : > { %4384 = vmatpush.bf16.msrb.mxu2 %v13649_v16  ;;  %4397 = vmatpush.bf16.msrb.mxu3 %v13650_v23  ;;  %v13662_v16 = vld [vmem:[#allocation83_spill] sm:$0xff]  ;;  %v1621_v23 = vperm.slane %v11498_v57, 6 }
 0x2a2   : > { %4307 = vmatpush.bf16.msra.mxu0 %v13651_v21  ;;  %4320 = vmatpush.bf16.msra.mxu1 %v13652_v47  ;;  %v13667_v21 = vld [vmem:[#allocation88_spill] sm:$0xff]  ;;  %v13668_v47 = vld [vmem:[#allocation89_spill] sm:$0xff] }
 0x2a3   : > { %4385 = vmatpush.bf16.msrb.mxu2 %v13653_v22  ;;  %4398 = vmatpush.bf16.msrb.mxu3 %v13654_v0  ;;  %v13669_v0 = vld [vmem:[#allocation90_spill] sm:$0xff] }
 0x2a6   : > { %4308 = vmatpush.bf16.msra.mxu0 %v13655_v36  ;;  %4321 = vmatpush.bf16.msra.mxu1 %v13656_v46  ;;  %v4028_v13 = vpop.f32.mrf.mxu0  ;;  %v4041_v18 = vpop.f32.mrf.mxu1  ;;  %v1622_v36 = vperm.slane %v11498_v57, 7  ;;  %v12214_v57 = vld [vmem:[#allocation12 + $0x178] sm:$0xff] }
 0x2a7   : > { %4386 = vmatpush.bf16.msrb.mxu2 %v13657_v60  ;;  %4399 = vmatpush.bf16.msrb.mxu3 %v13658_v40  ;;  %v4029_v22 = vadd.f32 %v4028_v13, %v1621_v23  ;;  %v13673_v60 = vld [vmem:[#allocation94_spill] sm:$0xff]  ;;  %v13674_v40 = vld [vmem:[#allocation95_spill] sm:$0xff] }
 0x2a8   : > { %v13678_v13 = vld [vmem:[#allocation99_spill] sm:$0xff] }
 0x2a9   : > { %4309 = vmatmul.bf16.vlgmr.msra.gmra.mxu0 %v11647_v9  ;;  %4322 = vmatmul.bf16.vlgmr.msra.gmra.mxu1 %v11649_v14  ;;  %v4042_v37 = vadd.f32 %v4041_v18, %v4029_v22  ;;  %v13682_v22 = vld [vmem:[#allocation103_spill] sm:$0xff] }
 0x2aa   : > { %4353 = vmatpush.bf16.msrb.mxu0 %v13659_v17  ;;  %4366 = vmatpush.bf16.msrb.mxu1 %v13660_v62 }
 0x2ab   : > { %4431 = vmatpush.bf16.msra.mxu2 %v13661_v15  ;;  %4444 = vmatpush.bf16.msra.mxu3 %v13662_v16  ;;  %v4055_v46 = vadd.f32 %v4054_v38, %v4042_v37  ;;  %v13676_v38 = vld [vmem:[#allocation97_spill] sm:$0xff]  ;;  %v13683_v37 = vld [vmem:[#allocation104_spill] sm:$0xff] }
 0x2ac   : > { %4387 = vmatmul.bf16.vlgmr.msrb.gmra.mxu2 %v11647_v9  ;;  %4400 = vmatmul.bf16.vlgmr.msrb.gmra.mxu3 %v11649_v14 }
 0x2ad   : > { %v4068_v15 = vadd.f32 %v11623_v42, %v4055_v46  ;;  %v13681_v42 = vld [vmem:[#allocation102_spill] sm:$0xff]  ;;  %v13684_v46 = vld [vmem:[#allocation105_spill] sm:$0xff] }
 0x2ae   : > { %4354 = vmatpush.bf16.msrb.mxu0 %v13663_v3  ;;  %4367 = vmatpush.bf16.msrb.mxu1 %v13664_v43  ;;  %v4030_v3 = vpop.f32.mrf.mxu0  ;;  %v4043_v43 = vpop.f32.mrf.mxu1 }
 0x2af   : > { %4432 = vmatpush.bf16.msra.mxu2 %v13665_v7  ;;  %4445 = vmatpush.bf16.msra.mxu3 %v13666_v63  ;;  %v4106_v17 = vpop.f32.mrf.mxu2  ;;  %v4119_v62 = vpop.f32.mrf.mxu3  ;;  %v13675_v7 = vld [vmem:[#allocation96_spill] sm:$0xff]  ;;  %v13677_v63 = vld [vmem:[#allocation98_spill] sm:$0xff]  ;;  %v13692_v3 = vld [vmem:[#allocation113_spill] sm:$0xff] }
 0x2b0   : > { %v4107_v16 = vadd.f32 %v4106_v17, %v1622_v36  ;;  %v13689_v17 = vld [vmem:[#allocation110_spill] sm:$0xff] }
 0x2b1   : > { %v13693_v43 = vld [vmem:[#allocation114_spill] sm:$0xff] }
 0x2b2   : > { %4355 = vmatpush.bf16.msrb.mxu0 %v13667_v21  ;;  %4368 = vmatpush.bf16.msrb.mxu1 %v13668_v47  ;;  %v11680_v18 = vadd.f32 %v4119_v62, %v4107_v16  ;;  %v13679_v21 = vld [vmem:[#allocation100_spill] sm:$0xff]  ;;  %v13680_v47 = vld [vmem:[#allocation101_spill] sm:$0xff]  ;;  %v13690_v62 = vld [vmem:[#allocation111_spill] sm:$0xff] }
 0x2b3   : > { %4433 = vmatpush.bf16.msra.mxu2 %v13669_v0  ;;  %4446 = vmatpush.bf16.msra.mxu3 %v13670_v33  ;;  %v13691_v16 = vld [vmem:[#allocation112_spill] sm:$0xff] }
 0x2b6   : > { %4356 = vmatpush.bf16.msrb.mxu0 %v13671_v4  ;;  %4369 = vmatpush.bf16.msrb.mxu1 %v13672_v55  ;;  %v13685_v4 = vld [vmem:[#allocation106_spill] sm:$0xff]  ;;  %v13686_v55 = vld [vmem:[#allocation107_spill] sm:$0xff] }
 0x2b7   : > { %4434 = vmatpush.bf16.msra.mxu2 %v13673_v60  ;;  %4447 = vmatpush.bf16.msra.mxu3 %v13674_v40  ;;  %v4108_v0 = vpop.f32.mrf.mxu2  ;;  %v4121_v33 = vpop.f32.mrf.mxu3  ;;  %v13687_v60 = vld [vmem:[#allocation108_spill] sm:$0xff]  ;;  %v13688_v40 = vld [vmem:[#allocation109_spill] sm:$0xff] }
 0x2b8   : > { %v13700_v0 = vld [vmem:[#allocation121_spill] sm:$0xff] }
 0x2ba   : > { %4357 = vmatpush.bf16.msrb.mxu0 %v13675_v7  ;;  %4370 = vmatpush.bf16.msrb.mxu1 %v13676_v38  ;;  %v13694_v7 = vld [vmem:[#allocation115_spill] sm:$0xff]  ;;  %v13695_v38 = vld [vmem:[#allocation116_spill] sm:$0xff] }
 0x2bb   : > { %4435 = vmatpush.bf16.msra.mxu2 %v13677_v63  ;;  %4448 = vmatpush.bf16.msra.mxu3 %v13678_v13  ;;  %v13696_v63 = vld [vmem:[#allocation117_spill] sm:$0xff]  ;;  %v13697_v13 = vld [vmem:[#allocation118_spill] sm:$0xff] }
 0x2be   : > { %4358 = vmatpush.bf16.msrb.mxu0 %v13679_v21  ;;  %4371 = vmatpush.bf16.msrb.mxu1 %v13680_v47  ;;  %v13698_v21 = vld [vmem:[#allocation119_spill] sm:$0xff] }
 0x2bf   : > { %4436 = vmatpush.bf16.msra.mxu2 %v13681_v42  ;;  %4449 = vmatpush.bf16.msra.mxu3 %v13682_v22  ;;  %v13699_v22 = vld [vmem:[#allocation120_spill] sm:$0xff] }
 0x2c2   : > { %4359 = vmatpush.bf16.msrb.mxu0 %v13683_v37  ;;  %4372 = vmatpush.bf16.msrb.mxu1 %v13684_v46  ;;  %v13701_v37 = vld [vmem:[#allocation122_spill] sm:$0xff]  ;;  %v13702_v46 = vld [vmem:[#allocation123_spill] sm:$0xff] }
 0x2c3   : > { %4437 = vmatpush.bf16.msra.mxu2 %v13685_v4  ;;  %4450 = vmatpush.bf16.msra.mxu3 %v13686_v55  ;;  %v13703_v55 = vld [vmem:[#allocation124_spill] sm:$0xff] }
 0x2c6   : > { %4360 = vmatpush.bf16.msrb.mxu0 %v13687_v60  ;;  %4373 = vmatpush.bf16.msrb.mxu1 %v13688_v40  ;;  %v4080_v47 = vpop.f32.mrf.mxu0  ;;  %v4093_v42 = vpop.f32.mrf.mxu1  ;;  %v13704_v60 = vld [vmem:[#allocation125_spill] sm:$0xff]  ;;  %v13705_v40 = vld [vmem:[#allocation126_spill] sm:$0xff] }
 0x2c7   : > { %4438 = vmatpush.bf16.msra.mxu2 %v13689_v17  ;;  %4451 = vmatpush.bf16.msra.mxu3 %v13690_v62  ;;  %v4081_v33 = vadd.f32 %v4080_v47, %v4068_v15  ;;  %v13706_v17 = vld [vmem:[#allocation127_spill] sm:$0xff]  ;;  %v13708_v15 = vld [vmem:[#allocation129_spill] sm:$0xff]  ;;  %v13713_v47 = vld [vmem:[#allocation134_spill] sm:$0xff] }
 0x2c9   : > { %4361 = vmatmul.bf16.vlgmr.msrb.gmra.mxu0 %v11562_v26  ;;  %4374 = vmatmul.bf16.vlgmr.msrb.gmra.mxu1 %v11564_v29  ;;  %v11710_v4 = vadd.f32 %v4093_v42, %v4081_v33  ;;  %v13714_v42 = vld [vmem:[#allocation135_spill] sm:$0xff]  ;;  %v13715_v33 = vld [vmem:[#allocation136_spill] sm:$0xff] }
 0x2ca   : > { %4405 = vmatpush.bf16.msra.mxu0 %v13691_v16  ;;  %4418 = vmatpush.bf16.msra.mxu1 %v13692_v3 }
 0x2cb   : > { %4483 = vmatpush.bf16.msrb.mxu2 %v13693_v43  ;;  %4496 = vmatpush.bf16.msrb.mxu3 %v13694_v7  ;;  %v13707_v7 = vld [vmem:[#allocation128_spill] sm:$0xff]  ;;  %vm4181_vm5 = vcmp.ge.f32.partialorder %v11710_v4, 0.0 }
 0x2cc   : > { %4439 = vmatmul.bf16.vlgmr.msra.gmra.mxu2 %v11562_v26  ;;  %4452 = vmatmul.bf16.vlgmr.msra.gmra.mxu3 %v11564_v29 }
 0x2ce   : > { %4406 = vmatpush.bf16.msra.mxu0 %v13695_v38  ;;  %4419 = vmatpush.bf16.msra.mxu1 %v13696_v63  ;;  %v4082_v3 = vpop.f32.mrf.mxu0  ;;  %v4095_v43 = vpop.f32.mrf.mxu1  ;;  %v13709_v38 = vld [vmem:[#allocation130_spill] sm:$0xff]  ;;  %v13710_v63 = vld [vmem:[#allocation131_spill] sm:$0xff] }
 0x2cf   : > { %4484 = vmatpush.bf16.msrb.mxu2 %v13697_v13  ;;  %4497 = vmatpush.bf16.msrb.mxu3 %v13698_v21  ;;  %v4158_v62 = vpop.f32.mrf.mxu2  ;;  %v4171_v16 = vpop.f32.mrf.mxu3  ;;  %v13711_v13 = vld [vmem:[#allocation132_spill] sm:$0xff]  ;;  %v13712_v21 = vld [vmem:[#allocation133_spill] sm:$0xff]  ;;  %v13722_v3 = vld [vmem:[#allocation143_spill] sm:$0xff] }
 0x2d0   : > { %v13723_v43 = vld [vmem:[#allocation144_spill] sm:$0xff] }
 0x2d2   : > { %4407 = vmatpush.bf16.msra.mxu0 %v13699_v22  ;;  %4420 = vmatpush.bf16.msra.mxu1 %v13700_v0 }
 0x2d3   : > { %4485 = vmatpush.bf16.msrb.mxu2 %v13701_v37  ;;  %4498 = vmatpush.bf16.msrb.mxu3 %v13702_v46  ;;  %v13716_v37 = vld [vmem:[#allocation137_spill] sm:$0xff]  ;;  %v13717_v46 = vld [vmem:[#allocation138_spill] sm:$0xff] }
 0x2d6   : > { %4408 = vmatpush.bf16.msra.mxu0 %v13703_v55  ;;  %4421 = vmatpush.bf16.msra.mxu1 %v13704_v60  ;;  %v13718_v55 = vld [vmem:[#allocation139_spill] sm:$0xff]  ;;  %v13719_v60 = vld [vmem:[#allocation140_spill] sm:$0xff] }
 0x2d7   : > { %4486 = vmatpush.bf16.msrb.mxu2 %v13705_v40  ;;  %4499 = vmatpush.bf16.msrb.mxu3 %v13706_v17  ;;  %v4160_v22 = vpop.f32.mrf.mxu2  ;;  %v4173_v0 = vpop.f32.mrf.mxu3  ;;  %v13720_v40 = vld [vmem:[#allocation141_spill] sm:$0xff]  ;;  %v13721_v17 = vld [vmem:[#allocation142_spill] sm:$0xff] }
 0x2d8   : > { %v13731_v0 = vld [vmem:[#allocation152_spill] sm:$0xff] }
 0x2da   : > { %4409 = vmatpush.bf16.msra.mxu0 %v13707_v7  ;;  %4422 = vmatpush.bf16.msra.mxu1 %v13708_v15  ;;  %v13724_v7 = vld [vmem:[#allocation145_spill] sm:$0xff]  ;;  %v13725_v15 = vld [vmem:[#allocation146_spill] sm:$0xff] }
 0x2db   : > { %4487 = vmatpush.bf16.msrb.mxu2 %v13709_v38  ;;  %4500 = vmatpush.bf16.msrb.mxu3 %v13710_v63  ;;  %v13726_v38 = vld [vmem:[#allocation147_spill] sm:$0xff]  ;;  %v13727_v63 = vld [vmem:[#allocation148_spill] sm:$0xff] }
 0x2de   : > { %4410 = vmatpush.bf16.msra.mxu0 %v13711_v13  ;;  %4423 = vmatpush.bf16.msra.mxu1 %v13712_v21  ;;  %v13728_v13 = vld [vmem:[#allocation149_spill] sm:$0xff]  ;;  %v13729_v21 = vld [vmem:[#allocation150_spill] sm:$0xff] }
 0x2df   : > { %4488 = vmatpush.bf16.msrb.mxu2 %v13713_v47  ;;  %4501 = vmatpush.bf16.msrb.mxu3 %v13714_v42  ;;  %v13730_v47 = vld [vmem:[#allocation151_spill] sm:$0xff] }
 0x2e2   : > { %4411 = vmatpush.bf16.msra.mxu0 %v13715_v33  ;;  %4424 = vmatpush.bf16.msra.mxu1 %v13716_v37  ;;  %v13732_v33 = vld [vmem:[#allocation153_spill] sm:$0xff] }
 0x2e3   : > { %4489 = vmatpush.bf16.msrb.mxu2 %v13717_v46  ;;  %4502 = vmatpush.bf16.msrb.mxu3 %v13718_v55  ;;  %v13733_v46 = vld [vmem:[#allocation154_spill] sm:$0xff]  ;;  %v13734_v55 = vld [vmem:[#allocation155_spill] sm:$0xff] }
 0x2e6   : > { %4412 = vmatpush.bf16.msra.mxu0 %v13719_v60  ;;  %4425 = vmatpush.bf16.msra.mxu1 %v13720_v40  ;;  %v4132_v42 = vpop.f32.mrf.mxu0  ;;  %v4145_v22 = vpop.f32.mrf.mxu1 }
 0x2e7   : > { %4490 = vmatpush.bf16.msrb.mxu2 %v13721_v17  ;;  %4503 = vmatpush.bf16.msrb.mxu3 %v13722_v3  ;;  %v4133_v37 = vadd.f32 %v4132_v42, %v11680_v18  ;;  %v13735_v17 = vld [vmem:[#allocation156_spill] sm:$0xff]  ;;  %v13736_v3 = vld [vmem:[#allocation157_spill] sm:$0xff] }
 0x2e8   : > { %v13740_v42 = vld [vmem:[#allocation161_spill] sm:$0xff] }
 0x2e9   : > { %4413 = vmatmul.bf16.vlgmr.msra.gmra.mxu0 %v13629_v52  ;;  %4426 = vmatmul.bf16.vlgmr.msra.gmra.mxu1 %v13630_v25  ;;  %v4146_v60 = vadd.f32 %v4145_v22, %v4133_v37  ;;  %v13741_v22 = vld [vmem:[#allocation162_spill] sm:$0xff] }
 0x2ea   : > { %4457 = vmatpush.bf16.msrb.mxu0 %v13723_v43  ;;  %4470 = vmatpush.bf16.msrb.mxu1 %v13724_v7  ;;  %v13737_v43 = vld [vmem:[#allocation158_spill] sm:$0xff]  ;;  %v13738_v7 = vld [vmem:[#allocation159_spill] sm:$0xff] }
 0x2eb   : > { %4535 = vmatpush.bf16.msra.mxu2 %v13725_v15  ;;  %4548 = vmatpush.bf16.msra.mxu3 %v13726_v38  ;;  %v4159_v40 = vadd.f32 %v4158_v62, %v4146_v60  ;;  %v4189_v15 = vmul.f32 0.01, %v11710_v4  ;;  %v13739_v62 = vld [vmem:[#allocation160_spill] sm:$0xff]  ;;  %v13744_v60 = vld [vmem:[#allocation165_spill] sm:$0xff] }
 0x2ec   : > { %4491 = vmatmul.bf16.vlgmr.msrb.gmra.mxu2 %v13629_v52  ;;  %4504 = vmatmul.bf16.vlgmr.msrb.gmra.mxu3 %v13630_v25 }
 0x2ed   : > { %v4172_v38 = vadd.f32 %v4171_v16, %v4159_v40  ;;  %v4943_v16 = vrot.slane %v11631_v54, 2 }
 0x2ee   : > { %4458 = vmatpush.bf16.msrb.mxu0 %v13727_v63  ;;  %4471 = vmatpush.bf16.msrb.mxu1 %v13728_v13  ;;  %v4134_v18 = vpop.f32.mrf.mxu0 }
 0x2ef   : > { %4536 = vmatpush.bf16.msra.mxu2 %v13729_v21  ;;  %4549 = vmatpush.bf16.msra.mxu3 %v13730_v47  ;;  %v4284_v63 = vpop.f32.mrf.mxu2  ;;  %v4297_v13 = vpop.f32.mrf.mxu3  ;;  %vm4182_vm7 = vcmp.ge.f32.partialorder %v4172_v38, 0.0  ;;  %v4190_v47 = vmul.f32 0.01, %v4172_v38 }
 0x2f0   : > { %v4147_v21 = vpop.f32.mrf.mxu1 }
 0x2f1   : > { %v4198_v37 = vsel %vm4182_vm7, %v4172_v38, %v4190_v47  ;;  %v4948_v21 = vsel %vm1168_vm2, %v11631_v54, %v4943_v16  ;;  %v13747_v38 = vld [vmem:[#allocation168_spill] sm:$0xff]  ;;  %v13748_v47 = vld [vmem:[#allocation169_spill] sm:$0xff]  ;;  %v13754_v54 = vld [vmem:[#allocation175_spill] sm:$0xff]  ;;  %vm4914_vm7 = vcmask 1045509  }
 0x2f2   : > { %4459 = vmatpush.bf16.msrb.mxu0 %v13731_v0  ;;  %4472 = vmatpush.bf16.msrb.mxu1 %v13732_v33  ;;  %v13742_v0 = vld [vmem:[#allocation163_spill] sm:$0xff]  ;;  %v4197_v33 = vsel %vm4181_vm5, %v11710_v4, %v4189_v15  ;;  %v13756_v16 = vld [vmem:[#allocation177_spill] sm:$0xff]  ;;  %vm11977_vm5 = vmand %vm4907_vm10, %vm4908_vm12 }
 0x2f3   : > { %4537 = vmatpush.bf16.msra.mxu2 %v13733_v46  ;;  %4550 = vmatpush.bf16.msra.mxu3 %v13734_v55  ;;  %v4202_v46 = vpack.c.bf16 %v4198_v37, %v4197_v33  ;;  %v13743_v55 = vld [vmem:[#allocation164_spill] sm:$0xff]  ;;  %v13753_v33 = vld [vmem:[#allocation174_spill] sm:$0xff] }
 0x2f4   : > { %v13755_v37 = vld [vmem:[#allocation176_spill] sm:$0xff] }
 0x2f5   : > { %v4944_v40 = vrot.slane %v4202_v46, 4 }
 0x2f6   : > { %4460 = vmatpush.bf16.msrb.mxu0 %v13735_v17  ;;  %4473 = vmatpush.bf16.msrb.mxu1 %v13736_v3  ;;  %v4945_v17 = vrot.slane %v4202_v46, 6  ;;  %v13745_v3 = vld [vmem:[#allocation166_spill] sm:$0xff] }
 0x2f7   : > { %4538 = vmatpush.bf16.msra.mxu2 %v13737_v43  ;;  %4551 = vmatpush.bf16.msra.mxu3 %v13738_v7  ;;  %v13746_v43 = vld [vmem:[#allocation167_spill] sm:$0xff]  ;;  %v4286_v7 = vpop.f32.mrf.mxu2  ;;  %v4299_v18 = vpop.f32.mrf.mxu3  ;;  %v13757_v46 = vld [vmem:[#allocation178_spill] sm:$0xff] }
 0x2f8   : > { %v4951_v4 = vsel %vm13134_vm6, %v4944_v40, %v4945_v17  ;;  %v13760_v40 = vld [vmem:[#allocation181_spill] sm:$0xff]  ;;  %v13761_v17 = vld [vmem:[#allocation182_spill] sm:$0xff]  ;;  %v13763_v18 = vld [vmem:[#allocation184_spill] sm:$0xff] }
 0x2f9   : > { %v11769_v15 = vsel %vm13132_vm13, %v4948_v21, %v4951_v4  ;;  %v13764_v21 = vld [vmem:[#allocation185_spill] sm:$0xff]  ;;  %v13765_v4 = vld [vmem:[#allocation212_spill] sm:$0xff]  ;;  %vm4918_vm13 = vcmask 1047559  }
 0x2fa   : > { %4461 = vmatpush.bf16.msrb.mxu0 %v13739_v62  ;;  %4474 = vmatpush.bf16.msrb.mxu1 %v13740_v42  ;;  %v13749_v62 = vld [vmem:[#allocation170_spill] sm:$0xff]  ;;  %v13750_v42 = vld [vmem:[#allocation171_spill] sm:$0xff]  ;;  %vm4920_vm6 = vmand %vm4918_vm13, %vm4919_vm15  ;;  %vm4971_vm15 = vsmask.f32 3328 }
 0x2fb   : > { %4539 = vmatpush.bf16.msra.mxu2 %v13741_v22  ;;  %4552 = vmatpush.bf16.msra.mxu3 %v13742_v0  ;;  %v13751_v22 = vld [vmem:[#allocation172_spill] sm:$0xff]  ;;  %v13752_v0 = vld [vmem:[#allocation173_spill] sm:$0xff]  ;;  %vm12024_vm13 = vmand %vm4970_vm11, %vm4971_vm15  ;;  %vm13939_vm11 = vcmask 1045508  }
 0x2fe   : > { %4462 = vmatpush.bf16.msrb.mxu0 %v13743_v55  ;;  %4475 = vmatpush.bf16.msrb.mxu1 %v13744_v60  ;;  %v13758_v55 = vld [vmem:[#allocation179_spill] sm:$0xff]  ;;  %v13759_v60 = vld [vmem:[#allocation180_spill] sm:$0xff] }
 0x2ff   : > { %4540 = vmatpush.bf16.msra.mxu2 %v13745_v3  ;;  %4553 = vmatpush.bf16.msra.mxu3 %v13746_v43  ;;  %v13762_v3 = vld [vmem:[#allocation183_spill] sm:$0xff] }
 0x302   : > { %4463 = vmatpush.bf16.msrb.mxu0 %v13747_v38  ;;  %4476 = vmatpush.bf16.msrb.mxu1 %v13748_v47  ;;  %v13766_v38 = vperm.slane %v13765_v4, 0 }
 0x303   : > { %4541 = vmatpush.bf16.msra.mxu2 %v13749_v62  ;;  %4554 = vmatpush.bf16.msra.mxu3 %v13750_v42  ;;  %v13767_v62 = vld [vmem:[#allocation186_spill] sm:$0xff]  ;;  %v13768_v42 = vld [vmem:[#allocation187_spill] sm:$0xff] }
 0x306   : > { %4464 = vmatpush.bf16.msrb.mxu0 %v13751_v22  ;;  %4477 = vmatpush.bf16.msrb.mxu1 %v13752_v0  ;;  %v4258_v43 = vpop.f32.mrf.mxu0  ;;  %v4271_v7 = vpop.f32.mrf.mxu1 }
 0x307   : > { %4542 = vmatpush.bf16.msra.mxu2 %v13753_v33  ;;  %4555 = vmatpush.bf16.msra.mxu3 %v13754_v54  ;;  %v4259_v47 = vadd.f32 %v4258_v43, %v13766_v38  ;;  %v13769_v33 = vld [vmem:[#allocation188_spill] sm:$0xff]  ;;  %v13770_v54 = vld [vmem:[#allocation189_spill] sm:$0xff] }
 0x309   : > { %4465 = vmatmul.bf16.vlgmr.msrb.gmra.mxu0 %v11647_v9  ;;  %4478 = vmatmul.bf16.vlgmr.msrb.gmra.mxu1 %v11649_v14  ;;  %v4272_v22 = vadd.f32 %v4271_v7, %v4259_v47  ;;  %v13775_v7 = vld [vmem:[#allocation193_spill] sm:$0xff]  ;;  %v13778_v47 = vld [vmem:[#allocation196_spill] sm:$0xff] }
 0x30a   : > { %4509 = vmatpush.bf16.msra.mxu0 %v13755_v37  ;;  %4522 = vmatpush.bf16.msra.mxu1 %v13756_v16  ;;  %v13771_v37 = vld [vmem:[#allocation190_spill] sm:$0xff]  ;;  %v13772_v16 = vld [vmem:[#allocation191_spill] sm:$0xff] }
 0x30b   : > { %4587 = vmatpush.bf16.msrb.mxu2 %v13757_v46  ;;  %4600 = vmatpush.bf16.msrb.mxu3 %v13758_v55  ;;  %v4285_v0 = vadd.f32 %v4284_v63, %v4272_v22  ;;  %v13776_v63 = vld [vmem:[#allocation194_spill] sm:$0xff] }
 0x30c   : > { %4543 = vmatmul.bf16.vlgmr.msra.gmra.mxu2 %v11647_v9  ;;  %4556 = vmatmul.bf16.vlgmr.msra.gmra.mxu3 %v11649_v14 }
 0x30e   : > { %4510 = vmatpush.bf16.msra.mxu0 %v13759_v60  ;;  %4523 = vmatpush.bf16.msra.mxu1 %v13760_v40  ;;  %v4298_v60 = vadd.f32 %v4297_v13, %v4285_v0  ;;  %v13773_v40 = vperm.slane %v13765_v4, 1  ;;  %v4273_v43 = vpop.f32.mrf.mxu1  ;;  %v13780_v13 = vld [vmem:[#allocation198_spill] sm:$0xff] }
 0x30f   : > { %4588 = vmatpush.bf16.msrb.mxu2 %v13761_v17  ;;  %4601 = vmatpush.bf16.msrb.mxu3 %v13762_v3  ;;  %v4336_v46 = vpop.f32.mrf.mxu2  ;;  %v4349_v55 = vpop.f32.mrf.mxu3  ;;  %v13791_v43 = vld [vmem:[#allocation209_spill] sm:$0xff] }
 0x310   : > { %v4337_v17 = vadd.f32 %v4336_v46, %v13773_v40  ;;  %v4260_v3 = vpop.f32.mrf.mxu0  ;;  %v13786_v46 = vld [vmem:[#allocation204_spill] sm:$0xff]  ;;  %v13788_v40 = vld [vmem:[#allocation206_spill] sm:$0xff] }
 0x311   : > { %v13790_v3 = vld [vmem:[#allocation208_spill] sm:$0xff] }
 0x312   : > { %4511 = vmatpush.bf16.msra.mxu0 %v13763_v18  ;;  %4524 = vmatpush.bf16.msra.mxu1 %v13764_v21  ;;  %v13774_v18 = vld [vmem:[#allocation192_spill] sm:$0xff]  ;;  %v13777_v21 = vld [vmem:[#allocation195_spill] sm:$0xff]  ;;  %v11807_v38 = vadd.f32 %v4349_v55, %v4337_v17  ;;  %v13787_v55 = vld [vmem:[#allocation205_spill] sm:$0xff] }
 0x313   : > { %4589 = vmatpush.bf16.msrb.mxu2 %v13767_v62  ;;  %4602 = vmatpush.bf16.msrb.mxu3 %v13768_v42  ;;  %v13779_v62 = vld [vmem:[#allocation197_spill] sm:$0xff]  ;;  %v13781_v42 = vld [vmem:[#allocation199_spill] sm:$0xff] }
 0x314   : > { %v13789_v17 = vld [vmem:[#allocation207_spill] sm:$0xff] }
 0x316   : > { %4512 = vmatpush.bf16.msra.mxu0 %v13769_v33  ;;  %4525 = vmatpush.bf16.msra.mxu1 %v13770_v54  ;;  %v13782_v33 = vld [vmem:[#allocation200_spill] sm:$0xff]  ;;  %v13783_v54 = vld [vmem:[#allocation201_spill] sm:$0xff] }
 0x317   : > { %4590 = vmatpush.bf16.msrb.mxu2 %v13771_v37  ;;  %4603 = vmatpush.bf16.msrb.mxu3 %v13772_v16  ;;  %v4338_v22 = vpop.f32.mrf.mxu2  ;;  %v4351_v0 = vpop.f32.mrf.mxu3  ;;  %v13784_v37 = vld [vmem:[#allocation202_spill] sm:$0xff]  ;;  %v13785_v16 = vld [vmem:[#allocation203_spill] sm:$0xff] }
 0x318   : > { %v13798_v22 = vld [vmem:[#allocation217_spill] sm:$0xff]  ;;  %v13799_v0 = vld [vmem:[#allocation218_spill] sm:$0xff] }
 0x31a   : > { %4513 = vmatpush.bf16.msra.mxu0 %v13774_v18  ;;  %4526 = vmatpush.bf16.msra.mxu1 %v13775_v7  ;;  %v13792_v18 = vld [vmem:[#allocation210_spill] sm:$0xff]  ;;  %v13793_v7 = vld [vmem:[#allocation211_spill] sm:$0xff] }
 0x31b   : > { %4591 = vmatpush.bf16.msrb.mxu2 %v13776_v63  ;;  %4604 = vmatpush.bf16.msrb.mxu3 %v13777_v21  ;;  %v13794_v63 = vld [vmem:[#allocation213_spill] sm:$0xff]  ;;  %v13795_v21 = vld [vmem:[#allocation214_spill] sm:$0xff] }
 0x31e   : > { %4514 = vmatpush.bf16.msra.mxu0 %v13778_v47  ;;  %4527 = vmatpush.bf16.msra.mxu1 %v13779_v62  ;;  %v13796_v47 = vld [vmem:[#allocation215_spill] sm:$0xff]  ;;  %v13797_v62 = vld [vmem:[#allocation216_spill] sm:$0xff] }
 0x31f   : > { %4592 = vmatpush.bf16.msrb.mxu2 %v13780_v13  ;;  %4605 = vmatpush.bf16.msrb.mxu3 %v13781_v42 }
 0x322   : > { %4515 = vmatpush.bf16.msra.mxu0 %v13782_v33  ;;  %4528 = vmatpush.bf16.msra.mxu1 %v13783_v54  ;;  %v13800_v54 = vld [vmem:[#allocation219_spill] sm:$0xff] }
 0x323   : > { %4593 = vmatpush.bf16.msrb.mxu2 %v13784_v37  ;;  %4606 = vmatpush.bf16.msrb.mxu3 %v13785_v16  ;;  %v13801_v37 = vld [vmem:[#allocation220_spill] sm:$0xff] }
 0x326   : > { %4516 = vmatpush.bf16.msra.mxu0 %v13786_v46  ;;  %4529 = vmatpush.bf16.msra.mxu1 %v13787_v55  ;;  %v4310_v13 = vpop.f32.mrf.mxu0  ;;  %v4323_v42 = vpop.f32.mrf.mxu1  ;;  %v13802_v46 = vld [vmem:[#allocation221_spill] sm:$0xff]  ;;  %v13803_v55 = vld [vmem:[#allocation222_spill] sm:$0xff] }
 0x327   : > { %4594 = vmatpush.bf16.msrb.mxu2 %v13788_v40  ;;  %4607 = vmatpush.bf16.msrb.mxu3 %v13789_v17  ;;  %v4311_v33 = vadd.f32 %v4310_v13, %v4298_v60  ;;  %v13804_v40 = vld [vmem:[#allocation223_spill] sm:$0xff]  ;;  %v13805_v17 = vld [vmem:[#allocation224_spill] sm:$0xff]  ;;  %v13807_v60 = vld [vmem:[#allocation226_spill] sm:$0xff] }
 0x328   : > { %v13811_v13 = vld [vmem:[#allocation230_spill] sm:$0xff] }
 0x329   : > { %4517 = vmatmul.bf16.vlgmr.msra.gmra.mxu0 %v11562_v26  ;;  %4530 = vmatmul.bf16.vlgmr.msra.gmra.mxu1 %v11564_v29  ;;  %v11837_v16 = vadd.f32 %v4323_v42, %v4311_v33  ;;  %v13812_v42 = vld [vmem:[#allocation231_spill] sm:$0xff] }
 0x32a   : > { %4561 = vmatpush.bf16.msrb.mxu0 %v13790_v3  ;;  %4574 = vmatpush.bf16.msrb.mxu1 %v13791_v43 }
 0x32b   : > { %4639 = vmatpush.bf16.msra.mxu2 %v13792_v18  ;;  %4652 = vmatpush.bf16.msra.mxu3 %v13793_v7  ;;  %vm4873_vm8 = vcmp.ge.f32.partialorder %v11837_v16, 0.0 }
 0x32c   : > { %4595 = vmatmul.bf16.vlgmr.msrb.gmra.mxu2 %v11562_v26  ;;  %4608 = vmatmul.bf16.vlgmr.msrb.gmra.mxu3 %v11564_v29 }
 0x32e   : > { %4562 = vmatpush.bf16.msrb.mxu0 %v13794_v63  ;;  %4575 = vmatpush.bf16.msrb.mxu1 %v13795_v21  ;;  %v4312_v18 = vpop.f32.mrf.mxu0  ;;  %v4325_v7 = vpop.f32.mrf.mxu1  ;;  %v13806_v63 = vld [vmem:[#allocation225_spill] sm:$0xff]  ;;  %v13808_v21 = vld [vmem:[#allocation227_spill] sm:$0xff] }
 0x32f   : > { %4640 = vmatpush.bf16.msra.mxu2 %v13796_v47  ;;  %4653 = vmatpush.bf16.msra.mxu3 %v13797_v62  ;;  %v4388_v3 = vpop.f32.mrf.mxu2  ;;  %v4401_v43 = vpop.f32.mrf.mxu3  ;;  %v13809_v47 = vld [vmem:[#allocation228_spill] sm:$0xff]  ;;  %v13810_v62 = vld [vmem:[#allocation229_spill] sm:$0xff]  ;;  %v13820_v18 = vld [vmem:[#allocation239_spill] sm:$0xff] }
 0x330   : > { %v13821_v7 = vld [vmem:[#allocation240_spill] sm:$0xff] }
 0x332   : > { %4563 = vmatpush.bf16.msrb.mxu0 %v13798_v22  ;;  %4576 = vmatpush.bf16.msrb.mxu1 %v13799_v0  ;;  %v13813_v22 = vld [vmem:[#allocation232_spill] sm:$0xff] }
 0x333   : > { %4641 = vmatpush.bf16.msra.mxu2 %v13800_v54  ;;  %4654 = vmatpush.bf16.msra.mxu3 %v13801_v37  ;;  %v13814_v54 = vld [vmem:[#allocation233_spill] sm:$0xff]  ;;  %v13815_v37 = vld [vmem:[#allocation234_spill] sm:$0xff] }
 0x336   : > { %4564 = vmatpush.bf16.msrb.mxu0 %v13802_v46  ;;  %4577 = vmatpush.bf16.msrb.mxu1 %v13803_v55  ;;  %v13816_v46 = vld [vmem:[#allocation235_spill] sm:$0xff]  ;;  %v13817_v55 = vld [vmem:[#allocation236_spill] sm:$0xff] }
 0x337   : > { %4642 = vmatpush.bf16.msra.mxu2 %v13804_v40  ;;  %4655 = vmatpush.bf16.msra.mxu3 %v13805_v17  ;;  %v4390_v0 = vpop.f32.mrf.mxu2  ;;  %v4403_v33 = vpop.f32.mrf.mxu3  ;;  %v13818_v40 = vld [vmem:[#allocation237_spill] sm:$0xff]  ;;  %v13819_v17 = vld [vmem:[#allocation238_spill] sm:$0xff] }
 0x33a   : > { %4565 = vmatpush.bf16.msrb.mxu0 %v13806_v63  ;;  %4578 = vmatpush.bf16.msrb.mxu1 %v13807_v60  ;;  %v13822_v63 = vld [vmem:[#allocation241_spill] sm:$0xff]  ;;  %v13823_v60 = vld [vmem:[#allocation242_spill] sm:$0xff] }
 0x33b   : > { %4643 = vmatpush.bf16.msra.mxu2 %v13808_v21  ;;  %4656 = vmatpush.bf16.msra.mxu3 %v13809_v47  ;;  %v13824_v21 = vld [vmem:[#allocation243_spill] sm:$0xff]  ;;  %v13825_v47 = vld [vmem:[#allocation244_spill] sm:$0xff] }
 0x33e   : > { %4566 = vmatpush.bf16.msrb.mxu0 %v13810_v62  ;;  %4579 = vmatpush.bf16.msrb.mxu1 %v13811_v13  ;;  %v13826_v62 = vld [vmem:[#allocation245_spill] sm:$0xff]  ;;  %v13827_v13 = vld [vmem:[#allocation246_spill] sm:$0xff] }
 0x33f   : > { %4644 = vmatpush.bf16.msra.mxu2 %v13812_v42  ;;  %4657 = vmatpush.bf16.msra.mxu3 %v13813_v22  ;;  %v13828_v42 = vld [vmem:[#allocation247_spill] sm:$0xff]  ;;  %v13829_v22 = vld [vmem:[#allocation248_spill] sm:$0xff] }
 0x342   : > { %4567 = vmatpush.bf16.msrb.mxu0 %v13814_v54  ;;  %4580 = vmatpush.bf16.msrb.mxu1 %v13815_v37  ;;  %v13830_v54 = vld [vmem:[#allocation249_spill] sm:$0xff]  ;;  %v13831_v37 = vld [vmem:[#allocation250_spill] sm:$0xff] }
 0x343   : > { %4645 = vmatpush.bf16.msra.mxu2 %v13816_v46  ;;  %4658 = vmatpush.bf16.msra.mxu3 %v13817_v55  ;;  %v13832_v55 = vld [vmem:[#allocation251_spill] sm:$0xff] }
 0x346   : > { %4568 = vmatpush.bf16.msrb.mxu0 %v13818_v40  ;;  %4581 = vmatpush.bf16.msrb.mxu1 %v13819_v17  ;;  %v4362_v0 = vpop.f32.mrf.mxu0  ;;  %v4375_v33 = vpop.f32.mrf.mxu1  ;;  %v13833_v40 = vld [vmem:[#allocation252_spill] sm:$0xff] }
 0x347   : > { %4646 = vmatpush.bf16.msra.mxu2 %v13820_v18  ;;  %4659 = vmatpush.bf16.msra.mxu3 %v13821_v7  ;;  %v4363_v46 = vadd.f32 %v4362_v0, %v11807_v38  ;;  %v13834_v7 = vld [vmem:[#allocation253_spill] sm:$0xff] }
 0x349   : > { %4569 = vmatmul.bf16.vlgmr.msrb.gmra.mxu0 %v13629_v52  ;;  %4582 = vmatmul.bf16.vlgmr.msrb.gmra.mxu1 %v13630_v25  ;;  %v4376_v17 = vadd.f32 %v4375_v33, %v4363_v46  ;;  %v13839_v33 = vld [vmem:[#allocation258_spill] sm:$0xff] }
 0x34a   : > { %4613 = vmatpush.bf16.msra.mxu0 %v13822_v63  ;;  %4626 = vmatpush.bf16.msra.mxu1 %v13823_v60  ;;  %v13835_v63 = vld [vmem:[#allocation254_spill] sm:$0xff]  ;;  %v13836_v60 = vld [vmem:[#allocation255_spill] sm:$0xff] }
 0x34b   : > { %4691 = vmatpush.bf16.msrb.mxu2 %v13824_v21  ;;  %4704 = vmatpush.bf16.msrb.mxu3 %v13825_v47  ;;  %v4389_v18 = vadd.f32 %v4388_v3, %v4376_v17  ;;  %v13837_v21 = vld [vmem:[#allocation256_spill] sm:$0xff]  ;;  %v4881_v47 = vmul.f32 0.01, %v11837_v16  ;;  %v13838_v3 = vld [vmem:[#allocation257_spill] sm:$0xff]  ;;  %v13843_v17 = vld [vmem:[#allocation262_spill] sm:$0xff] }
 0x34c   : > { %4647 = vmatmul.bf16.vlgmr.msra.gmra.mxu2 %v13629_v52  ;;  %4660 = vmatmul.bf16.vlgmr.msra.gmra.mxu3 %v13630_v25 }
 0x34d   : > { %v4889_v46 = vsel %vm4873_vm8, %v11837_v16, %v4881_v47  ;;  %v13849_v16 = vld [vmem:[#allocation268_spill] sm:$0xff]  ;;  %v13850_v47 = vld [vmem:[#allocation269_spill] sm:$0xff]  ;;  %vm4915_vm8 = vsmask.f32 7958 }
 0x34e   : > { %4614 = vmatpush.bf16.msra.mxu0 %v13826_v62  ;;  %4627 = vmatpush.bf16.msra.mxu1 %v13827_v13  ;;  %v4402_v62 = vadd.f32 %v4401_v43, %v4389_v18  ;;  %v4364_v38 = vpop.f32.mrf.mxu0  ;;  %v13844_v18 = vld [vmem:[#allocation263_spill] sm:$0xff]  ;;  %vm4916_vm10 = vmand %vm4914_vm7, %vm4915_vm8 }
 0x34f   : > { %4692 = vmatpush.bf16.msrb.mxu2 %v13828_v42  ;;  %4705 = vmatpush.bf16.msrb.mxu3 %v13829_v22  ;;  %v4440_v13 = vpop.f32.mrf.mxu2  ;;  %v4453_v42 = vpop.f32.mrf.mxu3  ;;  %v13847_v38 = vld [vmem:[#allocation266_spill] sm:$0xff] }
 0x350   : > { %v4377_v22 = vpop.f32.mrf.mxu1  ;;  %vm4874_vm9 = vcmp.ge.f32.partialorder %v4402_v62, 0.0  ;;  %v4882_v0 = vmul.f32 0.01, %v4402_v62 }
 0x351   : > { %v13848_v22 = vld [vmem:[#allocation267_spill] sm:$0xff] }
 0x352   : > { %4615 = vmatpush.bf16.msra.mxu0 %v13830_v54  ;;  %4628 = vmatpush.bf16.msra.mxu1 %v13831_v37  ;;  %v13840_v54 = vld [vmem:[#allocation259_spill] sm:$0xff]  ;;  %v13841_v37 = vld [vmem:[#allocation260_spill] sm:$0xff] }
 0x353   : > { %4693 = vmatpush.bf16.msrb.mxu2 %v13832_v55  ;;  %4706 = vmatpush.bf16.msrb.mxu3 %v13833_v40  ;;  %v4890_v55 = vsel %vm4874_vm9, %v4402_v62, %v4882_v0  ;;  %v13842_v40 = vld [vmem:[#allocation261_spill] sm:$0xff]  ;;  %v13851_v62 = vld [vmem:[#allocation270_spill] sm:$0xff]  ;;  %v13852_v0 = vld [vmem:[#allocation271_spill] sm:$0xff] }
 0x354   : > { %v11887_v43 = vpack.c.bf16 %v4890_v55, %v4889_v46  ;;  %v13857_v46 = vld [vmem:[#allocation276_spill] sm:$0xff]  ;;  %v13858_v55 = vld [vmem:[#allocation277_spill] sm:$0xff]  ;;  %vm4912_vm9 = vmand %vm4910_vm14, %vm4911_vm4  ;;  %vm4974_vm4 = vsmask.f32 5376 }
 0x355   : > { %vm4913_vm3 = vmor %vm4912_vm9, %vm11977_vm5  ;;  %vm4978_vm9 = vsmask.f32 7424 }
 0x356   : > { %4616 = vmatpush.bf16.msra.mxu0 %v13834_v7  ;;  %4629 = vmatpush.bf16.msra.mxu1 %v13835_v63  ;;  %v13845_v7 = vld [vmem:[#allocation264_spill] sm:$0xff]  ;;  %vm4917_vm12 = vmor %vm4916_vm10, %vm4913_vm3 }
 0x357   : > { %4694 = vmatpush.bf16.msrb.mxu2 %v13836_v60  ;;  %4707 = vmatpush.bf16.msrb.mxu3 %v13837_v21  ;;  %v4442_v63 = vpop.f32.mrf.mxu2  ;;  %v4455_v60 = vpop.f32.mrf.mxu3  ;;  %v13846_v21 = vld [vmem:[#allocation265_spill] sm:$0xff]  ;;  %vm4921_vm14 = vmor %vm4920_vm6, %vm4917_vm12  ;;  %vm4968_vm6 = vsmask.f32 1280 }
 0x358   : > { %v13862_v60 = vld [vmem:[#allocation281_spill] sm:$0xff]  ;;  %vm12018_vm3 = vmand %vm1168_vm2, %vm4968_vm6 }
 0x359   : > { %vm4973_vm5 = vmor %vm12024_vm13, %vm12018_vm3  ;;  %vm13953_vm13 = vcmask 1043456  }
 0x35a   : > { %4617 = vmatpush.bf16.msra.mxu0 %v13838_v3  ;;  %4630 = vmatpush.bf16.msra.mxu1 %v13839_v33  ;;  %v13853_v3 = vld [vmem:[#allocation272_spill] sm:$0xff]  ;;  %v13854_v33 = vld [vmem:[#allocation273_spill] sm:$0xff]  ;;  %vm4975_vm7 = vmand %vm13939_vm11, %vm4974_vm4 }
 0x35b   : > { %4695 = vmatpush.bf16.msrb.mxu2 %v13840_v54  ;;  %4708 = vmatpush.bf16.msrb.mxu3 %v13841_v37  ;;  %v13855_v54 = vld [vmem:[#allocation274_spill] sm:$0xff]  ;;  %v13856_v37 = vld [vmem:[#allocation275_spill] sm:$0xff]  ;;  %vm12048_vm12 = vmor %vm4975_vm7, %vm4973_vm5 }
 0x35c   : > { %vm13952_vm3 = vmmov %vm13939_vm11 }
 0x35e   : > { %4618 = vmatpush.bf16.msra.mxu0 %v13842_v40  ;;  %4631 = vmatpush.bf16.msra.mxu1 %v13843_v17  ;;  %v13859_v40 = vld [vmem:[#allocation278_spill] sm:$0xff]  ;;  %v13860_v17 = vld [vmem:[#allocation279_spill] sm:$0xff] }
 0x35f   : > { %4696 = vmatpush.bf16.msrb.mxu2 %v13844_v18  ;;  %4709 = vmatpush.bf16.msrb.mxu3 %v13845_v7  ;;  %v13861_v18 = vld [vmem:[#allocation280_spill] sm:$0xff] }
 0x362   : > { %4619 = vmatpush.bf16.msra.mxu0 %v13846_v21  ;;  %4632 = vmatpush.bf16.msra.mxu1 %v13847_v38  ;;  %v13863_v21 = vld [vmem:[#allocation282_spill] sm:$0xff]  ;;  %v13864_v38 = vperm.slane %v13765_v4, 2 }
 0x363   : > { %4697 = vmatpush.bf16.msrb.mxu2 %v13848_v22  ;;  %4710 = vmatpush.bf16.msrb.mxu3 %v13849_v16  ;;  %v13865_v16 = vld [vmem:[#allocation283_spill] sm:$0xff] }
 0x366   : > { %4620 = vmatpush.bf16.msra.mxu0 %v13850_v47  ;;  %4633 = vmatpush.bf16.msra.mxu1 %v13851_v62  ;;  %v4414_v7 = vpop.f32.mrf.mxu0  ;;  %v4427_v63 = vpop.f32.mrf.mxu1  ;;  %v13866_v47 = vld [vmem:[#allocation284_spill] sm:$0xff] }
 0x367   : > { %4698 = vmatpush.bf16.msrb.mxu2 %v13852_v0  ;;  %4711 = vmatpush.bf16.msrb.mxu3 %v13853_v3  ;;  %v4415_v22 = vadd.f32 %v4414_v7, %v13864_v38  ;;  %v13867_v3 = vld [vmem:[#allocation285_spill] sm:$0xff]  ;;  %v13876_v38 = vld [vmem:[#allocation294_spill] sm:$0xff] }
 0x368   : > { %v13871_v7 = vld [vmem:[#allocation289_spill] sm:$0xff] }
 0x369   : > { %4621 = vmatmul.bf16.vlgmr.msra.gmra.mxu0 %v11647_v9  ;;  %4634 = vmatmul.bf16.vlgmr.msra.gmra.mxu1 %v11649_v14  ;;  %v4428_v62 = vadd.f32 %v4427_v63, %v4415_v22  ;;  %v13872_v63 = vld [vmem:[#allocation290_spill] sm:$0xff]  ;;  %v13877_v22 = vld [vmem:[#allocation295_spill] sm:$0xff] }
 0x36a   : > { %4665 = vmatpush.bf16.msrb.mxu0 %v13854_v33  ;;  %4678 = vmatpush.bf16.msrb.mxu1 %v13855_v54  ;;  %v13868_v33 = vld [vmem:[#allocation286_spill] sm:$0xff]  ;;  %v13869_v54 = vld [vmem:[#allocation287_spill] sm:$0xff] }
 0x36b   : > { %4743 = vmatpush.bf16.msra.mxu2 %v13856_v37  ;;  %4756 = vmatpush.bf16.msra.mxu3 %v13857_v46  ;;  %v4441_v0 = vadd.f32 %v4440_v13, %v4428_v62  ;;  %v13870_v37 = vld [vmem:[#allocation288_spill] sm:$0xff]  ;;  %v13873_v13 = vld [vmem:[#allocation291_spill] sm:$0xff]  ;;  %v13879_v62 = vld [vmem:[#allocation297_spill] sm:$0xff] }
 0x36c   : > { %4699 = vmatmul.bf16.vlgmr.msrb.gmra.mxu2 %v11647_v9  ;;  %4712 = vmatmul.bf16.vlgmr.msrb.gmra.mxu3 %v11649_v14 }
 0x36e   : > { %4666 = vmatpush.bf16.msrb.mxu0 %v13858_v55  ;;  %4679 = vmatpush.bf16.msrb.mxu1 %v13859_v40  ;;  %v11927_v40 = vadd.f32 %v4453_v42, %v4441_v0  ;;  %v13880_v0 = vld [vmem:[#allocation298_spill] sm:$0xff] }
 0x36f   : > { %4744 = vmatpush.bf16.msra.mxu2 %v13860_v17  ;;  %4757 = vmatpush.bf16.msra.mxu3 %v13861_v18  ;;  %v11923_v46 = vpop.f32.mrf.mxu2  ;;  %v11925_v55 = vpop.f32.mrf.mxu3 }
 0x370   : > { %v4416_v17 = vpop.f32.mrf.mxu0  ;;  %v4429_v18 = vpop.f32.mrf.mxu1 }
 0x371   : > { %v13885_v17 = vld [vmem:[#allocation303_spill] sm:$0xff]  ;;  %v13886_v18 = vld [vmem:[#allocation304_spill] sm:$0xff] }
 0x372   : > { %4667 = vmatpush.bf16.msrb.mxu0 %v13862_v60  ;;  %4680 = vmatpush.bf16.msrb.mxu1 %v13863_v21  ;;  %v13874_v60 = vld [vmem:[#allocation292_spill] sm:$0xff]  ;;  %v13875_v21 = vld [vmem:[#allocation293_spill] sm:$0xff] }
 0x373   : > { %4745 = vmatpush.bf16.msra.mxu2 %v13865_v16  ;;  %4758 = vmatpush.bf16.msra.mxu3 %v13866_v47  ;;  %v13878_v16 = vld [vmem:[#allocation296_spill] sm:$0xff] }
 0x376   : > { %4668 = vmatpush.bf16.msrb.mxu0 %v13867_v3  ;;  %4681 = vmatpush.bf16.msrb.mxu1 %v13868_v33  ;;  %v13881_v3 = vld [vmem:[#allocation299_spill] sm:$0xff]  ;;  %v13882_v33 = vld [vmem:[#allocation300_spill] sm:$0xff] }
 0x377   : > { %4746 = vmatpush.bf16.msra.mxu2 %v13869_v54  ;;  %4759 = vmatpush.bf16.msra.mxu3 %v13870_v37  ;;  %v4494_v42 = vpop.f32.mrf.mxu2  ;;  %v4507_v47 = vpop.f32.mrf.mxu3  ;;  %v13883_v54 = vld [vmem:[#allocation301_spill] sm:$0xff]  ;;  %v13884_v37 = vld [vmem:[#allocation302_spill] sm:$0xff] }
 0x37a   : > { %4669 = vmatpush.bf16.msrb.mxu0 %v13871_v7  ;;  %4682 = vmatpush.bf16.msrb.mxu1 %v13872_v63  ;;  %v13887_v7 = vld [vmem:[#allocation305_spill] sm:$0xff]  ;;  %v13888_v63 = vld [vmem:[#allocation306_spill] sm:$0xff] }
 0x37b   : > { %4747 = vmatpush.bf16.msra.mxu2 %v13873_v13  ;;  %4760 = vmatpush.bf16.msra.mxu3 %v13874_v60  ;;  %v13889_v13 = vld [vmem:[#allocation307_spill] sm:$0xff]  ;;  %v13890_v60 = vld [vmem:[#allocation308_spill] sm:$0xff] }
 0x37e   : > { %4670 = vmatpush.bf16.msrb.mxu0 %v13875_v21  ;;  %4683 = vmatpush.bf16.msrb.mxu1 %v13876_v38  ;;  %v13891_v21 = vld [vmem:[#allocation309_spill] sm:$0xff]  ;;  %v13892_v38 = vld [vmem:[#allocation310_spill] sm:$0xff] }
 0x37f   : > { %4748 = vmatpush.bf16.msra.mxu2 %v13877_v22  ;;  %4761 = vmatpush.bf16.msra.mxu3 %v13878_v16  ;;  %v13893_v22 = vld [vmem:[#allocation311_spill] sm:$0xff]  ;;  %v13894_v16 = vld [vmem:[#allocation312_spill] sm:$0xff] }
 0x382   : > { %4671 = vmatpush.bf16.msrb.mxu0 %v13879_v62  ;;  %4684 = vmatpush.bf16.msrb.mxu1 %v13880_v0  ;;  %v13895_v62 = vld [vmem:[#allocation313_spill] sm:$0xff]  ;;  %v13896_v0 = vld [vmem:[#allocation314_spill] sm:$0xff] }
 0x383   : > { %4749 = vmatpush.bf16.msra.mxu2 %v13881_v3  ;;  %4762 = vmatpush.bf16.msra.mxu3 %v13882_v33  ;;  %v13897_v3 = vld [vmem:[#allocation315_spill] sm:$0xff]  ;;  %v13898_v33 = vld [vmem:[#allocation316_spill] sm:$0xff] }
 0x386   : > { %4672 = vmatpush.bf16.msrb.mxu0 %v13883_v54  ;;  %4685 = vmatpush.bf16.msrb.mxu1 %v13884_v37  ;;  %v11957_v42 = vpop.f32.mrf.mxu0  ;;  %v11959_v47 = vpop.f32.mrf.mxu1  ;;  %v13899_v54 = vld [vmem:[#allocation317_spill] sm:$0xff]  ;;  %v13900_v37 = vld [vmem:[#allocation318_spill] sm:$0xff] }
 0x387   : > { %4750 = vmatpush.bf16.msra.mxu2 %v13885_v17  ;;  %4763 = vmatpush.bf16.msra.mxu3 %v13886_v18  ;;  %v13901_v17 = vld [vmem:[#allocation319_spill] sm:$0xff]  ;;  %v13902_v18 = vld [vmem:[#allocation320_spill] sm:$0xff] }
 0x389   : > { %4673 = vmatmul.bf16.vlgmr.msrb.gmra.mxu0 %v11562_v26  ;;  %4686 = vmatmul.bf16.vlgmr.msrb.gmra.mxu1 %v11564_v29 }
 0x38a   : > { %4717 = vmatpush.bf16.msra.mxu0 %v13887_v7  ;;  %4730 = vmatpush.bf16.msra.mxu1 %v13888_v63 }
 0x38b   : > { %4795 = vmatpush.bf16.msrb.mxu2 %v13889_v13  ;;  %4808 = vmatpush.bf16.msrb.mxu3 %v13890_v60 }
 0x38c   : > { %4751 = vmatmul.bf16.vlgmr.msra.gmra.mxu2 %v11562_v26  ;;  %4764 = vmatmul.bf16.vlgmr.msra.gmra.mxu3 %v11564_v29 }
 0x38e   : > { %4718 = vmatpush.bf16.msra.mxu0 %v13891_v21  ;;  %4731 = vmatpush.bf16.msra.mxu1 %v13892_v38  ;;  %v4468_v13 = vpop.f32.mrf.mxu0  ;;  %v4481_v60 = vpop.f32.mrf.mxu1  ;;  %v13903_v21 = vld [vmem:[#allocation321_spill] sm:$0xff]  ;;  %v13904_v38 = vld [vmem:[#allocation322_spill] sm:$0xff] }
 0x38f   : > { %4796 = vmatpush.bf16.msrb.mxu2 %v13893_v22  ;;  %4809 = vmatpush.bf16.msrb.mxu3 %v13894_v16  ;;  %v11969_v7 = vpop.f32.mrf.mxu2  ;;  %v11971_v63 = vpop.f32.mrf.mxu3  ;;  %v13905_v22 = vld [vmem:[#allocation323_spill] sm:$0xff]  ;;  %v13906_v16 = vld [vmem:[#allocation324_spill] sm:$0xff]  ;;  %v13913_v13 = vld [vmem:[#allocation329_spill] sm:$0xff] }
 0x390   : > { %v13914_v60 = vld [vmem:[#allocation330_spill] sm:$0xff] }
 0x392   : > { %4719 = vmatpush.bf16.msra.mxu0 %v13895_v62  ;;  %4732 = vmatpush.bf16.msra.mxu1 %v13896_v0  ;;  %v13909_v0 = vld [vmem:[#allocation325_spill] sm:$0xff]  ;;  %v13918_v62 = vld [vmem:[#allocation334_spill] sm:$0xff] }
 0x393   : > { %4797 = vmatpush.bf16.msrb.mxu2 %v13897_v3  ;;  %4810 = vmatpush.bf16.msrb.mxu3 %v13898_v33  ;;  %v13910_v3 = vld [vmem:[#allocation326_spill] sm:$0xff]  ;;  %v13911_v33 = vld [vmem:[#allocation327_spill] sm:$0xff] }
 0x396   : > { %4720 = vmatpush.bf16.msra.mxu0 %v13899_v54  ;;  %4733 = vmatpush.bf16.msra.mxu1 %v13900_v37  ;;  %v13912_v54 = vld [vmem:[#allocation328_spill] sm:$0xff] }
 0x397   : > { %4798 = vmatpush.bf16.msrb.mxu2 %v13901_v17  ;;  %4811 = vmatpush.bf16.msrb.mxu3 %v13902_v18  ;;  %v4546_v37 = vpop.f32.mrf.mxu2  ;;  %v4559_v17 = vpop.f32.mrf.mxu3  ;;  %v4922_v18 = vld [vmem:[#allocation7] sm:$0xaa] }
 0x398   : > { %v13925_v37 = vld [vmem:[#allocation340_spill] sm:$0xff]  ;;  %v13926_v17 = vld [vmem:[#allocation341_spill] sm:$0xff] }
 0x39a   : > { %4721 = vmatpush.bf16.msra.mxu0 %v13903_v21  ;;  %4734 = vmatpush.bf16.msra.mxu1 %v13904_v38  ;;  %v4923_v21 = vsel %vm4921_vm14, 0, %v4922_v18  ;;  %v13915_v38 = vld [vmem:[#allocation331_spill] sm:$0xff]  ;;  %vm13946_vm14 = vcmask 1047558  }
 0x39b   : > { %4799 = vmatpush.bf16.msrb.mxu2 %v13905_v22  ;;  %4812 = vmatpush.bf16.msrb.mxu3 %v13906_v16  ;;  %4924 = vst [vmem:[#allocation7] sm:$0xaa] %v4923_v21  ;;  %v13916_v22 = vld [vmem:[#allocation332_spill] sm:$0xff]  ;;  %v13917_v16 = vld [vmem:[#allocation333_spill] sm:$0xff]  ;;  %vm12053_vm6 = vmand %vm13946_vm14, %vm4978_vm9 }
 0x39c   : > { %v13929_v21 = vld [vmem:[#allocation344_spill] sm:$0xff]  ;;  %vm4980_vm15 = vmor %vm12053_vm6, %vm12048_vm12 }
 0x39d   : > { %vm13968_vm9 = vmmov %vm13953_vm13 }
 0x39e   : > { %4722 = vmatpush.bf16.msra.mxu0 %v13909_v0  ;;  %4735 = vmatpush.bf16.msra.mxu1 %v13910_v3  ;;  %v13919_v0 = vld [vmem:[#allocation335_spill] sm:$0xff]  ;;  %v13920_v3 = vld [vmem:[#allocation336_spill] sm:$0xff] }
 0x39f   : > { %4800 = vmatpush.bf16.msrb.mxu2 %v13911_v33  ;;  %4813 = vmatpush.bf16.msrb.mxu3 %v13912_v54  ;;  %v13921_v33 = vld [vmem:[#allocation337_spill] sm:$0xff]  ;;  %v13924_v54 = vld [vmem:[#allocation339_spill] sm:$0xff] }
 0x3a2   : > { %4723 = vmatpush.bf16.msra.mxu0 %v13913_v13  ;;  %4736 = vmatpush.bf16.msra.mxu1 %v13914_v60 }
 0x3a3   : > { %4801 = vmatpush.bf16.msrb.mxu2 %v11337_v51  ;;  %4814 = vmatpush.bf16.msrb.mxu3 %v11339_v39  ;;  %v13922_v51 = vperm.slane %v13765_v4, 3 }
 0x3a5   : > { %v4493_v39 = vadd.f32 %v11923_v46, %v13922_v51  ;;  %v4467_v46 = vadd.f32 %v11957_v42, %v11927_v40 }
 0x3a6   : > { %4724 = vmatpush.bf16.msra.mxu0 %v11343_v44  ;;  %4737 = vmatpush.bf16.msra.mxu1 %v13915_v38  ;;  %v13923_v44 = vld [vmem:[#allocation338_spill] sm:$0xff]  ;;  %v4518_v18 = vpop.f32.mrf.mxu0  ;;  %v4531_v13 = vpop.f32.mrf.mxu1  ;;  %v13930_v38 = vld [vmem:[#allocation345_spill] sm:$0xff] }
 0x3a7   : > { %4802 = vmatpush.bf16.msrb.mxu2 %v13916_v22  ;;  %4815 = vmatpush.bf16.msrb.mxu3 %v13917_v16  ;;  %v4506_v4 = vadd.f32 %v11925_v55, %v4493_v39  ;;  %v4480_v55 = vadd.f32 %v11959_v47, %v4467_v46  ;;  %v13942_v46 = vld [vmem:[#allocation352_spill] sm:$0xff] }
 0x3a9   : > { %4725 = vmatmul.bf16.vlgmr.msra.gmra.mxu0 %v13629_v52  ;;  %4738 = vmatmul.bf16.vlgmr.msra.gmra.mxu1 %v13630_v25  ;;  %v4519_v60 = vadd.f32 %v4518_v18, %v4506_v4  ;;  %v4883_v47 = vmul.f32 0.01, %v4480_v55  ;;  %vm4875_vm8 = vcmp.ge.f32.partialorder %v4480_v55, 0.0  ;;  %v13941_v4 = vld [vmem:[#allocation351_spill] sm:$0xff]  ;;  %v13943_v18 = vld [vmem:[#allocation353_spill] sm:$0xff] }
 0x3aa   : > { %4769 = vmatpush.bf16.msrb.mxu0 %v13918_v62  ;;  %4782 = vmatpush.bf16.msrb.mxu1 %v13919_v0  ;;  %v13935_v62 = vld [vmem:[#allocation346_spill] sm:$0xff]  ;;  %v13936_v0 = vld [vmem:[#allocation347_spill] sm:$0xff] }
 0x3ab   : > { %4847 = vmatpush.bf16.msra.mxu2 %v13920_v3  ;;  %4860 = vmatpush.bf16.msra.mxu3 %v13921_v33  ;;  %v4532_v40 = vadd.f32 %v4531_v13, %v4519_v60  ;;  %v13937_v3 = vld [vmem:[#allocation348_spill] sm:$0xff]  ;;  %v13938_v33 = vld [vmem:[#allocation349_spill] sm:$0xff]  ;;  %v4891_v13 = vsel %vm4875_vm8, %v4480_v55, %v4883_v47  ;;  %v4957_v60 = vrot.slane %v11887_v43, 2  ;;  %vm13967_vm8 = vmmov %vm13952_vm3 }
 0x3ac   : > { %4803 = vmatmul.bf16.vlgmr.msrb.gmra.mxu2 %v13629_v52  ;;  %4816 = vmatmul.bf16.vlgmr.msrb.gmra.mxu3 %v13630_v25  ;;  %v13927_v52 = vld [vmem:[#allocation342_spill] sm:$0xff]  ;;  %v13928_v25 = vld [vmem:[#allocation343_spill] sm:$0xff] }
 0x3ad   : > { %v4545_v16 = vadd.f32 %v11969_v7, %v4532_v40  ;;  %v13950_v40 = vld [vmem:[#allocation355_spill] sm:$0xff] }
 0x3ae   : > { %4770 = vmatpush.bf16.msrb.mxu0 %v13923_v44  ;;  %4783 = vmatpush.bf16.msrb.mxu1 %v13924_v54  ;;  %v4520_v7 = vpop.f32.mrf.mxu0  ;;  %v4533_v54 = vpop.f32.mrf.mxu1  ;;  %v4981_v55 = vld [vmem:[#allocation7] sm:$0xff] }
 0x3af   : > { %4848 = vmatpush.bf16.msra.mxu2 %v13925_v37  ;;  %4861 = vmatpush.bf16.msra.mxu3 %v13926_v17  ;;  %v4558_v51 = vadd.f32 %v11971_v63, %v4545_v16  ;;  %v4596_v39 = vpop.f32.mrf.mxu2  ;;  %v4609_v44 = vpop.f32.mrf.mxu3  ;;  %v13940_v17 = vld [vmem:[#allocation350_spill] sm:$0xff]  ;;  %v13951_v16 = vld [vmem:[#allocation356_spill] sm:$0xff] }
 0x3b1   : > { %vm4876_vm10 = vcmp.ge.f32.partialorder %v4558_v51, 0.0  ;;  %v4884_v37 = vmul.f32 0.01, %v4558_v51 }
 0x3b2   : > { %4771 = vmatpush.bf16.msrb.mxu0 %v13927_v52  ;;  %4784 = vmatpush.bf16.msrb.mxu1 %v13928_v25 }
 0x3b3   : > { %4849 = vmatpush.bf16.msra.mxu2 %v13929_v21  ;;  %4862 = vmatpush.bf16.msra.mxu3 %v13930_v38  ;;  %v4892_v52 = vsel %vm4876_vm10, %v4558_v51, %v4884_v37  ;;  %v13949_v38 = vld [vmem:[#allocation354_spill] sm:$0xff] }
 0x3b4   : > { %v4898_v21 = vpack.c.bf16 %v4892_v52, %v4891_v13 }
 0x3b6   : > { %4772 = vmatpush.bf16.msrb.mxu0 %v13935_v62  ;;  %4785 = vmatpush.bf16.msrb.mxu1 %v13936_v0  ;;  %v4958_v22 = vrot.slane %v4898_v21, 4  ;;  %v4959_v42 = vrot.slane %v4898_v21, 6  ;;  %v12111_v21 = vld [vmem:[#allocation12 + $0x38] sm:$0xff] }
 0x3b7   : > { %4850 = vmatpush.bf16.msra.mxu2 %v13937_v3  ;;  %4863 = vmatpush.bf16.msra.mxu3 %v13938_v33  ;;  %v4598_v62 = vpop.f32.mrf.mxu2  ;;  %v4611_v0 = vpop.f32.mrf.mxu3  ;;  %v4962_v3 = vsel %vm1168_vm2, %v11887_v43, %v4957_v60  ;;  %13954 = vst [vmem:[#allocation22_spill] sm:$0xff] %v12111_v21 }
 0x3b8   : > { %v4965_v33 = vsel %vm13952_vm3, %v4958_v22, %v4959_v42  ;;  %v12117_v22 = vld [vmem:[#allocation12 + $0xf8] sm:$0xff]  ;;  %v12129_v0 = vld [vmem:[#allocation12 + $0x30] sm:$0xff] }
 0x3b9   : > { %v4966_v47 = vsel %vm13953_vm13, %v4962_v3, %v4965_v33  ;;  %v12131_v3 = vld [vmem:[#allocation12 + $0x70] sm:$0xff] }
 0x3ba   : > { %4773 = vmatpush.bf16.msrb.mxu0 %v13940_v17  ;;  %4786 = vmatpush.bf16.msrb.mxu1 %v13941_v4  ;;  %v12133_v33 = vld [vmem:[#allocation12 + $0xb0] sm:$0xff] }
 0x3bb   : > { %4851 = vmatpush.bf16.msra.mxu2 %v13942_v46  ;;  %4864 = vmatpush.bf16.msra.mxu3 %v13943_v18 }
 0x3be   : > { %4774 = vmatpush.bf16.msrb.mxu0 %v13949_v38  ;;  %4787 = vmatpush.bf16.msrb.mxu1 %v13950_v40  ;;  %v12113_v38 = vld [vmem:[#allocation12 + $0x78] sm:$0xff] }
 0x3bf   : > { %4852 = vmatpush.bf16.msra.mxu2 %v13951_v16  ;;  %4865 = vmatpush.bf16.msra.mxu3 %v11436_v45  ;;  %v12072_v45 = vsel %vm4980_vm15, %v4966_v47, %v4981_v55  ;;  %v12115_v40 = vld [vmem:[#allocation12 + $0xb8] sm:$0xff]  ;;  %v12135_v47 = vld [vmem:[#allocation12 + $0xf0] sm:$0xff] }
 0x3c0   : > { %4983 = vst [vmem:[#allocation7] sm:$0xff] %v12072_v45 }
 0x3c2   : > { %4775 = vmatpush.bf16.msrb.mxu0 %v11444_v41  ;;  %4788 = vmatpush.bf16.msrb.mxu1 %v11446_v58 }
 0x3c3   : > { %4853 = vmatpush.bf16.msra.mxu2 %v11450_v31  ;;  %4866 = vmatpush.bf16.msra.mxu3 %v11452_v1 }
 0x3c6   : > { %4776 = vmatpush.bf16.msrb.mxu0 %v11462_v30  ;;  %4789 = vmatpush.bf16.msrb.mxu1 %v11464_v24  ;;  %v4570_v41 = vpop.f32.mrf.mxu0  ;;  %v4583_v58 = vpop.f32.mrf.mxu1 }
 0x3c7   : > { %4854 = vmatpush.bf16.msra.mxu2 %v11468_v34  ;;  %4867 = vmatpush.bf16.msra.mxu3 %v11470_v6  ;;  %v4571_v31 = vadd.f32 %v4570_v41, %v1619_v28  ;;  %v12139_v41 = vld [vmem:[#allocation12 + $0x28] sm:$0xff] }
 0x3c9   : > { %4777 = vmatmul.bf16.vlgmr.msrb.gmra.mxu0 %v11647_v9  ;;  %4790 = vmatmul.bf16.vlgmr.msrb.gmra.mxu1 %v11649_v14  ;;  %v4584_v1 = vadd.f32 %v4583_v58, %v4571_v31  ;;  %v12141_v58 = vld [vmem:[#allocation12 + $0x68] sm:$0xff] }
 0x3ca   : > { %4821 = vmatpush.bf16.msra.mxu0 %v11472_v49  ;;  %4834 = vmatpush.bf16.msra.mxu1 %v11474_v20 }
 0x3cb   : > { %4855 = vmatmul.bf16.vlgmr.msra.gmra.mxu2 %v11647_v9  ;;  %4868 = vmatmul.bf16.vlgmr.msra.gmra.mxu3 %v11649_v14  ;;  %v4597_v30 = vadd.f32 %v4596_v39, %v4584_v1 }
 0x3cc   : > { %5844 = vmatpush.bf16.msrb.mxu2 %v12115_v40  ;;  %5857 = vmatpush.bf16.msrb.mxu3 %v12117_v22 }
 0x3cd   : > { %v4610_v6 = vadd.f32 %v4609_v44, %v4597_v30  ;;  %v12145_v30 = vld [vmem:[#allocation12 + $0xa8] sm:$0xff] }
 0x3ce   : > { %4822 = vmatpush.bf16.msra.mxu0 %v11482_v61  ;;  %4835 = vmatpush.bf16.msra.mxu1 %v11484_v35  ;;  %v4572_v20 = vpop.f32.mrf.mxu0  ;;  %v4585_v61 = vpop.f32.mrf.mxu1 }
 0x3cf   : > { %v4648_v24 = vpop.f32.mrf.mxu2  ;;  %v4661_v34 = vpop.f32.mrf.mxu3  ;;  %v12159_v20 = vld [vmem:[#allocation12 + $0xe0] sm:$0xff]  ;;  %v12163_v61 = vld [vmem:[#allocation12 + $0x18] sm:$0xff] }
 0x3d0   : > { %v4649_v49 = vadd.f32 %v4648_v24, %v1620_v59  ;;  %5845 = vmatpush.bf16.msrb.mxu2 %v12133_v33  ;;  %5858 = vmatpush.bf16.msrb.mxu3 %v12135_v47  ;;  %v12147_v24 = vld [vmem:[#allocation12 + $0xe8] sm:$0xff]  ;;  %13956 = vst [vmem:[#allocation24_spill] sm:$0xff] %v12159_v20 }
 0x3d1   : > { %13957 = vst [vmem:[#allocation25_spill] sm:$0xff] %v12163_v61 }
 0x3d2   : > { %4823 = vmatpush.bf16.msra.mxu0 %v11494_v48  ;;  %4836 = vmatpush.bf16.msra.mxu1 %v11496_v56  ;;  %v4662_v35 = vadd.f32 %v4661_v34, %v4649_v49  ;;  %v12151_v34 = vld [vmem:[#allocation12 + $0x20] sm:$0xff] }
 0x3d3   : > { %v12157_v49 = vld [vmem:[#allocation12 + $0xa0] sm:$0xff] }
 0x3d4   : > { %5846 = vmatpush.bf16.msrb.mxu2 %v12145_v30  ;;  %5859 = vmatpush.bf16.msrb.mxu3 %v12147_v24  ;;  %13955 = vst [vmem:[#allocation23_spill] sm:$0xff] %v12157_v49 }
 0x3d6   : > { %4824 = vmatpush.bf16.msra.mxu0 %v11507_v53  ;;  %4837 = vmatpush.bf16.msra.mxu1 %v11509_v8 }
 0x3d7   : > { %v4650_v48 = vpop.f32.mrf.mxu2  ;;  %v4663_v56 = vpop.f32.mrf.mxu3 }
 0x3d8   : > { %5847 = vmatpush.bf16.msrb.mxu2 %v12157_v49  ;;  %5860 = vmatpush.bf16.msrb.mxu3 %v12159_v20  ;;  %v12169_v48 = vld [vmem:[#allocation12 + $0x98] sm:$0xff] }
 0x3d9   : > { %v12171_v56 = vld [vmem:[#allocation12 + $0xd8] sm:$0xff] }
 0x3da   : > { %4825 = vmatpush.bf16.msra.mxu0 %v11517_v19  ;;  %4838 = vmatpush.bf16.msra.mxu1 %v11519_v50 }
 0x3dc   : > { %5848 = vmatpush.bf16.msrb.mxu2 %v12169_v48  ;;  %5861 = vmatpush.bf16.msrb.mxu3 %v12171_v56 }
 0x3de   : > { %4826 = vmatpush.bf16.msra.mxu0 %v11530_v12  ;;  %4839 = vmatpush.bf16.msra.mxu1 %v11532_v10 }
 0x3e2   : > { %4827 = vmatpush.bf16.msra.mxu0 %v11540_v32  ;;  %4840 = vmatpush.bf16.msra.mxu1 %v11542_v5 }
 0x3e6   : > { %4828 = vmatpush.bf16.msra.mxu0 %v11548_v2  ;;  %4841 = vmatpush.bf16.msra.mxu1 %v11550_v11  ;;  %v4622_v28 = vpop.f32.mrf.mxu0  ;;  %v4635_v53 = vpop.f32.mrf.mxu1 }
 0x3e7   : > { %v4623_v8 = vadd.f32 %v4622_v28, %v4610_v6  ;;  %v12153_v6 = vld [vmem:[#allocation12 + $0x60] sm:$0xff] }
 0x3e9   : > { %4829 = vmatmul.bf16.vlgmr.msra.gmra.mxu0 %v11562_v26  ;;  %4842 = vmatmul.bf16.vlgmr.msra.gmra.mxu1 %v11564_v29  ;;  %v4636_v59 = vadd.f32 %v4635_v53, %v4623_v8 }
 0x3ea   : > { %5818 = vmatpush.bf16.msrb.mxu0 %v12111_v21  ;;  %5831 = vmatpush.bf16.msrb.mxu1 %v12113_v38 }
 0x3eb   : > { %v4885_v11 = vmul.f32 0.01, %v4636_v59  ;;  %vm4877_vm4 = vcmp.ge.f32.partialorder %v4636_v59, 0.0 }
 0x3ed   : > { %v4893_v37 = vsel %vm4877_vm4, %v4636_v59, %v4885_v11  ;;  %v12195_v11 = vld [vmem:[#allocation12 + $0xc8] sm:$0xff] }
 0x3ee   : > { %v4624_v12 = vpop.f32.mrf.mxu0  ;;  %v4637_v10 = vpop.f32.mrf.mxu1  ;;  %5819 = vmatpush.bf16.msrb.mxu0 %v12129_v0  ;;  %5832 = vmatpush.bf16.msrb.mxu1 %v12131_v3 }
 0x3ef   : > { %v4700_v19 = vpop.f32.mrf.mxu2  ;;  %v4713_v50 = vpop.f32.mrf.mxu3 }
 0x3f2   : > { %5820 = vmatpush.bf16.msrb.mxu0 %v12139_v41  ;;  %5833 = vmatpush.bf16.msrb.mxu1 %v12141_v58 }
 0x3f6   : > { %5821 = vmatpush.bf16.msrb.mxu0 %v12151_v34  ;;  %5834 = vmatpush.bf16.msrb.mxu1 %v12153_v6 }
 0x3f7   : > { %v4702_v9 = vpop.f32.mrf.mxu2  ;;  %v4715_v32 = vpop.f32.mrf.mxu3 }
 0x3f8   : > { %v12177_v9 = vld [vmem:[#allocation12 + $0x10] sm:$0xff] }
 0x3f9   : > { %v12179_v32 = vld [vmem:[#allocation12 + $0x50] sm:$0xff] }
 0x3fa   : > { %5822 = vmatpush.bf16.msrb.mxu0 %v12163_v61 }
 0x3fe   : > { %5823 = vmatpush.bf16.msrb.mxu0 %v12177_v9 }
 0x406   : > { %v4674_v14 = vpop.f32.mrf.mxu0  ;;  %v4687_v5 = vpop.f32.mrf.mxu1 }
 0x407   : > { %v4675_v43 = vadd.f32 %v4674_v14, %v4662_v35  ;;  %v12165_v35 = vld [vmem:[#allocation12 + $0x58] sm:$0xff]  ;;  %v12181_v14 = vld [vmem:[#allocation12 + $0x90] sm:$0xff] }
 0x408   : > { %5835 = vmatpush.bf16.msrb.mxu1 %v12165_v35  ;;  %5849 = vmatpush.bf16.msrb.mxu2 %v12181_v14 }
 0x409   : > { %v4688_v2 = vadd.f32 %v4687_v5, %v4675_v43  ;;  %v12183_v5 = vld [vmem:[#allocation12 + $0xd0] sm:$0xff]  ;;  %v12189_v43 = vld [vmem:[#allocation12 + $0x8] sm:$0xff] }
 0x40a   : > { %5862 = vmatpush.bf16.msrb.mxu3 %v12183_v5  ;;  %5824 = vmatpush.bf16.msrb.mxu0 %v12189_v43 }
 0x40b   : > { %v4701_v51 = vadd.f32 %v4700_v19, %v4688_v2  ;;  %v12191_v2 = vld [vmem:[#allocation12 + $0x48] sm:$0xff] }
 0x40c   : > { %5836 = vmatpush.bf16.msrb.mxu1 %v12179_v32 }
 0x40d   : > { %v4714_v39 = vadd.f32 %v4713_v50, %v4701_v51  ;;  %v12193_v51 = vld [vmem:[#allocation12 + $0x88] sm:$0xff] }
 0x40e   : > { %v4676_v29 = vpop.f32.mrf.mxu0  ;;  %v4689_v7 = vpop.f32.mrf.mxu1  ;;  %5850 = vmatpush.bf16.msrb.mxu2 %v12193_v51  ;;  %5863 = vmatpush.bf16.msrb.mxu3 %v12195_v11 }
 0x40f   : > { %v4752_v26 = vpop.f32.mrf.mxu2  ;;  %v4765_v44 = vpop.f32.mrf.mxu3  ;;  %vm4878_vm5 = vcmp.ge.f32.partialorder %v4714_v39, 0.0  ;;  %v4886_v54 = vmul.f32 0.01, %v4714_v39  ;;  %v12208_v29 = vld [vmem:[#allocation12 + $0x80] sm:$0xff] }
 0x410   : > { %5837 = vmatpush.bf16.msrb.mxu1 %v12191_v2  ;;  %v12210_v7 = vld [vmem:[#allocation12 + $0xc0] sm:$0xff] }
 0x411   : > { %v4894_v17 = vsel %vm4878_vm5, %v4714_v39, %v4886_v54  ;;  %v12212_v54 = vld [vmem:[#allocation12 + $0x138] sm:$0xff] }
 0x412   : > { %v12107_v4 = vpack.c.bf16 %v4894_v17, %v4893_v37  ;;  %v12218_v37 = vld [vmem:[#allocation12 + $0x1f8] sm:$0xff]  ;;  %5851 = vmatpush.bf16.msrb.mxu2 %v12208_v29  ;;  %5864 = vmatpush.bf16.msrb.mxu3 %v12210_v7 }
 0x416   : > { %5909 = vmatpush.bf16.msra.mxu3 %v12218_v37 }
 0x417   : > { %v4754_v46 = vpop.f32.mrf.mxu2  ;;  %v4767_v18 = vpop.f32.mrf.mxu3 }
 0x426   : > { %v4726_v63 = vpop.f32.mrf.mxu0  ;;  %v4739_v13 = vpop.f32.mrf.mxu1 }
 0x427   : > { %v4727_v52 = vadd.f32 %v4726_v63, %v1621_v23 }
 0x429   : > { %v4740_v25 = vadd.f32 %v4739_v13, %v4727_v52  ;;  %v12228_v52 = vld [vmem:[#allocation12 + $0x130] sm:$0xff] }
 0x42b   : > { %v4753_v60 = vadd.f32 %v4752_v26, %v4740_v25  ;;  %v12202_v26 = vld [vmem:[#allocation12] sm:$0xff]  ;;  %v12230_v25 = vld [vmem:[#allocation12 + $0x170] sm:$0xff] }
 0x42c   : > { %5825 = vmatpush.bf16.msrb.mxu0 %v12202_v26 }
 0x42d   : > { %v12123_v55 = vadd.f32 %v4765_v44, %v4753_v60  ;;  %v12204_v44 = vld [vmem:[#allocation12 + $0x40] sm:$0xff]  ;;  %v12234_v60 = vld [vmem:[#allocation12 + $0x1b0] sm:$0xff] }
 0x42e   : > { %v4728_v23 = vpop.f32.mrf.mxu0  ;;  %v4741_v62 = vpop.f32.mrf.mxu1  ;;  %5838 = vmatpush.bf16.msrb.mxu1 %v12204_v44 }
 0x42f   : > { %v12119_v42 = vpop.f32.mrf.mxu2  ;;  %v12121_v16 = vpop.f32.mrf.mxu3  ;;  %v12240_v62 = vld [vmem:[#allocation12 + $0x128] sm:$0xff] }
 0x430   : > { %v4805_v39 = vadd.f32 %v12119_v42, %v1622_v36  ;;  %v12216_v36 = vld [vmem:[#allocation12 + $0x1b8] sm:$0xff]  ;;  %5870 = vmatpush.bf16.msra.mxu0 %v12212_v54  ;;  %v12236_v42 = vld [vmem:[#allocation12 + $0x1f0] sm:$0xff] }
 0x431   : > { %5896 = vmatpush.bf16.msra.mxu2 %v12216_v36  ;;  %5910 = vmatpush.bf16.msra.mxu3 %v12236_v42 }
 0x432   : > { %v4818_v17 = vadd.f32 %v12121_v16, %v4805_v39  ;;  %5883 = vmatpush.bf16.msra.mxu1 %v12214_v57  ;;  %v12254_v39 = vld [vmem:[#allocation12 + $0x160] sm:$0xff] }
 0x433   : > { %13960 = vst [vmem:[#allocation28_spill] sm:$0xff] %v12254_v39 }
 0x434   : > { %5871 = vmatpush.bf16.msra.mxu0 %v12228_v52 }
 0x435   : > { %5897 = vmatpush.bf16.msra.mxu2 %v12234_v60 }
 0x436   : > { %5884 = vmatpush.bf16.msra.mxu1 %v12230_v25 }
 0x437   : > { %v4806_v31 = vpop.f32.mrf.mxu2  ;;  %v4819_v1 = vpop.f32.mrf.mxu3 }
 0x438   : > { %v12242_v31 = vld [vmem:[#allocation12 + $0x168] sm:$0xff]  ;;  %5872 = vmatpush.bf16.msra.mxu0 %v12240_v62 }
 0x439   : > { %v12246_v1 = vld [vmem:[#allocation12 + $0x1a8] sm:$0xff] }
 0x43a   : > { %5885 = vmatpush.bf16.msra.mxu1 %v12242_v31  ;;  %5898 = vmatpush.bf16.msra.mxu2 %v12246_v1 }
 0x43e   : > { %5886 = vmatpush.bf16.msra.mxu1 %v12254_v39 }
 0x446   : > { %v4778_v28 = vpop.f32.mrf.mxu0  ;;  %v4791_v53 = vpop.f32.mrf.mxu1 }
 0x447   : > { %v4779_v46 = vadd.f32 %v4778_v28, %v12123_v55  ;;  %v12248_v28 = vld [vmem:[#allocation12 + $0x1e8] sm:$0xff] }
 0x448   : > { %13958 = vst [vmem:[#allocation26_spill] sm:$0xff] %v12248_v28  ;;  %5911 = vmatpush.bf16.msra.mxu3 %v12248_v28  ;;  %v12271_v28 = vld [vmem:[#allocation12 + $0x198] sm:$0xff] }
 0x449   : > { %v4792_v16 = vadd.f32 %v4791_v53, %v4779_v46  ;;  %13965 = vst [vmem:[#allocation33_spill] sm:$0xff] %v12271_v28 }
 0x44b   : > { %vm4879_vm11 = vcmp.ge.f32.partialorder %v4792_v16, 0.0 }
 0x44e   : > { %v4856_v8 = vpop.f32.mrf.mxu2  ;;  %v4869_v59 = vpop.f32.mrf.mxu3 }
 0x44f   : > { %v4780_v19 = vpop.f32.mrf.mxu0  ;;  %v4793_v50 = vpop.f32.mrf.mxu1 }
 0x450   : > { %v4887_v19 = vmul.f32 0.01, %v4792_v16 }
 0x452   : > { %v4895_v46 = vsel %vm4879_vm11, %v4792_v16, %v4887_v19  ;;  %v12273_v16 = vld [vmem:[#allocation12 + $0x1d8] sm:$0xff] }
 0x453   : > { %13966 = vst [vmem:[#allocation34_spill] sm:$0xff] %v12273_v16 }
 0x456   : > { %v4858_v12 = vpop.f32.mrf.mxu2  ;;  %v4871_v10 = vpop.f32.mrf.mxu3 }
 0x457   : > { %v12252_v10 = vld [vmem:[#allocation12 + $0x120] sm:$0xff] }
 0x458   : > { %13959 = vst [vmem:[#allocation27_spill] sm:$0xff] %v12252_v10  ;;  %5873 = vmatpush.bf16.msra.mxu0 %v12252_v10 }
 0x466   : > { %v4830_v18 = vpop.f32.mrf.mxu0  ;;  %v4843_v63 = vpop.f32.mrf.mxu1 }
 0x467   : > { %v4831_v13 = vadd.f32 %v4830_v18, %v4818_v17  ;;  %v12258_v17 = vld [vmem:[#allocation12 + $0x1a0] sm:$0xff] }
 0x468   : > { %13961 = vst [vmem:[#allocation29_spill] sm:$0xff] %v12258_v17  ;;  %5899 = vmatpush.bf16.msra.mxu2 %v12258_v17 }
 0x469   : > { %v4844_v55 = vadd.f32 %v4843_v63, %v4831_v13  ;;  %v4986_v63 = vrot.slane %v12107_v4, 2 }
 0x46b   : > { %v4857_v23 = vadd.f32 %v4856_v8, %v4844_v55  ;;  %v12265_v55 = vld [vmem:[#allocation12 + $0x118] sm:$0xff]  ;;  %v4991_v19 = vsel %vm1168_vm2, %v12107_v4, %v4986_v63  ;;  %v12289_v4 = vld [vmem:[#allocation12 + $0x1d0] sm:$0xff]  ;;  %vm13979_vm2 = vmor %vm10418_vm1, %vm10413_vm0 }
 0x46c   : > { %13963 = vst [vmem:[#allocation31_spill] sm:$0xff] %v12265_v55  ;;  %5874 = vmatpush.bf16.msra.mxu0 %v12265_v55  ;;  %5900 = vmatpush.bf16.msra.mxu2 %v12271_v28  ;;  %v12301_v28 = vld [vmem:[#allocation12 + $0x1c8] sm:$0xff]  ;;  %v12388_v55 = vld [vmem:[#allocation12 + $0x250] sm:$0xff] }
 0x46d   : > { %v4870_v53 = vadd.f32 %v4869_v59, %v4857_v23  ;;  %v12260_v59 = vld [vmem:[#allocation12 + $0x1e0] sm:$0xff]  ;;  %v12267_v23 = vld [vmem:[#allocation12 + $0x158] sm:$0xff]  ;;  %13972 = vst [vmem:[#allocation38_spill] sm:$0xff] %v12289_v4 }
 0x46e   : > { %v4832_v8 = vpop.f32.mrf.mxu0  ;;  %v4845_v50 = vpop.f32.mrf.mxu1  ;;  %13962 = vst [vmem:[#allocation30_spill] sm:$0xff] %v12260_v59  ;;  %5912 = vmatpush.bf16.msra.mxu3 %v12260_v59  ;;  %5887 = vmatpush.bf16.msra.mxu1 %v12267_v23  ;;  %v12287_v59 = vld [vmem:[#allocation12 + $0x190] sm:$0xff] }
 0x46f   : > { %vm4880_vm7 = vcmp.ge.f32.partialorder %v4870_v53, 0.0  ;;  %v4888_v12 = vmul.f32 0.01, %v4870_v53  ;;  %13964 = vst [vmem:[#allocation32_spill] sm:$0xff] %v12267_v23 }
 0x470   : > { %13971 = vst [vmem:[#allocation37_spill] sm:$0xff] %v12287_v59  ;;  %5901 = vmatpush.bf16.msra.mxu2 %v12287_v59 }
 0x471   : > { %v4896_v18 = vsel %vm4880_vm7, %v4870_v53, %v4888_v12  ;;  %13976 = vst [vmem:[#allocation42_spill] sm:$0xff] %v12301_v28 }
 0x472   : > { %v4900_v13 = vpack.c.bf16 %v4896_v18, %v4895_v46  ;;  %v12281_v46 = vld [vmem:[#allocation12 + $0x110] sm:$0xff]  ;;  %5913 = vmatpush.bf16.msra.mxu3 %v12273_v16  ;;  %v12299_v16 = vld [vmem:[#allocation12 + $0x188] sm:$0xff]  ;;  %14005 = vst [vmem:[#allocation74_spill] sm:$0xff] %v12388_v55 }
 0x473   : > { %13969 = vst [vmem:[#allocation35_spill] sm:$0xff] %v12281_v46  ;;  %v12283_v18 = vld [vmem:[#allocation12 + $0x150] sm:$0xff]  ;;  %5875 = vmatpush.bf16.msra.mxu0 %v12281_v46 }
 0x474   : > { %v4987_v8 = vrot.slane %v4900_v13, 4  ;;  %v4988_v50 = vrot.slane %v4900_v13, 6  ;;  %13970 = vst [vmem:[#allocation36_spill] sm:$0xff] %v12283_v18  ;;  %5888 = vmatpush.bf16.msra.mxu1 %v12283_v18  ;;  %5902 = vmatpush.bf16.msra.mxu2 %v12299_v16  ;;  %v12382_v18 = vld [vmem:[#allocation12 + $0x298] sm:$0xff] }
 0x475   : > { %13975 = vst [vmem:[#allocation41_spill] sm:$0xff] %v12299_v16  ;;  %v12334_v16 = vld [vmem:[#allocation12 + $0x2f8] sm:$0xff] }
 0x476   : > { %v4994_v53 = vsel %vm13967_vm8, %v4987_v8, %v4988_v50  ;;  %v5010_v50 = vld [vmem:[#allocation4] sm:$0xff]  ;;  %5914 = vmatpush.bf16.msra.mxu3 %v12289_v4  ;;  %13987 = vst [vmem:[#allocation46_spill] sm:$0xff] %v12334_v16 }
 0x477   : > { %v4995_v12 = vsel %vm13968_vm9, %v4991_v19, %v4994_v53  ;;  %v12293_v19 = vld [vmem:[#allocation12 + $0x108] sm:$0xff]  ;;  %14002 = vst [vmem:[#allocation72_spill] sm:$0xff] %v12382_v18 }
 0x478   : > { %v4996_v13 = vshrl.u32 %v4995_v12, 16  ;;  %v4999_v8 = vshll.u32 %v4995_v12, 16  ;;  %13973 = vst [vmem:[#allocation39_spill] sm:$0xff] %v12293_v19  ;;  %v12295_v53 = vld [vmem:[#allocation12 + $0x148] sm:$0xff]  ;;  %5876 = vmatpush.bf16.msra.mxu0 %v12293_v19  ;;  %v12330_v12 = vld [vmem:[#allocation12 + $0x278] sm:$0xff] }
 0x479   : > { %13974 = vst [vmem:[#allocation40_spill] sm:$0xff] %v12295_v53  ;;  %5889 = vmatpush.bf16.msra.mxu1 %v12295_v53  ;;  %v12332_v53 = vld [vmem:[#allocation12 + $0x2b8] sm:$0xff] }
 0x47a   : > { %v4998_v63 = vrot.slane %v4996_v13, 7  ;;  %5915 = vmatpush.bf16.msra.mxu3 %v12301_v28  ;;  %v12320_v13 = vld [vmem:[#allocation12 + $0x180] sm:$0xff]  ;;  %13985 = vst [vmem:[#allocation64_spill] sm:$0xff] %v12330_v12 }
 0x47b   : > { %13982 = vst [vmem:[#allocation45_spill] sm:$0xff] %v12320_v13  ;;  %5903 = vmatpush.bf16.msra.mxu2 %v12320_v13  ;;  %v12341_v13 = vld [vmem:[#allocation12 + $0x270] sm:$0xff] }
 0x47c   : > { %v5001_v23 = vor.u32 %v4999_v8, %v4998_v63  ;;  %v12313_v63 = vld [vmem:[#allocation12 + $0x100] sm:$0xff]  ;;  %13986 = vst [vmem:[#allocation65_spill] sm:$0xff] %v12332_v53 }
 0x47d   : > { %13980 = vst [vmem:[#allocation43_spill] sm:$0xff] %v12313_v63  ;;  %v12315_v8 = vld [vmem:[#allocation12 + $0x140] sm:$0xff]  ;;  %5877 = vmatpush.bf16.msra.mxu0 %v12313_v63 }
 0x47e   : > { %v12308_v46 = vsel %vm13979_vm2, %v5001_v23, %v5010_v50  ;;  %13981 = vst [vmem:[#allocation44_spill] sm:$0xff] %v12315_v8  ;;  %v12322_v23 = vld [vmem:[#allocation12 + $0x1c0] sm:$0xff]  ;;  %5890 = vmatpush.bf16.msra.mxu1 %v12315_v8  ;;  %v12328_v50 = vld [vmem:[#allocation12 + $0x238] sm:$0xff] }
 0x47f   : > { %5012 = vst [vmem:[#allocation4] sm:$0xff] %v12308_v46  ;;  %5916 = vmatpush.bf16.msra.mxu3 %v12322_v23 }
 0x480   : > { %5017 = vst [vmem:[#allocation1] ss:$4 sm:$0xff] %v12308_v46 }
 0x481   : > { %13983 = vst [vmem:[#allocation52_spill] sm:$0xff] %v12322_v23  ;;  %v12339_v23 = vld [vmem:[#allocation12 + $0x230] sm:$0xff] }
 0x482   : > { %13984 = vst [vmem:[#allocation53_spill] sm:$0xff] %v12328_v50 }
 0x483   : > { %13988 = vst [vmem:[#allocation47_spill] sm:$0xff] %v12339_v23 }
 0x484   : > { %13989 = vst [vmem:[#allocation55_spill] sm:$0xff] %v12341_v13 }
 0x487   : > { %v5018_v28 = vld.sshfl [vmem:[#allocation1] sm:$0xff pattern:$0x73625140]  ;;  %v5019_v19 = vld.sshfl [vmem:[#allocation1 + $0x8] sm:$0xff pattern:$0x73625140] }
 0x488   : > { %5826 = vmatmul.bf16.vlgmr.msrb.gmra.mxu0 %v5018_v28  ;;  %5839 = vmatmul.bf16.vlgmr.msrb.gmra.mxu1 %v5019_v19  ;;  %v5020_v4 = vld.sshfl [vmem:[#allocation1 + $0x10] sm:$0xff pattern:$0x73625140]  ;;  %v5021_v63 = vld.sshfl [vmem:[#allocation1 + $0x18] sm:$0xff pattern:$0x73625140] }
 0x489   : > { %5852 = vmatmul.bf16.vlgmr.msrb.gmra.mxu2 %v5020_v4  ;;  %5865 = vmatmul.bf16.vlgmr.msrb.gmra.mxu3 %v5021_v63  ;;  %5027 = vst [vmem:[#allocation1] ss:$4 sm:$0xff] %v11458_v27  ;;  %v12345_v28 = vld [vmem:[#allocation12 + $0x2b0] sm:$0xff]  ;;  %v12351_v4 = vld [vmem:[#allocation12 + $0x228] sm:$0xff] }
 0x48a   : > { %5922 = vmatpush.bf16.msrb.mxu0 %v12328_v50  ;;  %5935 = vmatpush.bf16.msrb.mxu1 %v12330_v12  ;;  %13990 = vst [vmem:[#allocation56_spill] sm:$0xff] %v12345_v28  ;;  %v12347_v19 = vld [vmem:[#allocation12 + $0x2f0] sm:$0xff]  ;;  %v12353_v63 = vld [vmem:[#allocation12 + $0x268] sm:$0xff] }
 0x48b   : > { %5948 = vmatpush.bf16.msrb.mxu2 %v12332_v53  ;;  %5961 = vmatpush.bf16.msrb.mxu3 %v12334_v16  ;;  %13991 = vst [vmem:[#allocation48_spill] sm:$0xff] %v12347_v19  ;;  %v12357_v12 = vld [vmem:[#allocation12 + $0x2a8] sm:$0xff] }
 0x48c   : > { %13992 = vst [vmem:[#allocation49_spill] sm:$0xff] %v12351_v4  ;;  %v12359_v53 = vld [vmem:[#allocation12 + $0x2e8] sm:$0xff] }
 0x48d   : > { %13993 = vst [vmem:[#allocation60_spill] sm:$0xff] %v12353_v63 }
 0x48e   : > { %5923 = vmatpush.bf16.msrb.mxu0 %v12339_v23  ;;  %5936 = vmatpush.bf16.msrb.mxu1 %v12341_v13  ;;  %13994 = vst [vmem:[#allocation61_spill] sm:$0xff] %v12357_v12  ;;  %v12363_v13 = vld [vmem:[#allocation12 + $0x220] sm:$0xff] }
 0x48f   : > { %5949 = vmatpush.bf16.msrb.mxu2 %v12345_v28  ;;  %5962 = vmatpush.bf16.msrb.mxu3 %v12347_v19  ;;  %13995 = vst [vmem:[#allocation50_spill] sm:$0xff] %v12359_v53  ;;  %v12365_v23 = vld [vmem:[#allocation12 + $0x260] sm:$0xff] }
 0x490   : > { %v5028_v16 = vld.sshfl [vmem:[#allocation1] sm:$0xff pattern:$0x73625140]  ;;  %v5029_v50 = vld.sshfl [vmem:[#allocation1 + $0x8] sm:$0xff pattern:$0x73625140] }
 0x491   : > { %v5030_v8 = vld.sshfl [vmem:[#allocation1 + $0x10] sm:$0xff pattern:$0x73625140]  ;;  %v5031_v59 = vld.sshfl [vmem:[#allocation1 + $0x18] sm:$0xff pattern:$0x73625140] }
 0x492   : > { %5924 = vmatpush.bf16.msrb.mxu0 %v12351_v4  ;;  %5937 = vmatpush.bf16.msrb.mxu1 %v12353_v63  ;;  %13996 = vst [vmem:[#allocation51_spill] sm:$0xff] %v12363_v13  ;;  %v12370_v19 = vld [vmem:[#allocation12 + $0x2a0] sm:$0xff]  ;;  %v12376_v4 = vld [vmem:[#allocation12 + $0x218] sm:$0xff] }
 0x493   : > { %13997 = vst [vmem:[#allocation66_spill] sm:$0xff] %v12365_v23  ;;  %5950 = vmatpush.bf16.msrb.mxu2 %v12357_v12  ;;  %5963 = vmatpush.bf16.msrb.mxu3 %v12359_v53  ;;  %v12372_v28 = vld [vmem:[#allocation12 + $0x2e0] sm:$0xff]  ;;  %v12378_v63 = vld [vmem:[#allocation12 + $0x258] sm:$0xff]  ;;  %v12386_v53 = vld [vmem:[#allocation12 + $0x210] sm:$0xff] }
 0x494   : > { %5037 = vst [vmem:[#allocation1] ss:$4 sm:$0xff] %v11769_v15  ;;  %v12384_v12 = vld [vmem:[#allocation12 + $0x2d8] sm:$0xff] }
 0x495   : > { %13998 = vst [vmem:[#allocation67_spill] sm:$0xff] %v12370_v19 }
 0x496   : > { %13999 = vst [vmem:[#allocation54_spill] sm:$0xff] %v12372_v28  ;;  %5925 = vmatpush.bf16.msrb.mxu0 %v12363_v13  ;;  %5938 = vmatpush.bf16.msrb.mxu1 %v12365_v23 }
 0x497   : > { %14000 = vst [vmem:[#allocation57_spill] sm:$0xff] %v12376_v4  ;;  %5951 = vmatpush.bf16.msrb.mxu2 %v12370_v19  ;;  %5964 = vmatpush.bf16.msrb.mxu3 %v12372_v28 }
 0x498   : > { %14001 = vst [vmem:[#allocation71_spill] sm:$0xff] %v12378_v63  ;;  %5878 = vmatmul.bf16.vlgmr.msra.gmra.mxu0 %v5028_v16  ;;  %5891 = vmatmul.bf16.vlgmr.msra.gmra.mxu1 %v5029_v50  ;;  %v12394_v16 = vld [vmem:[#allocation12 + $0x290] sm:$0xff] }
 0x499   : > { %14003 = vst [vmem:[#allocation62_spill] sm:$0xff] %v12384_v12  ;;  %5904 = vmatmul.bf16.vlgmr.msra.gmra.mxu2 %v5030_v8  ;;  %5917 = vmatmul.bf16.vlgmr.msra.gmra.mxu3 %v5031_v59  ;;  %v12396_v50 = vld [vmem:[#allocation12 + $0x2d0] sm:$0xff]  ;;  %v12401_v59 = vld [vmem:[#allocation12 + $0x208] sm:$0xff] }
 0x49a   : > { %14004 = vst [vmem:[#allocation63_spill] sm:$0xff] %v12386_v53  ;;  %5926 = vmatpush.bf16.msrb.mxu0 %v12376_v4  ;;  %5939 = vmatpush.bf16.msrb.mxu1 %v12378_v63  ;;  %v12403_v8 = vld [vmem:[#allocation12 + $0x248] sm:$0xff]  ;;  %v12411_v63 = vld [vmem:[#allocation12 + $0x200] sm:$0xff] }
 0x49b   : > { %v5038_v23 = vld.sshfl [vmem:[#allocation1] sm:$0xff pattern:$0x73625140]  ;;  %v5039_v13 = vld.sshfl [vmem:[#allocation1 + $0x8] sm:$0xff pattern:$0x73625140]  ;;  %5952 = vmatpush.bf16.msrb.mxu2 %v12382_v18  ;;  %5965 = vmatpush.bf16.msrb.mxu3 %v12384_v12 }
 0x49c   : > { %v5040_v19 = vld.sshfl [vmem:[#allocation1 + $0x10] sm:$0xff pattern:$0x73625140]  ;;  %v5041_v28 = vld.sshfl [vmem:[#allocation1 + $0x18] sm:$0xff pattern:$0x73625140] }
 0x49d   : > { %14006 = vst [vmem:[#allocation75_spill] sm:$0xff] %v12394_v16  ;;  %v12407_v18 = vld [vmem:[#allocation12 + $0x288] sm:$0xff]  ;;  %v12413_v4 = vld [vmem:[#allocation12 + $0x240] sm:$0xff] }
 0x49e   : > { %14007 = vst [vmem:[#allocation68_spill] sm:$0xff] %v12396_v50  ;;  %5927 = vmatpush.bf16.msrb.mxu0 %v12386_v53  ;;  %5940 = vmatpush.bf16.msrb.mxu1 %v12388_v55  ;;  %v12409_v12 = vld [vmem:[#allocation12 + $0x2c8] sm:$0xff]  ;;  %v12417_v53 = vld [vmem:[#allocation12 + $0x2c0] sm:$0xff] }
 0x49f   : > { %5975 = vst [vmem:[#allocation1] ss:$4 sm:$0xff] %v11458_v27  ;;  %5953 = vmatpush.bf16.msrb.mxu2 %v12394_v16  ;;  %5966 = vmatpush.bf16.msrb.mxu3 %v12396_v50  ;;  %v12415_v27 = vld [vmem:[#allocation12 + $0x280] sm:$0xff] }
 0x4a0   : > { %14008 = vst [vmem:[#allocation69_spill] sm:$0xff] %v12409_v12 }
 0x4a1   : > { %14009 = vst [vmem:[#allocation76_spill] sm:$0xff] %v12411_v63 }
 0x4a2   : > { %14010 = vst [vmem:[#allocation77_spill] sm:$0xff] %v12413_v4  ;;  %5928 = vmatpush.bf16.msrb.mxu0 %v12401_v59  ;;  %5941 = vmatpush.bf16.msrb.mxu1 %v12403_v8 }
 0x4a3   : > { %14011 = vst [vmem:[#allocation70_spill] sm:$0xff] %v12415_v27  ;;  %5954 = vmatpush.bf16.msrb.mxu2 %v12407_v18  ;;  %5967 = vmatpush.bf16.msrb.mxu3 %v12409_v12 }
 0x4a4   : > { %14012 = vst [vmem:[#allocation73_spill] sm:$0xff] %v12417_v53 }
 0x4a6   : > { %v12421_v55 = vld.sshfl [vmem:[#allocation1] sm:$0xff pattern:$0x73625140]  ;;  %v12423_v16 = vld.sshfl [vmem:[#allocation1 + $0x8] sm:$0xff pattern:$0x73625140]  ;;  %5929 = vmatpush.bf16.msrb.mxu0 %v12411_v63  ;;  %5942 = vmatpush.bf16.msrb.mxu1 %v12413_v4 }
 0x4a7   : > { %v12427_v50 = vld.sshfl [vmem:[#allocation1 + $0x10] sm:$0xff pattern:$0x73625140]  ;;  %v12429_v17 = vld.sshfl [vmem:[#allocation1 + $0x18] sm:$0xff pattern:$0x73625140]  ;;  %5955 = vmatpush.bf16.msrb.mxu2 %v12415_v27  ;;  %5968 = vmatpush.bf16.msrb.mxu3 %v12417_v53 }
 0x4a8   : > { %5984 = vst [vmem:[#allocation1] ss:$4 sm:$0xff] %v11769_v15 }
 0x4a9   : > { %5930 = vmatmul.bf16.vlgmr.msrb.gmra.mxu0 %v5038_v23  ;;  %5943 = vmatmul.bf16.vlgmr.msrb.gmra.mxu1 %v5039_v13 }
 0x4aa   : > { %6003 = vmatpush.bf16.msra.mxu0 %v12111_v21  ;;  %6016 = vmatpush.bf16.msra.mxu1 %v12113_v38 }
 0x4ab   : > { %6029 = vmatpush.bf16.msra.mxu2 %v12115_v40  ;;  %6042 = vmatpush.bf16.msra.mxu3 %v12117_v22 }
 0x4ac   : > { %5956 = vmatmul.bf16.vlgmr.msrb.gmra.mxu2 %v5040_v19  ;;  %5969 = vmatmul.bf16.vlgmr.msrb.gmra.mxu3 %v5041_v28 }
 0x4ae   : > { %6004 = vmatpush.bf16.msra.mxu0 %v12129_v0  ;;  %6017 = vmatpush.bf16.msra.mxu1 %v12131_v3 }
 0x4af   : > { %v12440_v12 = vld.sshfl [vmem:[#allocation1] sm:$0xff pattern:$0x73625140]  ;;  %v12442_v63 = vld.sshfl [vmem:[#allocation1 + $0x8] sm:$0xff pattern:$0x73625140]  ;;  %6030 = vmatpush.bf16.msra.mxu2 %v12133_v33  ;;  %6043 = vmatpush.bf16.msra.mxu3 %v12135_v47 }
 0x4b0   : > { %v12446_v53 = vld.sshfl [vmem:[#allocation1 + $0x10] sm:$0xff pattern:$0x73625140]  ;;  %v12448_v21 = vld.sshfl [vmem:[#allocation1 + $0x18] sm:$0xff pattern:$0x73625140] }
 0x4b1   : > { %5994 = vst [vmem:[#allocation1] ss:$4 sm:$0xff] %v12072_v45 }
 0x4b2   : > { %6005 = vmatpush.bf16.msra.mxu0 %v12139_v41  ;;  %6018 = vmatpush.bf16.msra.mxu1 %v12141_v58 }
 0x4b3   : > { %6031 = vmatpush.bf16.msra.mxu2 %v12145_v30  ;;  %6044 = vmatpush.bf16.msra.mxu3 %v12147_v24 }
 0x4b6   : > { %6006 = vmatpush.bf16.msra.mxu0 %v12151_v34  ;;  %6019 = vmatpush.bf16.msra.mxu1 %v12153_v6 }
 0x4b7   : > { %6032 = vmatpush.bf16.msra.mxu2 %v12157_v49  ;;  %6045 = vmatpush.bf16.msra.mxu3 %v12159_v20 }
 0x4b8   : > { %v12459_v13 = vld.sshfl [vmem:[#allocation1] sm:$0xff pattern:$0x73625140]  ;;  %v12461_v23 = vld.sshfl [vmem:[#allocation1 + $0x8] sm:$0xff pattern:$0x73625140] }
 0x4b9   : > { %v12465_v28 = vld.sshfl [vmem:[#allocation1 + $0x10] sm:$0xff pattern:$0x73625140]  ;;  %v12467_v19 = vld.sshfl [vmem:[#allocation1 + $0x18] sm:$0xff pattern:$0x73625140] }
 0x4ba   : > { %6163 = vst [vmem:[#allocation1] ss:$4 sm:$0xff] %v11769_v15  ;;  %6007 = vmatpush.bf16.msra.mxu0 %v12163_v61  ;;  %6020 = vmatpush.bf16.msra.mxu1 %v12165_v35 }
 0x4bb   : > { %6033 = vmatpush.bf16.msra.mxu2 %v12169_v48  ;;  %6046 = vmatpush.bf16.msra.mxu3 %v12171_v56 }
 0x4be   : > { %6008 = vmatpush.bf16.msra.mxu0 %v12177_v9  ;;  %6021 = vmatpush.bf16.msra.mxu1 %v12179_v32 }
 0x4bf   : > { %6034 = vmatpush.bf16.msra.mxu2 %v12181_v14  ;;  %6047 = vmatpush.bf16.msra.mxu3 %v12183_v5 }
 0x4c1   : > { %v12478_v20 = vld.sshfl [vmem:[#allocation1] sm:$0xff pattern:$0x73625140]  ;;  %v12480_v49 = vld.sshfl [vmem:[#allocation1 + $0x8] sm:$0xff pattern:$0x73625140] }
 0x4c2   : > { %14013 = vst [vmem:[#allocation78_spill] sm:$0xff] %v12478_v20  ;;  %v12482_v15 = vld.sshfl [vmem:[#allocation1 + $0x10] sm:$0xff pattern:$0x73625140]  ;;  %6009 = vmatpush.bf16.msra.mxu0 %v12189_v43  ;;  %6022 = vmatpush.bf16.msra.mxu1 %v12191_v2 }
 0x4c3   : > { %14014 = vst [vmem:[#allocation79_spill] sm:$0xff] %v12480_v49  ;;  %v12484_v61 = vld.sshfl [vmem:[#allocation1 + $0x18] sm:$0xff pattern:$0x73625140]  ;;  %6035 = vmatpush.bf16.msra.mxu2 %v12193_v51  ;;  %6048 = vmatpush.bf16.msra.mxu3 %v12195_v11 }
 0x4c4   : > { %14015 = vst [vmem:[#allocation80_spill] sm:$0xff] %v12482_v15 }
 0x4c5   : > { %14016 = vst [vmem:[#allocation81_spill] sm:$0xff] %v12484_v61 }
 0x4c6   : > { %6173 = vst [vmem:[#allocation1] ss:$4 sm:$0xff] %v12072_v45  ;;  %6010 = vmatpush.bf16.msra.mxu0 %v12202_v26  ;;  %6023 = vmatpush.bf16.msra.mxu1 %v12204_v44 }
 0x4c7   : > { %6036 = vmatpush.bf16.msra.mxu2 %v12208_v29  ;;  %6049 = vmatpush.bf16.msra.mxu3 %v12210_v7 }
 0x4c9   : > { %6011 = vmatmul.bf16.vlgmr.msra.gmra.mxu0 %v12421_v55  ;;  %6024 = vmatmul.bf16.vlgmr.msra.gmra.mxu1 %v12423_v16  ;;  %v14021_v55 = vld [vmem:[#allocation26_spill] sm:$0xff] }
 0x4ca   : > { %6055 = vmatpush.bf16.msrb.mxu0 %v12212_v54  ;;  %6068 = vmatpush.bf16.msrb.mxu1 %v12214_v57 }
 0x4cb   : > { %6081 = vmatpush.bf16.msrb.mxu2 %v12216_v36  ;;  %6094 = vmatpush.bf16.msrb.mxu3 %v12218_v37 }
 0x4cc   : > { %6037 = vmatmul.bf16.vlgmr.msra.gmra.mxu2 %v12427_v50  ;;  %6050 = vmatmul.bf16.vlgmr.msra.gmra.mxu3 %v12429_v17 }
 0x4cd   : > { %v12497_v61 = vld.sshfl [vmem:[#allocation1] sm:$0xff pattern:$0x73625140]  ;;  %v12499_v15 = vld.sshfl [vmem:[#allocation1 + $0x8] sm:$0xff pattern:$0x73625140] }
 0x4ce   : > { %14017 = vst [vmem:[#allocation82_spill] sm:$0xff] %v12497_v61  ;;  %v12503_v49 = vld.sshfl [vmem:[#allocation1 + $0x10] sm:$0xff pattern:$0x73625140]  ;;  %6056 = vmatpush.bf16.msrb.mxu0 %v12228_v52  ;;  %6069 = vmatpush.bf16.msrb.mxu1 %v12230_v25  ;;  %v14028_v61 = vld [vmem:[#allocation31_spill] sm:$0xff] }
 0x4cf   : > { %14018 = vst [vmem:[#allocation83_spill] sm:$0xff] %v12499_v15  ;;  %v12505_v20 = vld.sshfl [vmem:[#allocation1 + $0x18] sm:$0xff pattern:$0x73625140]  ;;  %6082 = vmatpush.bf16.msrb.mxu2 %v12234_v60  ;;  %6095 = vmatpush.bf16.msrb.mxu3 %v12236_v42 }
 0x4d0   : > { %14019 = vst [vmem:[#allocation84_spill] sm:$0xff] %v12503_v49  ;;  %v14026_v49 = vld [vmem:[#allocation29_spill] sm:$0xff]  ;;  %v14027_v15 = vld [vmem:[#allocation30_spill] sm:$0xff] }
 0x4d1   : > { %14020 = vst [vmem:[#allocation85_spill] sm:$0xff] %v12505_v20 }
 0x4d2   : > { %6183 = vst [vmem:[#allocation1] ss:$4 sm:$0xff] %v12308_v46  ;;  %6057 = vmatpush.bf16.msrb.mxu0 %v12240_v62  ;;  %6070 = vmatpush.bf16.msrb.mxu1 %v12242_v31 }
 0x4d3   : > { %6083 = vmatpush.bf16.msrb.mxu2 %v12246_v1  ;;  %6096 = vmatpush.bf16.msrb.mxu3 %v14021_v55  ;;  %v14029_v55 = vld [vmem:[#allocation32_spill] sm:$0xff] }
 0x4d6   : > { %6058 = vmatpush.bf16.msrb.mxu0 %v12252_v10  ;;  %6071 = vmatpush.bf16.msrb.mxu1 %v12254_v39  ;;  %v14034_v10 = vld [vmem:[#allocation35_spill] sm:$0xff]  ;;  %v14035_v39 = vld [vmem:[#allocation36_spill] sm:$0xff] }
 0x4d7   : > { %6084 = vmatpush.bf16.msrb.mxu2 %v14026_v49  ;;  %6097 = vmatpush.bf16.msrb.mxu3 %v14027_v15  ;;  %v14038_v15 = vld [vmem:[#allocation37_spill] sm:$0xff] }
 0x4d9   : > { %v12520_v16 = vld.sshfl [vmem:[#allocation1] sm:$0xff pattern:$0x73625140]  ;;  %v12522_v50 = vld.sshfl [vmem:[#allocation1 + $0x8] sm:$0xff pattern:$0x73625140] }
 0x4da   : > { %14022 = vst [vmem:[#allocation86_spill] sm:$0xff] %v12520_v16  ;;  %v12524_v17 = vld.sshfl [vmem:[#allocation1 + $0x10] sm:$0xff pattern:$0x73625140]  ;;  %6059 = vmatpush.bf16.msrb.mxu0 %v14028_v61  ;;  %6072 = vmatpush.bf16.msrb.mxu1 %v14029_v55 }
 0x4db   : > { %14023 = vst [vmem:[#allocation87_spill] sm:$0xff] %v12522_v50  ;;  %v12526_v20 = vld.sshfl [vmem:[#allocation1 + $0x18] sm:$0xff pattern:$0x73625140]  ;;  %v14030_v16 = vld [vmem:[#allocation33_spill] sm:$0xff] }
 0x4dc   : > { %14024 = vst [vmem:[#allocation88_spill] sm:$0xff] %v12524_v17  ;;  %6085 = vmatpush.bf16.msrb.mxu2 %v14030_v16  ;;  %v14031_v50 = vld [vmem:[#allocation34_spill] sm:$0xff]  ;;  %v14040_v16 = vld [vmem:[#allocation39_spill] sm:$0xff] }
 0x4dd   : > { %14025 = vst [vmem:[#allocation89_spill] sm:$0xff] %v12526_v20  ;;  %6098 = vmatpush.bf16.msrb.mxu3 %v14031_v50  ;;  %v14039_v61 = vld [vmem:[#allocation38_spill] sm:$0xff]  ;;  %v14041_v50 = vld [vmem:[#allocation40_spill] sm:$0xff] }
 0x4de   : > { %6373 = vst [vmem:[#allocation1] ss:$4 sm:$0xff] %v12072_v45  ;;  %6060 = vmatpush.bf16.msrb.mxu0 %v14034_v10  ;;  %6073 = vmatpush.bf16.msrb.mxu1 %v14035_v39  ;;  %v14044_v10 = vld [vmem:[#allocation43_spill] sm:$0xff]  ;;  %v14045_v39 = vld [vmem:[#allocation44_spill] sm:$0xff] }
 0x4e0   : > { %6086 = vmatpush.bf16.msrb.mxu2 %v14038_v15  ;;  %v14048_v15 = vld [vmem:[#allocation45_spill] sm:$0xff] }
 0x4e1   : > { %6099 = vmatpush.bf16.msrb.mxu3 %v14039_v61  ;;  %v14049_v61 = vld [vmem:[#allocation52_spill] sm:$0xff] }
 0x4e2   : > { %6061 = vmatpush.bf16.msrb.mxu0 %v14040_v16  ;;  %6074 = vmatpush.bf16.msrb.mxu1 %v14041_v50  ;;  %v14051_v16 = vld [vmem:[#allocation64_spill] sm:$0xff] }
 0x4e5   : > { %v12537_v17 = vld.sshfl [vmem:[#allocation1] sm:$0xff pattern:$0x73625140]  ;;  %v12539_v20 = vld.sshfl [vmem:[#allocation1 + $0x8] sm:$0xff pattern:$0x73625140] }
 0x4e6   : > { %14032 = vst [vmem:[#allocation90_spill] sm:$0xff] %v12537_v17  ;;  %v12543_v45 = vld.sshfl [vmem:[#allocation1 + $0x10] sm:$0xff pattern:$0x73625140]  ;;  %6062 = vmatpush.bf16.msrb.mxu0 %v14044_v10  ;;  %6075 = vmatpush.bf16.msrb.mxu1 %v14045_v39 }
 0x4e7   : > { %14033 = vst [vmem:[#allocation91_spill] sm:$0xff] %v12539_v20  ;;  %v12545_v49 = vld.sshfl [vmem:[#allocation1 + $0x18] sm:$0xff pattern:$0x73625140]  ;;  %v14042_v17 = vld [vmem:[#allocation41_spill] sm:$0xff] }
 0x4e8   : > { %14036 = vst [vmem:[#allocation92_spill] sm:$0xff] %v12543_v45  ;;  %6087 = vmatpush.bf16.msrb.mxu2 %v14042_v17  ;;  %v14043_v20 = vld [vmem:[#allocation42_spill] sm:$0xff]  ;;  %v14056_v39 = vld [vmem:[#allocation357_spill] sm:$0xff] }
 0x4e9   : > { %14037 = vst [vmem:[#allocation93_spill] sm:$0xff] %v12545_v49  ;;  %6100 = vmatpush.bf16.msrb.mxu3 %v14043_v20  ;;  %v14054_v20 = vld [vmem:[#allocation65_spill] sm:$0xff]  ;;  %v14055_v10 = vld [vmem:[#allocation46_spill] sm:$0xff]  ;;  %6063 = vmatmul.bf16.vlgmr.msrb.gmra.mxu0 %v12440_v12 }
 0x4ea   : > { %6382 = vst [vmem:[#allocation1] ss:$4 sm:$0xff] %v12308_v46  ;;  %v14050_v46 = vld [vmem:[#allocation53_spill] sm:$0xff]  ;;  %6120 = vmatpush.bf16.msra.mxu1 %v14051_v16  ;;  %v14064_v12 = vld [vmem:[#allocation50_spill] sm:$0xff] }
 0x4eb   : > { %6107 = vmatpush.bf16.msra.mxu0 %v14050_v46  ;;  %6076 = vmatmul.bf16.vlgmr.msrb.gmra.mxu1 %v12442_v63  ;;  %v14065_v63 = vld [vmem:[#allocation51_spill] sm:$0xff] }
 0x4ec   : > { %6088 = vmatpush.bf16.msrb.mxu2 %v14048_v15 }
 0x4ed   : > { %6101 = vmatpush.bf16.msrb.mxu3 %v14049_v61 }
 0x4ef   : > { %6089 = vmatmul.bf16.vlgmr.msrb.gmra.mxu2 %v12446_v53  ;;  %v14066_v53 = vld [vmem:[#allocation66_spill] sm:$0xff] }
 0x4f0   : > { %6133 = vmatpush.bf16.msra.mxu2 %v14054_v20  ;;  %6102 = vmatmul.bf16.vlgmr.msrb.gmra.mxu3 %v12448_v21  ;;  %v14061_v20 = vld [vmem:[#allocation49_spill] sm:$0xff]  ;;  %v14067_v21 = vld [vmem:[#allocation67_spill] sm:$0xff] }
 0x4f1   : > { %v12556_v45 = vld.sshfl [vmem:[#allocation1] sm:$0xff pattern:$0x73625140]  ;;  %v12558_v49 = vld.sshfl [vmem:[#allocation1 + $0x8] sm:$0xff pattern:$0x73625140]  ;;  %6146 = vmatpush.bf16.msra.mxu3 %v14055_v10 }
 0x4f2   : > { %14046 = vst [vmem:[#allocation94_spill] sm:$0xff] %v12556_v45  ;;  %v12564_v50 = vld.sshfl [vmem:[#allocation1 + $0x10] sm:$0xff pattern:$0x73625140]  ;;  %v14058_v45 = vld [vmem:[#allocation55_spill] sm:$0xff]  ;;  %v14062_v10 = vld [vmem:[#allocation60_spill] sm:$0xff] }
 0x4f3   : > { %14047 = vst [vmem:[#allocation95_spill] sm:$0xff] %v12558_v49  ;;  %v12566_v17 = vld.sshfl [vmem:[#allocation1 + $0x18] sm:$0xff pattern:$0x73625140]  ;;  %6121 = vmatpush.bf16.msra.mxu1 %v14058_v45  ;;  %v14069_v45 = vld [vmem:[#allocation57_spill] sm:$0xff] }
 0x4f4   : > { %14052 = vst [vmem:[#allocation96_spill] sm:$0xff] %v12564_v50  ;;  %v14057_v49 = vld [vmem:[#allocation47_spill] sm:$0xff]  ;;  %v14059_v50 = vld [vmem:[#allocation56_spill] sm:$0xff] }
 0x4f5   : > { %14053 = vst [vmem:[#allocation97_spill] sm:$0xff] %v12566_v17  ;;  %6108 = vmatpush.bf16.msra.mxu0 %v14057_v49  ;;  %6134 = vmatpush.bf16.msra.mxu2 %v14059_v50  ;;  %v14060_v17 = vld [vmem:[#allocation48_spill] sm:$0xff]  ;;  %v14068_v49 = vld [vmem:[#allocation54_spill] sm:$0xff]  ;;  %v14070_v50 = vld [vmem:[#allocation71_spill] sm:$0xff] }
 0x4f6   : > { %6416 = vst [vmem:[#allocation1] ss:$4 sm:$0xff] %v14056_v39  ;;  %6147 = vmatpush.bf16.msra.mxu3 %v14060_v17  ;;  %v14063_v39 = vld [vmem:[#allocation61_spill] sm:$0xff]  ;;  %v14071_v17 = vld [vmem:[#allocation72_spill] sm:$0xff] }
 0x4f7   : > { %6122 = vmatpush.bf16.msra.mxu1 %v14062_v10  ;;  %v14073_v10 = vld [vmem:[#allocation63_spill] sm:$0xff] }
 0x4f9   : > { %6109 = vmatpush.bf16.msra.mxu0 %v14061_v20  ;;  %6135 = vmatpush.bf16.msra.mxu2 %v14063_v39  ;;  %v14072_v20 = vld [vmem:[#allocation62_spill] sm:$0xff] }
 0x4fa   : > { %6148 = vmatpush.bf16.msra.mxu3 %v14064_v12  ;;  %v14074_v39 = vld [vmem:[#allocation74_spill] sm:$0xff]  ;;  %v14075_v12 = vld [vmem:[#allocation75_spill] sm:$0xff] }
 0x4fb   : > { %6123 = vmatpush.bf16.msra.mxu1 %v14066_v53 }
 0x4fd   : > { %6110 = vmatpush.bf16.msra.mxu0 %v14065_v63  ;;  %6136 = vmatpush.bf16.msra.mxu2 %v14067_v21  ;;  %v14076_v63 = vld [vmem:[#allocation68_spill] sm:$0xff] }
 0x4fe   : > { %6149 = vmatpush.bf16.msra.mxu3 %v14068_v49 }
 0x4ff   : > { %6124 = vmatpush.bf16.msra.mxu1 %v14070_v50  ;;  %v14078_v50 = vld [vmem:[#allocation76_spill] sm:$0xff] }
 0x501   : > { %6111 = vmatpush.bf16.msra.mxu0 %v14069_v45  ;;  %6137 = vmatpush.bf16.msra.mxu2 %v14071_v17  ;;  %v14077_v45 = vld [vmem:[#allocation69_spill] sm:$0xff] }
 0x502   : > { %6150 = vmatpush.bf16.msra.mxu3 %v14072_v20 }
 0x503   : > { %6125 = vmatpush.bf16.msra.mxu1 %v14074_v39  ;;  %v14080_v39 = vld [vmem:[#allocation22_spill] sm:$0xff] }
 0x505   : > { %6112 = vmatpush.bf16.msra.mxu0 %v14073_v10  ;;  %6138 = vmatpush.bf16.msra.mxu2 %v14075_v12  ;;  %v14079_v10 = vld [vmem:[#allocation73_spill] sm:$0xff] }
 0x506   : > { %6151 = vmatpush.bf16.msra.mxu3 %v14076_v63 }
 0x507   : > { %6126 = vmatpush.bf16.msra.mxu1 %v12403_v8 }
 0x509   : > { %6113 = vmatpush.bf16.msra.mxu0 %v12401_v59  ;;  %6139 = vmatpush.bf16.msra.mxu2 %v12407_v18 }
 0x50a   : > { %6152 = vmatpush.bf16.msra.mxu3 %v14077_v45 }
 0x50b   : > { %6127 = vmatpush.bf16.msra.mxu1 %v12413_v4  ;;  %v5827_v4 = vpop.f32.mrf.mxu0 }
 0x50d   : > { %6114 = vmatpush.bf16.msra.mxu0 %v14078_v50  ;;  %6140 = vmatpush.bf16.msra.mxu2 %v12415_v27  ;;  %v5840_v27 = vpop.f32.mrf.mxu1 }
 0x50e   : > { %6153 = vmatpush.bf16.msra.mxu3 %v14079_v10  ;;  %6128 = vmatmul.bf16.vlgmr.msra.gmra.mxu1 %v12461_v23 }
 0x50f   : > { %6229 = vmatpush.bf16.msrb.mxu1 %v12113_v38  ;;  %v5853_v38 = vpop.f32.mrf.mxu2 }
 0x510   : > { %6115 = vmatmul.bf16.vlgmr.msra.gmra.mxu0 %v12459_v13  ;;  %6141 = vmatmul.bf16.vlgmr.msra.gmra.mxu2 %v12465_v28 }
 0x511   : > { %6216 = vmatpush.bf16.msrb.mxu0 %v14080_v39  ;;  %6242 = vmatpush.bf16.msrb.mxu2 %v12115_v40  ;;  %v5866_v40 = vpop.f32.mrf.mxu3  ;;  %v14093_v39 = vld [vmem:[#allocation31_spill] sm:$0xff] }
 0x512   : > { %6255 = vmatpush.bf16.msrb.mxu3 %v12117_v22  ;;  %v12619_v22 = vld [vmem:[#allocation16] ss:$0 sm:$0xff] }
 0x513   : > { %6154 = vmatmul.bf16.vlgmr.msra.gmra.mxu3 %v12467_v19  ;;  %6230 = vmatpush.bf16.msrb.mxu1 %v12131_v3  ;;  %v5829_v13 = vpop.f32.mrf.mxu0  ;;  %v14081_v3 = vld [vmem:[#allocation23_spill] sm:$0xff] }
 0x514   : > { %v14096_v13 = vld [vmem:[#allocation35_spill] sm:$0xff] }
 0x515   : > { %6217 = vmatpush.bf16.msrb.mxu0 %v12129_v0  ;;  %6243 = vmatpush.bf16.msrb.mxu2 %v12133_v33  ;;  %v5842_v0 = vpop.f32.mrf.mxu1  ;;  %v14082_v33 = vld [vmem:[#allocation24_spill] sm:$0xff] }
 0x516   : > { %6256 = vmatpush.bf16.msrb.mxu3 %v12135_v47  ;;  %v5828_v47 = vadd.f32 %v12619_v22, %v5827_v4  ;;  %v14097_v0 = vld [vmem:[#allocation36_spill] sm:$0xff] }
 0x517   : > { %6231 = vmatpush.bf16.msrb.mxu1 %v12141_v58  ;;  %v5855_v58 = vpop.f32.mrf.mxu2 }
 0x518   : > { %v14100_v58 = vld [vmem:[#allocation39_spill] sm:$0xff] }
 0x519   : > { %6218 = vmatpush.bf16.msrb.mxu0 %v12139_v41  ;;  %6244 = vmatpush.bf16.msrb.mxu2 %v12145_v30  ;;  %v14083_v41 = vld [vmem:[#allocation25_spill] sm:$0xff]  ;;  %v5868_v30 = vpop.f32.mrf.mxu3 }
 0x51a   : > { %6257 = vmatpush.bf16.msrb.mxu3 %v12147_v24  ;;  %v5841_v24 = vadd.f32 %v5840_v27, %v5828_v47  ;;  %v14101_v30 = vld [vmem:[#allocation40_spill] sm:$0xff] }
 0x51b   : > { %6232 = vmatpush.bf16.msrb.mxu1 %v12153_v6 }
 0x51c   : > { %v5854_v6 = vadd.f32 %v5853_v38, %v5841_v24  ;;  %v14095_v38 = vld [vmem:[#allocation34_spill] sm:$0xff] }
 0x51d   : > { %6219 = vmatpush.bf16.msrb.mxu0 %v12151_v34  ;;  %6245 = vmatpush.bf16.msrb.mxu2 %v14081_v3  ;;  %v5879_v34 = vpop.f32.mrf.mxu0  ;;  %v5892_v23 = vpop.f32.mrf.mxu1  ;;  %v14098_v3 = vld [vmem:[#allocation37_spill] sm:$0xff]  ;;  %v14103_v24 = vld [vmem:[#allocation42_spill] sm:$0xff] }
 0x51e   : > { %6258 = vmatpush.bf16.msrb.mxu3 %v14082_v33  ;;  %v14099_v33 = vld [vmem:[#allocation38_spill] sm:$0xff] }
 0x51f   : > { %6233 = vmatpush.bf16.msrb.mxu1 %v12165_v35  ;;  %v5867_v35 = vadd.f32 %v5866_v40, %v5854_v6  ;;  %v5905_v27 = vpop.f32.mrf.mxu2  ;;  %v14106_v6 = vld [vmem:[#allocation65_spill] sm:$0xff] }
 0x521   : > { %6220 = vmatpush.bf16.msrb.mxu0 %v14083_v41  ;;  %6246 = vmatpush.bf16.msrb.mxu2 %v12169_v48  ;;  %v5918_v48 = vpop.f32.mrf.mxu3 }
 0x522   : > { %6259 = vmatpush.bf16.msrb.mxu3 %v12171_v56  ;;  %v5880_v56 = vadd.f32 %v5879_v34, %v5867_v35  ;;  %v14104_v34 = vld [vmem:[#allocation43_spill] sm:$0xff]  ;;  %v14107_v35 = vld [vmem:[#allocation46_spill] sm:$0xff] }
 0x523   : > { %6234 = vmatpush.bf16.msrb.mxu1 %v12179_v32 }
 0x524   : > { %v5893_v32 = vadd.f32 %v5892_v23, %v5880_v56  ;;  %v14105_v23 = vld [vmem:[#allocation44_spill] sm:$0xff] }
 0x525   : > { %6221 = vmatpush.bf16.msrb.mxu0 %v12177_v9  ;;  %6247 = vmatpush.bf16.msrb.mxu2 %v12181_v14  ;;  %v5881_v9 = vpop.f32.mrf.mxu0  ;;  %v5894_v4 = vpop.f32.mrf.mxu1  ;;  %v14084_v14 = vld [vmem:[#allocation78_spill] sm:$0xff]  ;;  %v14110_v56 = vld [vmem:[#allocation84_spill] sm:$0xff] }
 0x526   : > { %6260 = vmatpush.bf16.msrb.mxu3 %v12183_v5  ;;  %v14085_v5 = vld [vmem:[#allocation79_spill] sm:$0xff]  ;;  %v14111_v9 = vld [vmem:[#allocation85_spill] sm:$0xff] }
 0x527   : > { %6235 = vmatpush.bf16.msrb.mxu1 %v12191_v2  ;;  %v14086_v2 = vld [vmem:[#allocation80_spill] sm:$0xff]  ;;  %v14112_v4 = vld [vmem:[#allocation47_spill] sm:$0xff] }
 0x529   : > { %6222 = vmatpush.bf16.msrb.mxu0 %v12189_v43  ;;  %6248 = vmatpush.bf16.msrb.mxu2 %v12193_v51  ;;  %v5906_v43 = vadd.f32 %v5905_v27, %v5893_v32  ;;  %v14087_v51 = vld [vmem:[#allocation81_spill] sm:$0xff]  ;;  %v14108_v27 = vld [vmem:[#allocation82_spill] sm:$0xff] }
 0x52a   : > { %6261 = vmatpush.bf16.msrb.mxu3 %v12195_v11  ;;  %v5907_v11 = vpop.f32.mrf.mxu2 }
 0x52b   : > { %6236 = vmatpush.bf16.msrb.mxu1 %v12204_v44  ;;  %v5919_v44 = vadd.f32 %v5918_v48, %v5906_v43  ;;  %v14109_v48 = vld [vmem:[#allocation83_spill] sm:$0xff]  ;;  %v14118_v43 = vld [vmem:[#allocation61_spill] sm:$0xff] }
 0x52d   : > { %6223 = vmatpush.bf16.msrb.mxu0 %v12202_v26  ;;  %6249 = vmatpush.bf16.msrb.mxu2 %v12208_v29  ;;  %v5920_v26 = vpop.f32.mrf.mxu3  ;;  %v5931_v29 = vpop.f32.mrf.mxu0 }
 0x52e   : > { %6262 = vmatpush.bf16.msrb.mxu3 %v12210_v7  ;;  %6237 = vmatmul.bf16.vlgmr.msrb.gmra.mxu1 %v14085_v5  ;;  %v5944_v7 = vpop.f32.mrf.mxu1  ;;  %v14117_v5 = vld [vmem:[#allocation60_spill] sm:$0xff] }
 0x52f   : > { %6281 = vmatpush.bf16.msra.mxu1 %v12214_v57  ;;  %v5932_v57 = vadd.f32 %v5931_v29, %v5919_v44 }
 0x530   : > { %6224 = vmatmul.bf16.vlgmr.msrb.gmra.mxu0 %v14084_v14  ;;  %6250 = vmatmul.bf16.vlgmr.msrb.gmra.mxu2 %v14086_v2  ;;  %v14116_v14 = vld [vmem:[#allocation49_spill] sm:$0xff]  ;;  %v14119_v2 = vld [vmem:[#allocation50_spill] sm:$0xff] }
 0x531   : > { %6268 = vmatpush.bf16.msra.mxu0 %v12212_v54  ;;  %6294 = vmatpush.bf16.msra.mxu2 %v12216_v36  ;;  %v14088_v54 = vld [vmem:[#allocation26_spill] sm:$0xff]  ;;  %v14089_v36 = vld [vmem:[#allocation27_spill] sm:$0xff] }
 0x532   : > { %6307 = vmatpush.bf16.msra.mxu3 %v12218_v37  ;;  %v14090_v37 = vld [vmem:[#allocation28_spill] sm:$0xff] }
 0x533   : > { %6263 = vmatmul.bf16.vlgmr.msrb.gmra.mxu3 %v14087_v51  ;;  %6282 = vmatpush.bf16.msra.mxu1 %v12230_v25  ;;  %v14091_v25 = vld [vmem:[#allocation29_spill] sm:$0xff]  ;;  %v14120_v51 = vld [vmem:[#allocation51_spill] sm:$0xff] }
 0x535   : > { %6269 = vmatpush.bf16.msra.mxu0 %v12228_v52  ;;  %6295 = vmatpush.bf16.msra.mxu2 %v12234_v60  ;;  %v5945_v52 = vadd.f32 %v5944_v7, %v5932_v57  ;;  %v14092_v60 = vld [vmem:[#allocation30_spill] sm:$0xff]  ;;  %v5970_v28 = vpop.f32.mrf.mxu3  ;;  %v5933_v19 = vpop.f32.mrf.mxu0  ;;  %v14121_v7 = vld [vmem:[#allocation57_spill] sm:$0xff]  ;;  %v14123_v57 = vld [vmem:[#allocation63_spill] sm:$0xff] }
 0x536   : > { %6308 = vmatpush.bf16.msra.mxu3 %v12236_v42  ;;  %v5957_v42 = vpop.f32.mrf.mxu2 }
 0x537   : > { %6283 = vmatpush.bf16.msra.mxu1 %v12242_v31  ;;  %v5946_v31 = vpop.f32.mrf.mxu1 }
 0x538   : > { %v14128_v31 = vld [vmem:[#allocation89_spill] sm:$0xff] }
 0x539   : > { %6270 = vmatpush.bf16.msra.mxu0 %v12240_v62  ;;  %6296 = vmatpush.bf16.msra.mxu2 %v12246_v1  ;;  %v5958_v62 = vadd.f32 %v5957_v42, %v5945_v52  ;;  %v14094_v1 = vld [vmem:[#allocation33_spill] sm:$0xff]  ;;  %v14126_v42 = vld [vmem:[#allocation87_spill] sm:$0xff] }
 0x53a   : > { %6309 = vmatpush.bf16.msra.mxu3 %v14088_v54  ;;  %v14122_v54 = vld [vmem:[#allocation71_spill] sm:$0xff] }
 0x53b   : > { %6284 = vmatpush.bf16.msra.mxu1 %v14090_v37  ;;  %v5971_v40 = vadd.f32 %v5970_v28, %v5958_v62  ;;  %v6196_v28 = vshll.u32 %v14126_v42, 16  ;;  %v14127_v62 = vld [vmem:[#allocation88_spill] sm:$0xff] }
 0x53c   : > { %v6202_v19 = vshll.u32 %v14127_v62, 16 }
 0x53d   : > { %6271 = vmatpush.bf16.msra.mxu0 %v14089_v36  ;;  %6297 = vmatpush.bf16.msra.mxu2 %v14091_v25  ;;  %6605 = vst [vmem:[%s10127_s30] sm:$0xf] %v5971_v40  ;;  %v5972_v41 = vpop.f32.mrf.mxu3  ;;  %v14124_v36 = vld [vmem:[#allocation74_spill] sm:$0xff] }
 0x53e   : > { %6310 = vmatpush.bf16.msra.mxu3 %v14092_v60  ;;  %v5959_v47 = vpop.f32.mrf.mxu2  ;;  %v14125_v25 = vld [vmem:[#allocation86_spill] sm:$0xff]  ;;  %v6204_v40 = vrot.slane %v6202_v19, 1  ;;  %v6200_v41 = vshrl.u32 %v14127_v62, 16 }
 0x53f   : > { %6285 = vmatpush.bf16.msra.mxu1 %v14029_v55  ;;  %v14102_v55 = vld [vmem:[#allocation41_spill] sm:$0xff]  ;;  %v6190_v60 = vshll.u32 %v14125_v25, 16  ;;  %v14130_v47 = vld [vmem:[#allocation70_spill] sm:$0xff] }
 0x541   : > { %6272 = vmatpush.bf16.msra.mxu0 %v14093_v39  ;;  %6298 = vmatpush.bf16.msra.mxu2 %v14094_v1  ;;  %v6208_v39 = vshll.u32 %v14128_v31, 16  ;;  %v6192_v1 = vrot.slane %v6190_v60, 1 }
 0x542   : > { %6311 = vmatpush.bf16.msra.mxu3 %v14095_v38  ;;  %v6198_v38 = vrot.slane %v6196_v28, 1 }
 0x543   : > { %6286 = vmatpush.bf16.msra.mxu1 %v14097_v0  ;;  %v14129_v0 = vld [vmem:[#allocation77_spill] sm:$0xff] }
 0x545   : > { %6273 = vmatpush.bf16.msra.mxu0 %v14096_v13  ;;  %6299 = vmatpush.bf16.msra.mxu2 %v14098_v3  ;;  %v6210_v13 = vrot.slane %v6208_v39, 1  ;;  %v6188_v3 = vshrl.u32 %v14125_v25, 16  ;;  %v9722_v25 = vld [vmem:[#allocation12 + $0xe0] sm:$0xff]  ;;  %v9724_v39 = vld [vmem:[#allocation12 + $0x58] sm:$0xff] }
 0x546   : > { %6312 = vmatpush.bf16.msra.mxu3 %v14099_v33  ;;  %v12693_v32 = vpop.f32.mrf.mxu1  ;;  %v6194_v33 = vshrl.u32 %v14126_v42, 16 }
 0x547   : > { %6287 = vmatpush.bf16.msra.mxu1 %v14101_v30  ;;  %v9707_v30 = vld [vmem:[#allocation12 + $0x38] sm:$0xff] }
 0x549   : > { %6274 = vmatpush.bf16.msra.mxu0 %v14100_v58  ;;  %6300 = vmatpush.bf16.msra.mxu2 %v14102_v55  ;;  %v6206_v58 = vshrl.u32 %v14128_v31, 16  ;;  %v9708_v55 = vld [vmem:[#allocation12 + $0x78] sm:$0xff] }
 0x54a   : > { %6313 = vmatpush.bf16.msra.mxu3 %v14103_v24  ;;  %v6193_v24 = vor.u32 %v6192_v1, %v6188_v3  ;;  %v9723_v31 = vld [vmem:[#allocation12 + $0x18] sm:$0xff]  ;;  %v9728_v3 = vld [vmem:[#allocation12 + $0x50] sm:$0xff] }
 0x54b   : > { %6288 = vmatpush.bf16.msra.mxu1 %v14105_v23  ;;  %v9709_v23 = vld [vmem:[#allocation12 + $0xb8] sm:$0xff] }
 0x54c   : > { %v9725_v1 = vld [vmem:[#allocation12 + $0x98] sm:$0xff] }
 0x54d   : > { %6275 = vmatpush.bf16.msra.mxu0 %v14104_v34  ;;  %6301 = vmatpush.bf16.msra.mxu2 %v14048_v15  ;;  %v14113_v15 = vld [vmem:[#allocation55_spill] sm:$0xff]  ;;  %v6199_v34 = vor.u32 %v6198_v38, %v6194_v33 }
 0x54e   : > { %6314 = vmatpush.bf16.msra.mxu3 %v14049_v61  ;;  %6289 = vmatmul.bf16.vlgmr.msra.gmra.mxu1 %v14109_v48  ;;  %v14114_v61 = vld [vmem:[#allocation56_spill] sm:$0xff]  ;;  %v6027_v29 = vpop.f32.mrf.mxu1  ;;  %v9711_v48 = vld [vmem:[#allocation12 + $0x30] sm:$0xff] }
 0x54f   : > { %6333 = vmatpush.bf16.msrb.mxu1 %v14051_v16  ;;  %v12691_v16 = vpop.f32.mrf.mxu0  ;;  %v12703_v11 = vpop.f32.mrf.mxu2  ;;  %v9719_v29 = vld [vmem:[#allocation12 + $0x20] sm:$0xff]  ;;  %v9726_v38 = vld [vmem:[#allocation12 + $0xd8] sm:$0xff] }
 0x550   : > { %6276 = vmatmul.bf16.vlgmr.msra.gmra.mxu0 %v14108_v27  ;;  %6302 = vmatmul.bf16.vlgmr.msra.gmra.mxu2 %v14110_v56  ;;  %v12705_v26 = vpop.f32.mrf.mxu3  ;;  %v6211_v27 = vor.u32 %v6210_v13, %v6206_v58  ;;  %v9712_v56 = vld [vmem:[#allocation12 + $0x70] sm:$0xff]  ;;  %v6013_v28 = vadd.f32 %v12619_v22, %v12691_v16 }
 0x551   : > { %6320 = vmatpush.bf16.msrb.mxu0 %v14050_v46  ;;  %6346 = vmatpush.bf16.msrb.mxu2 %v14106_v6  ;;  %v14115_v46 = vld [vmem:[#allocation48_spill] sm:$0xff]  ;;  %v9727_v13 = vld [vmem:[#allocation12 + $0x10] sm:$0xff] }
 0x552   : > { %6359 = vmatpush.bf16.msrb.mxu3 %v14107_v35  ;;  %v9710_v6 = vld [vmem:[#allocation12 + $0xf8] sm:$0xff]  ;;  %v6205_v35 = vor.u32 %v6204_v40, %v6200_v41  ;;  %v6026_v40 = vadd.f32 %v12693_v32, %v6013_v28  ;;  %v9729_v41 = vld [vmem:[#allocation12 + $0x90] sm:$0xff]  ;;  %v9734_v32 = vld [vmem:[#allocation12 + $0xc8] sm:$0xff] }
 0x553   : > { %6315 = vmatmul.bf16.vlgmr.msra.gmra.mxu3 %v14111_v9  ;;  %6334 = vmatpush.bf16.msrb.mxu1 %v14113_v15  ;;  %v9713_v9 = vld [vmem:[#allocation12 + $0xb0] sm:$0xff] }
 0x554   : > { %v6039_v33 = vadd.f32 %v12703_v11, %v6026_v40  ;;  %v9730_v16 = vld [vmem:[#allocation12 + $0xd0] sm:$0xff]  ;;  %v9736_v11 = vld [vmem:[#allocation12 + $0x40] sm:$0xff] }
 0x555   : > { %6321 = vmatpush.bf16.msrb.mxu0 %v14112_v4  ;;  %6347 = vmatpush.bf16.msrb.mxu2 %v14114_v61  ;;  %v9714_v4 = vld [vmem:[#allocation12 + $0xf0] sm:$0xff]  ;;  %v9751_v40 = vld [vmem:[#allocation12 + $0x120] sm:$0xff] }
 0x556   : > { %6360 = vmatpush.bf16.msrb.mxu3 %v14115_v46  ;;  %v9715_v46 = vld [vmem:[#allocation12 + $0x28] sm:$0xff] }
 0x557   : > { %6335 = vmatpush.bf16.msrb.mxu1 %v14117_v5  ;;  %v6014_v44 = vpop.f32.mrf.mxu0  ;;  %v6040_v37 = vpop.f32.mrf.mxu2  ;;  %v9717_v5 = vld [vmem:[#allocation12 + $0xa8] sm:$0xff] }
 0x558   : > { %v6053_v52 = vpop.f32.mrf.mxu3  ;;  %v9718_v44 = vld [vmem:[#allocation12 + $0xe8] sm:$0xff]  ;;  %v9720_v37 = vld [vmem:[#allocation12 + $0x60] sm:$0xff] }
 0x559   : > { %6322 = vmatpush.bf16.msrb.mxu0 %v14116_v14  ;;  %6348 = vmatpush.bf16.msrb.mxu2 %v14118_v43  ;;  %v9716_v14 = vld [vmem:[#allocation12 + $0x68] sm:$0xff]  ;;  %v9721_v52 = vld [vmem:[#allocation12 + $0xa0] sm:$0xff] }
 0x55a   : > { %6361 = vmatpush.bf16.msrb.mxu3 %v14119_v2 }
 0x55b   : > { %6336 = vmatpush.bf16.msrb.mxu1 %v14066_v53 }
 0x55d   : > { %6323 = vmatpush.bf16.msrb.mxu0 %v14120_v51  ;;  %6349 = vmatpush.bf16.msrb.mxu2 %v14067_v21 }
 0x55e   : > { %6362 = vmatpush.bf16.msrb.mxu3 %v14068_v49 }
 0x55f   : > { %6337 = vmatpush.bf16.msrb.mxu1 %v14122_v54 }
 0x561   : > { %6324 = vmatpush.bf16.msrb.mxu0 %v14121_v7  ;;  %6350 = vmatpush.bf16.msrb.mxu2 %v14071_v17 }
 0x562   : > { %6363 = vmatpush.bf16.msrb.mxu3 %v14072_v20 }
 0x563   : > { %6338 = vmatpush.bf16.msrb.mxu1 %v14124_v36 }
 0x565   : > { %6325 = vmatpush.bf16.msrb.mxu0 %v14123_v57  ;;  %6351 = vmatpush.bf16.msrb.mxu2 %v14075_v12 }
 0x566   : > { %6364 = vmatpush.bf16.msrb.mxu3 %v14076_v63  ;;  %v6064_v15 = vpop.f32.mrf.mxu0 }
 0x567   : > { %6339 = vmatpush.bf16.msrb.mxu1 %v12403_v8 }
 0x568   : > { %v12731_v61 = vpop.f32.mrf.mxu1 }
 0x569   : > { %6326 = vmatpush.bf16.msrb.mxu0 %v12401_v59  ;;  %6352 = vmatpush.bf16.msrb.mxu2 %v12407_v18 }
 0x56a   : > { %6365 = vmatpush.bf16.msrb.mxu3 %v14077_v45 }
 0x56b   : > { %6340 = vmatpush.bf16.msrb.mxu1 %v14129_v0 }
 0x56d   : > { %6327 = vmatpush.bf16.msrb.mxu0 %v14078_v50  ;;  %6353 = vmatpush.bf16.msrb.mxu2 %v14130_v47 }
 0x56e   : > { %6366 = vmatpush.bf16.msrb.mxu3 %v14079_v10  ;;  %6341 = vmatmul.bf16.vlgmr.msrb.gmra.mxu1 %v6199_v34  ;;  %v6066_v62 = vpop.f32.mrf.mxu0  ;;  %v6052_v34 = vadd.f32 %v12705_v26, %v6039_v33  ;;  %v9741_v26 = vld [vmem:[#allocation12 + $0x1b8] sm:$0xff]  ;;  %v9753_v33 = vld [vmem:[#allocation12 + $0x1a0] sm:$0xff] }
 0x56f   : > { %6462 = vmatpush.bf16.msra.mxu1 %v9708_v55  ;;  %v9731_v55 = vld [vmem:[#allocation12 + $0x8] sm:$0xff] }
 0x570   : > { %6328 = vmatmul.bf16.vlgmr.msrb.gmra.mxu0 %v6193_v24  ;;  %6354 = vmatmul.bf16.vlgmr.msrb.gmra.mxu2 %v6205_v35  ;;  %v6079_v19 = vpop.f32.mrf.mxu1  ;;  %v9732_v24 = vld [vmem:[#allocation12 + $0x48] sm:$0xff]  ;;  %v9735_v35 = vld [vmem:[#allocation12] sm:$0xff] }
 0x571   : > { %6449 = vmatpush.bf16.msra.mxu0 %v9707_v30  ;;  %6475 = vmatpush.bf16.msra.mxu2 %v9709_v23  ;;  %v9733_v23 = vld [vmem:[#allocation12 + $0x88] sm:$0xff] }
 0x572   : > { %6488 = vmatpush.bf16.msra.mxu3 %v9710_v6  ;;  %v6090_v60 = vpop.f32.mrf.mxu2  ;;  %v6065_v6 = vadd.f32 %v6064_v15, %v6052_v34  ;;  %v14132_v15 = vld [vmem:[#allocation91_spill] sm:$0xff] }
 0x573   : > { %6367 = vmatmul.bf16.vlgmr.msrb.gmra.mxu3 %v6211_v27  ;;  %6463 = vmatpush.bf16.msra.mxu1 %v9712_v56  ;;  %v12733_v42 = vpop.f32.mrf.mxu3  ;;  %v9737_v27 = vld [vmem:[#allocation12 + $0x80] sm:$0xff]  ;;  %v9739_v56 = vld [vmem:[#allocation12 + $0x138] sm:$0xff] }
 0x574   : > { %v9756_v34 = vld [vmem:[#allocation12 + $0x158] sm:$0xff] }
 0x575   : > { %6450 = vmatpush.bf16.msra.mxu0 %v9711_v48  ;;  %6476 = vmatpush.bf16.msra.mxu2 %v9713_v9  ;;  %v9738_v48 = vld [vmem:[#allocation12 + $0xc0] sm:$0xff]  ;;  %v9740_v9 = vld [vmem:[#allocation12 + $0x178] sm:$0xff] }
 0x576   : > { %6489 = vmatpush.bf16.msra.mxu3 %v9714_v4  ;;  %v6078_v4 = vadd.f32 %v12731_v61, %v6065_v6  ;;  %v9746_v61 = vld [vmem:[#allocation12 + $0x1f0] sm:$0xff] }
 0x577   : > { %6464 = vmatpush.bf16.msra.mxu1 %v9716_v14  ;;  %v14131_v14 = vld [vmem:[#allocation90_spill] sm:$0xff] }
 0x579   : > { %6451 = vmatpush.bf16.msra.mxu0 %v9715_v46  ;;  %6477 = vmatpush.bf16.msra.mxu2 %v9717_v5  ;;  %v9742_v46 = vld [vmem:[#allocation12 + $0x1f8] sm:$0xff]  ;;  %v6091_v5 = vadd.f32 %v6090_v60, %v6078_v4  ;;  %v9749_v60 = vld [vmem:[#allocation12 + $0x1a8] sm:$0xff] }
 0x57a   : > { %6490 = vmatpush.bf16.msra.mxu3 %v9718_v44  ;;  %v6092_v58 = vpop.f32.mrf.mxu2  ;;  %v14133_v44 = vld [vmem:[#allocation92_spill] sm:$0xff]  ;;  %v14135_v4 = vld [vmem:[#allocation94_spill] sm:$0xff] }
 0x57b   : > { %6465 = vmatpush.bf16.msra.mxu1 %v9720_v37  ;;  %v6105_v30 = vpop.f32.mrf.mxu3  ;;  %v9743_v37 = vld [vmem:[#allocation12 + $0x130] sm:$0xff]  ;;  %v6104_v28 = vadd.f32 %v12733_v42, %v6091_v5 }
 0x57d   : > { %6452 = vmatpush.bf16.msra.mxu0 %v9719_v29  ;;  %6478 = vmatpush.bf16.msra.mxu2 %v9721_v52  ;;  %v14134_v29 = vld [vmem:[#allocation93_spill] sm:$0xff]  ;;  %v9744_v52 = vld [vmem:[#allocation12 + $0x170] sm:$0xff] }
 0x57e   : > { %6491 = vmatpush.bf16.msra.mxu3 %v9722_v25  ;;  %v9745_v25 = vld [vmem:[#allocation12 + $0x1b0] sm:$0xff] }
 0x57f   : > { %6466 = vmatpush.bf16.msra.mxu1 %v9724_v39  ;;  %v9748_v39 = vld [vmem:[#allocation12 + $0x168] sm:$0xff] }
 0x581   : > { %6453 = vmatpush.bf16.msra.mxu0 %v9723_v31  ;;  %6479 = vmatpush.bf16.msra.mxu2 %v9725_v1  ;;  %v9747_v31 = vld [vmem:[#allocation12 + $0x128] sm:$0xff] }
 0x582   : > { %6492 = vmatpush.bf16.msra.mxu3 %v9726_v38  ;;  %v9750_v1 = vld [vmem:[#allocation12 + $0x1e8] sm:$0xff] }
 0x583   : > { %6467 = vmatpush.bf16.msra.mxu1 %v9728_v3 }
 0x585   : > { %6454 = vmatpush.bf16.msra.mxu0 %v9727_v13  ;;  %6480 = vmatpush.bf16.msra.mxu2 %v9729_v41  ;;  %v9752_v13 = vld [vmem:[#allocation12 + $0x160] sm:$0xff] }
 0x586   : > { %6493 = vmatpush.bf16.msra.mxu3 %v9730_v16  ;;  %v9754_v41 = vld [vmem:[#allocation12 + $0x1e0] sm:$0xff] }
 0x587   : > { %6468 = vmatpush.bf16.msra.mxu1 %v9732_v24  ;;  %v9755_v24 = vld [vmem:[#allocation12 + $0x118] sm:$0xff] }
 0x589   : > { %6455 = vmatpush.bf16.msra.mxu0 %v9731_v55  ;;  %6481 = vmatpush.bf16.msra.mxu2 %v9733_v23  ;;  %v9757_v23 = vld [vmem:[#allocation12 + $0x198] sm:$0xff] }
 0x58a   : > { %6494 = vmatpush.bf16.msra.mxu3 %v9734_v32  ;;  %v9758_v32 = vld [vmem:[#allocation12 + $0x1d8] sm:$0xff] }
 0x58b   : > { %6469 = vmatpush.bf16.msra.mxu1 %v9736_v11  ;;  %v6129_v19 = vpop.f32.mrf.mxu1  ;;  %v9760_v11 = vld [vmem:[#allocation12 + $0x150] sm:$0xff] }
 0x58d   : > { %6456 = vmatpush.bf16.msra.mxu0 %v9735_v35  ;;  %6482 = vmatpush.bf16.msra.mxu2 %v9737_v27  ;;  %v6116_v62 = vpop.f32.mrf.mxu0  ;;  %v9759_v35 = vld [vmem:[#allocation12 + $0x110] sm:$0xff] }
 0x58e   : > { %6495 = vmatpush.bf16.msra.mxu3 %v9738_v48  ;;  %6470 = vmatmul.bf16.vlgmr.msra.gmra.mxu1 %v14132_v15  ;;  %v6117_v38 = vadd.f32 %v6116_v62, %v6104_v28  ;;  %v9761_v27 = vld [vmem:[#allocation12 + $0x190] sm:$0xff]  ;;  %v14137_v15 = vld [vmem:[#allocation96_spill] sm:$0xff] }
 0x58f   : > { %6514 = vmatpush.bf16.msrb.mxu1 %v9740_v9  ;;  %v9762_v48 = vld [vmem:[#allocation12 + $0x1d0] sm:$0xff]  ;;  %v6401_v5 = vshll.u32 %v14137_v15, 16 }
 0x590   : > { %6457 = vmatmul.bf16.vlgmr.msra.gmra.mxu0 %v14131_v14  ;;  %6483 = vmatmul.bf16.vlgmr.msra.gmra.mxu2 %v14133_v44  ;;  %v6130_v3 = vadd.f32 %v6129_v19, %v6117_v38  ;;  %v14138_v44 = vld [vmem:[#allocation97_spill] sm:$0xff] }
 0x591   : > { %6501 = vmatpush.bf16.msrb.mxu0 %v9739_v56  ;;  %6527 = vmatpush.bf16.msrb.mxu2 %v9741_v26  ;;  %v6389_v26 = vshll.u32 %v14135_v4, 16  ;;  %v6403_v19 = vrot.slane %v6401_v5, 1 }
 0x592   : > { %6540 = vmatpush.bf16.msrb.mxu3 %v9742_v46  ;;  %v14136_v46 = vld [vmem:[#allocation95_spill] sm:$0xff] }
 0x593   : > { %6496 = vmatmul.bf16.vlgmr.msra.gmra.mxu3 %v14134_v29  ;;  %6515 = vmatpush.bf16.msrb.mxu1 %v9744_v52  ;;  %v6142_v42 = vpop.f32.mrf.mxu2  ;;  %v6131_v55 = vpop.f32.mrf.mxu1  ;;  %v6395_v14 = vshll.u32 %v14136_v46, 16  ;;  %v6407_v29 = vshll.u32 %v14138_v44, 16  ;;  %v9764_v52 = vld [vmem:[#allocation12 + $0x148] sm:$0xff]  ;;  %v6391_v28 = vrot.slane %v6389_v26, 1  ;;  %v6393_v38 = vshrl.u32 %v14136_v46, 16 }
 0x594   : > { %v6143_v58 = vadd.f32 %v6142_v42, %v6130_v3  ;;  %v6399_v3 = vshrl.u32 %v14137_v15, 16  ;;  %v9772_v42 = vld [vmem:[#allocation12 + $0x278] sm:$0xff] }
 0x595   : > { %6502 = vmatpush.bf16.msrb.mxu0 %v9743_v37  ;;  %6528 = vmatpush.bf16.msrb.mxu2 %v9745_v25  ;;  %v6118_v30 = vpop.f32.mrf.mxu0  ;;  %v9763_v37 = vld [vmem:[#allocation12 + $0x108] sm:$0xff]  ;;  %v6397_v62 = vrot.slane %v6395_v14, 1  ;;  %v9774_v55 = vld [vmem:[#allocation12 + $0x2f8] sm:$0xff] }
 0x596   : > { %6541 = vmatpush.bf16.msrb.mxu3 %v9746_v61  ;;  %v6155_v16 = vpop.f32.mrf.mxu3  ;;  %v9765_v25 = vld [vmem:[#allocation12 + $0x188] sm:$0xff]  ;;  %v9773_v30 = vld [vmem:[#allocation12 + $0x2b8] sm:$0xff] }
 0x597   : > { %6516 = vmatpush.bf16.msrb.mxu1 %v9748_v39  ;;  %v6156_v6 = vadd.f32 %v6155_v16, %v6143_v58  ;;  %v9766_v61 = vld [vmem:[#allocation12 + $0x1c8] sm:$0xff]  ;;  %v9767_v39 = vld [vmem:[#allocation12 + $0x100] sm:$0xff]  ;;  %v6398_v58 = vor.u32 %v6397_v62, %v6393_v38 }
 0x599   : > { %6503 = vmatpush.bf16.msrb.mxu0 %v9747_v31  ;;  %6529 = vmatpush.bf16.msrb.mxu2 %v9749_v60  ;;  %6606 = vst [vmem:[%s10127_s30 + $0x4] sm:$0xf] %v6156_v6  ;;  %v6409_v31 = vrot.slane %v6407_v29, 1  ;;  %v9768_v60 = vld [vmem:[#allocation12 + $0x140] sm:$0xff]  ;;  %v9777_v6 = vld [vmem:[#allocation12 + $0x2b0] sm:$0xff] }
 0x59a   : > { %6542 = vmatpush.bf16.msrb.mxu3 %v9750_v1  ;;  %v6387_v1 = vshrl.u32 %v14135_v4, 16 }
 0x59b   : > { %6517 = vmatpush.bf16.msrb.mxu1 %v9752_v13  ;;  %v6144_v56 = vpop.f32.mrf.mxu2  ;;  %v9770_v13 = vld [vmem:[#allocation12 + $0x1c0] sm:$0xff] }
 0x59c   : > { %v6392_v16 = vor.u32 %v6391_v28, %v6387_v1  ;;  %v9780_v56 = vld [vmem:[#allocation12 + $0x268] sm:$0xff] }
 0x59d   : > { %6504 = vmatpush.bf16.msrb.mxu0 %v9751_v40  ;;  %6530 = vmatpush.bf16.msrb.mxu2 %v9753_v33  ;;  %v9769_v40 = vld [vmem:[#allocation12 + $0x180] sm:$0xff]  ;;  %v6405_v33 = vshrl.u32 %v14138_v44, 16 }
 0x59e   : > { %6543 = vmatpush.bf16.msrb.mxu3 %v9754_v41  ;;  %v6157_v9 = vpop.f32.mrf.mxu3  ;;  %v9771_v41 = vld [vmem:[#allocation12 + $0x238] sm:$0xff] }
 0x59f   : > { %6518 = vmatpush.bf16.msrb.mxu1 %v9756_v34  ;;  %v6410_v34 = vor.u32 %v6409_v31, %v6405_v33 }
 0x5a1   : > { %6505 = vmatpush.bf16.msrb.mxu0 %v9755_v24  ;;  %6531 = vmatpush.bf16.msrb.mxu2 %v9757_v23  ;;  %v6404_v24 = vor.u32 %v6403_v19, %v6399_v3  ;;  %v9775_v23 = vld [vmem:[#allocation12 + $0x230] sm:$0xff] }
 0x5a2   : > { %6544 = vmatpush.bf16.msrb.mxu3 %v9758_v32  ;;  %v9776_v32 = vld [vmem:[#allocation12 + $0x270] sm:$0xff] }
 0x5a3   : > { %6519 = vmatpush.bf16.msrb.mxu1 %v9760_v11 }
 0x5a5   : > { %6506 = vmatpush.bf16.msrb.mxu0 %v9759_v35  ;;  %6532 = vmatpush.bf16.msrb.mxu2 %v9761_v27  ;;  %v9778_v35 = vld [vmem:[#allocation12 + $0x2f0] sm:$0xff] }
 0x5a6   : > { %6545 = vmatpush.bf16.msrb.mxu3 %v9762_v48  ;;  %v9779_v48 = vld [vmem:[#allocation12 + $0x228] sm:$0xff] }
 0x5a7   : > { %6520 = vmatpush.bf16.msrb.mxu1 %v9764_v52 }
 0x5a9   : > { %6507 = vmatpush.bf16.msrb.mxu0 %v9763_v37  ;;  %6533 = vmatpush.bf16.msrb.mxu2 %v9765_v25 }
 0x5aa   : > { %6546 = vmatpush.bf16.msrb.mxu3 %v9766_v61 }
 0x5ab   : > { %6521 = vmatpush.bf16.msrb.mxu1 %v9768_v60  ;;  %v12755_v27 = vpop.f32.mrf.mxu1 }
 0x5ad   : > { %6508 = vmatpush.bf16.msrb.mxu0 %v9767_v39  ;;  %6534 = vmatpush.bf16.msrb.mxu2 %v9769_v40  ;;  %v6225_v11 = vpop.f32.mrf.mxu0 }
 0x5ae   : > { %6547 = vmatpush.bf16.msrb.mxu3 %v9770_v13  ;;  %6522 = vmatmul.bf16.vlgmr.msrb.gmra.mxu1 %v6398_v58 }
 0x5af   : > { %6566 = vmatpush.bf16.msra.mxu1 %v9772_v42 }
 0x5b0   : > { %6509 = vmatmul.bf16.vlgmr.msrb.gmra.mxu0 %v6392_v16  ;;  %6535 = vmatmul.bf16.vlgmr.msrb.gmra.mxu2 %v6404_v24 }
 0x5b1   : > { %6553 = vmatpush.bf16.msra.mxu0 %v9771_v41  ;;  %6579 = vmatpush.bf16.msra.mxu2 %v9773_v30 }
 0x5b2   : > { %6592 = vmatpush.bf16.msra.mxu3 %v9774_v55 }
 0x5b3   : > { %6548 = vmatmul.bf16.vlgmr.msrb.gmra.mxu3 %v6410_v34  ;;  %6567 = vmatpush.bf16.msra.mxu1 %v9776_v32  ;;  %v6251_v9 = vpop.f32.mrf.mxu2  ;;  %v6240_v46 = vpop.f32.mrf.mxu1 }
 0x5b5   : > { %6554 = vmatpush.bf16.msra.mxu0 %v9775_v23  ;;  %6580 = vmatpush.bf16.msra.mxu2 %v9777_v6  ;;  %v6227_v26 = vpop.f32.mrf.mxu0 }
 0x5b6   : > { %6593 = vmatpush.bf16.msra.mxu3 %v9778_v35  ;;  %v6264_v4 = vpop.f32.mrf.mxu3 }
 0x5b7   : > { %6568 = vmatpush.bf16.msra.mxu1 %v9780_v56 }
 0x5b9   : > { %6555 = vmatpush.bf16.msra.mxu0 %v9779_v48  ;;  %6581 = vmatpush.bf16.msra.mxu2 %v14118_v43  ;;  %v6417_v43 = vld.sshfl [vmem:[#allocation1] sm:$0xff pattern:$0x73625140] }
 0x5ba   : > { %6594 = vmatpush.bf16.msra.mxu3 %v14119_v2  ;;  %v6418_v2 = vld.sshfl [vmem:[#allocation1 + $0x8] sm:$0xff pattern:$0x73625140]  ;;  %v6421_v15 = vshrl.u32 %v6417_v43, 16 }
 0x5bb   : > { %6569 = vmatpush.bf16.msra.mxu1 %v14066_v53  ;;  %v6420_v53 = vld.sshfl [vmem:[#allocation1 + $0x18] sm:$0xff pattern:$0x73625140] }
 0x5bc   : > { %v6439_v44 = vshrl.u32 %v6420_v53, 16 }
 0x5bd   : > { %6556 = vmatpush.bf16.msra.mxu0 %v14120_v51  ;;  %6582 = vmatpush.bf16.msra.mxu2 %v14067_v21  ;;  %v6419_v51 = vld.sshfl [vmem:[#allocation1 + $0x10] sm:$0xff pattern:$0x73625140]  ;;  %v6429_v21 = vshll.u32 %v6418_v2, 16 }
 0x5be   : > { %6595 = vmatpush.bf16.msra.mxu3 %v14068_v49  ;;  %v6423_v49 = vshll.u32 %v6417_v43, 16  ;;  %v6435_v14 = vshll.u32 %v6419_v51, 16  ;;  %v6433_v5 = vshrl.u32 %v6419_v51, 16 }
 0x5bf   : > { %6570 = vmatpush.bf16.msra.mxu1 %v14122_v54  ;;  %v6266_v54 = vpop.f32.mrf.mxu3 }
 0x5c1   : > { %6557 = vmatpush.bf16.msra.mxu0 %v14121_v7  ;;  %6583 = vmatpush.bf16.msra.mxu2 %v14071_v17  ;;  %v6253_v7 = vpop.f32.mrf.mxu2  ;;  %v6441_v17 = vshll.u32 %v6420_v53, 16 }
 0x5c2   : > { %6596 = vmatpush.bf16.msra.mxu3 %v14072_v20  ;;  %v6425_v20 = vrot.slane %v6423_v49, 1 }
 0x5c3   : > { %6571 = vmatpush.bf16.msra.mxu1 %v14124_v36  ;;  %v6437_v36 = vrot.slane %v6435_v14, 1 }
 0x5c5   : > { %6558 = vmatpush.bf16.msra.mxu0 %v14123_v57  ;;  %6584 = vmatpush.bf16.msra.mxu2 %v14075_v12  ;;  %v6431_v57 = vrot.slane %v6429_v21, 1  ;;  %v6443_v12 = vrot.slane %v6441_v17, 1 }
 0x5c6   : > { %6597 = vmatpush.bf16.msra.mxu3 %v14076_v63  ;;  %v6427_v63 = vshrl.u32 %v6418_v2, 16 }
 0x5c7   : > { %6572 = vmatpush.bf16.msra.mxu1 %v12403_v8  ;;  %v6438_v8 = vor.u32 %v6437_v36, %v6433_v5 }
 0x5c9   : > { %6559 = vmatpush.bf16.msra.mxu0 %v12401_v59  ;;  %6585 = vmatpush.bf16.msra.mxu2 %v12407_v18  ;;  %v6426_v59 = vor.u32 %v6425_v20, %v6421_v15  ;;  %v6432_v18 = vor.u32 %v6431_v57, %v6427_v63 }
 0x5ca   : > { %6598 = vmatpush.bf16.msra.mxu3 %v14077_v45  ;;  %v6444_v45 = vor.u32 %v6443_v12, %v6439_v44 }
 0x5cb   : > { %6573 = vmatpush.bf16.msra.mxu1 %v14129_v0  ;;  %v6290_v37 = vpop.f32.mrf.mxu1  ;;  %v6226_v0 = vadd.f32 %v12619_v22, %v6225_v11 }
 0x5cd   : > { %6560 = vmatpush.bf16.msra.mxu0 %v14078_v50  ;;  %6586 = vmatpush.bf16.msra.mxu2 %v14130_v47  ;;  %v6277_v29 = vpop.f32.mrf.mxu0  ;;  %v6239_v47 = vadd.f32 %v12755_v27, %v6226_v0 }
 0x5ce   : > { %6599 = vmatpush.bf16.msra.mxu3 %v14079_v10  ;;  %6574 = vmatmul.bf16.vlgmr.msra.gmra.mxu1 %v6432_v18 }
 0x5cf   : > { %v6252_v28 = vadd.f32 %v6251_v9, %v6239_v47 }
 0x5d0   : > { %6561 = vmatmul.bf16.vlgmr.msra.gmra.mxu0 %v6426_v59  ;;  %6587 = vmatmul.bf16.vlgmr.msra.gmra.mxu2 %v6438_v8 }
 0x5d1   : > { %6600 = vmatmul.bf16.vlgmr.msra.gmra.mxu3 %v6444_v45  ;;  %v6265_v19 = vadd.f32 %v6264_v4, %v6252_v28 }
 0x5d3   : > { %v6303_v52 = vpop.f32.mrf.mxu2  ;;  %v6292_v61 = vpop.f32.mrf.mxu1  ;;  %v6278_v31 = vadd.f32 %v6277_v29, %v6265_v19 }
 0x5d5   : > { %v6279_v25 = vpop.f32.mrf.mxu0  ;;  %v6291_v39 = vadd.f32 %v6290_v37, %v6278_v31 }
 0x5d6   : > { %v6316_v50 = vpop.f32.mrf.mxu3 }
 0x5d7   : > { %v6304_v60 = vadd.f32 %v6303_v52, %v6291_v39 }
 0x5d9   : > { %v6317_v1 = vadd.f32 %v6316_v50, %v6304_v60 }
 0x5db   : > { %v6305_v10 = vpop.f32.mrf.mxu2 }
 0x5de   : > { %v6318_v62 = vpop.f32.mrf.mxu3 }
 0x5eb   : > { %v6342_v40 = vpop.f32.mrf.mxu1 }
 0x5ed   : > { %v6329_v38 = vpop.f32.mrf.mxu0 }
 0x5ee   : > { %v6330_v13 = vadd.f32 %v6329_v38, %v6317_v1 }
 0x5f0   : > { %v6343_v3 = vadd.f32 %v6342_v40, %v6330_v13 }
 0x5f3   : > { %v6355_v33 = vpop.f32.mrf.mxu2  ;;  %v6344_v58 = vpop.f32.mrf.mxu1 }
 0x5f4   : > { %v6356_v42 = vadd.f32 %v6355_v33, %v6343_v3 }
 0x5f5   : > { %v6331_v16 = vpop.f32.mrf.mxu0 }
 0x5f6   : > { %v6368_v41 = vpop.f32.mrf.mxu3 }
 0x5f7   : > { %v6369_v30 = vadd.f32 %v6368_v41, %v6356_v42 }
 0x5f9   : > { %6607 = vst [vmem:[%s10127_s30 + $0x8] sm:$0x7] %v6369_v30 }
 0x5fb   : > { %v6357_v55 = vpop.f32.mrf.mxu2 }
 0x5fe   : > { %v6370_v24 = vpop.f32.mrf.mxu3 }
 0x60b   : > { %v6471_v23 = vpop.f32.mrf.mxu1 }
 0x60d   : > { %v6458_v34 = vpop.f32.mrf.mxu0 }
 0x60e   : > { %v6459_v4 = vadd.f32 %v12619_v22, %v6458_v34 }
 0x610   : > { %v6472_v51 = vadd.f32 %v6471_v23, %v6459_v4 }
 0x613   : > { %v6484_v32 = vpop.f32.mrf.mxu2  ;;  %v6473_v11 = vpop.f32.mrf.mxu1 }
 0x614   : > { %v6485_v53 = vadd.f32 %v6484_v32, %v6472_v51 }
 0x615   : > { %v6460_v35 = vpop.f32.mrf.mxu0 }
 0x616   : > { %v6497_v6 = vpop.f32.mrf.mxu3 }
 0x617   : > { %v6498_v7 = vadd.f32 %v6497_v6, %v6485_v53 }
 0x61b   : > { %v6486_v27 = vpop.f32.mrf.mxu2 }
 0x61e   : > { %v6499_v48 = vpop.f32.mrf.mxu3 }
 0x62b   : > { %v6523_v9 = vpop.f32.mrf.mxu1 }
 0x62d   : > { %v6510_v56 = vpop.f32.mrf.mxu0 }
 0x62e   : > { %v6511_v54 = vadd.f32 %v6510_v56, %v6498_v7 }
 0x630   : > { %v6524_v14 = vadd.f32 %v6523_v9, %v6511_v54 }
 0x633   : > { %v6536_v26 = vpop.f32.mrf.mxu2  ;;  %v6525_v2 = vpop.f32.mrf.mxu1 }
 0x634   : > { %v6537_v17 = vadd.f32 %v6536_v26, %v6524_v14 }
 0x635   : > { %v6512_v43 = vpop.f32.mrf.mxu0 }
 0x636   : > { %v6549_v46 = vpop.f32.mrf.mxu3 }
 0x637   : > { %v6550_v20 = vadd.f32 %v6549_v46, %v6537_v17 }
 0x63b   : > { %v6538_v49 = vpop.f32.mrf.mxu2 }
 0x63e   : > { %v6551_v21 = vpop.f32.mrf.mxu3 }
 0x64b   : > { %v6575_v36 = vpop.f32.mrf.mxu1 }
 0x64d   : > { %v6562_v57 = vpop.f32.mrf.mxu0 }
 0x64e   : > { %v6563_v12 = vadd.f32 %v6562_v57, %v6550_v20 }
 0x650   : > { %v6576_v15 = vadd.f32 %v6575_v36, %v6563_v12 }
 0x653   : > { %v6588_v63 = vpop.f32.mrf.mxu2  ;;  %v6577_v59 = vpop.f32.mrf.mxu1 }
 0x654   : > { %v6601_v22 = vpop.f32.mrf.mxu3  ;;  %v6589_v5 = vadd.f32 %v6588_v63, %v6576_v15 }
 0x655   : > { %v6564_v44 = vpop.f32.mrf.mxu0 }
 0x656   : > { %v6602_v18 = vadd.f32 %v6601_v22, %v6589_v5 }
 0x658   : > { %6609 = vst [vmem:[%s10127_s30 + $0xc] sm:$0x7] %v6602_v18 }
 0x65b   : > { %v6590_v8 = vpop.f32.mrf.mxu2 }
 0x65c   : > { %v6603_v45 = vpop.f32.mrf.mxu3 }
 0x65d PF: > { %s21_s24 = sadd.s32 1, %s9983_s24  }
 0x65e   : > { %p18_p7 = scmp.ge.s32.totalorder %s21_s24, 4  }
 0x660   :  { %20 = sbr.rel (!%p18_p7) target bundleno = 4 (0x4), region = 103 }
 0x665   :  { %6632 = vsyncpa [#allocation9], 1 }
 0x666   :  { %6634 = vsyncpa [#allocation9 + $0x1], 1 }
 0x667   :  { %6635 = vsyncpa [#allocation11], 1 }
 0x668   :  { %6636 = vsyncpa [#allocation14], 1 }
 0x669   :  { %6637 = vsyncpa [#allocation17], 1 }

</bundles_post_ra>
